<compile_context>
chip_gen: v5e
topology: v5e:2x2
jax: 0.10.0
libtpu: 0.0.40
codegen_flags: <defaults>
</compile_context>

<pallas_src>
import jax
import jax.numpy as jnp
from jax.experimental import pallas as pl
from jax.experimental.pallas import tpu as pltpu

# ---- static geometry (from sparseModel.input_spatial_size([1,1]) == 21x21) ----
_H = 21                      # conv1 spatial size, 200 input channels
_ROW = _H + 1                # flat row stride of one padded image row = 22
_NR1 = _ROW * _ROW           # conv1 outputs computed on the padded 22x22 grid = 484
_XROWS = 512                 # per-batch padded flat rows (484 real + 28 zero)
_C1 = 16                     # conv1 out channels
_C2 = 32                     # conv2 out channels
_QBLK = 24                   # 8-aligned row stride per pooled row in the scratch
_QROWS = 7 * _QBLK           # pool1 scratch rows = 168
_NR2 = 56                    # conv2 rows computed on the redundant flat grid


def _sparsenet_kernel(x_ref, w1_ref, w2_ref, w3_ref, b3_ref, o_ref, q_ref):
    """One batch element per grid step.

    x_ref : (1, 512, 200) bf16  flat rows r = i*22 + j of the zero-padded
                                22x22 NHWC image; rows 484..511 are zeros.
    w1_ref: (4, 200, 16)  bf16  conv1 taps, index 2*a + e
    w2_ref: (25, 16, 32)  f32   conv2 taps, index 5*di + dj
    w3_ref: (2, 32) f32         linear weight (torch layout)
    b3_ref: (2, 1)  f32         linear bias
    o_ref : (1, 8, 128)   f32   softmax probs stored at [0, 0:2, 0]
    q_ref : (168, 16)     f32   pool1 rows at a 24-row stride (VMEM scratch)
    """
    f32 = jnp.float32

    # ---- conv1: 2x2 submanifold conv (dense analog, bottom/right zero pad)
    # as 4 plain matmuls on the flat layout; row r = i*22+j holds conv1[i, j].
    acc1 = None
    for a in range(2):
        for e in range(2):
            off = _ROW * a + e
            xs = x_ref[0, off:off + _NR1, :]                       # (484, 200) bf16
            d = jnp.dot(xs, w1_ref[2 * a + e],
                        preferred_element_type=f32)                # (484, 16) f32
            acc1 = d if acc1 is None else acc1 + d

    # ---- MaxPooling(3, stride 3): shifted contiguous slices + maxima.
    L1 = _NR1 - 2 * _ROW                                            # 440
    m1 = jnp.maximum(jnp.maximum(acc1[0:L1], acc1[_ROW:_ROW + L1]),
                     acc1[2 * _ROW:2 * _ROW + L1])                  # rows i..i+2
    L2 = L1 - 2                                                     # 438
    m2 = jnp.maximum(jnp.maximum(m1[0:L2], m1[1:1 + L2]), m1[2:2 + L2])
    # m2[i*22 + j] = max over the 3x3 window anchored at (i, j).

    # ---- store the 7 pooled rows (anchors i = 3*pi, all 21 columns) at an
    # 8-aligned 24-row stride: 7 lane-dense (21, 16) stores, f32 (no bf16 trip).
    q_ref[...] = jnp.zeros((_QROWS, _C1), f32)
    for pi in range(7):
        q_ref[_QBLK * pi:_QBLK * pi + _H, :] = \
            m2[3 * _ROW * pi:3 * _ROW * pi + _H, :]

    # ---- conv2 (5x5 valid, 16->32) on the flat q layout: 25 plain f32 dots.
    # Valid outputs live at rows t = oi*24 + 3*oj, oi, oj in {0, 1, 2}.
    q = q_ref[...]                                                  # (168, 16) f32
    acc2 = None
    for di in range(5):
        for dj in range(5):
            off = _QBLK * di + 3 * dj
            d = jnp.dot(q[off:off + _NR2, :], w2_ref[5 * di + dj],
                        preferred_element_type=f32)                 # (56, 32) f32
            acc2 = d if acc2 is None else acc2 + d

    # ---- MaxPooling(3, stride 1) on the 3x3 map == max over the 9 valid rows.
    L3 = _NR2 - 6                                                   # 50
    t1 = jnp.maximum(jnp.maximum(acc2[0:L3], acc2[3:3 + L3]), acc2[6:6 + L3])
    L4 = L3 - 2 * _QBLK                                             # 2
    t2 = jnp.maximum(jnp.maximum(t1[0:L4], t1[_QBLK:_QBLK + L4]),
                     t1[2 * _QBLK:2 * _QBLK + L4])
    feat = t2[0:1, :]                                               # (1, 32) f32

    # ---- Linear(32 -> 2) + softmax(dim=1) on the VPU (no MXU push for N=2).
    prod = w3_ref[...] * feat                                       # (2, 32)
    logits = jnp.sum(prod, axis=1, keepdims=True) + b3_ref[...]     # (2, 1)
    mx = jnp.max(logits, axis=0, keepdims=True)
    ex = jnp.exp(logits - mx)
    probs = ex / jnp.sum(ex, axis=0, keepdims=True)                 # (2, 1)

    o_ref[...] = jnp.zeros((1, 8, 128), f32)
    o_ref[0, 0:2, 0:1] = probs


def init_params(key):
    """Random weights, stored directly in kernel layout (tap-major, Cin x Cout)."""
    k1, k2, k3, k4 = jax.random.split(key, 4)
    # SubmanifoldConvolution(2, 200, 16, 2, False): reference weight (16, 200, 2, 2)
    w1 = jax.random.normal(k1, (16, 200, 2, 2), jnp.float32) * 0.05
    # Convolution(2, 16, 32, 5, 1, False): reference weight (32, 16, 5, 5)
    w2 = jax.random.normal(k2, (32, 16, 5, 5), jnp.float32) * 0.05
    # Linear(32, 2)
    w3 = jax.random.normal(k3, (2, 32), jnp.float32) * 0.1
    b3 = jax.random.normal(k4, (2,), jnp.float32) * 0.1
    return dict(
        w1k=jnp.transpose(w1, (2, 3, 1, 0)).reshape(4, 200, 16).astype(jnp.bfloat16),
        w2k=jnp.transpose(w2, (2, 3, 1, 0)).reshape(25, 16, 32),   # f32 taps
        w3=w3,                                                     # (2, 32) f32
        b3=b3.reshape(2, 1),                                       # (2, 1) f32
    )


def sparsenet_forward(params, x_nchw):
    """x_nchw: (B, 200, 21, 21) dense analog of the scn sparse input -> (B, 2)."""
    B = x_nchw.shape[0]
    # TODO(synk): scn.InputLayer / SubmanifoldConvolution consume sparse
    # (coords, features) pairs and mask inactive sites; this is the dense-grid
    # analog on the 21x21 grid implied by input_spatial_size([1,1]), with the
    # even 2x2 kernel anchored top-left (bottom/right zero pad).
    x = jnp.transpose(x_nchw.astype(jnp.bfloat16), (0, 2, 3, 1))    # (B,21,21,200)
    x = jnp.pad(x, ((0, 0), (0, 1), (0, 1), (0, 0)))                # (B,22,22,200)
    x = x.reshape(B, _NR1, 200)
    x = jnp.pad(x, ((0, 0), (0, _XROWS - _NR1), (0, 0)))            # (B,512,200)

    out = pl.pallas_call(
        _sparsenet_kernel,
        grid=(B,),
        out_shape=jax.ShapeDtypeStruct((B, 8, 128), jnp.float32),
        in_specs=[
            pl.BlockSpec((1, _XROWS, 200), lambda b: (b, 0, 0)),    # per-batch input
            pl.BlockSpec((4, 200, 16), lambda b: (0, 0, 0)),        # weights: DMA once
            pl.BlockSpec((25, 16, 32), lambda b: (0, 0, 0)),
            pl.BlockSpec((2, 32), lambda b: (0, 0)),
            pl.BlockSpec((2, 1), lambda b: (0, 0)),
        ],
        out_specs=pl.BlockSpec((1, 8, 128), lambda b: (b, 0, 0)),
        scratch_shapes=[pltpu.VMEM((_QROWS, _C1), jnp.float32)],
        compiler_params=pltpu.CompilerParams(
            dimension_semantics=("parallel",),
            vmem_limit_bytes=32 * 1024 * 1024),
    )(x, params["w1k"], params["w2k"], params["w3"], params["b3"])
    return out[:, 0:2, 0]


if __name__ == "__main__":
    key = jax.random.PRNGKey(0)
    pk, xk = jax.random.split(key)
    params = init_params(pk)
    # batch=2, channels=200 (fixed by the module), spatial=21x21 (from
    # sparseModel.input_spatial_size(torch.LongTensor([1, 1]))).
    x = jax.random.normal(xk, (2, 200, 21, 21), jnp.float32)
    out = jax.block_until_ready(jax.jit(sparsenet_forward)(params, x))
    assert out.shape == (2, 2)
    assert bool(jnp.all(jnp.isfinite(out)))
    # rows of a softmax sum to 1
    assert bool(jnp.allclose(jnp.sum(out, axis=-1), 1.0, atol=1e-5))
    print("KERNEL_OK")
</pallas_src>

<mosaic_0001>
module attributes {stable_mosaic.version = 11 : i64} {
  func.func @_sparsenet_kernel(%arg0: i32, %arg1: memref<1x512x200xbf16, #tpu.memory_space<vmem>>, %arg2: memref<4x200x16xbf16, #tpu.memory_space<vmem>>, %arg3: memref<25x16x32xf32, #tpu.memory_space<vmem>>, %arg4: memref<2x32xf32, #tpu.memory_space<vmem>>, %arg5: memref<2x1xf32, #tpu.memory_space<vmem>>, %arg6: memref<1x8x128xf32, #tpu.memory_space<vmem>>, %arg7: memref<168x16xf32, #tpu.memory_space<vmem>>) attributes {dimension_semantics = [#tpu.dimension_semantics<parallel>], iteration_bounds = array<i64: 2>, scalar_prefetch = 0 : i64, scratch_operands = 1 : i64, tpu.core_type = #tpu.core_type<tc>, window_params = [{transform_indices = @transform_0, window_bounds = array<i64: 1, 512, 200>}, {pipeline_mode = #tpu.pipeline_mode<synchronous>, transform_indices = @transform_1, window_bounds = array<i64: 4, 200, 16>}, {pipeline_mode = #tpu.pipeline_mode<synchronous>, transform_indices = @transform_2, window_bounds = array<i64: 25, 16, 32>}, {pipeline_mode = #tpu.pipeline_mode<synchronous>, transform_indices = @transform_3, window_bounds = array<i64: 2, 32>}, {pipeline_mode = #tpu.pipeline_mode<synchronous>, transform_indices = @transform_4, window_bounds = array<i64: 2, 1>}, {transform_indices = @transform_5, window_bounds = array<i64: 1, 8, 128>}]} {
    %c0 = arith.constant 0 : index
    %c0_0 = arith.constant 0 : index
    %c0_1 = arith.constant 0 : index
    %0 = vector.load %arg1[%c0, %c0_0, %c0_1] : memref<1x512x200xbf16, #tpu.memory_space<vmem>>, vector<1x484x200xbf16>
    %1 = vector.shape_cast %0 : vector<1x484x200xbf16> to vector<484x200xbf16>
    %c0_2 = arith.constant 0 : index
    %c0_3 = arith.constant 0 : index
    %c0_4 = arith.constant 0 : index
    %2 = vector.load %arg2[%c0_2, %c0_3, %c0_4] : memref<4x200x16xbf16, #tpu.memory_space<vmem>>, vector<1x200x16xbf16>
    %3 = vector.shape_cast %2 : vector<1x200x16xbf16> to vector<200x16xbf16>
    %cst = arith.constant dense<0.000000e+00> : vector<484x16xf32>
    %4 = tpu.matmul %1, %3, %cst {dimension_numbers = #tpu.dot_dimension_numbers<[1], [0], [0], [1], [0, 0, 1, 1], [], []>} : vector<484x200xbf16>, vector<200x16xbf16>, vector<484x16xf32> -> vector<484x16xf32>
    %c0_5 = arith.constant 0 : index
    %c1 = arith.constant 1 : index
    %c0_6 = arith.constant 0 : index
    %5 = vector.load %arg1[%c0_5, %c1, %c0_6] : memref<1x512x200xbf16, #tpu.memory_space<vmem>>, vector<1x484x200xbf16>
    %6 = vector.shape_cast %5 : vector<1x484x200xbf16> to vector<484x200xbf16>
    %c1_7 = arith.constant 1 : index
    %c0_8 = arith.constant 0 : index
    %c0_9 = arith.constant 0 : index
    %7 = vector.load %arg2[%c1_7, %c0_8, %c0_9] : memref<4x200x16xbf16, #tpu.memory_space<vmem>>, vector<1x200x16xbf16>
    %8 = vector.shape_cast %7 : vector<1x200x16xbf16> to vector<200x16xbf16>
    %cst_10 = arith.constant dense<0.000000e+00> : vector<484x16xf32>
    %9 = tpu.matmul %6, %8, %cst_10 {dimension_numbers = #tpu.dot_dimension_numbers<[1], [0], [0], [1], [0, 0, 1, 1], [], []>} : vector<484x200xbf16>, vector<200x16xbf16>, vector<484x16xf32> -> vector<484x16xf32>
    %10 = arith.addf %4, %9 : vector<484x16xf32>
    %c0_11 = arith.constant 0 : index
    %c22 = arith.constant 22 : index
    %c0_12 = arith.constant 0 : index
    %11 = vector.load %arg1[%c0_11, %c22, %c0_12] : memref<1x512x200xbf16, #tpu.memory_space<vmem>>, vector<1x484x200xbf16>
    %12 = vector.shape_cast %11 : vector<1x484x200xbf16> to vector<484x200xbf16>
    %c2 = arith.constant 2 : index
    %c0_13 = arith.constant 0 : index
    %c0_14 = arith.constant 0 : index
    %13 = vector.load %arg2[%c2, %c0_13, %c0_14] : memref<4x200x16xbf16, #tpu.memory_space<vmem>>, vector<1x200x16xbf16>
    %14 = vector.shape_cast %13 : vector<1x200x16xbf16> to vector<200x16xbf16>
    %cst_15 = arith.constant dense<0.000000e+00> : vector<484x16xf32>
    %15 = tpu.matmul %12, %14, %cst_15 {dimension_numbers = #tpu.dot_dimension_numbers<[1], [0], [0], [1], [0, 0, 1, 1], [], []>} : vector<484x200xbf16>, vector<200x16xbf16>, vector<484x16xf32> -> vector<484x16xf32>
    %16 = arith.addf %10, %15 : vector<484x16xf32>
    %c0_16 = arith.constant 0 : index
    %c23 = arith.constant 23 : index
    %c0_17 = arith.constant 0 : index
    %17 = vector.load %arg1[%c0_16, %c23, %c0_17] : memref<1x512x200xbf16, #tpu.memory_space<vmem>>, vector<1x484x200xbf16>
    %18 = vector.shape_cast %17 : vector<1x484x200xbf16> to vector<484x200xbf16>
    %c3 = arith.constant 3 : index
    %c0_18 = arith.constant 0 : index
    %c0_19 = arith.constant 0 : index
    %19 = vector.load %arg2[%c3, %c0_18, %c0_19] : memref<4x200x16xbf16, #tpu.memory_space<vmem>>, vector<1x200x16xbf16>
    %20 = vector.shape_cast %19 : vector<1x200x16xbf16> to vector<200x16xbf16>
    %cst_20 = arith.constant dense<0.000000e+00> : vector<484x16xf32>
    %21 = tpu.matmul %18, %20, %cst_20 {dimension_numbers = #tpu.dot_dimension_numbers<[1], [0], [0], [1], [0, 0, 1, 1], [], []>} : vector<484x200xbf16>, vector<200x16xbf16>, vector<484x16xf32> -> vector<484x16xf32>
    %22 = arith.addf %16, %21 : vector<484x16xf32>
    %23 = vector.extract_strided_slice %22 {offsets = [0, 0], sizes = [440, 16], strides = [1, 1]} : vector<484x16xf32> to vector<440x16xf32>
    %24 = vector.extract_strided_slice %22 {offsets = [22, 0], sizes = [440, 16], strides = [1, 1]} : vector<484x16xf32> to vector<440x16xf32>
    %25 = arith.maximumf %23, %24 : vector<440x16xf32>
    %26 = vector.extract_strided_slice %22 {offsets = [44, 0], sizes = [440, 16], strides = [1, 1]} : vector<484x16xf32> to vector<440x16xf32>
    %27 = arith.maximumf %25, %26 : vector<440x16xf32>
    %28 = vector.extract_strided_slice %27 {offsets = [0, 0], sizes = [438, 16], strides = [1, 1]} : vector<440x16xf32> to vector<438x16xf32>
    %29 = vector.extract_strided_slice %27 {offsets = [1, 0], sizes = [438, 16], strides = [1, 1]} : vector<440x16xf32> to vector<438x16xf32>
    %30 = arith.maximumf %28, %29 : vector<438x16xf32>
    %31 = vector.extract_strided_slice %27 {offsets = [2, 0], sizes = [438, 16], strides = [1, 1]} : vector<440x16xf32> to vector<438x16xf32>
    %32 = arith.maximumf %30, %31 : vector<438x16xf32>
    %cst_21 = arith.constant 0.000000e+00 : f32
    %33 = vector.broadcast %cst_21 : f32 to vector<168x16xf32>
    %c0_22 = arith.constant 0 : index
    %c0_23 = arith.constant 0 : index
    %34 = vector.load %arg7[%c0_22, %c0_23] : memref<168x16xf32, #tpu.memory_space<vmem>>, vector<168x16xf32>
    tpu.vector_store %arg7[%c0_22, %c0_23], %33 {strides = array<i32>} : memref<168x16xf32, #tpu.memory_space<vmem>>, vector<168x16xf32>,
    %35 = vector.extract_strided_slice %32 {offsets = [0, 0], sizes = [21, 16], strides = [1, 1]} : vector<438x16xf32> to vector<21x16xf32>
    %c0_24 = arith.constant 0 : index
    %c0_25 = arith.constant 0 : index
    %36 = vector.load %arg7[%c0_24, %c0_25] : memref<168x16xf32, #tpu.memory_space<vmem>>, vector<21x16xf32>
    tpu.vector_store %arg7[%c0_24, %c0_25], %35 {strides = array<i32>} : memref<168x16xf32, #tpu.memory_space<vmem>>, vector<21x16xf32>,
    %37 = vector.extract_strided_slice %32 {offsets = [66, 0], sizes = [21, 16], strides = [1, 1]} : vector<438x16xf32> to vector<21x16xf32>
    %c24 = arith.constant 24 : index
    %c0_26 = arith.constant 0 : index
    %38 = vector.load %arg7[%c24, %c0_26] : memref<168x16xf32, #tpu.memory_space<vmem>>, vector<21x16xf32>
    tpu.vector_store %arg7[%c24, %c0_26], %37 {strides = array<i32>} : memref<168x16xf32, #tpu.memory_space<vmem>>, vector<21x16xf32>,
    %39 = vector.extract_strided_slice %32 {offsets = [132, 0], sizes = [21, 16], strides = [1, 1]} : vector<438x16xf32> to vector<21x16xf32>
    %c48 = arith.constant 48 : index
    %c0_27 = arith.constant 0 : index
    %40 = vector.load %arg7[%c48, %c0_27] : memref<168x16xf32, #tpu.memory_space<vmem>>, vector<21x16xf32>
    tpu.vector_store %arg7[%c48, %c0_27], %39 {strides = array<i32>} : memref<168x16xf32, #tpu.memory_space<vmem>>, vector<21x16xf32>,
    %41 = vector.extract_strided_slice %32 {offsets = [198, 0], sizes = [21, 16], strides = [1, 1]} : vector<438x16xf32> to vector<21x16xf32>
    %c72 = arith.constant 72 : index
    %c0_28 = arith.constant 0 : index
    %42 = vector.load %arg7[%c72, %c0_28] : memref<168x16xf32, #tpu.memory_space<vmem>>, vector<21x16xf32>
    tpu.vector_store %arg7[%c72, %c0_28], %41 {strides = array<i32>} : memref<168x16xf32, #tpu.memory_space<vmem>>, vector<21x16xf32>,
    %43 = vector.extract_strided_slice %32 {offsets = [264, 0], sizes = [21, 16], strides = [1, 1]} : vector<438x16xf32> to vector<21x16xf32>
    %c96 = arith.constant 96 : index
    %c0_29 = arith.constant 0 : index
    %44 = vector.load %arg7[%c96, %c0_29] : memref<168x16xf32, #tpu.memory_space<vmem>>, vector<21x16xf32>
    tpu.vector_store %arg7[%c96, %c0_29], %43 {strides = array<i32>} : memref<168x16xf32, #tpu.memory_space<vmem>>, vector<21x16xf32>,
    %45 = vector.extract_strided_slice %32 {offsets = [330, 0], sizes = [21, 16], strides = [1, 1]} : vector<438x16xf32> to vector<21x16xf32>
    %c120 = arith.constant 120 : index
    %c0_30 = arith.constant 0 : index
    %46 = vector.load %arg7[%c120, %c0_30] : memref<168x16xf32, #tpu.memory_space<vmem>>, vector<21x16xf32>
    tpu.vector_store %arg7[%c120, %c0_30], %45 {strides = array<i32>} : memref<168x16xf32, #tpu.memory_space<vmem>>, vector<21x16xf32>,
    %47 = vector.extract_strided_slice %32 {offsets = [396, 0], sizes = [21, 16], strides = [1, 1]} : vector<438x16xf32> to vector<21x16xf32>
    %c144 = arith.constant 144 : index
    %c0_31 = arith.constant 0 : index
    %48 = vector.load %arg7[%c144, %c0_31] : memref<168x16xf32, #tpu.memory_space<vmem>>, vector<21x16xf32>
    tpu.vector_store %arg7[%c144, %c0_31], %47 {strides = array<i32>} : memref<168x16xf32, #tpu.memory_space<vmem>>, vector<21x16xf32>,
    %c0_32 = arith.constant 0 : index
    %c0_33 = arith.constant 0 : index
    %49 = vector.load %arg7[%c0_32, %c0_33] : memref<168x16xf32, #tpu.memory_space<vmem>>, vector<168x16xf32>
    %50 = vector.extract_strided_slice %49 {offsets = [0, 0], sizes = [56, 16], strides = [1, 1]} : vector<168x16xf32> to vector<56x16xf32>
    %c0_34 = arith.constant 0 : index
    %c0_35 = arith.constant 0 : index
    %c0_36 = arith.constant 0 : index
    %51 = vector.load %arg3[%c0_34, %c0_35, %c0_36] : memref<25x16x32xf32, #tpu.memory_space<vmem>>, vector<1x16x32xf32>
    %52 = vector.shape_cast %51 : vector<1x16x32xf32> to vector<16x32xf32>
    %cst_37 = arith.constant dense<0.000000e+00> : vector<56x32xf32>
    %53 = tpu.matmul %50, %52, %cst_37 {dimension_numbers = #tpu.dot_dimension_numbers<[1], [0], [0], [1], [0, 0, 1, 1], [], []>} : vector<56x16xf32>, vector<16x32xf32>, vector<56x32xf32> -> vector<56x32xf32>
    %54 = vector.extract_strided_slice %49 {offsets = [3, 0], sizes = [56, 16], strides = [1, 1]} : vector<168x16xf32> to vector<56x16xf32>
    %c1_38 = arith.constant 1 : index
    %c0_39 = arith.constant 0 : index
    %c0_40 = arith.constant 0 : index
    %55 = vector.load %arg3[%c1_38, %c0_39, %c0_40] : memref<25x16x32xf32, #tpu.memory_space<vmem>>, vector<1x16x32xf32>
    %56 = vector.shape_cast %55 : vector<1x16x32xf32> to vector<16x32xf32>
    %cst_41 = arith.constant dense<0.000000e+00> : vector<56x32xf32>
    %57 = tpu.matmul %54, %56, %cst_41 {dimension_numbers = #tpu.dot_dimension_numbers<[1], [0], [0], [1], [0, 0, 1, 1], [], []>} : vector<56x16xf32>, vector<16x32xf32>, vector<56x32xf32> -> vector<56x32xf32>
    %58 = arith.addf %53, %57 : vector<56x32xf32>
    %59 = vector.extract_strided_slice %49 {offsets = [6, 0], sizes = [56, 16], strides = [1, 1]} : vector<168x16xf32> to vector<56x16xf32>
    %c2_42 = arith.constant 2 : index
    %c0_43 = arith.constant 0 : index
    %c0_44 = arith.constant 0 : index
    %60 = vector.load %arg3[%c2_42, %c0_43, %c0_44] : memref<25x16x32xf32, #tpu.memory_space<vmem>>, vector<1x16x32xf32>
    %61 = vector.shape_cast %60 : vector<1x16x32xf32> to vector<16x32xf32>
    %cst_45 = arith.constant dense<0.000000e+00> : vector<56x32xf32>
    %62 = tpu.matmul %59, %61, %cst_45 {dimension_numbers = #tpu.dot_dimension_numbers<[1], [0], [0], [1], [0, 0, 1, 1], [], []>} : vector<56x16xf32>, vector<16x32xf32>, vector<56x32xf32> -> vector<56x32xf32>
    %63 = arith.addf %58, %62 : vector<56x32xf32>
    %64 = vector.extract_strided_slice %49 {offsets = [9, 0], sizes = [56, 16], strides = [1, 1]} : vector<168x16xf32> to vector<56x16xf32>
    %c3_46 = arith.constant 3 : index
    %c0_47 = arith.constant 0 : index
    %c0_48 = arith.constant 0 : index
    %65 = vector.load %arg3[%c3_46, %c0_47, %c0_48] : memref<25x16x32xf32, #tpu.memory_space<vmem>>, vector<1x16x32xf32>
    %66 = vector.shape_cast %65 : vector<1x16x32xf32> to vector<16x32xf32>
    %cst_49 = arith.constant dense<0.000000e+00> : vector<56x32xf32>
    %67 = tpu.matmul %64, %66, %cst_49 {dimension_numbers = #tpu.dot_dimension_numbers<[1], [0], [0], [1], [0, 0, 1, 1], [], []>} : vector<56x16xf32>, vector<16x32xf32>, vector<56x32xf32> -> vector<56x32xf32>
    %68 = arith.addf %63, %67 : vector<56x32xf32>
    %69 = vector.extract_strided_slice %49 {offsets = [12, 0], sizes = [56, 16], strides = [1, 1]} : vector<168x16xf32> to vector<56x16xf32>
    %c4 = arith.constant 4 : index
    %c0_50 = arith.constant 0 : index
    %c0_51 = arith.constant 0 : index
    %70 = vector.load %arg3[%c4, %c0_50, %c0_51] : memref<25x16x32xf32, #tpu.memory_space<vmem>>, vector<1x16x32xf32>
    %71 = vector.shape_cast %70 : vector<1x16x32xf32> to vector<16x32xf32>
    %cst_52 = arith.constant dense<0.000000e+00> : vector<56x32xf32>
    %72 = tpu.matmul %69, %71, %cst_52 {dimension_numbers = #tpu.dot_dimension_numbers<[1], [0], [0], [1], [0, 0, 1, 1], [], []>} : vector<56x16xf32>, vector<16x32xf32>, vector<56x32xf32> -> vector<56x32xf32>
    %73 = arith.addf %68, %72 : vector<56x32xf32>
    %74 = vector.extract_strided_slice %49 {offsets = [24, 0], sizes = [56, 16], strides = [1, 1]} : vector<168x16xf32> to vector<56x16xf32>
    %c5 = arith.constant 5 : index
    %c0_53 = arith.constant 0 : index
    %c0_54 = arith.constant 0 : index
    %75 = vector.load %arg3[%c5, %c0_53, %c0_54] : memref<25x16x32xf32, #tpu.memory_space<vmem>>, vector<1x16x32xf32>
    %76 = vector.shape_cast %75 : vector<1x16x32xf32> to vector<16x32xf32>
    %cst_55 = arith.constant dense<0.000000e+00> : vector<56x32xf32>
    %77 = tpu.matmul %74, %76, %cst_55 {dimension_numbers = #tpu.dot_dimension_numbers<[1], [0], [0], [1], [0, 0, 1, 1], [], []>} : vector<56x16xf32>, vector<16x32xf32>, vector<56x32xf32> -> vector<56x32xf32>
    %78 = arith.addf %73, %77 : vector<56x32xf32>
    %79 = vector.extract_strided_slice %49 {offsets = [27, 0], sizes = [56, 16], strides = [1, 1]} : vector<168x16xf32> to vector<56x16xf32>
    %c6 = arith.constant 6 : index
    %c0_56 = arith.constant 0 : index
    %c0_57 = arith.constant 0 : index
    %80 = vector.load %arg3[%c6, %c0_56, %c0_57] : memref<25x16x32xf32, #tpu.memory_space<vmem>>, vector<1x16x32xf32>
    %81 = vector.shape_cast %80 : vector<1x16x32xf32> to vector<16x32xf32>
    %cst_58 = arith.constant dense<0.000000e+00> : vector<56x32xf32>
    %82 = tpu.matmul %79, %81, %cst_58 {dimension_numbers = #tpu.dot_dimension_numbers<[1], [0], [0], [1], [0, 0, 1, 1], [], []>} : vector<56x16xf32>, vector<16x32xf32>, vector<56x32xf32> -> vector<56x32xf32>
    %83 = arith.addf %78, %82 : vector<56x32xf32>
    %84 = vector.extract_strided_slice %49 {offsets = [30, 0], sizes = [56, 16], strides = [1, 1]} : vector<168x16xf32> to vector<56x16xf32>
    %c7 = arith.constant 7 : index
    %c0_59 = arith.constant 0 : index
    %c0_60 = arith.constant 0 : index
    %85 = vector.load %arg3[%c7, %c0_59, %c0_60] : memref<25x16x32xf32, #tpu.memory_space<vmem>>, vector<1x16x32xf32>
    %86 = vector.shape_cast %85 : vector<1x16x32xf32> to vector<16x32xf32>
    %cst_61 = arith.constant dense<0.000000e+00> : vector<56x32xf32>
    %87 = tpu.matmul %84, %86, %cst_61 {dimension_numbers = #tpu.dot_dimension_numbers<[1], [0], [0], [1], [0, 0, 1, 1], [], []>} : vector<56x16xf32>, vector<16x32xf32>, vector<56x32xf32> -> vector<56x32xf32>
    %88 = arith.addf %83, %87 : vector<56x32xf32>
    %89 = vector.extract_strided_slice %49 {offsets = [33, 0], sizes = [56, 16], strides = [1, 1]} : vector<168x16xf32> to vector<56x16xf32>
    %c8 = arith.constant 8 : index
    %c0_62 = arith.constant 0 : index
    %c0_63 = arith.constant 0 : index
    %90 = vector.load %arg3[%c8, %c0_62, %c0_63] : memref<25x16x32xf32, #tpu.memory_space<vmem>>, vector<1x16x32xf32>
    %91 = vector.shape_cast %90 : vector<1x16x32xf32> to vector<16x32xf32>
    %cst_64 = arith.constant dense<0.000000e+00> : vector<56x32xf32>
    %92 = tpu.matmul %89, %91, %cst_64 {dimension_numbers = #tpu.dot_dimension_numbers<[1], [0], [0], [1], [0, 0, 1, 1], [], []>} : vector<56x16xf32>, vector<16x32xf32>, vector<56x32xf32> -> vector<56x32xf32>
    %93 = arith.addf %88, %92 : vector<56x32xf32>
    %94 = vector.extract_strided_slice %49 {offsets = [36, 0], sizes = [56, 16], strides = [1, 1]} : vector<168x16xf32> to vector<56x16xf32>
    %c9 = arith.constant 9 : index
    %c0_65 = arith.constant 0 : index
    %c0_66 = arith.constant 0 : index
    %95 = vector.load %arg3[%c9, %c0_65, %c0_66] : memref<25x16x32xf32, #tpu.memory_space<vmem>>, vector<1x16x32xf32>
    %96 = vector.shape_cast %95 : vector<1x16x32xf32> to vector<16x32xf32>
    %cst_67 = arith.constant dense<0.000000e+00> : vector<56x32xf32>
    %97 = tpu.matmul %94, %96, %cst_67 {dimension_numbers = #tpu.dot_dimension_numbers<[1], [0], [0], [1], [0, 0, 1, 1], [], []>} : vector<56x16xf32>, vector<16x32xf32>, vector<56x32xf32> -> vector<56x32xf32>
    %98 = arith.addf %93, %97 : vector<56x32xf32>
    %99 = vector.extract_strided_slice %49 {offsets = [48, 0], sizes = [56, 16], strides = [1, 1]} : vector<168x16xf32> to vector<56x16xf32>
    %c10 = arith.constant 10 : index
    %c0_68 = arith.constant 0 : index
    %c0_69 = arith.constant 0 : index
    %100 = vector.load %arg3[%c10, %c0_68, %c0_69] : memref<25x16x32xf32, #tpu.memory_space<vmem>>, vector<1x16x32xf32>
    %101 = vector.shape_cast %100 : vector<1x16x32xf32> to vector<16x32xf32>
    %cst_70 = arith.constant dense<0.000000e+00> : vector<56x32xf32>
    %102 = tpu.matmul %99, %101, %cst_70 {dimension_numbers = #tpu.dot_dimension_numbers<[1], [0], [0], [1], [0, 0, 1, 1], [], []>} : vector<56x16xf32>, vector<16x32xf32>, vector<56x32xf32> -> vector<56x32xf32>
    %103 = arith.addf %98, %102 : vector<56x32xf32>
    %104 = vector.extract_strided_slice %49 {offsets = [51, 0], sizes = [56, 16], strides = [1, 1]} : vector<168x16xf32> to vector<56x16xf32>
    %c11 = arith.constant 11 : index
    %c0_71 = arith.constant 0 : index
    %c0_72 = arith.constant 0 : index
    %105 = vector.load %arg3[%c11, %c0_71, %c0_72] : memref<25x16x32xf32, #tpu.memory_space<vmem>>, vector<1x16x32xf32>
    %106 = vector.shape_cast %105 : vector<1x16x32xf32> to vector<16x32xf32>
    %cst_73 = arith.constant dense<0.000000e+00> : vector<56x32xf32>
    %107 = tpu.matmul %104, %106, %cst_73 {dimension_numbers = #tpu.dot_dimension_numbers<[1], [0], [0], [1], [0, 0, 1, 1], [], []>} : vector<56x16xf32>, vector<16x32xf32>, vector<56x32xf32> -> vector<56x32xf32>
    %108 = arith.addf %103, %107 : vector<56x32xf32>
    %109 = vector.extract_strided_slice %49 {offsets = [54, 0], sizes = [56, 16], strides = [1, 1]} : vector<168x16xf32> to vector<56x16xf32>
    %c12 = arith.constant 12 : index
    %c0_74 = arith.constant 0 : index
    %c0_75 = arith.constant 0 : index
    %110 = vector.load %arg3[%c12, %c0_74, %c0_75] : memref<25x16x32xf32, #tpu.memory_space<vmem>>, vector<1x16x32xf32>
    %111 = vector.shape_cast %110 : vector<1x16x32xf32> to vector<16x32xf32>
    %cst_76 = arith.constant dense<0.000000e+00> : vector<56x32xf32>
    %112 = tpu.matmul %109, %111, %cst_76 {dimension_numbers = #tpu.dot_dimension_numbers<[1], [0], [0], [1], [0, 0, 1, 1], [], []>} : vector<56x16xf32>, vector<16x32xf32>, vector<56x32xf32> -> vector<56x32xf32>
    %113 = arith.addf %108, %112 : vector<56x32xf32>
    %114 = vector.extract_strided_slice %49 {offsets = [57, 0], sizes = [56, 16], strides = [1, 1]} : vector<168x16xf32> to vector<56x16xf32>
    %c13 = arith.constant 13 : index
    %c0_77 = arith.constant 0 : index
    %c0_78 = arith.constant 0 : index
    %115 = vector.load %arg3[%c13, %c0_77, %c0_78] : memref<25x16x32xf32, #tpu.memory_space<vmem>>, vector<1x16x32xf32>
    %116 = vector.shape_cast %115 : vector<1x16x32xf32> to vector<16x32xf32>
    %cst_79 = arith.constant dense<0.000000e+00> : vector<56x32xf32>
    %117 = tpu.matmul %114, %116, %cst_79 {dimension_numbers = #tpu.dot_dimension_numbers<[1], [0], [0], [1], [0, 0, 1, 1], [], []>} : vector<56x16xf32>, vector<16x32xf32>, vector<56x32xf32> -> vector<56x32xf32>
    %118 = arith.addf %113, %117 : vector<56x32xf32>
    %119 = vector.extract_strided_slice %49 {offsets = [60, 0], sizes = [56, 16], strides = [1, 1]} : vector<168x16xf32> to vector<56x16xf32>
    %c14 = arith.constant 14 : index
    %c0_80 = arith.constant 0 : index
    %c0_81 = arith.constant 0 : index
    %120 = vector.load %arg3[%c14, %c0_80, %c0_81] : memref<25x16x32xf32, #tpu.memory_space<vmem>>, vector<1x16x32xf32>
    %121 = vector.shape_cast %120 : vector<1x16x32xf32> to vector<16x32xf32>
    %cst_82 = arith.constant dense<0.000000e+00> : vector<56x32xf32>
    %122 = tpu.matmul %119, %121, %cst_82 {dimension_numbers = #tpu.dot_dimension_numbers<[1], [0], [0], [1], [0, 0, 1, 1], [], []>} : vector<56x16xf32>, vector<16x32xf32>, vector<56x32xf32> -> vector<56x32xf32>
    %123 = arith.addf %118, %122 : vector<56x32xf32>
    %124 = vector.extract_strided_slice %49 {offsets = [72, 0], sizes = [56, 16], strides = [1, 1]} : vector<168x16xf32> to vector<56x16xf32>
    %c15 = arith.constant 15 : index
    %c0_83 = arith.constant 0 : index
    %c0_84 = arith.constant 0 : index
    %125 = vector.load %arg3[%c15, %c0_83, %c0_84] : memref<25x16x32xf32, #tpu.memory_space<vmem>>, vector<1x16x32xf32>
    %126 = vector.shape_cast %125 : vector<1x16x32xf32> to vector<16x32xf32>
    %cst_85 = arith.constant dense<0.000000e+00> : vector<56x32xf32>
    %127 = tpu.matmul %124, %126, %cst_85 {dimension_numbers = #tpu.dot_dimension_numbers<[1], [0], [0], [1], [0, 0, 1, 1], [], []>} : vector<56x16xf32>, vector<16x32xf32>, vector<56x32xf32> -> vector<56x32xf32>
    %128 = arith.addf %123, %127 : vector<56x32xf32>
    %129 = vector.extract_strided_slice %49 {offsets = [75, 0], sizes = [56, 16], strides = [1, 1]} : vector<168x16xf32> to vector<56x16xf32>
    %c16 = arith.constant 16 : index
    %c0_86 = arith.constant 0 : index
    %c0_87 = arith.constant 0 : index
    %130 = vector.load %arg3[%c16, %c0_86, %c0_87] : memref<25x16x32xf32, #tpu.memory_space<vmem>>, vector<1x16x32xf32>
    %131 = vector.shape_cast %130 : vector<1x16x32xf32> to vector<16x32xf32>
    %cst_88 = arith.constant dense<0.000000e+00> : vector<56x32xf32>
    %132 = tpu.matmul %129, %131, %cst_88 {dimension_numbers = #tpu.dot_dimension_numbers<[1], [0], [0], [1], [0, 0, 1, 1], [], []>} : vector<56x16xf32>, vector<16x32xf32>, vector<56x32xf32> -> vector<56x32xf32>
    %133 = arith.addf %128, %132 : vector<56x32xf32>
    %134 = vector.extract_strided_slice %49 {offsets = [78, 0], sizes = [56, 16], strides = [1, 1]} : vector<168x16xf32> to vector<56x16xf32>
    %c17 = arith.constant 17 : index
    %c0_89 = arith.constant 0 : index
    %c0_90 = arith.constant 0 : index
    %135 = vector.load %arg3[%c17, %c0_89, %c0_90] : memref<25x16x32xf32, #tpu.memory_space<vmem>>, vector<1x16x32xf32>
    %136 = vector.shape_cast %135 : vector<1x16x32xf32> to vector<16x32xf32>
    %cst_91 = arith.constant dense<0.000000e+00> : vector<56x32xf32>
    %137 = tpu.matmul %134, %136, %cst_91 {dimension_numbers = #tpu.dot_dimension_numbers<[1], [0], [0], [1], [0, 0, 1, 1], [], []>} : vector<56x16xf32>, vector<16x32xf32>, vector<56x32xf32> -> vector<56x32xf32>
    %138 = arith.addf %133, %137 : vector<56x32xf32>
    %139 = vector.extract_strided_slice %49 {offsets = [81, 0], sizes = [56, 16], strides = [1, 1]} : vector<168x16xf32> to vector<56x16xf32>
    %c18 = arith.constant 18 : index
    %c0_92 = arith.constant 0 : index
    %c0_93 = arith.constant 0 : index
    %140 = vector.load %arg3[%c18, %c0_92, %c0_93] : memref<25x16x32xf32, #tpu.memory_space<vmem>>, vector<1x16x32xf32>
    %141 = vector.shape_cast %140 : vector<1x16x32xf32> to vector<16x32xf32>
    %cst_94 = arith.constant dense<0.000000e+00> : vector<56x32xf32>
    %142 = tpu.matmul %139, %141, %cst_94 {dimension_numbers = #tpu.dot_dimension_numbers<[1], [0], [0], [1], [0, 0, 1, 1], [], []>} : vector<56x16xf32>, vector<16x32xf32>, vector<56x32xf32> -> vector<56x32xf32>
    %143 = arith.addf %138, %142 : vector<56x32xf32>
    %144 = vector.extract_strided_slice %49 {offsets = [84, 0], sizes = [56, 16], strides = [1, 1]} : vector<168x16xf32> to vector<56x16xf32>
    %c19 = arith.constant 19 : index
    %c0_95 = arith.constant 0 : index
    %c0_96 = arith.constant 0 : index
    %145 = vector.load %arg3[%c19, %c0_95, %c0_96] : memref<25x16x32xf32, #tpu.memory_space<vmem>>, vector<1x16x32xf32>
    %146 = vector.shape_cast %145 : vector<1x16x32xf32> to vector<16x32xf32>
    %cst_97 = arith.constant dense<0.000000e+00> : vector<56x32xf32>
    %147 = tpu.matmul %144, %146, %cst_97 {dimension_numbers = #tpu.dot_dimension_numbers<[1], [0], [0], [1], [0, 0, 1, 1], [], []>} : vector<56x16xf32>, vector<16x32xf32>, vector<56x32xf32> -> vector<56x32xf32>
    %148 = arith.addf %143, %147 : vector<56x32xf32>
    %149 = vector.extract_strided_slice %49 {offsets = [96, 0], sizes = [56, 16], strides = [1, 1]} : vector<168x16xf32> to vector<56x16xf32>
    %c20 = arith.constant 20 : index
    %c0_98 = arith.constant 0 : index
    %c0_99 = arith.constant 0 : index
    %150 = vector.load %arg3[%c20, %c0_98, %c0_99] : memref<25x16x32xf32, #tpu.memory_space<vmem>>, vector<1x16x32xf32>
    %151 = vector.shape_cast %150 : vector<1x16x32xf32> to vector<16x32xf32>
    %cst_100 = arith.constant dense<0.000000e+00> : vector<56x32xf32>
    %152 = tpu.matmul %149, %151, %cst_100 {dimension_numbers = #tpu.dot_dimension_numbers<[1], [0], [0], [1], [0, 0, 1, 1], [], []>} : vector<56x16xf32>, vector<16x32xf32>, vector<56x32xf32> -> vector<56x32xf32>
    %153 = arith.addf %148, %152 : vector<56x32xf32>
    %154 = vector.extract_strided_slice %49 {offsets = [99, 0], sizes = [56, 16], strides = [1, 1]} : vector<168x16xf32> to vector<56x16xf32>
    %c21 = arith.constant 21 : index
    %c0_101 = arith.constant 0 : index
    %c0_102 = arith.constant 0 : index
    %155 = vector.load %arg3[%c21, %c0_101, %c0_102] : memref<25x16x32xf32, #tpu.memory_space<vmem>>, vector<1x16x32xf32>
    %156 = vector.shape_cast %155 : vector<1x16x32xf32> to vector<16x32xf32>
    %cst_103 = arith.constant dense<0.000000e+00> : vector<56x32xf32>
    %157 = tpu.matmul %154, %156, %cst_103 {dimension_numbers = #tpu.dot_dimension_numbers<[1], [0], [0], [1], [0, 0, 1, 1], [], []>} : vector<56x16xf32>, vector<16x32xf32>, vector<56x32xf32> -> vector<56x32xf32>
    %158 = arith.addf %153, %157 : vector<56x32xf32>
    %159 = vector.extract_strided_slice %49 {offsets = [102, 0], sizes = [56, 16], strides = [1, 1]} : vector<168x16xf32> to vector<56x16xf32>
    %c22_104 = arith.constant 22 : index
    %c0_105 = arith.constant 0 : index
    %c0_106 = arith.constant 0 : index
    %160 = vector.load %arg3[%c22_104, %c0_105, %c0_106] : memref<25x16x32xf32, #tpu.memory_space<vmem>>, vector<1x16x32xf32>
    %161 = vector.shape_cast %160 : vector<1x16x32xf32> to vector<16x32xf32>
    %cst_107 = arith.constant dense<0.000000e+00> : vector<56x32xf32>
    %162 = tpu.matmul %159, %161, %cst_107 {dimension_numbers = #tpu.dot_dimension_numbers<[1], [0], [0], [1], [0, 0, 1, 1], [], []>} : vector<56x16xf32>, vector<16x32xf32>, vector<56x32xf32> -> vector<56x32xf32>
    %163 = arith.addf %158, %162 : vector<56x32xf32>
    %164 = vector.extract_strided_slice %49 {offsets = [105, 0], sizes = [56, 16], strides = [1, 1]} : vector<168x16xf32> to vector<56x16xf32>
    %c23_108 = arith.constant 23 : index
    %c0_109 = arith.constant 0 : index
    %c0_110 = arith.constant 0 : index
    %165 = vector.load %arg3[%c23_108, %c0_109, %c0_110] : memref<25x16x32xf32, #tpu.memory_space<vmem>>, vector<1x16x32xf32>
    %166 = vector.shape_cast %165 : vector<1x16x32xf32> to vector<16x32xf32>
    %cst_111 = arith.constant dense<0.000000e+00> : vector<56x32xf32>
    %167 = tpu.matmul %164, %166, %cst_111 {dimension_numbers = #tpu.dot_dimension_numbers<[1], [0], [0], [1], [0, 0, 1, 1], [], []>} : vector<56x16xf32>, vector<16x32xf32>, vector<56x32xf32> -> vector<56x32xf32>
    %168 = arith.addf %163, %167 : vector<56x32xf32>
    %169 = vector.extract_strided_slice %49 {offsets = [108, 0], sizes = [56, 16], strides = [1, 1]} : vector<168x16xf32> to vector<56x16xf32>
    %c24_112 = arith.constant 24 : index
    %c0_113 = arith.constant 0 : index
    %c0_114 = arith.constant 0 : index
    %170 = vector.load %arg3[%c24_112, %c0_113, %c0_114] : memref<25x16x32xf32, #tpu.memory_space<vmem>>, vector<1x16x32xf32>
    %171 = vector.shape_cast %170 : vector<1x16x32xf32> to vector<16x32xf32>
    %cst_115 = arith.constant dense<0.000000e+00> : vector<56x32xf32>
    %172 = tpu.matmul %169, %171, %cst_115 {dimension_numbers = #tpu.dot_dimension_numbers<[1], [0], [0], [1], [0, 0, 1, 1], [], []>} : vector<56x16xf32>, vector<16x32xf32>, vector<56x32xf32> -> vector<56x32xf32>
    %173 = arith.addf %168, %172 : vector<56x32xf32>
    %174 = vector.extract_strided_slice %173 {offsets = [0, 0], sizes = [50, 32], strides = [1, 1]} : vector<56x32xf32> to vector<50x32xf32>
    %175 = vector.extract_strided_slice %173 {offsets = [3, 0], sizes = [50, 32], strides = [1, 1]} : vector<56x32xf32> to vector<50x32xf32>
    %176 = arith.maximumf %174, %175 : vector<50x32xf32>
    %177 = vector.extract_strided_slice %173 {offsets = [6, 0], sizes = [50, 32], strides = [1, 1]} : vector<56x32xf32> to vector<50x32xf32>
    %178 = arith.maximumf %176, %177 : vector<50x32xf32>
    %179 = vector.extract_strided_slice %178 {offsets = [0, 0], sizes = [2, 32], strides = [1, 1]} : vector<50x32xf32> to vector<2x32xf32>
    %180 = vector.extract_strided_slice %178 {offsets = [24, 0], sizes = [2, 32], strides = [1, 1]} : vector<50x32xf32> to vector<2x32xf32>
    %181 = arith.maximumf %179, %180 : vector<2x32xf32>
    %182 = vector.extract_strided_slice %178 {offsets = [48, 0], sizes = [2, 32], strides = [1, 1]} : vector<50x32xf32> to vector<2x32xf32>
    %183 = arith.maximumf %181, %182 : vector<2x32xf32>
    %184 = vector.extract_strided_slice %183 {offsets = [0, 0], sizes = [1, 32], strides = [1, 1]} : vector<2x32xf32> to vector<1x32xf32>
    %c0_116 = arith.constant 0 : index
    %c0_117 = arith.constant 0 : index
    %185 = vector.load %arg4[%c0_116, %c0_117] : memref<2x32xf32, #tpu.memory_space<vmem>>, vector<2x32xf32>
    %186 = vector.broadcast %184 : vector<1x32xf32> to vector<2x32xf32>
    %187 = arith.mulf %185, %186 : vector<2x32xf32>
    %cst_118 = arith.constant dense<0.000000e+00> : vector<2xf32>
    %188 = vector.multi_reduction <add>, %187, %cst_118 [1] : vector<2x32xf32> to vector<2xf32>
    %189 = vector.shape_cast %188 : vector<2xf32> to vector<2x1xf32>
    %c0_119 = arith.constant 0 : index
    %c0_120 = arith.constant 0 : index
    %190 = vector.load %arg5[%c0_119, %c0_120] : memref<2x1xf32, #tpu.memory_space<vmem>>, vector<2x1xf32>
    %191 = arith.addf %189, %190 : vector<2x1xf32>
    %cst_121 = arith.constant dense<0xFF800000> : vector<1xf32>
    %192 = vector.multi_reduction <maximumf>, %191, %cst_121 [0] : vector<2x1xf32> to vector<1xf32>
    %193 = vector.shape_cast %192 : vector<1xf32> to vector<1x1xf32>
    %194 = vector.broadcast %193 : vector<1x1xf32> to vector<2x1xf32>
    %195 = arith.subf %191, %194 : vector<2x1xf32>
    %196 = math.exp %195 : vector<2x1xf32>
    %cst_122 = arith.constant dense<0.000000e+00> : vector<1xf32>
    %197 = vector.multi_reduction <add>, %196, %cst_122 [0] : vector<2x1xf32> to vector<1xf32>
    %198 = vector.shape_cast %197 : vector<1xf32> to vector<1x1xf32>
    %199 = vector.broadcast %198 : vector<1x1xf32> to vector<2x1xf32>
    %200 = arith.divf %196, %199 : vector<2x1xf32>
    %cst_123 = arith.constant 0.000000e+00 : f32
    %201 = vector.broadcast %cst_123 : f32 to vector<1x8x128xf32>
    %c0_124 = arith.constant 0 : index
    %c0_125 = arith.constant 0 : index
    %c0_126 = arith.constant 0 : index
    %202 = vector.load %arg6[%c0_124, %c0_125, %c0_126] : memref<1x8x128xf32, #tpu.memory_space<vmem>>, vector<1x8x128xf32>
    tpu.vector_store %arg6[%c0_124, %c0_125, %c0_126], %201 {strides = array<i32>} : memref<1x8x128xf32, #tpu.memory_space<vmem>>, vector<1x8x128xf32>,
    %c0_127 = arith.constant 0 : index
    %c0_128 = arith.constant 0 : index
    %c0_129 = arith.constant 0 : index
    %203 = vector.load %arg6[%c0_127, %c0_128, %c0_129] : memref<1x8x128xf32, #tpu.memory_space<vmem>>, vector<1x2x1xf32>
    %204 = vector.shape_cast %203 : vector<1x2x1xf32> to vector<2x1xf32>
    %205 = vector.shape_cast %200 : vector<2x1xf32> to vector<1x2x1xf32>
    tpu.vector_store %arg6[%c0_127, %c0_128, %c0_129], %205 {strides = array<i32>} : memref<1x8x128xf32, #tpu.memory_space<vmem>>, vector<1x2x1xf32>,
    return
  }
  func.func @transform_0(%arg0: i32) -> (i32, i32, i32) {
    %c0_i32 = arith.constant 0 : i32
    %c0_i32_0 = arith.constant 0 : i32
    %c0_i32_1 = arith.constant 0 : i32
    return %arg0, %c0_i32, %c0_i32_0 : i32, i32, i32
  }
  func.func @transform_1(%arg0: i32) -> (i32, i32, i32) {
    %c0_i32 = arith.constant 0 : i32
    %c0_i32_0 = arith.constant 0 : i32
    %c0_i32_1 = arith.constant 0 : i32
    %c0_i32_2 = arith.constant 0 : i32
    return %c0_i32, %c0_i32_0, %c0_i32_1 : i32, i32, i32
  }
  func.func @transform_2(%arg0: i32) -> (i32, i32, i32) {
    %c0_i32 = arith.constant 0 : i32
    %c0_i32_0 = arith.constant 0 : i32
    %c0_i32_1 = arith.constant 0 : i32
    %c0_i32_2 = arith.constant 0 : i32
    return %c0_i32, %c0_i32_0, %c0_i32_1 : i32, i32, i32
  }
  func.func @transform_3(%arg0: i32) -> (i32, i32) {
    %c0_i32 = arith.constant 0 : i32
    %c0_i32_0 = arith.constant 0 : i32
    %c0_i32_1 = arith.constant 0 : i32
    return %c0_i32, %c0_i32_0 : i32, i32
  }
  func.func @transform_4(%arg0: i32) -> (i32, i32) {
    %c0_i32 = arith.constant 0 : i32
    %c0_i32_0 = arith.constant 0 : i32
    %c0_i32_1 = arith.constant 0 : i32
    return %c0_i32, %c0_i32_0 : i32, i32
  }
  func.func @transform_5(%arg0: i32) -> (i32, i32, i32) {
    %c0_i32 = arith.constant 0 : i32
    %c0_i32_0 = arith.constant 0 : i32
    %c0_i32_1 = arith.constant 0 : i32
    return %arg0, %c0_i32, %c0_i32_0 : i32, i32, i32
  }
}

</mosaic_0001>

<bundles_post_ra>
// kernel: sparsenet_forward.1
= control target key start
LH: loop header
LB: loop body
LE: loop exit
PB: predicated region body
PF: predicated region fallthrough
CT: control target
= control target key end

     0   :  { %s7880_s18 = smov 0   ;;  %s11545_s0 = inlined_call_operand.vmem [shape: bf16[2,512,200], index: 0, kind: input, shape index: {}]   ;;  %s11546_s1 = inlined_call_operand.vmem [shape: bf16[4,200,16], index: 1, kind: input, shape index: {}]   ;;  %s11547_s2 = inlined_call_operand.vmem [shape: f32[25,16,32], index: 2, kind: input, shape index: {}]   ;;  %s11548_s3 = inlined_call_operand.vmem [shape: f32[2,32], index: 3, kind: input, shape index: {}]   ;;  %s11549_s4 = inlined_call_operand.vmem [shape: f32[2,1], index: 4, kind: input, shape index: {}]   ;;  %s11550_s5 = inlined_call_operand.vmem [shape: f32[2,8,128], index: 5, kind: output, shape index: {}]  }
   0x1 LB: > { %s6547_s19 = sadd.s32 4294967295, %s7847_s18   ;;  %p6551_p0 = scmp.ge.s32.totalorder %s7847_s18, 1  ;;  %s7847_s18 = sphi %s7880_s18, %s15_s18  }
   0x2   : > { %p187_p1 = scmp.lt.s32.totalorder %s7847_s18, 3 }
   0x4   : > { %p188_p2 = pnand %p6551_p0, %p187_p1 }
   0x6   : > { %191 = sbr.rel (%p188_p2) target bundleno = 1708 (0x6ac), region = 40 }
   0xb   : > { %v7731_v0 = vld [vmem:[%s11546_s1 + $0x9c] sm:$0xff]  ;;  %v6579_v2 = vld [vmem:[%s11546_s1 + $0xc4] sm:$0xf]  ;;  %p214_p3 = scmp.lt.s32.totalorder %s6547_s19, 1  ;;  %vm1277_vm0 = vcmask 1043456   ;;  %v7730_v5 = vld [vmem:[%s11546_s1 + $0x94] sm:$0xff] }
   0xc   : > { %v7719_v1 = vld [vmem:[%s11546_s1 + $0x38] sm:$0xff]  ;;  %v1157_v3 = vunpack.c.l.b16 %v6579_v2  ;;  %1281 = vmatpush.bf16.msra.mxu0 %v7731_v0  ;;  %v7718_v6 = vld [vmem:[%s11546_s1 + $0x30] sm:$0xff]  ;;  %v7717_v10 = vld [vmem:[%s11546_s1 + $0x28] sm:$0xff]  ;;  %vm582_vm1 = vsmask.f32 7424  ;;  %vm1183_vm2 = vcmask 588800  }
   0xd   : > { %1782 = vmatpush.bf16.msra.mxu2 %v7719_v1  ;;  %s11650_s19 = smov (!%p214_p3, %s6547_s19), 1  ;;  %v7735_v8 = vld [vmem:[%s11546_s1 + $0xbc] sm:$0xff]  ;;  %v7729_v9 = vld [vmem:[%s11546_s1 + $0x8c] sm:$0xff]  ;;  %v7734_v22 = vld [vmem:[%s11546_s1 + $0xb4] sm:$0xff]  ;;  %vm2442_vm3 = vcmask 1044480   ;;  %vm4364_vm5 = vcmask 1041408  }
   0xe   : > { %v1170_v4 = vpack.c.b16 %v1157_v3, %v1157_v3  ;;  %s7651_s30 = sshll.u32 %s11650_s19, 9  ;;  %v309_v25 = vld [vmem:[%s11546_s1 + $0x60] sm:$0xf]  ;;  %v7728_v26 = vld [vmem:[%s11546_s1 + $0x84] sm:$0xff]  ;;  %v7733_v34 = vld [vmem:[%s11546_s1 + $0xac] sm:$0xff]  ;;  %vm4886_vm6 = vcmask 130048  }
   0xf   : > { %s7919_s14 = scalar_lea.vmem %s11545_s0, %s7651_s30  ;;  %v7716_v27 = vld [vmem:[%s11546_s1 + $0x20] sm:$0xff]  ;;  %v1690_v33 = vunpack.c.l.b16 %v309_v25  ;;  %v7715_v40 = vld [vmem:[%s11546_s1 + $0x18] sm:$0xff]  ;;  %v7714_v51 = vld [vmem:[%s11546_s1 + $0x10] sm:$0xff]  ;;  %vm3183_vm4 = vsmask.f32 4352  ;;  %vm4678_vm7 = vcmask 1046528  }
  0x10   : > { %v1279_v7 = vsel %vm1277_vm0, %v1170_v4, 0  ;;  %v7652_v11 = vld [vmem:[%s7919_s14 + $0x4] sm:$0xf]  ;;  %v6584_v12 = vld [vmem:[%s7919_s14 + $0x8] sm:$0xf0]  ;;  %1282 = vmatpush.bf16.msra.mxu0 %v7730_v5  ;;  %v7727_v39 = vld [vmem:[%s11546_s1 + $0x7c] sm:$0xff] }
  0x11   : > { %1446 = vmatpush.bf16.msra.mxu1 %v1279_v7  ;;  %7820 = vmatpush.bf16.msra.mxu3 %v1279_v7  ;;  %v7654_v13 = vld [vmem:[%s7919_s14 + $0x14] sm:$0xf]  ;;  %v6592_v14 = vld [vmem:[%s7919_s14 + $0x18] sm:$0xf0]  ;;  %v7925_v15 = vor.u32 %v7652_v11, %v6584_v12  ;;  %v310_v18 = vld [vmem:[%s7919_s14 + $0x1e0] sm:$0x77]  ;;  %v1703_v44 = vpack.c.b16 %v1690_v33, %v1690_v33 }
  0x12   : > { %1783 = vmatpush.bf16.msra.mxu2 %v7718_v6  ;;  %v7710_v16 = vld [vmem:[%s7919_s14 + $0x1d4] sm:$0xf]  ;;  %v6816_v17 = vld [vmem:[%s7919_s14 + $0x1d8] sm:$0xf0]  ;;  %v7932_v20 = vor.u32 %v7654_v13, %v6592_v14  ;;  %v519_v21 = vunpack.c.h.b16 %v310_v18  ;;  %v6582_v29 = vld [vmem:[%s7919_s14] sm:$0xf] }
  0x13   : > { %v7930_v19 = vor.u32 %v7710_v16, %v6816_v17  ;;  %v598_v23 = vshll.u32 %v7925_v15, 16  ;;  %v7653_v30 = vld [vmem:[%s7919_s14 + $0x4] sm:$0xf0]  ;;  %v596_v31 = vshrl.u32 %v7925_v15, 16  ;;  %v6590_v42 = vld [vmem:[%s7919_s14 + $0x10] sm:$0xf] }
  0x14   : > { %1283 = vmatpush.bf16.msra.mxu0 %v7729_v9  ;;  %v7948_v28 = vpack.c.b16 %v519_v21, %v519_v21  ;;  %v603_v32 = vshll.u32 %v7932_v20, 16  ;;  %v7967_v41 = vor.u32 %v7653_v30, %v6582_v29  ;;  %v7655_v43 = vld [vmem:[%s7919_s14 + $0x14] sm:$0xf0]  ;;  %v7732_v45 = vld [vmem:[%s11546_s1 + $0xa4] sm:$0xff]  ;;  %v7346_v54 = vld [vmem:[%s11546_s1 + $0x18c] sm:$0xf] }
  0x15   : > { %1447 = vmatpush.bf16.msra.mxu1 %v7735_v8  ;;  %7821 = vmatpush.bf16.msra.mxu3 %v7735_v8  ;;  %v1051_v24 = vshll.u32 %v7930_v19, 16  ;;  %v600_v35 = vrot.slane %v598_v23, 1  ;;  %v1063_v37 = vshrl.u32 %v7930_v19, 16  ;;  %v7726_v50 = vld [vmem:[%s11546_s1 + $0x74] sm:$0xff]  ;;  %v7983_v52 = vor.u32 %v7655_v43, %v6590_v42  ;;  %v7803_v55 = vld [vmem:[%s11546_s1 + $0x100] sm:$0xff]  ;;  %v7725_v59 = vld [vmem:[%s11546_s1 + $0x6c] sm:$0xff] }
  0x16   : > { %1784 = vmatpush.bf16.msra.mxu2 %v7717_v10  ;;  %v1067_v38 = vshll.u32 %v7948_v28, 16  ;;  %v605_v47 = vrot.slane %v603_v32, 1  ;;  %v586_v53 = vshll.u32 %v7967_v41, 16  ;;  %v1780_v56 = vsel %vm1277_vm0, %v1703_v44, 0  ;;  %v7656_v60 = vld [vmem:[%s7919_s14 + $0x24] sm:$0xf] }
  0x17   : > { %v7957_v36 = vrot.slane %v1051_v24, 1  ;;  %v601_v46 = vor.u32 %v600_v35, %v596_v31  ;;  %v3820_v61 = vunpack.c.l.b16 %v7346_v54  ;;  %v7713_v62 = vld [vmem:[%s11546_s1 + $0x8] sm:$0xff]  ;;  %v584_v63 = vshrl.u32 %v7967_v41, 16  ;;  %v7723_v3 = vld [vmem:[%s11546_s1 + $0x58] sm:$0xff]  ;;  %v7712_v7 = vld [vmem:[%s11546_s1] sm:$0xff]  ;;  %s6554_s25 = sshll.u32 %s11650_s19, 3 }
  0x18   : > { %1284 = vmatpush.bf16.msra.mxu0 %v7728_v26  ;;  %v7975_v49 = vrot.slane %v1067_v38, 1  ;;  %v588_v0 = vrot.slane %v586_v53, 1  ;;  %v591_v1 = vshll.u32 %v7983_v52, 16  ;;  %v6600_v2 = vld [vmem:[%s7919_s14 + $0x28] sm:$0xf0]  ;;  %v7724_v6 = vld [vmem:[%s11546_s1 + $0x64] sm:$0xff]  ;;  %s11523_s28 = scalar_lea.vmem %s11550_s5, %s6554_s25 }
  0x19   : > { %1448 = vmatpush.bf16.msra.mxu1 %v7734_v22  ;;  %7822 = vmatpush.bf16.msra.mxu3 %v7734_v22  ;;  %v1065_v48 = vor.u32 %v1063_v37, %v7957_v36  ;;  %v606_v57 = vsel %vm582_vm1, %v601_v46, %v605_v47  ;;  %v8011_v4 = vor.u32 %v7656_v60, %v6600_v2  ;;  %v7722_v10 = vld [vmem:[%s11546_s1 + $0x50] sm:$0xff]  ;;  %v7815_v11 = vld [vmem:[%s11546_s1 + $0x164] sm:$0xff]  ;;  %v615_v13 = vshrl.u32 %v7932_v20, 16  ;;  %v6598_v22 = vld [vmem:[%s7919_s14 + $0x20] sm:$0xf] }
  0x1a   : > { %1785 = vmatpush.bf16.msra.mxu2 %v7716_v27  ;;  %v3833_v5 = vpack.c.b16 %v3820_v61, %v3820_v61  ;;  %v589_v8 = vor.u32 %v588_v0, %v584_v63  ;;  %v593_v9 = vrot.slane %v591_v1, 1  ;;  %v7002_v12 = vld [vmem:[%s11546_s1 + $0x128] sm:$0xf]  ;;  %v1074_v24 = vshrl.u32 %v7948_v28, 16  ;;  %v7720_v30 = vld [vmem:[%s11546_s1 + $0x40] sm:$0xff] }
  0x1b   : > { %v1070_v58 = vsel %vm582_vm1, %v1065_v48, %v7975_v49  ;;  %v619_v14 = vshll.u32 %v8011_v4, 16  ;;  %v2645_v18 = vunpack.c.l.b16 %v7002_v12  ;;  %v7721_v21 = vld [vmem:[%s11546_s1 + $0x48] sm:$0xff]  ;;  %v617_v25 = vor.u32 %v615_v13, %v605_v47  ;;  %v6608_v35 = vld [vmem:[%s7919_s14 + $0x38] sm:$0xf0]  ;;  %v6606_v44 = vld [vmem:[%s7919_s14 + $0x30] sm:$0xf] }
  0x1c   : > { %1285 = vmatpush.bf16.msra.mxu0 %v7727_v39  ;;  %v3940_v16 = vsel %vm1277_vm0, %v3833_v5, 0  ;;  %v594_v17 = vsel %vm582_vm1, %v589_v8, %v593_v9  ;;  %v7657_v23 = vld [vmem:[%s7919_s14 + $0x24] sm:$0xf0]  ;;  %v1076_v31 = vor.u32 %v1074_v24, %v7975_v49  ;;  %v607_v28 = vshrl.u32 %v7983_v52, 16  ;;  %v7660_v53 = vld [vmem:[%s7919_s14 + $0x44] sm:$0xf] }
  0x1d   : > { %1449 = vmatpush.bf16.msra.mxu1 %v7733_v34  ;;  %7823 = vmatpush.bf16.msra.mxu3 %v7733_v34  ;;  %v621_v26 = vrot.slane %v619_v14, 1  ;;  %v6599_v27 = vor.u32 %v7657_v23, %v6598_v22  ;;  %v2658_v29 = vpack.c.b16 %v2645_v18, %v2645_v18  ;;  %v7658_v34 = vld [vmem:[%s7919_s14 + $0x34] sm:$0xf]  ;;  %v6616_v54 = vld [vmem:[%s7919_s14 + $0x48] sm:$0xf0]  ;;  %vm4782_vm8 = vcmask 1045504  }
  0x1e   : > { %1786 = vmatpush.bf16.msra.mxu2 %v7715_v40  ;;  %v8050_v38 = vor.u32 %v7658_v34, %v6608_v35  ;;  %v609_v39 = vor.u32 %v607_v28, %v593_v9  ;;  %v6614_v61 = vld [vmem:[%s7919_s14 + $0x40] sm:$0xf]  ;;  %v7662_v5 = vld [vmem:[%s7919_s14 + $0x54] sm:$0xf]  ;;  %v6622_v14 = vld [vmem:[%s7919_s14 + $0x50] sm:$0xf] }
  0x1f   : > { %v622_v32 = vsel %vm582_vm1, %v617_v25, %v621_v26  ;;  %v611_v33 = vshll.u32 %v6599_v27, 16  ;;  %v2765_v37 = vsel %vm1277_vm0, %v2658_v29, 0  ;;  %v7664_v24 = vld [vmem:[%s7919_s14 + $0x64] sm:$0xf]  ;;  %v6632_v25 = vld [vmem:[%s7919_s14 + $0x68] sm:$0xf0] }
  0x20   : > { %1286 = vmatpush.bf16.msra.mxu0 %v7726_v50  ;;  %v635_v42 = vshll.u32 %v8050_v38, 16  ;;  %v623_v50 = vshrl.u32 %v6599_v27, 16  ;;  %v6630_v28 = vld [vmem:[%s7919_s14 + $0x60] sm:$0xf]  ;;  %vm4910_vm9 = vcmask 126976   ;;  %vm4912_vm10 = vcmask 130050  }
  0x21   : > { %1450 = vmatpush.bf16.msra.mxu1 %v7732_v45  ;;  %7824 = vmatpush.bf16.msra.mxu3 %v7732_v45  ;;  %v613_v40 = vrot.slane %v611_v33, 1  ;;  %v7659_v45 = vld [vmem:[%s7919_s14 + $0x34] sm:$0xf0]  ;;  %v7665_v33 = vld [vmem:[%s7919_s14 + $0x64] sm:$0xf0]  ;;  %vm4915_vm11 = vcmask 129024  }
  0x22   : > { %1787 = vmatpush.bf16.msra.mxu2 %v7714_v51  ;;  %v637_v47 = vrot.slane %v635_v42, 1  ;;  %v6607_v48 = vor.u32 %v7659_v45, %v6606_v44  ;;  %v6640_v42 = vld [vmem:[%s7919_s14 + $0x78] sm:$0xf0]  ;;  %vm4917_vm12 = vcmask 130052   ;;  %vm4921_vm13 = vcmask 122880  }
  0x23   : > { %v614_v43 = vsel %vm582_vm1, %v609_v39, %v613_v40  ;;  %vm4923_vm14 = vcmask 130054   ;;  %vm4927_vm15 = vcmask 124928  }
  0x24   : > { %6868 = vmatmul.msk.bf16.vlgmr.msra.gmra.mxu1 %vm1183_vm2, %v606_v57  ;;  %6897 = vmatmul.msk.bf16.vlgmr.msra.gmra.mxu3 %vm1183_vm2, %v1070_v58  ;;  %v627_v51 = vshll.u32 %v6607_v48, 16  ;;  %v647_v58 = vshrl.u32 %v8050_v38, 16  ;;  %v639_v2 = vshrl.u32 %v6607_v48, 16 }
  0x25   : > { %1947 = vmatpush.bf16.msrb.mxu3 %v1780_v56  ;;  %2767 = vmatpush.bf16.msrb.mxu1 %v7803_v55  ;;  %v8067_v55 = vor.u32 %v7660_v53, %v6616_v54  ;;  %v625_v56 = vor.u32 %v623_v50, %v613_v40  ;;  %v7667_v50 = vld [vmem:[%s7919_s14 + $0x74] sm:$0xf0] }
  0x26   : > { %1287 = vmatpush.bf16.msra.mxu0 %v7725_v59  ;;  %1788 = vmatpush.bf16.msra.mxu2 %v7713_v62  ;;  %v629_v57 = vrot.slane %v627_v51, 1  ;;  %v7661_v62 = vld [vmem:[%s7919_s14 + $0x44] sm:$0xf0] }
  0x27   : > { %v651_v59 = vshll.u32 %v8067_v55, 16  ;;  %v6615_v0 = vor.u32 %v7661_v62, %v6614_v61 }
  0x28   : > { %v630_v60 = vsel %vm582_vm1, %v625_v56, %v629_v57  ;;  %v641_v9 = vor.u32 %v639_v2, %v629_v57  ;;  %v7668_v57 = vld [vmem:[%s7919_s14 + $0x84] sm:$0xf]  ;;  %v6646_v2 = vld [vmem:[%s7919_s14 + $0x80] sm:$0xf] }
  0x29   : > { %1948 = vmatpush.bf16.msrb.mxu3 %v7723_v3  ;;  %v653_v63 = vrot.slane %v651_v59, 1  ;;  %v643_v3 = vshll.u32 %v6615_v0, 16  ;;  %v655_v22 = vshrl.u32 %v6615_v0, 16  ;;  %v7801_v59 = vld [vmem:[%s11546_s1 + $0xf0] sm:$0xff] }
  0x2a   : > { %1288 = vmatpush.bf16.msra.mxu0 %v7724_v6  ;;  %1789 = vmatpush.bf16.msra.mxu2 %v7712_v7  ;;  %v6624_v6 = vld [vmem:[%s7919_s14 + $0x58] sm:$0xf0] }
  0x2b   : > { %v7814_v7 = vld [vmem:[%s11546_s1 + $0x15c] sm:$0xff]  ;;  %v8083_v8 = vor.u32 %v7662_v5, %v6624_v6 }
  0x2d   : > { %1949 = vmatpush.bf16.msrb.mxu3 %v7722_v10  ;;  %1289 = vmatmul.bf16.vlgmr.msra.gmra.mxu0 %v594_v17  ;;  %v645_v10 = vrot.slane %v643_v3, 1  ;;  %v667_v12 = vshll.u32 %v8083_v8, 16  ;;  %v7669_v3 = vld [vmem:[%s7919_s14 + $0x84] sm:$0xf0] }
  0x2e   : > { %3942 = vmatpush.bf16.msrb.mxu0 %v7815_v11  ;;  %4107 = vmatpush.bf16.msrb.mxu2 %v3940_v16  ;;  %v663_v11 = vshrl.u32 %v8067_v55, 16  ;;  %v7663_v16 = vld [vmem:[%s7919_s14 + $0x54] sm:$0xf0] }
  0x2f   : > { %1790 = vmatmul.bf16.vlgmr.msra.gmra.mxu2 %v7967_v41  ;;  %v631_v41 = vshrl.u32 %v8011_v4, 16  ;;  %v646_v13 = vsel %vm582_vm1, %v641_v9, %v645_v10  ;;  %v669_v17 = vrot.slane %v667_v12, 1  ;;  %v6623_v18 = vor.u32 %v7663_v16, %v6622_v14  ;;  %v7670_v12 = vld [vmem:[%s7919_s14 + $0x94] sm:$0xf] }
  0x31   : > { %1950 = vmatpush.bf16.msrb.mxu3 %v7721_v21  ;;  %v633_v46 = vor.u32 %v631_v41, %v621_v26  ;;  %v659_v23 = vshll.u32 %v6623_v18, 16  ;;  %v8096_v26 = vor.u32 %v7664_v24, %v6632_v25  ;;  %v671_v39 = vshrl.u32 %v6623_v18, 16  ;;  %v7666_v41 = vld [vmem:[%s7919_s14 + $0x74] sm:$0xf]  ;;  %v7671_v24 = vld [vmem:[%s7919_s14 + $0x94] sm:$0xf0] }
  0x32   : > { %3943 = vmatpush.bf16.msrb.mxu0 %v7814_v7  ;;  %v6647_v7 = vor.u32 %v7669_v3, %v6646_v2 }
  0x33   : > { %v638_v49 = vsel %vm582_vm1, %v633_v46, %v637_v47  ;;  %v661_v29 = vrot.slane %v659_v23, 1  ;;  %v695_v46 = vshrl.u32 %v8096_v26, 16  ;;  %v6654_v23 = vld [vmem:[%s7919_s14 + $0x90] sm:$0xf] }
  0x34   : > { %6869 = vmatmul.msk.bf16.gmra.mxu1 %vm1183_vm2, %v622_v32  ;;  %6898 = vmatmul.msk.bf16.gmra.mxu3 %vm1183_vm2, %v1076_v31  ;;  %v683_v31 = vshll.u32 %v8096_v26, 16 }
  0x35   : > { %1951 = vmatpush.bf16.msrb.mxu3 %v7720_v30  ;;  %v679_v30 = vshrl.u32 %v8083_v8, 16  ;;  %v673_v44 = vor.u32 %v671_v39, %v661_v29 }
  0x36   : > { %v685_v35 = vrot.slane %v683_v31, 1  ;;  %v719_v31 = vshrl.u32 %v6647_v7, 16 }
  0x37   : > { %v681_v34 = vor.u32 %v679_v30, %v669_v17 }
  0x38   : > { %v697_v51 = vor.u32 %v695_v46, %v685_v35  ;;  %v6662_v46 = vld [vmem:[%s7919_s14 + $0xa0] sm:$0xf] }
  0x39   : > { %2932 = vmatpush.bf16.msra.mxu3 %v2765_v37  ;;  %v686_v37 = vsel %vm582_vm1, %v681_v34, %v685_v35 }
  0x3d   : > { %1294 = vmatmul.bf16.gmra.mxu0 %v614_v43  ;;  %v8109_v43 = vor.u32 %v7666_v41, %v6640_v42 }
  0x3f   : > { %1795 = vmatmul.bf16.gmra.mxu2 %v7983_v52  ;;  %v7802_v52 = vld [vmem:[%s11546_s1 + $0xf8] sm:$0xff] }
  0x40   : > { %2768 = vmatpush.bf16.msrb.mxu1 %v7802_v52 }
  0x44   : > { %6870 = vmatmul.msk.bf16.gmra.mxu1 %vm1183_vm2, %v638_v49  ;;  %6947 = vmatmul.msk.bf16.vlgmr.msrb.gmra.mxu3 %vm1183_vm2, %v7925_v15  ;;  %v649_v15 = vor.u32 %v647_v58, %v637_v47  ;;  %v699_v47 = vshll.u32 %v8109_v43, 16  ;;  %v6638_v49 = vld [vmem:[%s7919_s14 + $0x70] sm:$0xf]  ;;  %v6648_v58 = vld [vmem:[%s7919_s14 + $0x88] sm:$0xf0] }
  0x45   : > { %v6639_v54 = vor.u32 %v7667_v50, %v6638_v49  ;;  %v8128_v61 = vor.u32 %v7668_v57, %v6648_v58  ;;  %2769 = vmatpush.bf16.msrb.mxu1 %v7801_v59  ;;  %v7674_v58 = vld [vmem:[%s7919_s14 + $0xb4] sm:$0xf]  ;;  %v6672_v59 = vld [vmem:[%s7919_s14 + $0xb8] sm:$0xf0] }
  0x46   : > { %v654_v1 = vsel %vm582_vm1, %v649_v15, %v653_v63  ;;  %v701_v53 = vrot.slane %v699_v47, 1  ;;  %v7673_v47 = vld [vmem:[%s7919_s14 + $0xa4] sm:$0xf0] }
  0x47   : > { %v691_v56 = vshll.u32 %v6639_v54, 16  ;;  %v8169_v49 = vor.u32 %v7673_v47, %v6662_v46  ;;  %v6678_v46 = vld [vmem:[%s7919_s14 + $0xc0] sm:$0xf] }
  0x49   : > { %v693_v15 = vrot.slane %v691_v56, 1  ;;  %v739_v57 = vshll.u32 %v8169_v49, 16 }
  0x4d   : > { %1299 = vmatmul.bf16.gmra.mxu0 %v630_v60  ;;  %v7819_v60 = vld [vmem:[%s11546_s1 + $0x184] sm:$0xff] }
  0x4e   : > { %4108 = vmatpush.bf16.msrb.mxu2 %v7819_v60 }
  0x4f   : > { %1800 = vmatmul.bf16.gmra.mxu2 %v6599_v27  ;;  %v657_v27 = vor.u32 %v655_v22, %v645_v10  ;;  %v703_v10 = vshrl.u32 %v6639_v54, 16 }
  0x51   : > { %v662_v32 = vsel %vm582_vm1, %v657_v27, %v661_v29  ;;  %v705_v16 = vor.u32 %v703_v10, %v693_v15  ;;  %v6655_v27 = vor.u32 %v7671_v24, %v6654_v23  ;;  %v6670_v10 = vld [vmem:[%s7919_s14 + $0xb0] sm:$0xf]  ;;  %v751_v24 = vshrl.u32 %v8169_v49, 16 }
  0x53   : > { %v735_v56 = vshrl.u32 %v6655_v27, 16 }
  0x54   : > { %6871 = vmatmul.msk.bf16.gmra.mxu1 %vm1183_vm2, %v654_v1  ;;  %6948 = vmatmul.msk.bf16.gmra.mxu3 %vm1183_vm2, %v7932_v20  ;;  %v665_v20 = vor.u32 %v663_v11, %v653_v63  ;;  %v7807_v63 = vld [vmem:[%s11546_s1 + $0x120] sm:$0xff]  ;;  %v707_v11 = vshll.u32 %v6647_v7, 16 }
  0x55   : > { %2933 = vmatpush.bf16.msra.mxu3 %v7807_v63  ;;  %v741_v63 = vrot.slane %v739_v57, 1 }
  0x56   : > { %v670_v21 = vsel %vm582_vm1, %v665_v20, %v669_v17  ;;  %v709_v20 = vrot.slane %v707_v11, 1  ;;  %v727_v17 = vshrl.u32 %v8128_v61, 16  ;;  %v7675_v11 = vld [vmem:[%s7919_s14 + $0xb4] sm:$0xf0] }
  0x58   : > { %v710_v22 = vsel %vm582_vm1, %v705_v16, %v709_v20  ;;  %v721_v35 = vor.u32 %v719_v31, %v709_v20  ;;  %v8190_v16 = vor.u32 %v7675_v11, %v6670_v10  ;;  %v753_v31 = vor.u32 %v751_v24, %v741_v63 }
  0x5d   : > { %1304 = vmatmul.bf16.gmra.mxu0 %v646_v13  ;;  %v6656_v13 = vld [vmem:[%s7919_s14 + $0x98] sm:$0xf0] }
  0x5e   : > { %v8144_v14 = vor.u32 %v7670_v12, %v6656_v13  ;;  %v7800_v13 = vld [vmem:[%s11546_s1 + $0xe8] sm:$0xff] }
  0x5f   : > { %1805 = vmatmul.bf16.gmra.mxu2 %v6607_v48  ;;  %2770 = vmatpush.bf16.msrb.mxu1 %v7800_v13  ;;  %v7679_v13 = vld [vmem:[%s7919_s14 + $0xd4] sm:$0xf0] }
  0x64   : > { %6872 = vmatmul.msk.bf16.gmra.mxu1 %vm1183_vm2, %v670_v21  ;;  %6949 = vmatmul.msk.bf16.gmra.mxu3 %vm1183_vm2, %v8011_v4  ;;  %v6631_v4 = vor.u32 %v7665_v33, %v6630_v28  ;;  %v7813_v21 = vld [vmem:[%s11546_s1 + $0x154] sm:$0xff]  ;;  %v7672_v28 = vld [vmem:[%s7919_s14 + $0xa4] sm:$0xf]  ;;  %v6664_v33 = vld [vmem:[%s7919_s14 + $0xa8] sm:$0xf0] }
  0x65   : > { %3944 = vmatpush.bf16.msrb.mxu0 %v7813_v21  ;;  %v8160_v34 = vor.u32 %v7672_v28, %v6664_v33 }
  0x66   : > { %v675_v40 = vshll.u32 %v6631_v4, 16  ;;  %v687_v52 = vshrl.u32 %v6631_v4, 16 }
  0x67   : > { %v747_v41 = vshll.u32 %v8160_v34, 16  ;;  %v759_v3 = vshrl.u32 %v8160_v34, 16 }
  0x68   : > { %v677_v45 = vrot.slane %v675_v40, 1  ;;  %v743_v40 = vshrl.u32 %v8144_v14, 16 }
  0x6a   : > { %v678_v48 = vsel %vm582_vm1, %v673_v44, %v677_v45  ;;  %v689_v62 = vor.u32 %v687_v52, %v677_v45 }
  0x6c   : > { %v694_v1 = vsel %vm582_vm1, %v689_v62, %v693_v15  ;;  %v8180_v62 = vor.u32 %v7674_v58, %v6672_v59  ;;  %v767_v58 = vshrl.u32 %v8190_v16, 16 }
  0x6d   : > { %1309 = vmatmul.bf16.gmra.mxu0 %v662_v32  ;;  %v723_v32 = vshll.u32 %v6655_v27, 16 }
  0x6f   : > { %1810 = vmatmul.bf16.gmra.mxu2 %v6615_v0  ;;  %v715_v0 = vshll.u32 %v8128_v61, 16 }
  0x71   : > { %v717_v6 = vrot.slane %v715_v0, 1 }
  0x74   : > { %6873 = vmatmul.msk.bf16.gmra.mxu1 %vm1183_vm2, %v686_v37  ;;  %6950 = vmatmul.msk.bf16.gmra.mxu3 %vm1183_vm2, %v8050_v38  ;;  %v702_v38 = vsel %vm582_vm1, %v697_v51, %v701_v53 }
  0x7d   : > { %1314 = vmatmul.bf16.gmra.mxu0 %v678_v48  ;;  %v749_v48 = vrot.slane %v747_v41, 1 }
  0x7f   : > { %1815 = vmatmul.bf16.gmra.mxu2 %v6623_v18  ;;  %v731_v18 = vshll.u32 %v8144_v14, 16 }
  0x81   : > { %v733_v25 = vrot.slane %v731_v18, 1 }
  0x84   : > { %6874 = vmatmul.msk.bf16.gmra.mxu1 %vm1183_vm2, %v702_v38  ;;  %6951 = vmatmul.msk.bf16.gmra.mxu3 %vm1183_vm2, %v8067_v55  ;;  %v711_v55 = vshrl.u32 %v8109_v43, 16 }
  0x86   : > { %v713_v5 = vor.u32 %v711_v55, %v701_v53 }
  0x88   : > { %v718_v9 = vsel %vm582_vm1, %v713_v5, %v717_v6  ;;  %v763_v5 = vshll.u32 %v8180_v62, 16 }
  0x8a   : > { %v765_v12 = vrot.slane %v763_v5, 1 }
  0x8d   : > { %1319 = vmatmul.bf16.gmra.mxu0 %v694_v1 }
  0x8f   : > { %1820 = vmatmul.bf16.gmra.mxu2 %v6631_v4  ;;  %v725_v4 = vrot.slane %v723_v32, 1 }
  0x91   : > { %v726_v44 = vsel %vm582_vm1, %v721_v35, %v725_v4  ;;  %v737_v15 = vor.u32 %v735_v56, %v725_v4 }
  0x94   : > { %6875 = vmatmul.msk.bf16.gmra.mxu1 %vm1183_vm2, %v718_v9  ;;  %6952 = vmatmul.msk.bf16.gmra.mxu3 %vm1183_vm2, %v8083_v8  ;;  %v729_v8 = vor.u32 %v727_v17, %v717_v6 }
  0x96   : > { %v734_v30 = vsel %vm582_vm1, %v729_v8, %v733_v25  ;;  %v755_v8 = vshll.u32 %v8190_v16, 16 }
  0x98   : > { %v757_v32 = vrot.slane %v755_v8, 1 }
  0x9d   : > { %1324 = vmatmul.bf16.gmra.mxu0 %v710_v22 }
  0x9f   : > { %1825 = vmatmul.bf16.gmra.mxu2 %v6639_v54 }
  0xa1   : > { %v1452_v29 = vpop.f32.mrf.mxu1 }
  0xa4   : > { %6876 = vmatmul.msk.bf16.gmra.mxu1 %vm1183_vm2, %v734_v30  ;;  %6953 = vmatmul.msk.bf16.gmra.mxu3 %vm1183_vm2, %v8096_v26  ;;  %v745_v26 = vor.u32 %v743_v40, %v733_v25  ;;  %v7676_v25 = vld [vmem:[%s7919_s14 + $0xc4] sm:$0xf]  ;;  %v775_v40 = vshrl.u32 %v8180_v62, 16 }
  0xa6   : > { %v750_v38 = vsel %vm582_vm1, %v745_v26, %v749_v48  ;;  %v777_v47 = vor.u32 %v775_v40, %v765_v12 }
  0xa7   : > { %v8162_v37 = vpop.f32.mrf.mxu3 }
  0xa9   : > { %v1454_v39 = vpop.f32.mrf.mxu1 }
  0xaa   : > { %v1290_v42 = vpop.f32.mrf.mxu0 }
  0xab   : > { %v1453_v45 = vadd.f32 %v1452_v29, %v1290_v42 }
  0xad   : > { %1329 = vmatmul.bf16.gmra.mxu0 %v726_v44  ;;  %v758_v44 = vsel %vm582_vm1, %v753_v31, %v757_v32 }
  0xaf   : > { %1830 = vmatmul.bf16.gmra.mxu2 %v6647_v7  ;;  %v8171_v50 = vpop.f32.mrf.mxu3  ;;  %v742_v7 = vsel %vm582_vm1, %v737_v15, %v741_v63  ;;  %v6688_v15 = vld [vmem:[%s7919_s14 + $0xd8] sm:$0xf0]  ;;  %v7812_v63 = vld [vmem:[%s11546_s1 + $0x14c] sm:$0xff] }
  0xb0   : > { %3945 = vmatpush.bf16.msrb.mxu0 %v7812_v63 }
  0xb1   : > { %v1457_v54 = vpop.f32.mrf.mxu1 }
  0xb2   : > { %v1791_v51 = vpop.f32.mrf.mxu2  ;;  %v1292_v52 = vpop.f32.mrf.mxu0 }
  0xb3   : > { %v1792_v53 = vadd.f32 %v1791_v51, %v1453_v45  ;;  %v1455_v60 = vadd.f32 %v1454_v39, %v1292_v52 }
  0xb4   : > { %6877 = vmatmul.msk.bf16.gmra.mxu1 %vm1183_vm2, %v750_v38  ;;  %6954 = vmatmul.msk.bf16.gmra.mxu3 %vm1183_vm2, %v8109_v43  ;;  %v761_v43 = vor.u32 %v759_v3, %v749_v48 }
  0xb6   : > { %v766_v22 = vsel %vm582_vm1, %v761_v43, %v765_v12  ;;  %v6686_v12 = vld [vmem:[%s7919_s14 + $0xd0] sm:$0xf] }
  0xb7   : > { %v1602_v55 = vpop.f32.mrf.mxu3 }
  0xb9   : > { %v1459_v2 = vpop.f32.mrf.mxu1 }
  0xba   : > { %v1793_v0 = vpop.f32.mrf.mxu2  ;;  %v1295_v6 = vpop.f32.mrf.mxu0 }
  0xbb   : > { %v1794_v1 = vadd.f32 %v1793_v0, %v1455_v60  ;;  %v1458_v9 = vadd.f32 %v1457_v54, %v1295_v6  ;;  %v7678_v60 = vld [vmem:[%s7919_s14 + $0xd4] sm:$0xf]  ;;  %v769_v0 = vor.u32 %v767_v58, %v757_v32  ;;  %v7680_v32 = vld [vmem:[%s7919_s14 + $0xe4] sm:$0xf] }
  0xbc   : > { %v8225_v55 = vor.u32 %v7678_v60, %v6688_v15 }
  0xbd   : > { %1334 = vmatmul.bf16.gmra.mxu0 %v742_v7 }
  0xbf   : > { %1835 = vmatmul.bf16.gmra.mxu2 %v6655_v27  ;;  %v1603_v20 = vpop.f32.mrf.mxu3  ;;  %v6680_v27 = vld [vmem:[%s7919_s14 + $0xc8] sm:$0xf0] }
  0xc0   : > { %v8200_v30 = vor.u32 %v7676_v25, %v6680_v27 }
  0xc1   : > { %v1462_v21 = vpop.f32.mrf.mxu1 }
  0xc2   : > { %v1796_v17 = vpop.f32.mrf.mxu2  ;;  %v1297_v23 = vpop.f32.mrf.mxu0  ;;  %v779_v41 = vshll.u32 %v8200_v30, 16 }
  0xc3   : > { %v1797_v18 = vadd.f32 %v1796_v17, %v1458_v9  ;;  %v1460_v29 = vadd.f32 %v1459_v2, %v1297_v23  ;;  %v791_v9 = vshrl.u32 %v8200_v30, 16 }
  0xc4   : > { %6878 = vmatmul.msk.bf16.gmra.mxu1 %vm1183_vm2, %v766_v22  ;;  %6955 = vmatmul.msk.bf16.gmra.mxu3 %vm1183_vm2, %v8128_v61  ;;  %v7677_v61 = vld [vmem:[%s7919_s14 + $0xc4] sm:$0xf0]  ;;  %v781_v26 = vrot.slane %v779_v41, 1 }
  0xc5   : > { %v8210_v48 = vor.u32 %v7677_v61, %v6678_v46  ;;  %v807_v61 = vshrl.u32 %v8225_v55, 16 }
  0xc6   : > { %v782_v56 = vsel %vm582_vm1, %v777_v47, %v781_v26  ;;  %v793_v20 = vor.u32 %v791_v9, %v781_v26 }
  0xc7   : > { %v1953_v28 = vpop.f32.mrf.mxu3  ;;  %v771_v59 = vshll.u32 %v8210_v48, 16 }
  0xc8   : > { %v8202_v33 = vadd.f32 %v1953_v28, %v1792_v53  ;;  %v6696_v28 = vld [vmem:[%s7919_s14 + $0xe8] sm:$0xf0] }
  0xc9   : > { %v1464_v39 = vpop.f32.mrf.mxu1 }
  0xca   : > { %v1798_v35 = vpop.f32.mrf.mxu2  ;;  %v1300_v42 = vpop.f32.mrf.mxu0 }
  0xcb   : > { %v1799_v4 = vadd.f32 %v1798_v35, %v1460_v29  ;;  %v1463_v45 = vadd.f32 %v1462_v21, %v1300_v42  ;;  %v783_v29 = vshrl.u32 %v8210_v48, 16  ;;  %v8247_v35 = vor.u32 %v7680_v32, %v6696_v28 }
  0xcd   : > { %1339 = vmatmul.bf16.gmra.mxu0 %v758_v44  ;;  %v7818_v44 = vld [vmem:[%s11546_s1 + $0x17c] sm:$0xff] }
  0xce   : > { %4109 = vmatpush.bf16.msrb.mxu2 %v7818_v44 }
  0xcf   : > { %1840 = vmatmul.bf16.gmra.mxu2 %v8169_v49  ;;  %v1955_v51 = vpop.f32.mrf.mxu3 }
  0xd0   : > { %v8212_v53 = vadd.f32 %v1955_v51, %v1794_v1  ;;  %v773_v1 = vrot.slane %v771_v59, 1 }
  0xd1   : > { %v1467_v52 = vpop.f32.mrf.mxu1 }
  0xd2   : > { %v1801_v54 = vpop.f32.mrf.mxu2  ;;  %v1302_v57 = vpop.f32.mrf.mxu0  ;;  %v774_v11 = vsel %vm582_vm1, %v769_v0, %v773_v1 }
  0xd3   : > { %v1802_v38 = vadd.f32 %v1801_v54, %v1463_v45  ;;  %v1465_v49 = vadd.f32 %v1464_v39, %v1302_v57  ;;  %v6694_v54 = vld [vmem:[%s7919_s14 + $0xe0] sm:$0xf] }
  0xd4   : > { %6879 = vmatmul.msk.bf16.gmra.mxu1 %vm1183_vm2, %v782_v56  ;;  %6956 = vmatmul.msk.bf16.gmra.mxu3 %vm1183_vm2, %v8144_v14  ;;  %v795_v14 = vshll.u32 %v8225_v55, 16 }
  0xd6   : > { %v797_v17 = vrot.slane %v795_v14, 1 }
  0xd7   : > { %v1958_v2 = vpop.f32.mrf.mxu3 }
  0xd8   : > { %v8227_v3 = vadd.f32 %v1958_v2, %v1797_v18  ;;  %v8235_v18 = vor.u32 %v7679_v13, %v6686_v12  ;;  %v798_v25 = vsel %vm582_vm1, %v793_v20, %v797_v17  ;;  %v809_v56 = vor.u32 %v807_v61, %v797_v17 }
  0xd9   : > { %v1469_v7 = vpop.f32.mrf.mxu1  ;;  %v823_v17 = vshrl.u32 %v8247_v35, 16 }
  0xda   : > { %v1803_v5 = vpop.f32.mrf.mxu2  ;;  %v1305_v10 = vpop.f32.mrf.mxu0  ;;  %v787_v31 = vshll.u32 %v8235_v18, 16  ;;  %v799_v2 = vshrl.u32 %v8235_v18, 16 }
  0xdb   : > { %v1804_v6 = vadd.f32 %v1803_v5, %v1465_v49  ;;  %v1468_v43 = vadd.f32 %v1467_v52, %v1305_v10  ;;  %v7681_v52 = vld [vmem:[%s7919_s14 + $0xe4] sm:$0xf0] }
  0xdc   : > { %v789_v39 = vrot.slane %v787_v31, 1  ;;  %v8263_v58 = vor.u32 %v7681_v52, %v6694_v54 }
  0xdd   : > { %1344 = vmatmul.bf16.gmra.mxu0 %v774_v11 }
  0xde   : > { %v803_v5 = vshll.u32 %v8263_v58, 16  ;;  %v801_v14 = vor.u32 %v799_v2, %v789_v39  ;;  %v6710_v2 = vld [vmem:[%s7919_s14 + $0x100] sm:$0xf] }
  0xdf   : > { %1845 = vmatmul.bf16.gmra.mxu2 %v8190_v16  ;;  %v1960_v21 = vpop.f32.mrf.mxu3 }
  0xe0   : > { %v8237_v22 = vadd.f32 %v1960_v21, %v1799_v4  ;;  %v785_v4 = vor.u32 %v783_v29, %v773_v1  ;;  %v805_v10 = vrot.slane %v803_v5, 1  ;;  %v7683_v29 = vld [vmem:[%s7919_s14 + $0xf4] sm:$0xf0] }
  0xe1   : > { %v1472_v8 = vpop.f32.mrf.mxu1 }
  0xe2   : > { %v1806_v23 = vpop.f32.mrf.mxu2  ;;  %v1307_v27 = vpop.f32.mrf.mxu0  ;;  %v790_v26 = vsel %vm582_vm1, %v785_v4, %v789_v39 }
  0xe3   : > { %v1807_v24 = vadd.f32 %v1806_v23, %v1468_v43  ;;  %v1470_v16 = vadd.f32 %v1469_v7, %v1307_v27  ;;  %v7682_v7 = vld [vmem:[%s7919_s14 + $0xf4] sm:$0xf]  ;;  %v7799_v23 = vld [vmem:[%s11546_s1 + $0xe0] sm:$0xff]  ;;  %v6702_v27 = vld [vmem:[%s7919_s14 + $0xf0] sm:$0xf] }
  0xe4   : > { %6880 = vmatmul.msk.bf16.gmra.mxu1 %vm1183_vm2, %v798_v25  ;;  %6957 = vmatmul.msk.bf16.gmra.mxu3 %vm1183_vm2, %v8160_v34  ;;  %v811_v34 = vshll.u32 %v8247_v35, 16  ;;  %v8288_v32 = vor.u32 %v7683_v29, %v6702_v27 }
  0xe5   : > { %2771 = vmatpush.bf16.msrb.mxu1 %v7799_v23  ;;  %v7686_v23 = vld [vmem:[%s7919_s14 + $0x114] sm:$0xf] }
  0xe6   : > { %v813_v57 = vrot.slane %v811_v34, 1  ;;  %v819_v61 = vshll.u32 %v8288_v32, 16  ;;  %v7684_v34 = vld [vmem:[%s7919_s14 + $0x104] sm:$0xf] }
  0xe7   : > { %v1963_v40 = vpop.f32.mrf.mxu3 }
  0xe8   : > { %v8249_v41 = vadd.f32 %v1963_v40, %v1802_v38  ;;  %v7806_v38 = vld [vmem:[%s11546_s1 + $0x118] sm:$0xff]  ;;  %v814_v0 = vsel %vm582_vm1, %v809_v56, %v813_v57 }
  0xe9   : > { %v1474_v46 = vpop.f32.mrf.mxu1  ;;  %2934 = vmatpush.bf16.msra.mxu3 %v7806_v38 }
  0xea   : > { %v1808_v42 = vpop.f32.mrf.mxu2  ;;  %v1310_v47 = vpop.f32.mrf.mxu0 }
  0xeb   : > { %v1809_v45 = vadd.f32 %v1808_v42, %v1470_v16  ;;  %v1473_v51 = vadd.f32 %v1472_v8, %v1310_v47  ;;  %v806_v8 = vsel %vm582_vm1, %v801_v14, %v805_v10  ;;  %v6712_v47 = vld [vmem:[%s7919_s14 + $0x108] sm:$0xf0] }
  0xed   : > { %1349 = vmatmul.bf16.gmra.mxu0 %v790_v26 }
  0xef   : > { %1850 = vmatmul.bf16.gmra.mxu2 %v8210_v48  ;;  %v1965_v59 = vpop.f32.mrf.mxu3  ;;  %v6704_v48 = vld [vmem:[%s7919_s14 + $0xf8] sm:$0xf0] }
  0xf0   : > { %v8265_v60 = vadd.f32 %v1965_v59, %v1804_v6  ;;  %v8275_v6 = vor.u32 %v7682_v7, %v6704_v48 }
  0xf1   : > { %v1477_v63 = vpop.f32.mrf.mxu1 }
  0xf2   : > { %v1811_v15 = vpop.f32.mrf.mxu2  ;;  %v1312_v1 = vpop.f32.mrf.mxu0  ;;  %v827_v21 = vshll.u32 %v8275_v6, 16  ;;  %v839_v59 = vshrl.u32 %v8275_v6, 16 }
  0xf3   : > { %v1812_v49 = vadd.f32 %v1811_v15, %v1473_v51  ;;  %v1475_v9 = vadd.f32 %v1474_v46, %v1312_v1  ;;  %v815_v46 = vshrl.u32 %v8263_v58, 16  ;;  %v821_v51 = vrot.slane %v819_v61, 1  ;;  %v6718_v61 = vld [vmem:[%s7919_s14 + $0x110] sm:$0xf] }
  0xf4   : > { %6881 = vmatmul.msk.bf16.gmra.mxu1 %vm1183_vm2, %v814_v0  ;;  %6958 = vmatmul.msk.bf16.gmra.mxu3 %vm1183_vm2, %v8180_v62  ;;  %v829_v31 = vrot.slane %v827_v21, 1 }
  0xf5   : > { %v817_v26 = vor.u32 %v815_v46, %v805_v10 }
  0xf7   : > { %v1968_v11 = vpop.f32.mrf.mxu3  ;;  %v822_v0 = vsel %vm582_vm1, %v817_v26, %v821_v51 }
  0xf8   : > { %v8277_v43 = vadd.f32 %v1968_v11, %v1807_v24  ;;  %v825_v24 = vor.u32 %v823_v17, %v813_v57  ;;  %v831_v17 = vshrl.u32 %v8288_v32, 16 }
  0xf9   : > { %v1479_v20 = vpop.f32.mrf.mxu1 }
  0xfa   : > { %v1813_v12 = vpop.f32.mrf.mxu2  ;;  %v1315_v62 = vpop.f32.mrf.mxu0  ;;  %v830_v42 = vsel %vm582_vm1, %v825_v24, %v829_v31 }
  0xfb   : > { %v1814_v13 = vadd.f32 %v1813_v12, %v1475_v9  ;;  %v1478_v25 = vadd.f32 %v1477_v63, %v1315_v62  ;;  %v6720_v62 = vld [vmem:[%s7919_s14 + $0x118] sm:$0xf0] }
  0xfd   : > { %1354 = vmatmul.bf16.gmra.mxu0 %v806_v8  ;;  %v8325_v8 = vor.u32 %v7686_v23, %v6720_v62 }
  0xff   : > { %1855 = vmatmul.bf16.gmra.mxu2 %v8235_v18  ;;  %v1970_v28 = vpop.f32.mrf.mxu3 }
 0x100   : > { %v8290_v16 = vadd.f32 %v1970_v28, %v1809_v45  ;;  %v8300_v45 = vor.u32 %v7684_v34, %v6712_v47  ;;  %v7687_v34 = vld [vmem:[%s7919_s14 + $0x114] sm:$0xf0] }
 0x101   : > { %v1482_v40 = vpop.f32.mrf.mxu1 }
 0x102   : > { %v1816_v4 = vpop.f32.mrf.mxu2  ;;  %v1317_v44 = vpop.f32.mrf.mxu0  ;;  %v843_v15 = vshll.u32 %v8300_v45, 16 }
 0x103   : > { %v1817_v39 = vadd.f32 %v1816_v4, %v1478_v25  ;;  %v1480_v18 = vadd.f32 %v1479_v20, %v1317_v44  ;;  %v833_v25 = vor.u32 %v831_v17, %v821_v51 }
 0x104   : > { %6882 = vmatmul.msk.bf16.gmra.mxu1 %vm1183_vm2, %v830_v42  ;;  %6959 = vmatmul.msk.bf16.gmra.mxu3 %vm1183_vm2, %v8200_v30  ;;  %v7685_v30 = vld [vmem:[%s7919_s14 + $0x104] sm:$0xf0]  ;;  %v845_v5 = vrot.slane %v843_v15, 1 }
 0x105   : > { %v8310_v7 = vor.u32 %v7685_v30, %v6710_v2  ;;  %v6728_v2 = vld [vmem:[%s7919_s14 + $0x128] sm:$0xf0] }
 0x107   : > { %v1973_v54 = vpop.f32.mrf.mxu3  ;;  %v835_v21 = vshll.u32 %v8310_v7, 16 }
 0x108   : > { %v8302_v52 = vadd.f32 %v1973_v54, %v1812_v49  ;;  %v841_v49 = vor.u32 %v839_v59, %v829_v31 }
 0x109   : > { %v1484_v57 = vpop.f32.mrf.mxu1  ;;  %v837_v27 = vrot.slane %v835_v21, 1 }
 0x10a   : > { %v1818_v38 = vpop.f32.mrf.mxu2  ;;  %v1320_v63 = vpop.f32.mrf.mxu0  ;;  %v846_v12 = vsel %vm582_vm1, %v841_v49, %v845_v5 }
 0x10b   : > { %v1819_v56 = vadd.f32 %v1818_v38, %v1480_v18  ;;  %v1483_v1 = vadd.f32 %v1482_v40, %v1320_v63  ;;  %v855_v40 = vshrl.u32 %v8300_v45, 16  ;;  %v838_v44 = vsel %vm582_vm1, %v833_v25, %v837_v27 }
 0x10c   : > { %v8335_v18 = vor.u32 %v7687_v34, %v6718_v61  ;;  %v847_v63 = vshrl.u32 %v8310_v7, 16  ;;  %v7690_v61 = vld [vmem:[%s7919_s14 + $0x134] sm:$0xf]  ;;  %v6736_v34 = vld [vmem:[%s7919_s14 + $0x138] sm:$0xf0] }
 0x10d   : > { %1359 = vmatmul.bf16.gmra.mxu0 %v822_v0 }
 0x10e   : > { %v851_v0 = vshll.u32 %v8335_v18, 16  ;;  %v849_v30 = vor.u32 %v847_v63, %v837_v27 }
 0x10f   : > { %1860 = vmatmul.bf16.gmra.mxu2 %v8263_v58  ;;  %v1975_v48 = vpop.f32.mrf.mxu3 }
 0x110   : > { %v8312_v9 = vadd.f32 %v1975_v48, %v1814_v13  ;;  %v7811_v13 = vld [vmem:[%s11546_s1 + $0x144] sm:$0xff]  ;;  %v853_v49 = vrot.slane %v851_v0, 1 }
 0x111   : > { %v1487_v11 = vpop.f32.mrf.mxu1  ;;  %3946 = vmatpush.bf16.msrb.mxu0 %v7811_v13 }
 0x112   : > { %v1821_v14 = vpop.f32.mrf.mxu2  ;;  %v1322_v20 = vpop.f32.mrf.mxu0  ;;  %v854_v23 = vsel %vm582_vm1, %v849_v30, %v853_v49  ;;  %v6734_v30 = vld [vmem:[%s7919_s14 + $0x130] sm:$0xf] }
 0x113   : > { %v1822_v10 = vadd.f32 %v1821_v14, %v1483_v1  ;;  %v1485_v58 = vadd.f32 %v1484_v57, %v1322_v20  ;;  %v7688_v1 = vld [vmem:[%s7919_s14 + $0x124] sm:$0xf]  ;;  %v871_v20 = vshrl.u32 %v8325_v8, 16 }
 0x114   : > { %6883 = vmatmul.msk.bf16.gmra.mxu1 %vm1183_vm2, %v846_v12  ;;  %6960 = vmatmul.msk.bf16.gmra.mxu3 %vm1183_vm2, %v8225_v55  ;;  %v859_v55 = vshll.u32 %v8325_v8, 16 }
 0x116   : > { %v861_v47 = vrot.slane %v859_v55, 1 }
 0x117   : > { %v1978_v29 = vpop.f32.mrf.mxu3 }
 0x118   : > { %v8327_v24 = vadd.f32 %v1978_v29, %v1817_v39  ;;  %v857_v39 = vor.u32 %v855_v40, %v845_v5 }
 0x119   : > { %v1489_v4 = vpop.f32.mrf.mxu1 }
 0x11a   : > { %v1823_v31 = vpop.f32.mrf.mxu2  ;;  %v1325_v42 = vpop.f32.mrf.mxu0  ;;  %v862_v59 = vsel %vm582_vm1, %v857_v39, %v861_v47  ;;  %v7798_v39 = vld [vmem:[%s11546_s1 + $0xd8] sm:$0xff] }
 0x11b   : > { %v1824_v28 = vadd.f32 %v1823_v31, %v1485_v58  ;;  %v1488_v46 = vadd.f32 %v1487_v11, %v1325_v42  ;;  %v6726_v58 = vld [vmem:[%s7919_s14 + $0x120] sm:$0xf]  ;;  %2772 = vmatpush.bf16.msrb.mxu1 %v7798_v39 }
 0x11d   : > { %1364 = vmatmul.bf16.gmra.mxu0 %v838_v44  ;;  %v863_v44 = vshrl.u32 %v8335_v18, 16 }
 0x11f   : > { %1865 = vmatmul.bf16.gmra.mxu2 %v8288_v32  ;;  %v1980_v26 = vpop.f32.mrf.mxu3 }
 0x120   : > { %v8337_v51 = vadd.f32 %v1980_v26, %v1819_v56  ;;  %v8347_v56 = vor.u32 %v7688_v1, %v6728_v2 }
 0x121   : > { %v1492_v57 = vpop.f32.mrf.mxu1 }
 0x122   : > { %v1826_v54 = vpop.f32.mrf.mxu2  ;;  %v1327_v15 = vpop.f32.mrf.mxu0  ;;  %v875_v17 = vshll.u32 %v8347_v56, 16  ;;  %v887_v0 = vshrl.u32 %v8347_v56, 16 }
 0x123   : > { %v1827_v38 = vadd.f32 %v1826_v54, %v1488_v46  ;;  %v1490_v32 = vadd.f32 %v1489_v4, %v1327_v15 }
 0x124   : > { %6884 = vmatmul.msk.bf16.gmra.mxu1 %vm1183_vm2, %v862_v59  ;;  %6961 = vmatmul.msk.bf16.gmra.mxu3 %vm1183_vm2, %v8247_v35  ;;  %v7689_v35 = vld [vmem:[%s7919_s14 + $0x124] sm:$0xf0]  ;;  %v877_v13 = vrot.slane %v875_v17, 1 }
 0x125   : > { %v8357_v25 = vor.u32 %v7689_v35, %v6726_v58 }
 0x127   : > { %v1983_v5 = vpop.f32.mrf.mxu3  ;;  %v867_v46 = vshll.u32 %v8357_v25, 16  ;;  %v879_v35 = vshrl.u32 %v8357_v25, 16 }
 0x128   : > { %v8349_v48 = vadd.f32 %v1983_v5, %v1822_v10  ;;  %v873_v10 = vor.u32 %v871_v20, %v861_v47  ;;  %v865_v47 = vor.u32 %v863_v44, %v853_v49  ;;  %v7691_v5 = vld [vmem:[%s7919_s14 + $0x134] sm:$0xf0] }
 0x129   : > { %v1494_v12 = vpop.f32.mrf.mxu1  ;;  %v869_v26 = vrot.slane %v867_v46, 1 }
 0x12a   : > { %v1828_v14 = vpop.f32.mrf.mxu2  ;;  %v1330_v21 = vpop.f32.mrf.mxu0  ;;  %v878_v55 = vsel %vm582_vm1, %v873_v10, %v877_v13 }
 0x12b   : > { %v1829_v11 = vadd.f32 %v1828_v14, %v1490_v32  ;;  %v1493_v62 = vadd.f32 %v1492_v57, %v1330_v21  ;;  %v870_v32 = vsel %vm582_vm1, %v865_v47, %v869_v26  ;;  %v8382_v14 = vor.u32 %v7691_v5, %v6734_v30 }
 0x12d   : > { %1369 = vmatmul.bf16.gmra.mxu0 %v854_v23  ;;  %v883_v10 = vshll.u32 %v8382_v14, 16 }
 0x12f   : > { %1870 = vmatmul.bf16.gmra.mxu2 %v8310_v7  ;;  %v1985_v27 = vpop.f32.mrf.mxu3 }
 0x130   : > { %v8359_v29 = vadd.f32 %v1985_v27, %v1824_v28  ;;  %v8372_v28 = vor.u32 %v7690_v61, %v6736_v34  ;;  %v7692_v27 = vld [vmem:[%s7919_s14 + $0x144] sm:$0xf] }
 0x131   : > { %v1497_v40 = vpop.f32.mrf.mxu1 }
 0x132   : > { %v1831_v31 = vpop.f32.mrf.mxu2  ;;  %v1332_v42 = vpop.f32.mrf.mxu0  ;;  %v891_v1 = vshll.u32 %v8372_v28, 16  ;;  %v903_v34 = vshrl.u32 %v8372_v28, 16 }
 0x133   : > { %v1832_v4 = vadd.f32 %v1831_v31, %v1493_v62  ;;  %v1495_v7 = vadd.f32 %v1494_v12, %v1332_v42  ;;  %v6744_v31 = vld [vmem:[%s7919_s14 + $0x148] sm:$0xf0] }
 0x134   : > { %6885 = vmatmul.msk.bf16.gmra.mxu1 %vm1183_vm2, %v878_v55  ;;  %6962 = vmatmul.msk.bf16.gmra.mxu3 %vm1183_vm2, %v8275_v6  ;;  %v893_v49 = vrot.slane %v891_v1, 1 }
 0x137   : > { %v1988_v54 = vpop.f32.mrf.mxu3 }
 0x138   : > { %v8374_v57 = vadd.f32 %v1988_v54, %v1827_v38  ;;  %v889_v38 = vor.u32 %v887_v0, %v877_v13  ;;  %v881_v13 = vor.u32 %v879_v35, %v869_v26  ;;  %v7817_v26 = vld [vmem:[%s11546_s1 + $0x174] sm:$0xff] }
 0x139   : > { %v1499_v63 = vpop.f32.mrf.mxu1  ;;  %v7805_v0 = vld [vmem:[%s11546_s1 + $0x110] sm:$0xff]  ;;  %4110 = vmatpush.bf16.msrb.mxu2 %v7817_v26 }
 0x13a   : > { %v1833_v59 = vpop.f32.mrf.mxu2  ;;  %v1335_v2 = vpop.f32.mrf.mxu0  ;;  %v894_v62 = vsel %vm582_vm1, %v889_v38, %v893_v49  ;;  %2935 = vmatpush.bf16.msra.mxu3 %v7805_v0 }
 0x13b   : > { %v1834_v15 = vadd.f32 %v1833_v59, %v1495_v7  ;;  %v1498_v6 = vadd.f32 %v1497_v40, %v1335_v2  ;;  %v885_v40 = vrot.slane %v883_v10, 1  ;;  %v6742_v59 = vld [vmem:[%s7919_s14 + $0x140] sm:$0xf] }
 0x13d   : > { %1374 = vmatmul.bf16.gmra.mxu0 %v870_v32  ;;  %v886_v47 = vsel %vm582_vm1, %v881_v13, %v885_v40 }
 0x13f   : > { %1875 = vmatmul.bf16.gmra.mxu2 %v8335_v18  ;;  %v1990_v12 = vpop.f32.mrf.mxu3 }
 0x140   : > { %v8384_v20 = vadd.f32 %v1990_v12, %v1829_v11  ;;  %v8394_v11 = vor.u32 %v7692_v27, %v6744_v31 }
 0x141   : > { %v1502_v23 = vpop.f32.mrf.mxu1 }
 0x142   : > { %v1836_v17 = vpop.f32.mrf.mxu2  ;;  %v1337_v58 = vpop.f32.mrf.mxu0  ;;  %v907_v7 = vshll.u32 %v8394_v11, 16 }
 0x143   : > { %v1837_v21 = vadd.f32 %v1836_v17, %v1498_v6  ;;  %v1500_v18 = vadd.f32 %v1499_v63, %v1337_v58  ;;  %v7694_v17 = vld [vmem:[%s7919_s14 + $0x154] sm:$0xf]  ;;  %v7810_v58 = vld [vmem:[%s11546_s1 + $0x13c] sm:$0xff] }
 0x144   : > { %6886 = vmatmul.msk.bf16.gmra.mxu1 %vm1183_vm2, %v894_v62  ;;  %6963 = vmatmul.msk.bf16.gmra.mxu3 %vm1183_vm2, %v8300_v45  ;;  %v7693_v45 = vld [vmem:[%s7919_s14 + $0x144] sm:$0xf0]  ;;  %v909_v63 = vrot.slane %v907_v7, 1 }
 0x145   : > { %v8410_v1 = vor.u32 %v7693_v45, %v6742_v59  ;;  %3947 = vmatpush.bf16.msrb.mxu0 %v7810_v58 }
 0x147   : > { %v1993_v55 = vpop.f32.mrf.mxu3  ;;  %v899_v12 = vshll.u32 %v8410_v1, 16 }
 0x148   : > { %v8396_v42 = vadd.f32 %v1993_v55, %v1832_v4  ;;  %v905_v4 = vor.u32 %v903_v34, %v893_v49  ;;  %v895_v49 = vshrl.u32 %v8382_v14, 16 }
 0x149   : > { %v1504_v61 = vpop.f32.mrf.mxu1  ;;  %v901_v10 = vrot.slane %v899_v12, 1 }
 0x14a   : > { %v1838_v44 = vpop.f32.mrf.mxu2  ;;  %v1340_v39 = vpop.f32.mrf.mxu0  ;;  %v897_v35 = vor.u32 %v895_v49, %v885_v40  ;;  %v6760_v49 = vld [vmem:[%s7919_s14 + $0x168] sm:$0xf0] }
 0x14b   : > { %v1839_v46 = vadd.f32 %v1838_v44, %v1500_v18  ;;  %v1503_v54 = vadd.f32 %v1502_v23, %v1340_v39  ;;  %v6752_v23 = vld [vmem:[%s7919_s14 + $0x158] sm:$0xf0]  ;;  %v919_v44 = vshrl.u32 %v8394_v11, 16  ;;  %v6750_v39 = vld [vmem:[%s7919_s14 + $0x150] sm:$0xf] }
 0x14c   : > { %v902_v7 = vsel %vm582_vm1, %v897_v35, %v901_v10 }
 0x14d   : > { %1379 = vmatmul.bf16.gmra.mxu0 %v886_v47  ;;  %v7695_v47 = vld [vmem:[%s7919_s14 + $0x154] sm:$0xf0] }
 0x14f   : > { %1880 = vmatmul.bf16.gmra.mxu2 %v8357_v25  ;;  %v1995_v2 = vpop.f32.mrf.mxu3  ;;  %v910_v25 = vsel %vm582_vm1, %v905_v4, %v909_v63 }
 0x150   : > { %v8412_v32 = vadd.f32 %v1995_v2, %v1834_v15  ;;  %v8425_v15 = vor.u32 %v7694_v17, %v6752_v23 }
 0x151   : > { %v1507_v5 = vpop.f32.mrf.mxu1 }
 0x152   : > { %v1841_v6 = vpop.f32.mrf.mxu2  ;;  %v1342_v38 = vpop.f32.mrf.mxu0 }
 0x153   : > { %v1842_v30 = vadd.f32 %v1841_v6, %v1503_v54  ;;  %v1505_v62 = vadd.f32 %v1504_v61, %v1342_v38  ;;  %v923_v61 = vshll.u32 %v8425_v15, 16  ;;  %v8435_v54 = vor.u32 %v7695_v47, %v6750_v39  ;;  %v7696_v38 = vld [vmem:[%s7919_s14 + $0x164] sm:$0xf] }
 0x154   : > { %6887 = vmatmul.msk.bf16.gmra.mxu1 %vm1183_vm2, %v910_v25  ;;  %6964 = vmatmul.msk.bf16.gmra.mxu3 %vm1183_vm2, %v8325_v8 }
 0x155   : > { %v925_v40 = vrot.slane %v923_v61, 1  ;;  %v915_v25 = vshll.u32 %v8435_v54, 16 }
 0x157   : > { %v1998_v27 = vpop.f32.mrf.mxu3  ;;  %v917_v12 = vrot.slane %v915_v25, 1  ;;  %v7698_v25 = vld [vmem:[%s7919_s14 + $0x174] sm:$0xf] }
 0x158   : > { %v8427_v31 = vadd.f32 %v1998_v27, %v1837_v21  ;;  %v921_v21 = vor.u32 %v919_v44, %v909_v63  ;;  %v935_v27 = vshrl.u32 %v8425_v15, 16 }
 0x159   : > { %v1509_v55 = vpop.f32.mrf.mxu1 }
 0x15a   : > { %11556 = vst [vmem:[#allocation3_spill] sm:$0xff] %v8427_v31  ;;  %v1843_v18 = vpop.f32.mrf.mxu2  ;;  %v1345_v34 = vpop.f32.mrf.mxu0  ;;  %v926_v2 = vsel %vm582_vm1, %v921_v21, %v925_v40 }
 0x15b   : > { %v1844_v13 = vadd.f32 %v1843_v18, %v1505_v62  ;;  %v1508_v8 = vadd.f32 %v1507_v5, %v1345_v34  ;;  %v911_v5 = vshrl.u32 %v8410_v1, 16  ;;  %v6758_v34 = vld [vmem:[%s7919_s14 + $0x160] sm:$0xf] }
 0x15d   : > { %1384 = vmatmul.bf16.gmra.mxu0 %v902_v7  ;;  %v913_v63 = vor.u32 %v911_v5, %v901_v10  ;;  %v7797_v10 = vld [vmem:[%s11546_s1 + $0xd0] sm:$0xff] }
 0x15e   : > { %2773 = vmatpush.bf16.msrb.mxu1 %v7797_v10 }
 0x15f   : > { %1885 = vmatmul.bf16.gmra.mxu2 %v8382_v14  ;;  %v2000_v59 = vpop.f32.mrf.mxu3  ;;  %v918_v44 = vsel %vm582_vm1, %v913_v63, %v917_v12 }
 0x160   : > { %v8437_v45 = vadd.f32 %v2000_v59, %v1839_v46  ;;  %v8447_v46 = vor.u32 %v7696_v38, %v6760_v49 }
 0x161   : > { %v1512_v0 = vpop.f32.mrf.mxu1 }
 0x162   : > { %11557 = vst [vmem:[#allocation4_spill] sm:$0xff] %v8437_v45  ;;  %v1846_v26 = vpop.f32.mrf.mxu2  ;;  %v1347_v6 = vpop.f32.mrf.mxu0  ;;  %v939_v18 = vshll.u32 %v8447_v46, 16 }
 0x163   : > { %v1847_v4 = vadd.f32 %v1846_v26, %v1508_v8  ;;  %v1510_v14 = vadd.f32 %v1509_v55, %v1347_v6  ;;  %v927_v6 = vshrl.u32 %v8435_v54, 16 }
 0x164   : > { %6888 = vmatmul.msk.bf16.gmra.mxu1 %vm1183_vm2, %v926_v2  ;;  %6965 = vmatmul.msk.bf16.gmra.mxu3 %vm1183_vm2, %v8347_v56  ;;  %v7697_v56 = vld [vmem:[%s7919_s14 + $0x164] sm:$0xf0]  ;;  %v941_v7 = vrot.slane %v939_v18, 1  ;;  %v951_v18 = vshrl.u32 %v8447_v46, 16 }
 0x165   : > { %v8460_v8 = vor.u32 %v7697_v56, %v6758_v34  ;;  %v929_v38 = vor.u32 %v927_v6, %v917_v12  ;;  %v6766_v34 = vld [vmem:[%s7919_s14 + $0x170] sm:$0xf] }
 0x167   : > { %v2003_v17 = vpop.f32.mrf.mxu3  ;;  %v931_v5 = vshll.u32 %v8460_v8, 16  ;;  %v943_v6 = vshrl.u32 %v8460_v8, 16 }
 0x168   : > { %v8449_v23 = vadd.f32 %v2003_v17, %v1842_v30  ;;  %v937_v30 = vor.u32 %v935_v27, %v925_v40 }
 0x169   : > { %v1514_v35 = vpop.f32.mrf.mxu1  ;;  %v933_v49 = vrot.slane %v931_v5, 1 }
 0x16a   : > { %11558 = vst [vmem:[#allocation5_spill] sm:$0xff] %v8449_v23  ;;  %v1848_v62 = vpop.f32.mrf.mxu2  ;;  %v1350_v55 = vpop.f32.mrf.mxu0  ;;  %v7762_v23 = vld [vmem:[%s7919_s14 + $0xe4] sm:$0xf] }
 0x16b   : > { %v1849_v58 = vadd.f32 %v1848_v62, %v1510_v14  ;;  %v1513_v61 = vadd.f32 %v1512_v0, %v1350_v55  ;;  %v942_v0 = vsel %vm582_vm1, %v937_v30, %v941_v7 }
 0x16d   : > { %1389 = vmatmul.bf16.gmra.mxu0 %v918_v44  ;;  %v934_v44 = vsel %vm582_vm1, %v929_v38, %v933_v49 }
 0x16f   : > { %1890 = vmatmul.bf16.gmra.mxu2 %v8410_v1  ;;  %v2005_v39 = vpop.f32.mrf.mxu3  ;;  %v6768_v1 = vld [vmem:[%s7919_s14 + $0x178] sm:$0xf0] }
 0x170   : > { %v8462_v47 = vadd.f32 %v2005_v39, %v1844_v13  ;;  %v8472_v13 = vor.u32 %v7698_v25, %v6768_v1  ;;  %v7700_v25 = vld [vmem:[%s7919_s14 + $0x184] sm:$0xf]  ;;  %v6776_v1 = vld [vmem:[%s7919_s14 + $0x188] sm:$0xf0] }
 0x171   : > { %v1517_v26 = vpop.f32.mrf.mxu1 }
 0x172   : > { %11559 = vst [vmem:[#allocation6_spill] sm:$0xff] %v8462_v47  ;;  %v1851_v21 = vpop.f32.mrf.mxu2  ;;  %v1352_v2 = vpop.f32.mrf.mxu0  ;;  %v7767_v47 = vld [vmem:[%s7919_s14 + $0x104] sm:$0xf0] }
 0x173   : > { %v1852_v59 = vadd.f32 %v1851_v21, %v1513_v61  ;;  %v1515_v40 = vadd.f32 %v1514_v35, %v1352_v2  ;;  %v955_v35 = vshll.u32 %v8472_v13, 16 }
 0x174   : > { %6889 = vmatmul.msk.bf16.gmra.mxu1 %vm1183_vm2, %v942_v0  ;;  %6966 = vmatmul.msk.bf16.gmra.mxu3 %vm1183_vm2, %v8372_v28  ;;  %v7699_v28 = vld [vmem:[%s7919_s14 + $0x174] sm:$0xf0] }
 0x175   : > { %v957_v12 = vrot.slane %v955_v35, 1  ;;  %v8482_v56 = vor.u32 %v7699_v28, %v6766_v34  ;;  %v6774_v28 = vld [vmem:[%s7919_s14 + $0x180] sm:$0xf] }
 0x177   : > { %v2008_v14 = vpop.f32.mrf.mxu3  ;;  %v947_v5 = vshll.u32 %v8482_v56, 16 }
 0x178   : > { %v8474_v63 = vadd.f32 %v2008_v14, %v1847_v4  ;;  %v953_v4 = vor.u32 %v951_v18, %v941_v7  ;;  %v945_v7 = vor.u32 %v943_v6, %v933_v49 }
 0x179   : > { %v1519_v27 = vpop.f32.mrf.mxu1 }
 0x17a   : > { %11560 = vst [vmem:[#allocation7_spill] sm:$0xff] %v8474_v63  ;;  %v1853_v17 = vpop.f32.mrf.mxu2  ;;  %v1355_v55 = vpop.f32.mrf.mxu0  ;;  %v958_v2 = vsel %vm582_vm1, %v953_v4, %v957_v12 }
 0x17b   : > { %v1854_v62 = vadd.f32 %v1853_v17, %v1515_v40  ;;  %v1518_v61 = vadd.f32 %v1517_v26, %v1355_v55  ;;  %v949_v40 = vrot.slane %v947_v5, 1  ;;  %v967_v55 = vshrl.u32 %v8472_v13, 16 }
 0x17d   : > { %1394 = vmatmul.bf16.gmra.mxu0 %v934_v44 }
 0x17f   : > { %1895 = vmatmul.bf16.gmra.mxu2 %v8435_v54  ;;  %v2010_v10 = vpop.f32.mrf.mxu3 }
 0x180   : > { %v8484_v30 = vadd.f32 %v2010_v10, %v1849_v58  ;;  %v8494_v58 = vor.u32 %v7700_v25, %v6776_v1  ;;  %v959_v1 = vshrl.u32 %v8482_v56, 16 }
 0x181   : > { %v1522_v0 = vpop.f32.mrf.mxu1 }
 0x182   : > { %11561 = vst [vmem:[#allocation8_spill] sm:$0xff] %v8484_v30  ;;  %v1856_v39 = vpop.f32.mrf.mxu2  ;;  %v1357_v26 = vpop.f32.mrf.mxu0  ;;  %v7103_v30 = vld [vmem:[%s7919_s14 + $0xd8] sm:$0xf0] }
 0x183   : > { %v1857_v21 = vadd.f32 %v1856_v39, %v1518_v61  ;;  %v1520_v54 = vadd.f32 %v1519_v27, %v1357_v26  ;;  %v971_v27 = vshll.u32 %v8494_v58, 16  ;;  %v950_v61 = vsel %vm582_vm1, %v945_v7, %v949_v40 }
 0x184   : > { %6890 = vmatmul.msk.bf16.gmra.mxu1 %vm1183_vm2, %v958_v2  ;;  %6967 = vmatmul.msk.bf16.gmra.mxu3 %vm1183_vm2, %v8394_v11  ;;  %v7701_v11 = vld [vmem:[%s7919_s14 + $0x184] sm:$0xf0] }
 0x185   : > { %v973_v49 = vrot.slane %v971_v27, 1  ;;  %v8504_v4 = vor.u32 %v7701_v11, %v6774_v28 }
 0x187   : > { %v2013_v38 = vpop.f32.mrf.mxu3 }
 0x188   : > { %v8496_v14 = vadd.f32 %v2013_v38, %v1852_v59  ;;  %v969_v59 = vor.u32 %v967_v55, %v957_v12  ;;  %v7702_v12 = vld [vmem:[%s7919_s14 + $0x194] sm:$0xf]  ;;  %v961_v38 = vor.u32 %v959_v1, %v949_v40 }
 0x189   : > { %v1524_v35 = vpop.f32.mrf.mxu1 }
 0x18a   : > { %11562 = vst [vmem:[#allocation9_spill] sm:$0xff] %v8496_v14  ;;  %v1858_v17 = vpop.f32.mrf.mxu2  ;;  %v1360_v44 = vpop.f32.mrf.mxu0  ;;  %v974_v5 = vsel %vm582_vm1, %v969_v59, %v973_v49  ;;  %v7760_v14 = vld [vmem:[%s7919_s14 + $0xd4] sm:$0xf] }
 0x18b   : > { %v1859_v18 = vadd.f32 %v1858_v17, %v1520_v54  ;;  %v1523_v34 = vadd.f32 %v1522_v0, %v1360_v44  ;;  %v7809_v0 = vld [vmem:[%s11546_s1 + $0x134] sm:$0xff]  ;;  %v6784_v54 = vld [vmem:[%s7919_s14 + $0x198] sm:$0xf0] }
 0x18c   : > { %3948 = vmatpush.bf16.msrb.mxu0 %v7809_v0 }
 0x18d   : > { %1399 = vmatmul.bf16.gmra.mxu0 %v950_v61 }
 0x18f   : > { %1900 = vmatmul.bf16.gmra.mxu2 %v8460_v8  ;;  %v2015_v10 = vpop.f32.mrf.mxu3  ;;  %v963_v8 = vshll.u32 %v8504_v4, 16 }
 0x190   : > { %v8506_v39 = vadd.f32 %v2015_v10, %v1854_v62  ;;  %v8519_v62 = vor.u32 %v7702_v12, %v6784_v54 }
 0x191   : > { %v1527_v6 = vpop.f32.mrf.mxu1  ;;  %v965_v17 = vrot.slane %v963_v8, 1 }
 0x192   : > { %11563 = vst [vmem:[#allocation10_spill] sm:$0xff] %v8506_v39  ;;  %v1861_v2 = vpop.f32.mrf.mxu2  ;;  %v1362_v25 = vpop.f32.mrf.mxu0  ;;  %v987_v28 = vshll.u32 %v8519_v62, 16 }
 0x193   : > { %v1862_v26 = vadd.f32 %v1861_v2, %v1523_v34  ;;  %v1525_v7 = vadd.f32 %v1524_v35, %v1362_v25  ;;  %v983_v35 = vshrl.u32 %v8494_v58, 16  ;;  %v966_v59 = vsel %vm582_vm1, %v961_v38, %v965_v17  ;;  %v6782_v2 = vld [vmem:[%s7919_s14 + $0x190] sm:$0xf] }
 0x194   : > { %6891 = vmatmul.msk.bf16.gmra.mxu1 %vm1183_vm2, %v974_v5  ;;  %6968 = vmatmul.msk.bf16.gmra.mxu3 %vm1183_vm2, %v8425_v15  ;;  %v7703_v15 = vld [vmem:[%s7919_s14 + $0x194] sm:$0xf0]  ;;  %v989_v40 = vrot.slane %v987_v28, 1 }
 0x195   : > { %v8529_v5 = vor.u32 %v7703_v15, %v6782_v2  ;;  %v999_v15 = vshrl.u32 %v8519_v62, 16 }
 0x197   : > { %v2018_v55 = vpop.f32.mrf.mxu3  ;;  %v979_v38 = vshll.u32 %v8529_v5, 16 }
 0x198   : > { %v8521_v27 = vadd.f32 %v2018_v55, %v1857_v21  ;;  %v985_v21 = vor.u32 %v983_v35, %v973_v49  ;;  %v7704_v55 = vld [vmem:[%s7919_s14 + $0x1a4] sm:$0xf] }
 0x199   : > { %v1529_v34 = vpop.f32.mrf.mxu1  ;;  %v981_v28 = vrot.slane %v979_v38, 1 }
 0x19a   : > { %11564 = vst [vmem:[#allocation11_spill] sm:$0xff] %v8521_v27  ;;  %v1863_v44 = vpop.f32.mrf.mxu2  ;;  %v1365_v11 = vpop.f32.mrf.mxu0  ;;  %v990_v54 = vsel %vm582_vm1, %v985_v21, %v989_v40 }
 0x19b   : > { %v1864_v61 = vadd.f32 %v1863_v44, %v1525_v7  ;;  %v1528_v10 = vadd.f32 %v1527_v6, %v1365_v11  ;;  %v975_v7 = vshrl.u32 %v8504_v4, 16  ;;  %v6792_v44 = vld [vmem:[%s7919_s14 + $0x1a8] sm:$0xf0] }
 0x19c   : > { %v8544_v49 = vor.u32 %v7704_v55, %v6792_v44 }
 0x19d   : > { %1404 = vmatmul.bf16.gmra.mxu0 %v966_v59  ;;  %v977_v35 = vor.u32 %v975_v7, %v965_v17  ;;  %v1001_v17 = vor.u32 %v999_v15, %v989_v40  ;;  %v7816_v7 = vld [vmem:[%s11546_s1 + $0x16c] sm:$0xff]  ;;  %v7706_v15 = vld [vmem:[%s7919_s14 + $0x1b4] sm:$0xf] }
 0x19e   : > { %4111 = vmatpush.bf16.msrb.mxu2 %v7816_v7 }
 0x19f   : > { %1905 = vmatmul.bf16.gmra.mxu2 %v8482_v56  ;;  %v2020_v0 = vpop.f32.mrf.mxu3 }
 0x1a0   : > { %v8531_v25 = vadd.f32 %v2020_v0, %v1859_v18  ;;  %v7796_v18 = vld [vmem:[%s11546_s1 + $0xc8] sm:$0xff]  ;;  %v982_v0 = vsel %vm582_vm1, %v977_v35, %v981_v28 }
 0x1a1   : > { %v1532_v12 = vpop.f32.mrf.mxu1  ;;  %2774 = vmatpush.bf16.msrb.mxu1 %v7796_v18 }
 0x1a2   : > { %11565 = vst [vmem:[#allocation12_spill] sm:$0xff] %v8531_v25  ;;  %v1866_v1 = vpop.f32.mrf.mxu2  ;;  %v1367_v6 = vpop.f32.mrf.mxu0  ;;  %v7023_v25 = vld [vmem:[%s7919_s14 + $0x38] sm:$0xf0] }
 0x1a3   : > { %v1867_v8 = vadd.f32 %v1866_v1, %v1528_v10  ;;  %v1530_v56 = vadd.f32 %v1529_v34, %v1367_v6  ;;  %v7705_v6 = vld [vmem:[%s7919_s14 + $0x1a4] sm:$0xf0] }
 0x1a4   : > { %6892 = vmatmul.msk.bf16.gmra.mxu1 %vm1183_vm2, %v990_v54  ;;  %6969 = vmatmul.msk.bf16.gmra.mxu3 %vm1183_vm2, %v8447_v46  ;;  %v1003_v46 = vshll.u32 %v8544_v49, 16  ;;  %v6790_v54 = vld [vmem:[%s7919_s14 + $0x1a0] sm:$0xf] }
 0x1a5   : > { %v8557_v38 = vor.u32 %v7705_v6, %v6790_v54 }
 0x1a7   : > { %v2023_v11 = vpop.f32.mrf.mxu3 }
 0x1a8   : > { %v8546_v59 = vadd.f32 %v2023_v11, %v1862_v26  ;;  %v1005_v26 = vrot.slane %v1003_v46, 1  ;;  %v991_v11 = vshrl.u32 %v8529_v5, 16  ;;  %v6800_v46 = vld [vmem:[%s7919_s14 + $0x1b8] sm:$0xf0] }
 0x1a9   : > { %v1534_v2 = vpop.f32.mrf.mxu1 }
 0x1aa   : > { %11566 = vst [vmem:[#allocation13_spill] sm:$0xff] %v8546_v59  ;;  %v1868_v34 = vpop.f32.mrf.mxu2  ;;  %v1370_v21 = vpop.f32.mrf.mxu0  ;;  %v1006_v35 = vsel %vm582_vm1, %v1001_v17, %v1005_v26  ;;  %v6808_v59 = vld [vmem:[%s7919_s14 + $0x1c8] sm:$0xf0] }
 0x1ab   : > { %v1869_v10 = vadd.f32 %v1868_v34, %v1530_v56  ;;  %v1533_v1 = vadd.f32 %v1532_v12, %v1370_v21  ;;  %v995_v34 = vshll.u32 %v8557_v38, 16 }
 0x1ad   : > { %1409 = vmatmul.bf16.gmra.mxu0 %v982_v0  ;;  %v993_v0 = vor.u32 %v991_v11, %v981_v28 }
 0x1af   : > { %1910 = vmatmul.bf16.gmra.mxu2 %v8504_v4  ;;  %v2025_v55 = vpop.f32.mrf.mxu3  ;;  %v7804_v4 = vld [vmem:[%s11546_s1 + $0x108] sm:$0xff] }
 0x1b0   : > { %v8559_v44 = vadd.f32 %v2025_v55, %v1864_v61  ;;  %2936 = vmatpush.bf16.msra.mxu3 %v7804_v4  ;;  %v8572_v61 = vor.u32 %v7706_v15, %v6800_v46 }
 0x1b1   : > { %v1537_v18 = vpop.f32.mrf.mxu1 }
 0x1b2   : > { %11567 = vst [vmem:[#allocation14_spill] sm:$0xff] %v8559_v44  ;;  %v1871_v12 = vpop.f32.mrf.mxu2  ;;  %v1372_v40 = vpop.f32.mrf.mxu0  ;;  %v6798_v44 = vld [vmem:[%s7919_s14 + $0x1b0] sm:$0xf] }
 0x1b3   : > { %v1872_v56 = vadd.f32 %v1871_v12, %v1533_v1  ;;  %v1535_v21 = vadd.f32 %v1534_v2, %v1372_v40  ;;  %v997_v1 = vrot.slane %v995_v34, 1  ;;  %v1015_v2 = vshrl.u32 %v8544_v49, 16 }
 0x1b4   : > { %6893 = vmatmul.msk.bf16.gmra.mxu1 %vm1183_vm2, %v1006_v35  ;;  %6970 = vmatmul.msk.bf16.gmra.mxu3 %vm1183_vm2, %v8472_v13  ;;  %v1019_v12 = vshll.u32 %v8572_v61, 16  ;;  %v7707_v13 = vld [vmem:[%s7919_s14 + $0x1b4] sm:$0xf0] }
 0x1b5   : > { %v998_v35 = vsel %vm582_vm1, %v993_v0, %v997_v1  ;;  %v6799_v11 = vor.u32 %v7707_v13, %v6798_v44 }
 0x1b6   : > { %v1021_v28 = vrot.slane %v1019_v12, 1 }
 0x1b7   : > { %v2028_v54 = vpop.f32.mrf.mxu3 }
 0x1b8   : > { %v8574_v6 = vadd.f32 %v2028_v54, %v1867_v8  ;;  %v1017_v8 = vor.u32 %v1015_v2, %v1005_v26 }
 0x1b9   : > { %v1539_v55 = vpop.f32.mrf.mxu1 }
 0x1ba   : > { %11568 = vst [vmem:[#allocation15_spill] sm:$0xff] %v8574_v6  ;;  %v1873_v17 = vpop.f32.mrf.mxu2  ;;  %v1375_v4 = vpop.f32.mrf.mxu0  ;;  %v7708_v6 = vld [vmem:[%s7919_s14 + $0x1c4] sm:$0xf] }
 0x1bb   : > { %v1874_v7 = vadd.f32 %v1873_v17, %v1535_v21  ;;  %v1538_v40 = vadd.f32 %v1537_v18, %v1375_v4  ;;  %v1022_v17 = vsel %vm582_vm1, %v1017_v8, %v1021_v28  ;;  %v1007_v18 = vshrl.u32 %v8557_v38, 16 }
 0x1bc   : > { %v1011_v4 = vshll.u32 %v6799_v11, 16  ;;  %v1031_v8 = vshrl.u32 %v8572_v61, 16 }
 0x1bd   : > { %1414 = vmatmul.bf16.gmra.mxu0 %v998_v35 }
 0x1be   : > { %v1013_v26 = vrot.slane %v1011_v4, 1 }
 0x1bf   : > { %1915 = vmatmul.bf16.gmra.mxu2 %v8529_v5  ;;  %v2030_v34 = vpop.f32.mrf.mxu3  ;;  %v8591_v5 = vor.u32 %v7708_v6, %v6808_v59  ;;  %v1033_v59 = vor.u32 %v1031_v8, %v1021_v28 }
 0x1c0   : > { %v8582_v15 = vadd.f32 %v2030_v34, %v1869_v10  ;;  %v1009_v10 = vor.u32 %v1007_v18, %v997_v1 }
 0x1c1   : > { %v1542_v54 = vpop.f32.mrf.mxu1 }
 0x1c2   : > { %11569 = vst [vmem:[#allocation16_spill] sm:$0xff] %v8582_v15  ;;  %v1876_v46 = vpop.f32.mrf.mxu2  ;;  %v1377_v0 = vpop.f32.mrf.mxu0 }
 0x1c3   : > { %v1877_v21 = vadd.f32 %v1876_v46, %v1538_v40  ;;  %v1540_v35 = vadd.f32 %v1539_v55, %v1377_v0  ;;  %v1035_v55 = vshll.u32 %v8591_v5, 16  ;;  %v1014_v46 = vsel %vm582_vm1, %v1009_v10, %v1013_v26  ;;  %v6806_v0 = vld [vmem:[%s7919_s14 + $0x1c0] sm:$0xf] }
 0x1c4   : > { %6894 = vmatmul.msk.bf16.gmra.mxu1 %vm1183_vm2, %v1022_v17  ;;  %6971 = vmatmul.msk.bf16.gmra.mxu3 %vm1183_vm2, %v8494_v58  ;;  %v7709_v58 = vld [vmem:[%s7919_s14 + $0x1c4] sm:$0xf0] }
 0x1c5   : > { %v1037_v1 = vrot.slane %v1035_v55, 1  ;;  %v8604_v6 = vor.u32 %v7709_v58, %v6806_v0 }
 0x1c7   : > { %v2033_v44 = vpop.f32.mrf.mxu3  ;;  %v1027_v28 = vshll.u32 %v8604_v6, 16 }
 0x1c8   : > { %v8593_v2 = vadd.f32 %v2033_v44, %v1872_v56  ;;  %v7808_v56 = vld [vmem:[%s11546_s1 + $0x12c] sm:$0xff]  ;;  %v1038_v44 = vsel %vm582_vm1, %v1033_v59, %v1037_v1  ;;  %v1047_v59 = vshrl.u32 %v8591_v5, 16 }
 0x1c9   : > { %v1544_v13 = vpop.f32.mrf.mxu1  ;;  %3949 = vmatpush.bf16.msrb.mxu0 %v7808_v56 }
 0x1ca   : > { %11570 = vst [vmem:[#allocation17_spill] sm:$0xff] %v8593_v2  ;;  %v1878_v12 = vpop.f32.mrf.mxu2  ;;  %v1380_v34 = vpop.f32.mrf.mxu0  ;;  %v4961_v2 = vld [vmem:[%s11547_s2 + $0x8] sm:$0xff] }
 0x1cb   : > { %v1879_v40 = vadd.f32 %v1878_v12, %v1540_v35  ;;  %v1543_v17 = vadd.f32 %v1542_v54, %v1380_v34  ;;  %7825 = vmatpush.msrb.mxu3 %v4961_v2 }
 0x1cd   : > { %1419 = vmatmul.bf16.gmra.mxu0 %v1014_v46 }
 0x1ce   : > { %5067 = vmatpush.msra.mxu0 %v4961_v2 }
 0x1cf   : > { %1920 = vmatmul.bf16.gmra.mxu2 %v8557_v38  ;;  %v2035_v18 = vpop.f32.mrf.mxu3  ;;  %v1023_v38 = vshrl.u32 %v6799_v11, 16 }
 0x1d0   : > { %v8606_v4 = vadd.f32 %v2035_v18, %v1874_v7  ;;  %v1029_v7 = vrot.slane %v1027_v28, 1 }
 0x1d1   : > { %v1547_v54 = vpop.f32.mrf.mxu1  ;;  %v1025_v55 = vor.u32 %v1023_v38, %v1013_v26 }
 0x1d2   : > { %11571 = vst [vmem:[#allocation18_spill] sm:$0xff] %v8606_v4  ;;  %v1881_v35 = vpop.f32.mrf.mxu2  ;;  %v1382_v12 = vpop.f32.mrf.mxu0 }
 0x1d3   : > { %v1882_v10 = vadd.f32 %v1881_v35, %v1543_v17  ;;  %v1545_v8 = vadd.f32 %v1544_v13, %v1382_v12  ;;  %v1030_v18 = vsel %vm582_vm1, %v1025_v55, %v1029_v7  ;;  %v6814_v35 = vld [vmem:[%s7919_s14 + $0x1d0] sm:$0xf]  ;;  %v7711_v13 = vld [vmem:[%s7919_s14 + $0x1d4] sm:$0xf0] }
 0x1d4   : > { %6895 = vmatmul.msk.bf16.gmra.mxu1 %vm1183_vm2, %v1038_v44  ;;  %6972 = vmatmul.msk.bf16.gmra.mxu3 %vm1183_vm2, %v8519_v62  ;;  %v1049_v44 = vor.u32 %v1047_v59, %v1037_v1  ;;  %v8619_v62 = vor.u32 %v7711_v13, %v6814_v35  ;;  %v7005_v59 = vld [vmem:[%s7919_s14 + $0x10] sm:$0x8]  ;;  %v7739_v35 = vld [vmem:[%s7919_s14 + $0x24] sm:$0xf0] }
 0x1d6   : > { %v1054_v55 = vsel %vm582_vm1, %v1049_v44, %v7957_v36 }
 0x1d7   : > { %v2038_v34 = vpop.f32.mrf.mxu3 }
 0x1d8   : > { %v8613_v46 = vadd.f32 %v2038_v34, %v1877_v21  ;;  %v1039_v34 = vshrl.u32 %v8604_v6, 16 }
 0x1d9   : > { %v1549_v58 = vpop.f32.mrf.mxu1 }
 0x1da   : > { %11572 = vst [vmem:[#allocation19_spill] sm:$0xff] %v8613_v46  ;;  %v1883_v17 = vpop.f32.mrf.mxu2  ;;  %v1385_v56 = vpop.f32.mrf.mxu0  ;;  %v1041_v36 = vor.u32 %v1039_v34, %v1029_v7 }
 0x1db   : > { %v1884_v0 = vadd.f32 %v1883_v17, %v1545_v8  ;;  %v1548_v12 = vadd.f32 %v1547_v54, %v1385_v56  ;;  %v1043_v54 = vshll.u32 %v8619_v62, 16  ;;  %v7737_v56 = vld [vmem:[%s7919_s14 + $0x14] sm:$0xf0] }
 0x1dd   : > { %1424 = vmatmul.bf16.gmra.mxu0 %v1030_v18  ;;  %v1045_v17 = vrot.slane %v1043_v54, 1  ;;  %v7013_v18 = vld [vmem:[%s7919_s14 + $0x20] sm:$0xf] }
 0x1df   : > { %1925 = vmatmul.bf16.gmra.mxu2 %v6799_v11  ;;  %v2040_v26 = vpop.f32.mrf.mxu3  ;;  %v7427_v11 = vld [vmem:[%s11547_s2 + $0x18] sm:$0xff] }
 0x1e0   : > { %v8621_v21 = vadd.f32 %v2040_v26, %v1879_v40  ;;  %5017 = vmatpush.msra.mxu1 %v7427_v11  ;;  %v8639_v11 = vor.u32 %v7737_v56, %v7005_v59 }
 0x1e1   : > { %v1552_v8 = vpop.f32.mrf.mxu1 }
 0x1e2   : > { %11573 = vst [vmem:[#allocation20_spill] sm:$0xff] %v8621_v21  ;;  %v1886_v38 = vpop.f32.mrf.mxu2  ;;  %v1387_v1 = vpop.f32.mrf.mxu0  ;;  %v2443_v7 = vrot.slane %v8639_v11, 3 }
 0x1e3   : > { %v1887_v28 = vadd.f32 %v1886_v38, %v1548_v12  ;;  %v1550_v40 = vadd.f32 %v1549_v58, %v1387_v1  ;;  %v8641_v58 = vor.u32 %v7739_v35, %v7013_v18  ;;  %v7840_v1 = vld [vmem:[%s7919_s14 + $0x1e0] sm:$0x77] }
 0x1e4   : > { %6896 = vmatmul.msk.bf16.gmra.mxu1 %vm1183_vm2, %v1054_v55  ;;  %6973 = vmatmul.msk.bf16.gmra.mxu3 %vm1183_vm2, %v8544_v49  ;;  %v1046_v49 = vsel %vm582_vm1, %v1041_v36, %v1045_v17  ;;  %v518_v54 = vunpack.c.l.b16 %v7840_v1  ;;  %v7021_v1 = vld [vmem:[%s7919_s14 + $0x30] sm:$0xf] }
 0x1e6   : > { %v580_v34 = vpack.c.b16 %v518_v54, %v518_v54  ;;  %v7741_v54 = vld [vmem:[%s7919_s14 + $0x34] sm:$0xf0] }
 0x1e7   : > { %v2043_v13 = vpop.f32.mrf.mxu3 }
 0x1e8   : > { %v8637_v12 = vadd.f32 %v2043_v13, %v1882_v10  ;;  %v2444_v10 = vrot.slane %v8641_v58, 3  ;;  %v1055_v13 = vshrl.u32 %v8619_v62, 16 }
 0x1e9   : > { %v1554_v38 = vpop.f32.mrf.mxu1 }
 0x1ea   : > { %11574 = vst [vmem:[#allocation21_spill] sm:$0xff] %v8637_v12  ;;  %v1888_v44 = vpop.f32.mrf.mxu2  ;;  %v1390_v55 = vpop.f32.mrf.mxu0  ;;  %v2445_v35 = vsel %vm2442_vm3, %v2443_v7, %v2444_v10 }
 0x1eb   : > { %v1889_v26 = vadd.f32 %v1888_v44, %v1550_v40  ;;  %v1553_v21 = vadd.f32 %v1552_v8, %v1390_v55  ;;  %v1057_v55 = vor.u32 %v1055_v13, %v1045_v17 }
 0x1ed   : > { %1429 = vmatmul.bf16.gmra.mxu0 %v1046_v49 }
 0x1ef   : > { %1930 = vmatmul.bf16.gmra.mxu2 %v8604_v6  ;;  %v2045_v40 = vpop.f32.mrf.mxu3  ;;  %v1059_v6 = vshll.u32 %v580_v34, 16 }
 0x1f0   : > { %v8648_v59 = vadd.f32 %v2045_v40, %v1884_v0 }
 0x1f1   : > { %v1557_v36 = vpop.f32.mrf.mxu1  ;;  %v1061_v49 = vrot.slane %v1059_v6, 1 }
 0x1f2   : > { %11575 = vst [vmem:[#allocation22_spill] sm:$0xff] %v8648_v59  ;;  %v1891_v56 = vpop.f32.mrf.mxu2  ;;  %v1392_v8 = vpop.f32.mrf.mxu0  ;;  %v8658_v59 = vor.u32 %v7741_v54, %v7021_v1  ;;  %v7029_v1 = vld [vmem:[%s7919_s14 + $0x40] sm:$0xf]  ;;  %v7743_v54 = vld [vmem:[%s7919_s14 + $0x44] sm:$0xf0] }
 0x1f3   : > { %v1892_v18 = vadd.f32 %v1891_v56, %v1553_v21  ;;  %v1555_v44 = vadd.f32 %v1554_v38, %v1392_v8  ;;  %v1062_v38 = vsel %vm582_vm1, %v1057_v55, %v1061_v49  ;;  %v1071_v55 = vshrl.u32 %v580_v34, 16 }
 0x1f4   : > { %6974 = vmatmul.msk.bf16.gmra.mxu3 %vm1183_vm2, %v8572_v61  ;;  %2775 = vmatmul.bf16.vlgmr.msrb.gmra.mxu1 %v2445_v35  ;;  %v2449_v61 = vrot.slane %v8658_v59, 3  ;;  %vm6459_vm1 = vcmask 1024  }
 0x1f7   : > { %v2048_v0 = vpop.f32.mrf.mxu3 }
 0x1f8   : > { %v8656_v40 = vadd.f32 %v2048_v0, %v1887_v28  ;;  %v7736_v0 = vld [vmem:[%s7919_s14 + $0x14] sm:$0x8] }
 0x1f9   : > { %v1559_v7 = vpop.f32.mrf.mxu1 }
 0x1fa   : > { %11576 = vst [vmem:[#allocation23_spill] sm:$0xff] %v8656_v40  ;;  %v1893_v21 = vpop.f32.mrf.mxu2  ;;  %v1395_v12 = vpop.f32.mrf.mxu0 }
 0x1fb   : > { %v1894_v56 = vadd.f32 %v1893_v21, %v1555_v44  ;;  %v1558_v8 = vadd.f32 %v1557_v36, %v1395_v12  ;;  %v2450_v12 = vsel %vm2442_vm3, %v2444_v10, %v2449_v61  ;;  %v8669_v44 = vld [vmem:[%s7919_s14 + $0x1e0] sm:$0x33] }
 0x1fd   : > { %1434 = vmatmul.bf16.gmra.mxu0 %v1062_v38  ;;  %v7007_v38 = vld [vmem:[%s7919_s14 + $0x18] sm:$0xf0] }
 0x1fe   : > { %v8686_v40 = vor.u32 %v7736_v0, %v7007_v38 }
 0x1ff   : > { %1935 = vmatmul.bf16.gmra.mxu2 %v8619_v62  ;;  %v2050_v28 = vpop.f32.mrf.mxu3 }
 0x200   : > { %v8663_v17 = vadd.f32 %v2050_v28, %v1889_v26  ;;  %v1606_v26 = vunpack.c.l.b16 %v8669_v44  ;;  %v7015_v28 = vld [vmem:[%s7919_s14 + $0x28] sm:$0xf0] }
 0x201   : > { %v1562_v6 = vpop.f32.mrf.mxu1 }
 0x202   : > { %11577 = vst [vmem:[#allocation24_spill] sm:$0xff] %v8663_v17  ;;  %v1896_v35 = vpop.f32.mrf.mxu2  ;;  %v1397_v36 = vpop.f32.mrf.mxu0  ;;  %v8682_v17 = vor.u32 %v7743_v54, %v7029_v1  ;;  %v3185_v1 = vshrl.u32 %v8639_v11, 16 }
 0x203   : > { %v8665_v13 = vadd.f32 %v1896_v35, %v1558_v8  ;;  %v1560_v62 = vadd.f32 %v1559_v7, %v1397_v36  ;;  %v7738_v8 = vld [vmem:[%s7919_s14 + $0x24] sm:$0xf] }
 0x204   : > { %6975 = vmatmul.msk.bf16.gmra.mxu3 %vm1183_vm2, %v8591_v5  ;;  %2780 = vmatmul.bf16.gmra.mxu1 %v2450_v12  ;;  %v1073_v5 = vor.u32 %v1071_v55, %v1061_v49  ;;  %v1608_v12 = vpack.c.b16 %v1606_v26, %v1606_v26  ;;  %v8688_v46 = vor.u32 %v7738_v8, %v7015_v28  ;;  %v3188_v49 = vshll.u32 %v8639_v11, 16 }
 0x205   : > { %v3196_v55 = vshll.u32 %v8641_v58, 16  ;;  %v3205_v26 = vshll.u32 %v8686_v40, 16  ;;  %v3187_v8 = vrot.slane %v3185_v1, 3 }
 0x206   : > { %v3210_v54 = vshrl.u32 %v8688_v46, 16  ;;  %v3213_v0 = vshll.u32 %v8688_v46, 16 }
 0x207   : > { %v2053_v21 = vpop.f32.mrf.mxu3 }
 0x208   : > { %v8680_v35 = vadd.f32 %v2053_v21, %v1892_v18  ;;  %v11551_v18 = vrot.slane %v8682_v17, 3 }
 0x209   : > { %v1564_v36 = vpop.f32.mrf.mxu1 }
 0x20a   : > { %11578 = vst [vmem:[#allocation25_spill] sm:$0xff] %v8680_v35  ;;  %v1898_v10 = vpop.f32.mrf.mxu2  ;;  %v1400_v34 = vpop.f32.mrf.mxu0  ;;  %v2454_v11 = vsel %vm2442_vm3, %v2449_v61, %v11551_v18  ;;  %v3212_v35 = vrot.slane %v3210_v54, 3  ;;  %v3215_v61 = vrot.slane %v3213_v0, 4  ;;  %v7745_v18 = vld [vmem:[%s7919_s14 + $0x54] sm:$0xf0] }
 0x20b   : > { %v8684_v7 = vadd.f32 %v1898_v10, %v1560_v62  ;;  %v1563_v4 = vadd.f32 %v1562_v6, %v1400_v34  ;;  %v3193_v62 = vshrl.u32 %v8641_v58, 16  ;;  %v3202_v6 = vshrl.u32 %v8686_v40, 16  ;;  %v7452_v34 = vld [vmem:[%s11547_s2 + $0x38] sm:$0xff] }
 0x20c   : > { %v3190_v10 = vrot.slane %v3188_v49, 4  ;;  %5209 = vmatpush.msra.mxu2 %v7452_v34 }
 0x20d   : > { %1439 = vmatmul.bf16.gmra.mxu0 %v1073_v5  ;;  %v3195_v5 = vrot.slane %v3193_v62, 3 }
 0x20e   : > { %v3191_v1 = vor.u32 %v3190_v10, %v3187_v8  ;;  %v1607_v10 = vunpack.c.h.b16 %v8669_v44 }
 0x20f   : > { %1940 = vmatmul.bf16.gmra.mxu2 %v1608_v12  ;;  %v2055_v21 = vpop.f32.mrf.mxu3  ;;  %v3198_v12 = vrot.slane %v3196_v55, 4  ;;  %v3216_v55 = vor.u32 %v3215_v61, %v3212_v35 }
 0x210   : > { %v8702_v38 = vadd.f32 %v2055_v21, %v1894_v56  ;;  %v3204_v21 = vrot.slane %v3202_v6, 3  ;;  %v7740_v6 = vld [vmem:[%s7919_s14 + $0x34] sm:$0xf] }
 0x211   : > { %v1567_v58 = vpop.f32.mrf.mxu1  ;;  %v3199_v49 = vor.u32 %v3198_v12, %v3195_v5  ;;  %v8725_v35 = vor.u32 %v7740_v6, %v7023_v25 }
 0x212   : > { %11579 = vst [vmem:[#allocation26_spill] sm:$0xff] %v8702_v38  ;;  %v1901_v2 = vpop.f32.mrf.mxu2  ;;  %v1402_v56 = vpop.f32.mrf.mxu0  ;;  %v3207_v38 = vrot.slane %v3205_v26, 4 }
 0x213   : > { %v8707_v28 = vadd.f32 %v1901_v2, %v1563_v4  ;;  %v1565_v4 = vadd.f32 %v1564_v36, %v1402_v56  ;;  %v7037_v2 = vld [vmem:[%s7919_s14 + $0x50] sm:$0xf]  ;;  %v3228_v5 = vshrl.u32 %v8725_v35, 16  ;;  %v3231_v12 = vshll.u32 %v8725_v35, 16 }
 0x214   : > { %6976 = vmatmul.msk.bf16.gmra.mxu3 %vm1183_vm2, %v7930_v19  ;;  %2785 = vmatmul.bf16.gmra.mxu1 %v2454_v11  ;;  %v3208_v62 = vor.u32 %v3207_v38, %v3204_v21  ;;  %v8721_v34 = vor.u32 %v7745_v18, %v7037_v2  ;;  %v3200_v11 = vsel %vm3183_vm4, %v3191_v1, %v3199_v49  ;;  %v3222_v18 = vshll.u32 %v8658_v59, 16 }
 0x215   : > { %v1609_v21 = vpack.c.b16 %v1607_v10, %v1607_v10  ;;  %v3230_v6 = vrot.slane %v3228_v5, 3 }
 0x216   : > { %v3217_v38 = vsel %vm3183_vm4, %v3208_v62, %v3216_v55  ;;  %v3224_v2 = vrot.slane %v3222_v18, 4 }
 0x217   : > { %v2058_v15 = vpop.f32.mrf.mxu3 }
 0x218   : > { %v8719_v26 = vadd.f32 %v2058_v15, %v8665_v13  ;;  %v2457_v15 = vrot.slane %v8721_v34, 3  ;;  %v3219_v13 = vshrl.u32 %v8658_v59, 16 }
 0x219   : > { %v1569_v36 = vpop.f32.mrf.mxu1 }
 0x21a   : > { %11580 = vst [vmem:[#allocation27_spill] sm:$0xff] %v8719_v26  ;;  %v1903_v54 = vpop.f32.mrf.mxu2  ;;  %v1405_v19 = vpop.f32.mrf.mxu0  ;;  %v3221_v62 = vrot.slane %v3219_v13, 3 }
 0x21b   : > { %v1904_v0 = vadd.f32 %v1903_v54, %v1565_v4  ;;  %v1568_v8 = vadd.f32 %v1567_v58, %v1405_v19  ;;  %v11582_v4 = vrot.slane %v8682_v17, 3  ;;  %v3233_v54 = vrot.slane %v3231_v12, 4 }
 0x21d   : > { %3950 = vmatmul.bf16.vlgmr.msrb.gmra.mxu0 %v3200_v11  ;;  %v2458_v59 = vsel %vm2442_vm3, %v11582_v4, %v2457_v15  ;;  %v3234_v11 = vor.u32 %v3233_v54, %v3230_v6  ;;  %v3240_v6 = vshll.u32 %v8682_v17, 16 }
 0x21f   : > { %7395 = vmatmul.msk.bf16.vlgmr.msrb.gmra.mxu2 %vm1183_vm2, %v3217_v38  ;;  %v2060_v56 = vpop.f32.mrf.mxu3  ;;  %v7045_v38 = vld [vmem:[%s7919_s14 + $0x60] sm:$0xf]  ;;  %v3235_v12 = vsel %vm3183_vm4, %v3216_v55, %v3234_v11 }
 0x220   : > { %v8735_v25 = vadd.f32 %v2060_v56, %v8684_v7  ;;  %v3225_v7 = vor.u32 %v3224_v2, %v3221_v62  ;;  %v7742_v56 = vld [vmem:[%s7919_s14 + $0x44] sm:$0xf]  ;;  %v2447_v62 = vrot.slane %v8688_v46, 3  ;;  %v3237_v2 = vshrl.u32 %v8682_v17, 16 }
 0x221   : > { %v1572_v61 = vpop.f32.mrf.mxu1 }
 0x222   : > { %11581 = vst [vmem:[#allocation28_spill] sm:$0xff] %v8735_v25  ;;  %v1906_v44 = vpop.f32.mrf.mxu2  ;;  %v1407_v1 = vpop.f32.mrf.mxu0  ;;  %v3239_v17 = vrot.slane %v3237_v2, 3 }
 0x223   : > { %v1907_v58 = vadd.f32 %v1906_v44, %v1568_v8  ;;  %v1570_v19 = vadd.f32 %v1569_v36, %v1407_v1  ;;  %v7747_v8 = vld [vmem:[%s7919_s14 + $0x64] sm:$0xf0]  ;;  %v7031_v44 = vld [vmem:[%s7919_s14 + $0x48] sm:$0xf0]  ;;  %v3226_v36 = vsel %vm3183_vm4, %v3199_v49, %v3225_v7 }
 0x224   : > { %6977 = vmatmul.msk.bf16.gmra.mxu3 %vm1183_vm2, %v1609_v21  ;;  %2790 = vmatmul.bf16.gmra.mxu1 %v2458_v59  ;;  %v8748_v18 = vor.u32 %v7747_v8, %v7045_v38  ;;  %v8752_v21 = vor.u32 %v7742_v56, %v7031_v44  ;;  %v3242_v56 = vrot.slane %v3240_v6, 4 }
 0x226   : > { %v2461_v1 = vrot.slane %v8748_v18, 3  ;;  %v3246_v49 = vshrl.u32 %v8752_v21, 16  ;;  %v3249_v55 = vshll.u32 %v8752_v21, 16 }
 0x227   : > { %v2063_v10 = vpop.f32.mrf.mxu3 }
 0x228   : > { %v8746_v25 = vadd.f32 %v2063_v10, %v8707_v28  ;;  %v2446_v28 = vrot.slane %v8686_v40, 3  ;;  %v2462_v40 = vsel %vm2442_vm3, %v2457_v15, %v2461_v1  ;;  %v3248_v44 = vrot.slane %v3246_v49, 3 }
 0x229   : > { %v1574_v13 = vpop.f32.mrf.mxu1 }
 0x22a   : > { %11583 = vst [vmem:[#allocation29_spill] sm:$0xff] %v8746_v25  ;;  %v1908_v4 = vpop.f32.mrf.mxu2  ;;  %v1410_v5 = vpop.f32.mrf.mxu0  ;;  %v2448_v46 = vsel %vm2442_vm3, %v2446_v28, %v2447_v62 }
 0x22b   : > { %v1909_v26 = vadd.f32 %v1908_v4, %v1570_v19  ;;  %v1573_v59 = vadd.f32 %v1572_v61, %v1410_v5  ;;  %v3251_v4 = vrot.slane %v3249_v55, 4 }
 0x22d   : > { %3955 = vmatmul.bf16.gmra.mxu0 %v3226_v36  ;;  %v3252_v36 = vor.u32 %v3251_v4, %v3248_v44 }
 0x22f   : > { %7396 = vmatmul.msk.bf16.gmra.mxu2 %vm1183_vm2, %v3235_v12  ;;  %v2065_v54 = vpop.f32.mrf.mxu3  ;;  %v7053_v12 = vld [vmem:[%s7919_s14 + $0x70] sm:$0xf]  ;;  %v3253_v49 = vsel %vm3183_vm4, %v3234_v11, %v3252_v36 }
 0x230   : > { %v8762_v19 = vadd.f32 %v2065_v54, %v1904_v0  ;;  %v3243_v0 = vor.u32 %v3242_v56, %v3239_v17 }
 0x231   : > { %v1577_v8 = vpop.f32.mrf.mxu1 }
 0x232   : > { %11584 = vst [vmem:[#allocation30_spill] sm:$0xff] %v8762_v19  ;;  %v1911_v61 = vpop.f32.mrf.mxu2  ;;  %v1412_v10 = vpop.f32.mrf.mxu0  ;;  %v7039_v19 = vld [vmem:[%s7919_s14 + $0x58] sm:$0xf0] }
 0x233   : > { %v1912_v38 = vadd.f32 %v1911_v61, %v1573_v59  ;;  %v1575_v5 = vadd.f32 %v1574_v13, %v1412_v10  ;;  %v7749_v59 = vld [vmem:[%s7919_s14 + $0x74] sm:$0xf0]  ;;  %v7744_v61 = vld [vmem:[%s7919_s14 + $0x54] sm:$0xf]  ;;  %v3244_v13 = vsel %vm3183_vm4, %v3225_v7, %v3243_v0  ;;  %v3258_v10 = vshll.u32 %v8721_v34, 16 }
 0x234   : > { %2795 = vmatmul.bf16.gmra.mxu1 %v2462_v40  ;;  %7291 = vmatmul.msk.bf16.vlgmr.msra.gmra.mxu3 %vm1183_vm2, %v2448_v46  ;;  %v8773_v2 = vor.u32 %v7749_v59, %v7053_v12  ;;  %v8777_v55 = vor.u32 %v7744_v61, %v7039_v19 }
 0x235   : > { %v3260_v12 = vrot.slane %v3258_v10, 4 }
 0x236   : > { %v2465_v46 = vrot.slane %v8773_v2, 3  ;;  %v3264_v17 = vshrl.u32 %v8777_v55, 16  ;;  %v3267_v7 = vshll.u32 %v8777_v55, 16 }
 0x237   : > { %v2068_v54 = vpop.f32.mrf.mxu3 }
 0x238   : > { %v8771_v15 = vadd.f32 %v2068_v54, %v1907_v58  ;;  %v2451_v58 = vrot.slane %v8725_v35, 3  ;;  %v2466_v4 = vsel %vm2442_vm3, %v2461_v1, %v2465_v46  ;;  %v3266_v59 = vrot.slane %v3264_v17, 3 }
 0x239   : > { %v1579_v27 = vpop.f32.mrf.mxu1  ;;  %v3269_v54 = vrot.slane %v3267_v7, 4 }
 0x23a   : > { %11585 = vst [vmem:[#allocation31_spill] sm:$0xff] %v8771_v15  ;;  %v1913_v25 = vpop.f32.mrf.mxu2  ;;  %v1415_v6 = vpop.f32.mrf.mxu0  ;;  %v2452_v35 = vsel %vm2442_vm3, %v2447_v62, %v2451_v58 }
 0x23b   : > { %v1914_v28 = vadd.f32 %v1913_v25, %v1575_v5  ;;  %v1578_v40 = vadd.f32 %v1577_v8, %v1415_v6  ;;  %v3255_v25 = vshrl.u32 %v8721_v34, 16  ;;  %v3270_v6 = vor.u32 %v3269_v54, %v3266_v59 }
 0x23d   : > { %3960 = vmatmul.bf16.gmra.mxu0 %v3244_v13  ;;  %v3257_v34 = vrot.slane %v3255_v25, 3  ;;  %v7061_v13 = vld [vmem:[%s7919_s14 + $0x80] sm:$0xf]  ;;  %v3271_v17 = vsel %vm3183_vm4, %v3252_v36, %v3270_v6 }
 0x23f   : > { %7397 = vmatmul.msk.bf16.gmra.mxu2 %vm1183_vm2, %v3253_v49  ;;  %v2070_v56 = vpop.f32.mrf.mxu3  ;;  %v7751_v49 = vld [vmem:[%s7919_s14 + $0x84] sm:$0xf0] }
 0x240   : > { %v8786_v11 = vadd.f32 %v2070_v56, %v1909_v26  ;;  %v3261_v26 = vor.u32 %v3260_v12, %v3257_v34  ;;  %v7746_v56 = vld [vmem:[%s7919_s14 + $0x64] sm:$0xf]  ;;  %v8797_v25 = vor.u32 %v7751_v49, %v7061_v13 }
 0x241   : > { %v1582_v44 = vpop.f32.mrf.mxu1 }
 0x242   : > { %11586 = vst [vmem:[#allocation32_spill] sm:$0xff] %v8786_v11  ;;  %v1916_v19 = vpop.f32.mrf.mxu2  ;;  %v1417_v5 = vpop.f32.mrf.mxu0 }
 0x243   : > { %v1917_v8 = vadd.f32 %v1916_v19, %v1578_v40  ;;  %v1580_v61 = vadd.f32 %v1579_v27, %v1417_v5  ;;  %v7047_v19 = vld [vmem:[%s7919_s14 + $0x68] sm:$0xf0]  ;;  %v3262_v27 = vsel %vm3183_vm4, %v3243_v0, %v3261_v26  ;;  %v3276_v5 = vshll.u32 %v8748_v18, 16 }
 0x244   : > { %2800 = vmatmul.bf16.gmra.mxu1 %v2466_v4  ;;  %7292 = vmatmul.msk.bf16.gmra.mxu3 %vm1183_vm2, %v2452_v35  ;;  %v8801_v7 = vor.u32 %v7746_v56, %v7047_v19  ;;  %v2469_v35 = vrot.slane %v8797_v25, 3 }
 0x245   : > { %v3278_v49 = vrot.slane %v3276_v5, 4 }
 0x246   : > { %v3282_v34 = vshrl.u32 %v8801_v7, 16  ;;  %v3285_v0 = vshll.u32 %v8801_v7, 16 }
 0x247   : > { %v2073_v40 = vpop.f32.mrf.mxu3 }
 0x248   : > { %v8795_v1 = vadd.f32 %v2073_v40, %v1912_v38  ;;  %v2455_v38 = vrot.slane %v8752_v21, 3  ;;  %v3284_v40 = vrot.slane %v3282_v34, 3  ;;  %v3287_v56 = vrot.slane %v3285_v0, 4 }
 0x249   : > { %v1584_v15 = vpop.f32.mrf.mxu1 }
 0x24a   : > { %11587 = vst [vmem:[#allocation33_spill] sm:$0xff] %v8795_v1  ;;  %v1918_v11 = vpop.f32.mrf.mxu2  ;;  %v1420_v10 = vpop.f32.mrf.mxu0  ;;  %v2456_v21 = vsel %vm2442_vm3, %v2451_v58, %v2455_v38 }
 0x24b   : > { %v1919_v62 = vadd.f32 %v1918_v11, %v1580_v61  ;;  %v1583_v4 = vadd.f32 %v1582_v44, %v1420_v10  ;;  %v3273_v11 = vshrl.u32 %v8748_v18, 16  ;;  %v2470_v61 = vsel %vm2442_vm3, %v2465_v46, %v2469_v35 }
 0x24c   : > { %v3288_v10 = vor.u32 %v3287_v56, %v3284_v40 }
 0x24d   : > { %3965 = vmatmul.bf16.gmra.mxu0 %v3262_v27  ;;  %v3275_v18 = vrot.slane %v3273_v11, 3  ;;  %v7069_v27 = vld [vmem:[%s7919_s14 + $0x90] sm:$0xf] }
 0x24e   : > { %v3289_v34 = vsel %vm3183_vm4, %v3270_v6, %v3288_v10 }
 0x24f   : > { %7398 = vmatmul.msk.bf16.gmra.mxu2 %vm1183_vm2, %v3271_v17  ;;  %v2075_v12 = vpop.f32.mrf.mxu3  ;;  %v7753_v17 = vld [vmem:[%s7919_s14 + $0x94] sm:$0xf0] }
 0x250   : > { %v8810_v36 = vadd.f32 %v2075_v12, %v1914_v28  ;;  %v3279_v28 = vor.u32 %v3278_v49, %v3275_v18  ;;  %v7748_v12 = vld [vmem:[%s7919_s14 + $0x74] sm:$0xf]  ;;  %v8821_v11 = vor.u32 %v7753_v17, %v7069_v27 }
 0x251   : > { %v1587_v54 = vpop.f32.mrf.mxu1 }
 0x252   : > { %11588 = vst [vmem:[#allocation34_spill] sm:$0xff] %v8810_v36  ;;  %v1921_v44 = vpop.f32.mrf.mxu2  ;;  %v1422_v13 = vpop.f32.mrf.mxu0 }
 0x253   : > { %v1922_v59 = vadd.f32 %v1921_v44, %v1583_v4  ;;  %v1585_v19 = vadd.f32 %v1584_v15, %v1422_v13  ;;  %v7055_v44 = vld [vmem:[%s7919_s14 + $0x78] sm:$0xf0]  ;;  %v3280_v15 = vsel %vm3183_vm4, %v3261_v26, %v3279_v28  ;;  %v3294_v13 = vshll.u32 %v8773_v2, 16 }
 0x254   : > { %2805 = vmatmul.bf16.gmra.mxu1 %v2470_v61  ;;  %7293 = vmatmul.msk.bf16.gmra.mxu3 %vm1183_vm2, %v2456_v21  ;;  %v8825_v0 = vor.u32 %v7748_v12, %v7055_v44  ;;  %v2473_v21 = vrot.slane %v8821_v11, 3 }
 0x255   : > { %v3296_v17 = vrot.slane %v3294_v13, 4 }
 0x256   : > { %v3300_v18 = vshrl.u32 %v8825_v0, 16  ;;  %v3303_v26 = vshll.u32 %v8825_v0, 16 }
 0x257   : > { %v2078_v4 = vpop.f32.mrf.mxu3 }
 0x258   : > { %v8819_v46 = vadd.f32 %v2078_v4, %v1917_v8  ;;  %v2459_v8 = vrot.slane %v8777_v55, 3  ;;  %v3302_v4 = vrot.slane %v3300_v18, 3  ;;  %v3305_v12 = vrot.slane %v3303_v26, 4 }
 0x259   : > { %v1589_v1 = vpop.f32.mrf.mxu1 }
 0x25a   : > { %11589 = vst [vmem:[#allocation35_spill] sm:$0xff] %v8819_v46  ;;  %v1923_v36 = vpop.f32.mrf.mxu2  ;;  %v1425_v5 = vpop.f32.mrf.mxu0  ;;  %v2460_v55 = vsel %vm2442_vm3, %v2455_v38, %v2459_v8 }
 0x25b   : > { %v1924_v58 = vadd.f32 %v1923_v36, %v1585_v19  ;;  %v1588_v61 = vadd.f32 %v1587_v54, %v1425_v5  ;;  %v3291_v36 = vshrl.u32 %v8773_v2, 16  ;;  %v2474_v19 = vsel %vm2442_vm3, %v2469_v35, %v2473_v21 }
 0x25c   : > { %v3306_v5 = vor.u32 %v3305_v12, %v3302_v4 }
 0x25d   : > { %3970 = vmatmul.bf16.gmra.mxu0 %v3280_v15  ;;  %v3293_v2 = vrot.slane %v3291_v36, 3  ;;  %v7077_v15 = vld [vmem:[%s7919_s14 + $0xa0] sm:$0xf] }
 0x25e   : > { %v3307_v18 = vsel %vm3183_vm4, %v3288_v10, %v3306_v5 }
 0x25f   : > { %7399 = vmatmul.msk.bf16.gmra.mxu2 %vm1183_vm2, %v3289_v34  ;;  %v2080_v49 = vpop.f32.mrf.mxu3  ;;  %v7755_v34 = vld [vmem:[%s7919_s14 + $0xa4] sm:$0xf0] }
 0x260   : > { %v8834_v6 = vadd.f32 %v2080_v49, %v1919_v62  ;;  %v3297_v62 = vor.u32 %v3296_v17, %v3293_v2  ;;  %v7750_v49 = vld [vmem:[%s7919_s14 + $0x84] sm:$0xf]  ;;  %v8845_v36 = vor.u32 %v7755_v34, %v7077_v15 }
 0x261   : > { %v1592_v56 = vpop.f32.mrf.mxu1 }
 0x262   : > { %11590 = vst [vmem:[#allocation36_spill] sm:$0xff] %v8834_v6  ;;  %v1926_v54 = vpop.f32.mrf.mxu2  ;;  %v1427_v27 = vpop.f32.mrf.mxu0 }
 0x263   : > { %v1927_v40 = vadd.f32 %v1926_v54, %v1588_v61  ;;  %v1590_v44 = vadd.f32 %v1589_v1, %v1427_v27  ;;  %v7063_v54 = vld [vmem:[%s7919_s14 + $0x88] sm:$0xf0]  ;;  %v3298_v1 = vsel %vm3183_vm4, %v3279_v28, %v3297_v62  ;;  %v3312_v27 = vshll.u32 %v8797_v25, 16 }
 0x264   : > { %2810 = vmatmul.bf16.gmra.mxu1 %v2474_v19  ;;  %7294 = vmatmul.msk.bf16.gmra.mxu3 %vm1183_vm2, %v2460_v55  ;;  %v8849_v26 = vor.u32 %v7750_v49, %v7063_v54  ;;  %v2477_v55 = vrot.slane %v8845_v36, 3 }
 0x265   : > { %v3314_v34 = vrot.slane %v3312_v27, 4 }
 0x266   : > { %v3318_v2 = vshrl.u32 %v8849_v26, 16  ;;  %v3321_v28 = vshll.u32 %v8849_v26, 16 }
 0x267   : > { %v2083_v61 = vpop.f32.mrf.mxu3 }
 0x268   : > { %v8843_v35 = vadd.f32 %v2083_v61, %v1922_v59  ;;  %v2463_v59 = vrot.slane %v8801_v7, 3  ;;  %v2478_v7 = vsel %vm2442_vm3, %v2473_v21, %v2477_v55  ;;  %v3320_v61 = vrot.slane %v3318_v2, 3 }
 0x269   : > { %v1594_v46 = vpop.f32.mrf.mxu1  ;;  %v3323_v49 = vrot.slane %v3321_v28, 4 }
 0x26a   : > { %11591 = vst [vmem:[#allocation37_spill] sm:$0xff] %v8843_v35  ;;  %v1928_v6 = vpop.f32.mrf.mxu2  ;;  %v1430_v13 = vpop.f32.mrf.mxu0 }
 0x26b   : > { %v1929_v38 = vadd.f32 %v1928_v6, %v1590_v44  ;;  %v1593_v19 = vadd.f32 %v1592_v56, %v1430_v13  ;;  %v3309_v6 = vshrl.u32 %v8797_v25, 16  ;;  %v2464_v44 = vsel %vm2442_vm3, %v2459_v8, %v2463_v59 }
 0x26c   : > { %v3324_v13 = vor.u32 %v3323_v49, %v3320_v61 }
 0x26d   : > { %3975 = vmatmul.bf16.gmra.mxu0 %v3298_v1  ;;  %v3311_v15 = vrot.slane %v3309_v6, 3  ;;  %v7085_v1 = vld [vmem:[%s7919_s14 + $0xb0] sm:$0xf] }
 0x26e   : > { %v3325_v2 = vsel %vm3183_vm4, %v3306_v5, %v3324_v13 }
 0x26f   : > { %7400 = vmatmul.msk.bf16.gmra.mxu2 %vm1183_vm2, %v3307_v18  ;;  %v2085_v17 = vpop.f32.mrf.mxu3  ;;  %v7757_v18 = vld [vmem:[%s7919_s14 + $0xb4] sm:$0xf0] }
 0x270   : > { %v8858_v10 = vadd.f32 %v2085_v17, %v1924_v58  ;;  %v3315_v58 = vor.u32 %v3314_v34, %v3311_v15  ;;  %v7752_v17 = vld [vmem:[%s7919_s14 + $0x94] sm:$0xf]  ;;  %v8873_v6 = vor.u32 %v7757_v18, %v7085_v1 }
 0x271   : > { %v8860_v12 = vpop.f32.mrf.mxu1 }
 0x272   : > { %11592 = vst [vmem:[#allocation38_spill] sm:$0xff] %v8858_v10  ;;  %v1931_v56 = vpop.f32.mrf.mxu2  ;;  %v1432_v25 = vpop.f32.mrf.mxu0 }
 0x273   : > { %v1932_v4 = vadd.f32 %v1931_v56, %v1593_v19  ;;  %v1595_v54 = vadd.f32 %v1594_v46, %v1432_v25  ;;  %v7071_v56 = vld [vmem:[%s7919_s14 + $0x98] sm:$0xf0]  ;;  %v3316_v46 = vsel %vm3183_vm4, %v3297_v62, %v3315_v58 }
 0x274   : > { %2815 = vmatmul.bf16.gmra.mxu1 %v2478_v7  ;;  %7295 = vmatmul.msk.bf16.gmra.mxu3 %vm1183_vm2, %v2464_v44  ;;  %v8877_v28 = vor.u32 %v7752_v17, %v7071_v56  ;;  %v2481_v7 = vrot.slane %v8873_v6, 3  ;;  %v3330_v44 = vshll.u32 %v8821_v11, 16 }
 0x276   : > { %v3336_v25 = vshrl.u32 %v8877_v28, 16  ;;  %v3339_v15 = vshll.u32 %v8877_v28, 16 }
 0x277   : > { %v2088_v19 = vpop.f32.mrf.mxu3 }
 0x278   : > { %v8869_v21 = vadd.f32 %v2088_v19, %v1927_v40  ;;  %v2467_v40 = vrot.slane %v8825_v0, 3  ;;  %v2482_v0 = vsel %vm2442_vm3, %v2477_v55, %v2481_v7  ;;  %v3332_v19 = vrot.slane %v3330_v44, 4  ;;  %v7079_v55 = vld [vmem:[%s7919_s14 + $0xa8] sm:$0xf0] }
 0x279   : > { %v8871_v35 = vpop.f32.mrf.mxu1  ;;  %v3338_v17 = vrot.slane %v3336_v25, 3 }
 0x27a   : > { %11593 = vst [vmem:[#allocation39_spill] sm:$0xff] %v8869_v21  ;;  %v1933_v10 = vpop.f32.mrf.mxu2  ;;  %v1435_v27 = vpop.f32.mrf.mxu0 }
 0x27b   : > { %v1934_v8 = vadd.f32 %v1933_v10, %v1595_v54  ;;  %v3327_v10 = vshrl.u32 %v8821_v11, 16  ;;  %v1598_v62 = vadd.f32 %v8162_v37, %v1435_v27  ;;  %v2468_v11 = vsel %vm2442_vm3, %v2463_v59, %v2467_v40  ;;  %v7093_v27 = vld [vmem:[%s7919_s14 + $0xc0] sm:$0xf] }
 0x27c   : > { %v3341_v37 = vrot.slane %v3339_v15, 4 }
 0x27d   : > { %3980 = vmatmul.bf16.gmra.mxu0 %v3316_v46  ;;  %v3329_v18 = vrot.slane %v3327_v10, 3  ;;  %v7759_v46 = vld [vmem:[%s7919_s14 + $0xc4] sm:$0xf0] }
 0x27e   : > { %v3342_v56 = vor.u32 %v3341_v37, %v3338_v17  ;;  %v8903_v44 = vor.u32 %v7759_v46, %v7093_v27 }
 0x27f   : > { %7401 = vmatmul.msk.bf16.gmra.mxu2 %vm1183_vm2, %v3325_v2  ;;  %v2090_v5 = vpop.f32.mrf.mxu3 }
 0x280   : > { %v8887_v34 = vadd.f32 %v2090_v5, %v1929_v38  ;;  %v3333_v38 = vor.u32 %v3332_v19, %v3329_v18  ;;  %v7754_v5 = vld [vmem:[%s7919_s14 + $0xa4] sm:$0xf]  ;;  %v3348_v18 = vshll.u32 %v8845_v36, 16 }
 0x281   : > { %v8889_v54 = vpop.f32.mrf.mxu1 }
 0x282   : > { %11594 = vst [vmem:[#allocation40_spill] sm:$0xff] %v8887_v34  ;;  %v1936_v61 = vpop.f32.mrf.mxu2  ;;  %v1437_v1 = vpop.f32.mrf.mxu0  ;;  %v3334_v15 = vsel %vm3183_vm4, %v3315_v58, %v3333_v38 }
 0x283   : > { %v1937_v49 = vadd.f32 %v1936_v61, %v1598_v62  ;;  %v1600_v2 = vadd.f32 %v8171_v50, %v1437_v1  ;;  %v2485_v50 = vrot.slane %v8903_v44, 3  ;;  %v3345_v1 = vshrl.u32 %v8845_v36, 16 }
 0x284   : > { %2820 = vmatmul.bf16.gmra.mxu1 %v2482_v0  ;;  %7296 = vmatmul.msk.bf16.gmra.mxu3 %vm1183_vm2, %v2468_v11  ;;  %v3343_v0 = vsel %vm3183_vm4, %v3324_v13, %v3342_v56  ;;  %v8907_v11 = vor.u32 %v7754_v5, %v7079_v55 }
 0x285   : > { %v3347_v36 = vrot.slane %v3345_v1, 3 }
 0x286   : > { %v3354_v19 = vshrl.u32 %v8907_v11, 16  ;;  %v3357_v17 = vshll.u32 %v8907_v11, 16 }
 0x287   : > { %v2093_v62 = vpop.f32.mrf.mxu3 }
 0x288   : > { %v8899_v61 = vadd.f32 %v2093_v62, %v1932_v4  ;;  %v2471_v4 = vrot.slane %v8849_v26, 3  ;;  %v2486_v26 = vsel %vm2442_vm3, %v2481_v7, %v2485_v50  ;;  %v3350_v62 = vrot.slane %v3348_v18, 4 }
 0x289   : > { %v8901_v10 = vpop.f32.mrf.mxu1  ;;  %v3356_v5 = vrot.slane %v3354_v19, 3  ;;  %v3359_v55 = vrot.slane %v3357_v17, 4 }
 0x28a   : > { %11595 = vst [vmem:[#allocation41_spill] sm:$0xff] %v8899_v61  ;;  %v1938_v59 = vpop.f32.mrf.mxu2  ;;  %v1440_v25 = vpop.f32.mrf.mxu0  ;;  %v2472_v46 = vsel %vm2442_vm3, %v2467_v40, %v2471_v4 }
 0x28b   : > { %v1939_v34 = vadd.f32 %v1938_v59, %v1600_v2  ;;  %v3351_v59 = vor.u32 %v3350_v62, %v3347_v36  ;;  %v7101_v25 = vld [vmem:[%s7919_s14 + $0xd0] sm:$0xf] }
 0x28d   : > { %3985 = vmatmul.bf16.gmra.mxu0 %v3334_v15  ;;  %v7761_v15 = vld [vmem:[%s7919_s14 + $0xd4] sm:$0xf0]  ;;  %v3352_v18 = vsel %vm3183_vm4, %v3333_v38, %v3351_v59 }
 0x28e   : > { %v8931_v40 = vor.u32 %v7761_v15, %v7101_v25 }
 0x28f   : > { %7402 = vmatmul.msk.bf16.gmra.mxu2 %vm1183_vm2, %v3343_v0  ;;  %v2095_v58 = vpop.f32.mrf.mxu3 }
 0x290   : > { %v8916_v13 = vadd.f32 %v2095_v58, %v1934_v8  ;;  %v3360_v8 = vor.u32 %v3359_v55, %v3356_v5  ;;  %v7756_v58 = vld [vmem:[%s7919_s14 + $0xb4] sm:$0xf] }
 0x291   : > { %v8918_v27 = vpop.f32.mrf.mxu1 }
 0x292   : > { %11596 = vst [vmem:[#allocation42_spill] sm:$0xff] %v8916_v13  ;;  %v1941_v37 = vpop.f32.mrf.mxu2  ;;  %v1441_v2 = vpop.f32.mrf.mxu0  ;;  %v3361_v19 = vsel %vm3183_vm4, %v3342_v56, %v3360_v8 }
 0x293   : > { %v7087_v37 = vld [vmem:[%s7919_s14 + $0xb8] sm:$0xf0]  ;;  %v3366_v2 = vshll.u32 %v8873_v6, 16 }
 0x294   : > { %2825 = vmatmul.bf16.gmra.mxu1 %v2486_v26  ;;  %7297 = vmatmul.msk.bf16.gmra.mxu3 %vm1183_vm2, %v2472_v46  ;;  %v8935_v17 = vor.u32 %v7756_v58, %v7087_v37  ;;  %v2489_v26 = vrot.slane %v8931_v40, 3  ;;  %v3363_v46 = vshrl.u32 %v8873_v6, 16 }
 0x295   : > { %v3368_v58 = vrot.slane %v3366_v2, 4 }
 0x296   : > { %v3372_v36 = vshrl.u32 %v8935_v17, 16  ;;  %v3375_v62 = vshll.u32 %v8935_v17, 16 }
 0x297   : > { %v2098_v0 = vpop.f32.mrf.mxu3 }
 0x298   : > { %v8927_v13 = vadd.f32 %v2098_v0, %v1937_v49  ;;  %v2475_v49 = vrot.slane %v8877_v28, 3  ;;  %v2490_v28 = vsel %vm2442_vm3, %v2485_v50, %v2489_v26  ;;  %v3365_v0 = vrot.slane %v3363_v46, 3 }
 0x299   : > { %v8929_v61 = vpop.f32.mrf.mxu1  ;;  %v3374_v37 = vrot.slane %v3372_v36, 3 }
 0x29a   : > { %11597 = vst [vmem:[#allocation43_spill] sm:$0xff] %v8927_v13  ;;  %v1942_v7 = vpop.f32.mrf.mxu2  ;;  %v3951_v1 = vpop.f32.mrf.mxu0  ;;  %v2476_v15 = vsel %vm2442_vm3, %v2471_v4, %v2475_v49 }
 0x29b   : > { %v3377_v7 = vrot.slane %v3375_v62, 4 }
 0x29d   : > { %3990 = vmatmul.bf16.gmra.mxu0 %v3352_v18  ;;  %v3378_v18 = vor.u32 %v3377_v7, %v3374_v37 }
 0x29f   : > { %7403 = vmatmul.msk.bf16.gmra.mxu2 %vm1183_vm2, %v3361_v19  ;;  %v2100_v38 = vpop.f32.mrf.mxu3  ;;  %v7109_v19 = vld [vmem:[%s7919_s14 + $0xe0] sm:$0xf]  ;;  %v3379_v36 = vsel %vm3183_vm4, %v3360_v8, %v3378_v18 }
 0x2a0   : > { %v8944_v56 = vadd.f32 %v2100_v38, %v1939_v34  ;;  %v3369_v34 = vor.u32 %v3368_v58, %v3365_v0 }
 0x2a1   : > { %v8946_v25 = vpop.f32.mrf.mxu1 }
 0x2a2   : > { %11598 = vst [vmem:[#allocation44_spill] sm:$0xff] %v8944_v56  ;;  %v4113_v5 = vpop.f32.mrf.mxu2  ;;  %v3953_v6 = vpop.f32.mrf.mxu0  ;;  %v7095_v56 = vld [vmem:[%s7919_s14 + $0xc8] sm:$0xf0]  ;;  %v3370_v2 = vsel %vm3183_vm4, %v3351_v59, %v3369_v34 }
 0x2a3   : > { %v4114_v55 = vadd.f32 %v4113_v5, %v3951_v1  ;;  %v7763_v1 = vld [vmem:[%s7919_s14 + $0xe4] sm:$0xf0]  ;;  %v7758_v5 = vld [vmem:[%s7919_s14 + $0xc4] sm:$0xf] }
 0x2a4   : > { %2830 = vmatmul.bf16.gmra.mxu1 %v2490_v28  ;;  %7298 = vmatmul.msk.bf16.gmra.mxu3 %vm1183_vm2, %v2476_v15  ;;  %v8959_v4 = vor.u32 %v7763_v1, %v7109_v19  ;;  %v8965_v62 = vor.u32 %v7758_v5, %v7095_v56  ;;  %v3381_v15 = vshrl.u32 %v8903_v44, 16 }
 0x2a6   : > { %v2493_v28 = vrot.slane %v8959_v4, 3  ;;  %v3390_v0 = vshrl.u32 %v8965_v62, 16  ;;  %v3393_v59 = vshll.u32 %v8965_v62, 16 }
 0x2a7   : > { %v2103_v38 = vpop.f32.mrf.mxu3 }
 0x2a8   : > { %v2494_v37 = vsel %vm2442_vm3, %v2489_v26, %v2493_v28  ;;  %v3392_v1 = vrot.slane %v3390_v0, 3  ;;  %v3395_v38 = vrot.slane %v3393_v59, 4 }
 0x2a9   : > { %v8957_v50 = vpop.f32.mrf.mxu1 }
 0x2aa   : > { %v4115_v13 = vpop.f32.mrf.mxu2  ;;  %v8961_v46 = vpop.f32.mrf.mxu0 }
 0x2ab   : > { %v8955_v21 = vadd.f32 %v4115_v13, %v3953_v6  ;;  %v2479_v13 = vrot.slane %v8907_v11, 3  ;;  %v3384_v6 = vshll.u32 %v8903_v44, 16  ;;  %v3383_v44 = vrot.slane %v3381_v15, 3 }
 0x2ad   : > { %3995 = vmatmul.bf16.gmra.mxu0 %v3370_v2  ;;  %v2480_v11 = vsel %vm2442_vm3, %v2475_v49, %v2479_v13  ;;  %v3386_v19 = vrot.slane %v3384_v6, 4  ;;  %v3396_v2 = vor.u32 %v3395_v38, %v3392_v1 }
 0x2af   : > { %7404 = vmatmul.msk.bf16.gmra.mxu2 %vm1183_vm2, %v3379_v36  ;;  %v2104_v8 = vpop.f32.mrf.mxu3  ;;  %v3387_v5 = vor.u32 %v3386_v19, %v3383_v44  ;;  %v7117_v36 = vld [vmem:[%s7919_s14 + $0xf0] sm:$0xf]  ;;  %v3399_v19 = vshrl.u32 %v8931_v40, 16 }
 0x2b0   : > { %v7765_v8 = vld [vmem:[%s7919_s14 + $0xf4] sm:$0xf0] }
 0x2b1   : > { %v8976_v58 = vpop.f32.mrf.mxu1  ;;  %v8992_v15 = vor.u32 %v7765_v8, %v7117_v36  ;;  %v3388_v59 = vsel %vm3183_vm4, %v3369_v34, %v3387_v5 }
 0x2b2   : > { %v8974_v56 = vpop.f32.mrf.mxu2  ;;  %v8980_v7 = vpop.f32.mrf.mxu0 }
 0x2b4   : > { %2835 = vmatmul.bf16.gmra.mxu1 %v2494_v37  ;;  %7299 = vmatmul.msk.bf16.gmra.mxu3 %vm1183_vm2, %v2480_v11  ;;  %v3397_v37 = vsel %vm3183_vm4, %v3378_v18, %v3396_v2  ;;  %v8999_v11 = vor.u32 %v7760_v14, %v7103_v30 }
 0x2b6   : > { %v3408_v1 = vshrl.u32 %v8999_v11, 16  ;;  %v3411_v34 = vshll.u32 %v8999_v11, 16 }
 0x2b7   : > { %v2938_v39 = vpop.f32.mrf.mxu3 }
 0x2b8   : > { %v2939_v26 = vadd.f32 %v2938_v39, %v8860_v12  ;;  %v2497_v39 = vrot.slane %v8992_v15, 3  ;;  %v2483_v12 = vrot.slane %v8935_v17, 3 }
 0x2b9   : > { %v8990_v49 = vpop.f32.mrf.mxu1 }
 0x2ba   : > { %v8988_v63 = vpop.f32.mrf.mxu2  ;;  %v3091_v6 = vadd.f32 %v2939_v26, %v8202_v33  ;;  %v8995_v0 = vpop.f32.mrf.mxu0  ;;  %v3402_v33 = vshll.u32 %v8931_v40, 16  ;;  %v2498_v38 = vsel %vm2442_vm3, %v2493_v28, %v2497_v39  ;;  %v2484_v17 = vsel %vm2442_vm3, %v2479_v13, %v2483_v12 }
 0x2bb   : > { %v3401_v40 = vrot.slane %v3399_v19, 3  ;;  %v7111_v19 = vld [vmem:[%s7919_s14 + $0xe8] sm:$0xf0] }
 0x2bc   : > { %v9001_v44 = vadd.f32 %v4114_v55, %v3091_v6  ;;  %v3404_v36 = vrot.slane %v3402_v33, 4  ;;  %v3410_v6 = vrot.slane %v3408_v1, 3 }
 0x2bd   : > { %4000 = vmatmul.bf16.gmra.mxu0 %v3388_v59 }
 0x2bf   : > { %7405 = vmatmul.msk.bf16.gmra.mxu2 %vm1183_vm2, %v3397_v37  ;;  %v2940_v18 = vpop.f32.mrf.mxu3  ;;  %v3405_v37 = vor.u32 %v3404_v36, %v3401_v40  ;;  %v9042_v36 = vor.u32 %v7762_v23, %v7111_v19 }
 0x2c0   : > { %v2941_v30 = vadd.f32 %v2940_v18, %v8871_v35  ;;  %v3413_v35 = vrot.slane %v3411_v34, 4  ;;  %v7125_v18 = vld [vmem:[%s7919_s14 + $0x100] sm:$0xf]  ;;  %v4119_v34 = vadd.f32 %v8974_v56, %v8961_v46  ;;  %v3420_v46 = vshll.u32 %v8959_v4, 16 }
 0x2c1   : > { %v9013_v55 = vpop.f32.mrf.mxu1  ;;  %v3406_v1 = vsel %vm3183_vm4, %v3387_v5, %v3405_v37  ;;  %v3429_v56 = vshll.u32 %v9042_v36, 16 }
 0x2c2   : > { %v9011_v14 = vpop.f32.mrf.mxu2  ;;  %v3092_v8 = vadd.f32 %v2941_v30, %v8212_v53  ;;  %v9018_v26 = vpop.f32.mrf.mxu0  ;;  %v3414_v28 = vor.u32 %v3413_v35, %v3410_v6  ;;  %v3422_v19 = vrot.slane %v3420_v46, 4 }
 0x2c4   : > { %v9021_v59 = vadd.f32 %v8955_v21, %v3092_v8  ;;  %2840 = vmatmul.bf16.gmra.mxu1 %v2498_v38  ;;  %7300 = vmatmul.msk.bf16.gmra.mxu3 %vm1183_vm2, %v2484_v17  ;;  %v9034_v21 = vor.u32 %v7767_v47, %v7125_v18  ;;  %v3415_v40 = vsel %vm3183_vm4, %v3396_v2, %v3414_v28  ;;  %v2487_v47 = vrot.slane %v8965_v62, 3 }
 0x2c5   : > { %v3417_v8 = vshrl.u32 %v8959_v4, 16  ;;  %v4121_v4 = vadd.f32 %v8988_v63, %v8980_v7 }
 0x2c6   : > { %v2501_v5 = vrot.slane %v9034_v21, 3  ;;  %v2488_v62 = vsel %vm2442_vm3, %v2483_v12, %v2487_v47  ;;  %v7769_v12 = vld [vmem:[%s7919_s14 + $0x114] sm:$0xf0] }
 0x2c7   : > { %v2943_v13 = vpop.f32.mrf.mxu3 }
 0x2c8   : > { %v2944_v33 = vadd.f32 %v2943_v13, %v8889_v54  ;;  %v2502_v18 = vsel %vm2442_vm3, %v2497_v39, %v2501_v5  ;;  %v3419_v13 = vrot.slane %v3417_v8, 3  ;;  %v7133_v39 = vld [vmem:[%s7919_s14 + $0x110] sm:$0xf] }
 0x2c9   : > { %v9031_v30 = vpop.f32.mrf.mxu1  ;;  %v9076_v46 = vor.u32 %v7769_v12, %v7133_v39 }
 0x2ca   : > { %v9029_v53 = vpop.f32.mrf.mxu2  ;;  %v3093_v38 = vadd.f32 %v2944_v33, %v8227_v3  ;;  %v9039_v17 = vpop.f32.mrf.mxu0  ;;  %v3426_v3 = vshrl.u32 %v9042_v36, 16 }
 0x2cb   : > { %v2505_v39 = vrot.slane %v9076_v46, 3 }
 0x2cc   : > { %v9044_v54 = vadd.f32 %v4119_v34, %v3093_v38  ;;  %v3431_v34 = vrot.slane %v3429_v56, 4  ;;  %v7119_v56 = vld [vmem:[%s7919_s14 + $0xf8] sm:$0xf0] }
 0x2cd   : > { %4005 = vmatmul.bf16.gmra.mxu0 %v3406_v1 }
 0x2ce   : > { %v4365_v63 = vrot.slane %v9044_v54, 6 }
 0x2cf   : > { %7406 = vmatmul.msk.bf16.gmra.mxu2 %vm1183_vm2, %v3415_v40  ;;  %v2945_v2 = vpop.f32.mrf.mxu3  ;;  %v9070_v40 = vor.u32 %v3422_v19, %v3419_v13 }
 0x2d0   : > { %v2946_v23 = vadd.f32 %v2945_v2, %v8901_v10  ;;  %v3428_v10 = vrot.slane %v3426_v3, 3  ;;  %v7764_v3 = vld [vmem:[%s7919_s14 + $0xf4] sm:$0xf] }
 0x2d1   : > { %v9056_v35 = vpop.f32.mrf.mxu1  ;;  %v3424_v19 = vsel %vm3183_vm4, %v3405_v37, %v9070_v40  ;;  %v2491_v37 = vrot.slane %v8999_v11, 3 }
 0x2d2   : > { %v9054_v6 = vpop.f32.mrf.mxu2  ;;  %v3094_v33 = vadd.f32 %v2946_v23, %v8237_v22  ;;  %v9063_v1 = vpop.f32.mrf.mxu0  ;;  %v9074_v7 = vor.u32 %v3431_v34, %v3428_v10  ;;  %v9099_v34 = vor.u32 %v7764_v3, %v7119_v56  ;;  %v2506_v3 = vsel %vm2442_vm3, %v2501_v5, %v2505_v39 }
 0x2d4   : > { %v9065_v38 = vadd.f32 %v4121_v4, %v3094_v33  ;;  %2845 = vmatmul.bf16.gmra.mxu1 %v2502_v18  ;;  %7301 = vmatmul.msk.bf16.gmra.mxu3 %vm1183_vm2, %v2488_v62  ;;  %v4124_v4 = vadd.f32 %v9011_v14, %v8995_v0  ;;  %v3438_v0 = vshll.u32 %v8992_v15, 16  ;;  %v3444_v14 = vshrl.u32 %v9099_v34, 16 }
 0x2d6   : > { %v4366_v22 = vrot.slane %v9065_v38, 6  ;;  %v3440_v5 = vrot.slane %v3438_v0, 4 }
 0x2d7   : > { %v2948_v8 = vpop.f32.mrf.mxu3 }
 0x2d8   : > { %v9081_v2 = vsel %vm4364_vm5, %v4365_v63, %v4366_v22  ;;  %v2949_v23 = vadd.f32 %v2948_v8, %v8918_v27  ;;  %v3433_v27 = vsel %vm3183_vm4, %v3414_v28, %v9074_v7  ;;  %v3435_v63 = vshrl.u32 %v8992_v15, 16 }
 0x2d9   : > { %v9088_v13 = vpop.f32.mrf.mxu1  ;;  %v3447_v8 = vshll.u32 %v9099_v34, 16  ;;  %v3446_v15 = vrot.slane %v3444_v14, 3  ;;  %v7766_v14 = vld [vmem:[%s7919_s14 + $0x104] sm:$0xf] }
 0x2da   : > { %v9084_v18 = vpop.f32.mrf.mxu2  ;;  %v3095_v33 = vadd.f32 %v2949_v23, %v8249_v41  ;;  %v9095_v10 = vpop.f32.mrf.mxu0 }
 0x2db   : > { %v3449_v62 = vrot.slane %v3447_v8, 4  ;;  %v7127_v8 = vld [vmem:[%s7919_s14 + $0x108] sm:$0xf0] }
 0x2dc   : > { %v4270_v12 = vadd.f32 %v4124_v4, %v3095_v33  ;;  %v2492_v33 = vsel %vm2442_vm3, %v2487_v47, %v2491_v37 }
 0x2dd   : > { %4010 = vmatmul.bf16.gmra.mxu0 %v3424_v19  ;;  %v9144_v0 = vor.u32 %v3449_v62, %v3446_v15 }
 0x2de   : > { %v4368_v41 = vrot.slane %v4270_v12, 6 }
 0x2df   : > { %7407 = vmatmul.msk.bf16.gmra.mxu2 %vm1183_vm2, %v3433_v27  ;;  %v2950_v28 = vpop.f32.mrf.mxu3  ;;  %v3437_v27 = vrot.slane %v3435_v63, 3 }
 0x2e0   : > { %v9112_v56 = vsel %vm4364_vm5, %v4366_v22, %v4368_v41  ;;  %v2951_v23 = vadd.f32 %v2950_v28, %v8929_v61  ;;  %v11553_v22 = vmov 0.0   ;;  %v4126_v61 = vadd.f32 %v9029_v53, %v9018_v26  ;;  %v7771_v26 = vld [vmem:[%s7919_s14 + $0x124] sm:$0xf0] }
 0x2e1   : > { %v9119_v4 = vpop.f32.mrf.mxu1  ;;  %4887 = vst.msk [vmem:[#allocation2] sm:$0xff] %vm4886_vm6, %v11553_v22  ;;  %v9142_v63 = vor.u32 %v3440_v5, %v3437_v27  ;;  %v9168_v5 = vor.u32 %v7766_v14, %v7127_v8  ;;  %v7426_v14 = vld [vmem:[%s11547_s2 + $0x10] sm:$0xff] }
 0x2e2   : > { %v9115_v19 = vpop.f32.mrf.mxu2  ;;  %v3096_v12 = vadd.f32 %v2951_v23, %v8265_v60  ;;  %v9129_v28 = vpop.f32.mrf.mxu0  ;;  %4888 = vst.msk [vmem:[#allocation2 + $0x8] sm:$0xff] %vm4886_vm6, %v11553_v22  ;;  %v7141_v60 = vld [vmem:[%s7919_s14 + $0x120] sm:$0xf]  ;;  %5018 = vmatpush.msra.mxu1 %v7426_v14 }
 0x2e3   : > { %4889 = vst.msk [vmem:[#allocation2 + $0x10] sm:$0xff] %vm4886_vm6, %v11553_v22  ;;  %v9152_v23 = vor.u32 %v7771_v26, %v7141_v60  ;;  %v3442_v60 = vsel %vm3183_vm4, %v9070_v40, %v9142_v63  ;;  %v3451_v26 = vsel %vm3183_vm4, %v9074_v7, %v9144_v0  ;;  %v3456_v7 = vshll.u32 %v9034_v21, 16 }
 0x2e4   : > { %v4271_v47 = vadd.f32 %v4126_v61, %v3096_v12  ;;  %2850 = vmatmul.bf16.gmra.mxu1 %v2506_v3  ;;  %7302 = vmatmul.msk.bf16.gmra.mxu3 %vm1183_vm2, %v2492_v33  ;;  %4890 = vst.msk [vmem:[#allocation2 + $0x18] sm:$0xff] %vm4886_vm6, %v11553_v22  ;;  %v3462_v8 = vshrl.u32 %v9168_v5, 16 }
 0x2e5   : > { %4891 = vst.msk [vmem:[#allocation2 + $0x20] sm:$0xff] %vm4886_vm6, %v11553_v22 }
 0x2e6   : > { %v4370_v53 = vrot.slane %v4271_v47, 6  ;;  %4892 = vst.msk [vmem:[#allocation2 + $0x28] sm:$0xff] %vm4886_vm6, %v11553_v22 }
 0x2e7   : > { %v2953_v3 = vpop.f32.mrf.mxu3  ;;  %4893 = vst.msk [vmem:[#allocation2 + $0x30] sm:$0xff] %vm4886_vm6, %v11553_v22 }
 0x2e8   : > { %v9155_v33 = vsel %vm4364_vm5, %v4368_v41, %v4370_v53  ;;  %v2954_v61 = vadd.f32 %v2953_v3, %v8946_v25  ;;  %4894 = vst.msk [vmem:[#allocation2 + $0x38] sm:$0xff] %vm4886_vm6, %v11553_v22  ;;  %v4129_v41 = vadd.f32 %v9054_v6, %v9039_v17  ;;  %v2495_v17 = vrot.slane %v9042_v36, 3 }
 0x2e9   : > { %v9164_v15 = vpop.f32.mrf.mxu1  ;;  %4895 = vst.msk [vmem:[#allocation2 + $0x40] sm:$0xff] %vm4886_vm6, %v11553_v22  ;;  %v3453_v6 = vshrl.u32 %v9034_v21, 16  ;;  %v3465_v3 = vshll.u32 %v9168_v5, 16  ;;  %v11602_v11 = vmax.f32 %v9044_v54, %v9155_v33 }
 0x2ea   : > { %v9158_v27 = vpop.f32.mrf.mxu2  ;;  %v3097_v25 = vadd.f32 %v2954_v61, %v8277_v43  ;;  %v9173_v12 = vpop.f32.mrf.mxu0  ;;  %4896 = vst.msk [vmem:[#allocation2 + $0x48] sm:$0xff] %vm4886_vm6, %v11553_v22  ;;  %v11552_v43 = vrot.slane %v9152_v23, 3  ;;  %v4516_v61 = vrot.slane %v4271_v47, 4  ;;  %v2496_v47 = vsel %vm2442_vm3, %v2491_v37, %v2495_v17 }
 0x2eb   : > { %4897 = vst.msk [vmem:[#allocation2 + $0x50] sm:$0xff] %vm4886_vm6, %v11553_v22  ;;  %v11599_v37 = vmax.f32 %v9001_v44, %v9081_v2  ;;  %v7149_v44 = vld [vmem:[%s7919_s14 + $0x130] sm:$0xf]  ;;  %v7773_v2 = vld [vmem:[%s7919_s14 + $0x134] sm:$0xf0] }
 0x2ec   : > { %v4272_v40 = vadd.f32 %v4129_v41, %v3097_v25  ;;  %4898 = vst.msk [vmem:[#allocation2 + $0x58] sm:$0xff] %vm4886_vm6, %v11553_v22  ;;  %v2510_v21 = vsel %vm2442_vm3, %v2505_v39, %v11552_v43  ;;  %v3455_v25 = vrot.slane %v3453_v6, 3  ;;  %v3458_v43 = vrot.slane %v3456_v7, 4 }
 0x2ed   : > { %4015 = vmatmul.bf16.gmra.mxu0 %v3442_v60  ;;  %4899 = vst.msk [vmem:[#allocation2 + $0x60] sm:$0xff] %vm4886_vm6, %v11553_v22 }
 0x2ee   : > { %v4372_v14 = vrot.slane %v4272_v40, 6  ;;  %v4517_v62 = vrot.slane %v4272_v40, 4  ;;  %4900 = vst.msk [vmem:[#allocation2 + $0x68] sm:$0xff] %vm4886_vm6, %v11553_v22 }
 0x2ef   : > { %7408 = vmatmul.msk.bf16.gmra.mxu2 %vm1183_vm2, %v3451_v26  ;;  %v2955_v41 = vpop.f32.mrf.mxu3  ;;  %4901 = vst.msk [vmem:[#allocation2 + $0x70] sm:$0xff] %vm4886_vm6, %v11553_v22 }
 0x2f0   : > { %v9214_v60 = vsel %vm4364_vm5, %v4370_v53, %v4372_v14  ;;  %v4518_v26 = vsel %vm1277_vm0, %v4516_v61, %v4517_v62  ;;  %v2956_v40 = vadd.f32 %v2955_v41, %v8957_v50  ;;  %4902 = vst.msk [vmem:[#allocation2 + $0x78] sm:$0xff] %vm4886_vm6, %v11553_v22  ;;  %v3464_v50 = vrot.slane %v3462_v8, 3 }
 0x2f1   : > { %v4616_v53 = vmax.f32 %v11599_v37, %v4518_v26  ;;  %4903 = vst.msk [vmem:[#allocation2 + $0x80] sm:$0xff] %vm4886_vm6, %v11553_v22  ;;  %v9229_v6 = vpop.f32.mrf.mxu1  ;;  %v3467_v61 = vrot.slane %v3465_v3, 4  ;;  %v4131_v14 = vadd.f32 %v9084_v18, %v9063_v1  ;;  %v9245_v1 = vor.u32 %v3458_v43, %v3455_v25  ;;  %v7768_v3 = vld [vmem:[%s7919_s14 + $0x114] sm:$0xf] }
 0x2f2   : > { %v9220_v39 = vpop.f32.mrf.mxu2  ;;  %v3098_v7 = vadd.f32 %v2956_v40, %v8290_v16  ;;  %4904 = vst.msk [vmem:[#allocation2 + $0x88] sm:$0xff] %vm4886_vm6, %v11553_v22  ;;  %v9236_v41 = vpop.f32.mrf.mxu0  ;;  %v9251_v8 = vor.u32 %v7773_v2, %v7149_v44  ;;  %v7135_v40 = vld [vmem:[%s7919_s14 + $0x118] sm:$0xf0] }
 0x2f3   : > { %4905 = vst.msk [vmem:[#allocation2 + $0x90] sm:$0xff] %vm4886_vm6, %v11553_v22  ;;  %v9249_v16 = vor.u32 %v3467_v61, %v3464_v50  ;;  %v3460_v43 = vsel %vm3183_vm4, %v9142_v63, %v9245_v1  ;;  %v9270_v61 = vor.u32 %v7768_v3, %v7135_v40  ;;  %v3474_v3 = vshll.u32 %v9076_v46, 16 }
 0x2f4   : > { %v4273_v26 = vadd.f32 %v4131_v14, %v3098_v7  ;;  %4906 = vst.msk [vmem:[#allocation2 + $0x98] sm:$0xff] %vm4886_vm6, %v11553_v22  ;;  %2855 = vmatmul.bf16.gmra.mxu1 %v2510_v21  ;;  %7303 = vmatmul.msk.bf16.gmra.mxu3 %vm1183_vm2, %v2496_v47  ;;  %v11600_v47 = vmax.f32 %v9021_v59, %v9112_v56  ;;  %v11554_v63 = vrot.slane %v9251_v8, 3  ;;  %v2499_v59 = vrot.slane %v9099_v34, 3  ;;  %v7451_v34 = vld [vmem:[%s11547_s2 + $0x30] sm:$0xff] }
 0x2f5   : > { %4907 = vst.msk [vmem:[#allocation2 + $0xa0] sm:$0xff] %vm4886_vm6, %v11553_v22  ;;  %v4679_v56 = vrot.slane %v4616_v53, 1  ;;  %v3483_v40 = vshll.u32 %v9270_v61, 16  ;;  %5210 = vmatpush.msra.mxu2 %v7451_v34 }
 0x2f6   : > { %v4519_v18 = vrot.slane %v4273_v26, 4  ;;  %v4783_v26 = vrot.slane %v4616_v53, 2 }
 0x2f7   : > { %v2958_v37 = vpop.f32.mrf.mxu3  ;;  %v3485_v36 = vrot.slane %v3483_v40, 4 }
 0x2f8   : > { %v4520_v14 = vsel %vm1277_vm0, %v4517_v62, %v4519_v18  ;;  %v2959_v21 = vadd.f32 %v2958_v37, %v8976_v58  ;;  %v3469_v62 = vsel %vm3183_vm4, %v9144_v0, %v9249_v16  ;;  %v4134_v58 = vadd.f32 %v9115_v19, %v9095_v10 }
 0x2f9   : > { %v4617_v25 = vmax.f32 %v11600_v47, %v4520_v14  ;;  %v9265_v50 = vpop.f32.mrf.mxu1  ;;  %v3471_v0 = vshrl.u32 %v9076_v46, 16  ;;  %v3480_v19 = vshrl.u32 %v9270_v61, 16 }
 0x2fa   : > { %v9257_v7 = vpop.f32.mrf.mxu2  ;;  %v3099_v44 = vadd.f32 %v2959_v21, %v8302_v52  ;;  %v9275_v2 = vpop.f32.mrf.mxu0 }
 0x2fb   : > { %v4680_v37 = vrot.slane %v4617_v25, 1  ;;  %v4784_v14 = vrot.slane %v4617_v25, 2 }
 0x2fc   : > { %v9279_v47 = vadd.f32 %v4134_v58, %v3099_v44  ;;  %v11601_v44 = vrot.slane %v9152_v23, 3 }
 0x2fd   : > { %v4681_v10 = vsel %vm4678_vm7, %v4679_v56, %v4680_v37  ;;  %v4785_v52 = vsel %vm4782_vm8, %v4783_v26, %v4784_v14  ;;  %4020 = vmatmul.bf16.gmra.mxu0 %v3460_v43  ;;  %v2500_v43 = vsel %vm2442_vm3, %v2495_v17, %v2499_v59  ;;  %v4136_v17 = vadd.f32 %v9158_v27, %v9129_v28 }
 0x2fe   : > { %v4758_v21 = vmax.f32 %v4616_v53, %v4681_v10  ;;  %v4521_v22 = vrot.slane %v9279_v47, 4  ;;  %v2514_v46 = vsel %vm2442_vm3, %v11601_v44, %v11554_v63  ;;  %v3473_v10 = vrot.slane %v3471_v0, 3 }
 0x2ff   : > { %7409 = vmatmul.msk.bf16.gmra.mxu2 %vm1183_vm2, %v3469_v62  ;;  %v2960_v58 = vpop.f32.mrf.mxu3  ;;  %v3476_v44 = vrot.slane %v3474_v3, 4  ;;  %v3482_v63 = vrot.slane %v3480_v19, 3 }
 0x300   : > { %v4862_v62 = vmax.f32 %v4758_v21, %v4785_v52  ;;  %v4522_v56 = vsel %vm1277_vm0, %v4519_v18, %v4521_v22  ;;  %v2961_v53 = vadd.f32 %v2960_v58, %v8990_v49  ;;  %v7775_v52 = vld [vmem:[%s7919_s14 + $0x144] sm:$0xf0]  ;;  %v7770_v58 = vld [vmem:[%s7919_s14 + $0x124] sm:$0xf] }
 0x301   : > { %v4618_v45 = vmax.f32 %v11602_v11, %v4522_v56  ;;  %v9306_v31 = vpop.f32.mrf.mxu1  ;;  %v9319_v28 = vor.u32 %v3476_v44, %v3473_v10  ;;  %v9321_v27 = vor.u32 %v3485_v36, %v3482_v63  ;;  %v11603_v63 = vmax.f32 %v9065_v38, %v9214_v60 }
 0x302   : > { %v9301_v26 = vpop.f32.mrf.mxu2  ;;  %4908 = vst.msk [vmem:[#allocation2] sm:$0xff] %vm4886_vm6, %v4862_v62  ;;  %v3100_v49 = vadd.f32 %v2961_v53, %v8312_v9  ;;  %v9312_v18 = vpop.f32.mrf.mxu0  ;;  %v7157_v9 = vld [vmem:[%s7919_s14 + $0x140] sm:$0xf]  ;;  %v7143_v62 = vld [vmem:[%s7919_s14 + $0x128] sm:$0xf0]  ;;  %v4139_v44 = vadd.f32 %v9220_v39, %v9173_v12 }
 0x303   : > { %v4682_v54 = vrot.slane %v4618_v45, 1  ;;  %v4786_v33 = vrot.slane %v4618_v45, 2  ;;  %v9354_v36 = vor.u32 %v7770_v58, %v7143_v62  ;;  %v11604_v62 = vrot.slane %v9251_v8, 3 }
 0x304   : > { %v9314_v11 = vadd.f32 %v4136_v17, %v3100_v49  ;;  %2860 = vmatmul.bf16.gmra.mxu1 %v2514_v46  ;;  %7304 = vmatmul.msk.bf16.gmra.mxu3 %vm1183_vm2, %v2500_v43 }
 0x305   : > { %v4683_v0 = vsel %vm4678_vm7, %v4680_v37, %v4682_v54  ;;  %v4787_v3 = vsel %vm4782_vm8, %v4784_v14, %v4786_v33  ;;  %v9332_v14 = vor.u32 %v7775_v52, %v7157_v9  ;;  %v3498_v52 = vshrl.u32 %v9354_v36, 16 }
 0x306   : > { %v4759_v19 = vmax.f32 %v4617_v25, %v4683_v0  ;;  %v4523_v40 = vrot.slane %v9314_v11, 4  ;;  %v3478_v25 = vsel %vm3183_vm4, %v9245_v1, %v9319_v28  ;;  %v2503_v0 = vrot.slane %v9168_v5, 3 }
 0x307   : > { %v2963_v21 = vpop.f32.mrf.mxu3  ;;  %v2517_v49 = vrot.slane %v9332_v14, 3 }
 0x308   : > { %v4863_v56 = vmax.f32 %v4759_v19, %v4787_v3  ;;  %v4524_v46 = vsel %vm1277_vm0, %v4521_v22, %v4523_v40  ;;  %v2964_v43 = vadd.f32 %v2963_v21, %v9013_v55  ;;  %v3487_v22 = vsel %vm3183_vm4, %v9249_v16, %v9321_v27  ;;  %v4960_v55 = vld [vmem:[%s11547_s2] sm:$0xff] }
 0x309   : > { %v4619_v53 = vmax.f32 %v11603_v63, %v4524_v46  ;;  %v9337_v10 = vpop.f32.mrf.mxu1  ;;  %5068 = vmatpush.msra.mxu0 %v4960_v55  ;;  %7826 = vmatpush.msrb.mxu3 %v4960_v55  ;;  %v3492_v3 = vshll.u32 %v9152_v23, 16  ;;  %v3501_v19 = vshll.u32 %v9354_v36, 16  ;;  %v4141_v46 = vadd.f32 %v9257_v7, %v9236_v41  ;;  %v7165_v7 = vld [vmem:[%s7919_s14 + $0x150] sm:$0xf] }
 0x30a   : > { %v9330_v37 = vpop.f32.mrf.mxu2  ;;  %4909 = vst.msk [vmem:[#allocation2 + $0x8] sm:$0xff] %vm4886_vm6, %v4863_v56  ;;  %v3101_v38 = vadd.f32 %v2964_v43, %v8327_v24  ;;  %v9352_v60 = vpop.f32.mrf.mxu0  ;;  %v3489_v24 = vshrl.u32 %v9152_v23, 16  ;;  %v2504_v23 = vsel %vm2442_vm3, %v2499_v59, %v2503_v0 }
 0x30b   : > { %v4684_v1 = vrot.slane %v4619_v53, 1  ;;  %v4788_v17 = vrot.slane %v4619_v53, 2  ;;  %v3500_v53 = vrot.slane %v3498_v52, 3 }
 0x30c   : > { %v9356_v16 = vadd.f32 %v4139_v44, %v3101_v38  ;;  %v3491_v56 = vrot.slane %v3489_v24, 3 }
 0x30d   : > { %v4685_v12 = vsel %vm4678_vm7, %v4682_v54, %v4684_v1  ;;  %v4789_v39 = vsel %vm4782_vm8, %v4786_v33, %v4788_v17  ;;  %4025 = vmatmul.bf16.gmra.mxu0 %v3478_v25  ;;  %v3503_v25 = vrot.slane %v3501_v19, 4  ;;  %v7772_v1 = vld [vmem:[%s7919_s14 + $0x134] sm:$0xf]  ;;  %v7151_v17 = vld [vmem:[%s7919_s14 + $0x138] sm:$0xf0] }
 0x30e   : > { %v4760_v9 = vmax.f32 %v4618_v45, %v4685_v12  ;;  %v2518_v45 = vsel %vm2442_vm3, %v11604_v62, %v2517_v49  ;;  %v9427_v62 = vor.u32 %v7772_v1, %v7151_v17  ;;  %v7173_v1 = vld [vmem:[%s7919_s14 + $0x160] sm:$0xf]  ;;  %v7779_v17 = vld [vmem:[%s7919_s14 + $0x164] sm:$0xf0] }
 0x30f   : > { %7410 = vmatmul.msk.bf16.gmra.mxu2 %vm1183_vm2, %v3487_v22  ;;  %v2965_v40 = vpop.f32.mrf.mxu3  ;;  %v7777_v22 = vld [vmem:[%s7919_s14 + $0x154] sm:$0xf0]  ;;  %v9400_v44 = vor.u32 %v3503_v25, %v3500_v53 }
 0x310   : > { %v4864_v21 = vmax.f32 %v4760_v9, %v4789_v39  ;;  %v2966_v58 = vadd.f32 %v2965_v40, %v9031_v30  ;;  %v3494_v30 = vrot.slane %v3492_v3, 4  ;;  %v9410_v3 = vor.u32 %v7777_v22, %v7165_v7 }
 0x311   : > { %v9370_v33 = vpop.f32.mrf.mxu1  ;;  %v4144_v40 = vadd.f32 %v9301_v26, %v9275_v2  ;;  %v3507_v2 = vshrl.u32 %v9251_v8, 16 }
 0x312   : > { %v9368_v54 = vpop.f32.mrf.mxu2  ;;  %4911 = vst.msk [vmem:[#allocation2 + $0x10] sm:$0x1f] %vm4910_vm9, %v4864_v21  ;;  %v3102_v43 = vadd.f32 %v2966_v58, %v8337_v51  ;;  %v9386_v63 = vpop.f32.mrf.mxu0  ;;  %v9394_v41 = vor.u32 %v3494_v30, %v3491_v56  ;;  %v4374_v51 = vrot.slane %v9356_v16, 6  ;;  %v3516_v56 = vshrl.u32 %v9427_v62, 16 }
 0x313   : > { %v3519_v30 = vshll.u32 %v9427_v62, 16  ;;  %v3509_v22 = vrot.slane %v3507_v2, 3 }
 0x314   : > { %v9391_v59 = vadd.f32 %v4141_v46, %v3102_v43  ;;  %2865 = vmatmul.bf16.gmra.mxu1 %v2518_v45  ;;  %7305 = vmatmul.msk.bf16.gmra.mxu3 %vm1183_vm2, %v2504_v23  ;;  %v3496_v19 = vsel %vm3183_vm4, %v9319_v28, %v9394_v41  ;;  %v2521_v23 = vrot.slane %v9410_v3, 3  ;;  %v2507_v28 = vrot.slane %v9270_v61, 3 }
 0x316   : > { %v4375_v55 = vrot.slane %v9391_v59, 6  ;;  %v2522_v25 = vsel %vm2442_vm3, %v2517_v49, %v2521_v23 }
 0x317   : > { %v2968_v38 = vpop.f32.mrf.mxu3 }
 0x318   : > { %v9405_v12 = vsel %vm4364_vm5, %v4374_v51, %v4375_v55  ;;  %v2969_v39 = vadd.f32 %v2968_v38, %v9056_v35  ;;  %v3505_v35 = vsel %vm3183_vm4, %v9321_v27, %v9400_v44 }
 0x319   : > { %v4469_v9 = vmax.f32 %v9279_v47, %v9405_v12  ;;  %v9414_v52 = vpop.f32.mrf.mxu1  ;;  %v7181_v12 = vld [vmem:[%s7919_s14 + $0x170] sm:$0xf] }
 0x31a   : > { %v9408_v24 = vpop.f32.mrf.mxu2  ;;  %v3103_v21 = vadd.f32 %v2969_v39, %v8349_v48  ;;  %v9422_v58 = vpop.f32.mrf.mxu0  ;;  %v3510_v48 = vshll.u32 %v9251_v8, 16  ;;  %v4146_v8 = vadd.f32 %v9330_v37, %v9312_v18  ;;  %v3518_v18 = vrot.slane %v3516_v56, 3 }
 0x31b   : > { %v3521_v37 = vrot.slane %v3519_v30, 4  ;;  %v4151_v61 = vadd.f32 %v9408_v24, %v9386_v63  ;;  %v7167_v63 = vld [vmem:[%s7919_s14 + $0x158] sm:$0xf0] }
 0x31c   : > { %v4278_v45 = vadd.f32 %v4144_v40, %v3103_v21  ;;  %v7159_v40 = vld [vmem:[%s7919_s14 + $0x148] sm:$0xf0] }
 0x31d   : > { %4030 = vmatmul.bf16.gmra.mxu0 %v3496_v19  ;;  %v9464_v19 = vor.u32 %v3521_v37, %v3518_v18 }
 0x31e   : > { %v4377_v26 = vrot.slane %v4278_v45, 6 }
 0x31f   : > { %7411 = vmatmul.msk.bf16.gmra.mxu2 %vm1183_vm2, %v3505_v35  ;;  %v2970_v27 = vpop.f32.mrf.mxu3 }
 0x320   : > { %v9437_v46 = vsel %vm4364_vm5, %v4375_v55, %v4377_v26  ;;  %v2971_v43 = vadd.f32 %v2970_v27, %v9088_v13  ;;  %v2508_v13 = vsel %vm2442_vm3, %v2503_v0, %v2507_v28  ;;  %v3512_v55 = vrot.slane %v3510_v48, 4  ;;  %v7774_v0 = vld [vmem:[%s7919_s14 + $0x144] sm:$0xf] }
 0x321   : > { %v4470_v34 = vmax.f32 %v9314_v11, %v9437_v46  ;;  %v9449_v7 = vpop.f32.mrf.mxu1  ;;  %v9480_v30 = vor.u32 %v7774_v0, %v7159_v40  ;;  %v4149_v27 = vadd.f32 %v9368_v54, %v9352_v60  ;;  %v3528_v60 = vshll.u32 %v9332_v14, 16 }
 0x322   : > { %v9440_v53 = vpop.f32.mrf.mxu2  ;;  %v3104_v51 = vadd.f32 %v2971_v43, %v8359_v29  ;;  %v9457_v49 = vpop.f32.mrf.mxu0  ;;  %v9462_v5 = vor.u32 %v3512_v55, %v3509_v22  ;;  %v9468_v29 = vor.u32 %v7779_v17, %v7173_v1  ;;  %v2511_v22 = vrot.slane %v9354_v36, 3 }
 0x323   : > { %v3534_v54 = vshrl.u32 %v9480_v30, 16  ;;  %v3537_v18 = vshll.u32 %v9480_v30, 16 }
 0x324   : > { %v4279_v38 = vadd.f32 %v4146_v8, %v3104_v51  ;;  %2870 = vmatmul.bf16.gmra.mxu1 %v2522_v25  ;;  %7306 = vmatmul.msk.bf16.gmra.mxu3 %vm1183_vm2, %v2508_v13  ;;  %v2525_v8 = vrot.slane %v9468_v29, 3 }
 0x326   : > { %v4379_v39 = vrot.slane %v4279_v38, 6  ;;  %v4525_v51 = vrot.slane %v4279_v38, 4  ;;  %v2526_v37 = vsel %vm2442_vm3, %v2521_v23, %v2525_v8  ;;  %v2512_v38 = vsel %vm2442_vm3, %v2507_v28, %v2511_v22 }
 0x327   : > { %v2973_v21 = vpop.f32.mrf.mxu3 }
 0x328   : > { %v9471_v35 = vsel %vm4364_vm5, %v4377_v26, %v4379_v39  ;;  %v2974_v45 = vadd.f32 %v2973_v21, %v9119_v4  ;;  %v3514_v4 = vsel %vm3183_vm4, %v9394_v41, %v9462_v5  ;;  %v3523_v26 = vsel %vm3183_vm4, %v9400_v44, %v9464_v19 }
 0x329   : > { %v4471_v48 = vmax.f32 %v9356_v16, %v9471_v35  ;;  %v9478_v56 = vpop.f32.mrf.mxu1  ;;  %v3530_v21 = vrot.slane %v3528_v60, 4  ;;  %v7776_v60 = vld [vmem:[%s7919_s14 + $0x154] sm:$0xf] }
 0x32a   : > { %v9474_v2 = vpop.f32.mrf.mxu2  ;;  %v3105_v43 = vadd.f32 %v2974_v45, %v8374_v57  ;;  %v9485_v25 = vpop.f32.mrf.mxu0  ;;  %v3525_v57 = vshrl.u32 %v9332_v14, 16 }
 0x32c   : > { %v4280_v13 = vadd.f32 %v4149_v27, %v3105_v43  ;;  %v3536_v27 = vrot.slane %v3534_v54, 3  ;;  %v3539_v43 = vrot.slane %v3537_v18, 4 }
 0x32d   : > { %4035 = vmatmul.bf16.gmra.mxu0 %v3514_v4 }
 0x32e   : > { %v4381_v41 = vrot.slane %v4280_v13, 6  ;;  %v4526_v55 = vrot.slane %v4280_v13, 4  ;;  %v9532_v13 = vor.u32 %v3539_v43, %v3536_v27 }
 0x32f   : > { %7412 = vmatmul.msk.bf16.gmra.mxu2 %vm1183_vm2, %v3523_v26  ;;  %v2975_v44 = vpop.f32.mrf.mxu3 }
 0x330   : > { %v9504_v1 = vsel %vm4364_vm5, %v4379_v39, %v4381_v41  ;;  %v4527_v17 = vsel %vm1277_vm0, %v4525_v51, %v4526_v55  ;;  %v2976_v0 = vadd.f32 %v2975_v44, %v9164_v15  ;;  %v3527_v15 = vrot.slane %v3525_v57, 3 }
 0x331   : > { %v4472_v23 = vmax.f32 %v9391_v59, %v9504_v1  ;;  %v4620_v39 = vmax.f32 %v4469_v9, %v4527_v17  ;;  %v9520_v40 = vpop.f32.mrf.mxu1  ;;  %v7781_v9 = vld [vmem:[%s7919_s14 + $0x174] sm:$0xf0]  ;;  %v3541_v17 = vsel %vm3183_vm4, %v9464_v19, %v9532_v13  ;;  %v3543_v19 = vshrl.u32 %v9410_v3, 16 }
 0x332   : > { %v9508_v14 = vpop.f32.mrf.mxu2  ;;  %v3106_v45 = vadd.f32 %v2976_v0, %v8384_v20  ;;  %v9525_v28 = vpop.f32.mrf.mxu0  ;;  %v9528_v47 = vor.u32 %v3530_v21, %v3527_v15  ;;  %v9540_v51 = vor.u32 %v7781_v9, %v7181_v12  ;;  %v9558_v0 = vor.u32 %v7776_v60, %v7167_v63 }
 0x333   : > { %v4686_v11 = vrot.slane %v4620_v39, 1  ;;  %v4790_v46 = vrot.slane %v4620_v39, 2  ;;  %v3546_v21 = vshll.u32 %v9410_v3, 16 }
 0x334   : > { %v4281_v4 = vadd.f32 %v4151_v61, %v3106_v45  ;;  %2875 = vmatmul.bf16.gmra.mxu1 %v2526_v37  ;;  %7307 = vmatmul.msk.bf16.gmra.mxu3 %vm1183_vm2, %v2512_v38  ;;  %v3532_v44 = vsel %vm3183_vm4, %v9462_v5, %v9528_v47  ;;  %v4154_v37 = vadd.f32 %v9440_v53, %v9422_v58  ;;  %v2529_v5 = vrot.slane %v9540_v51, 3 }
 0x335   : > { %v2515_v58 = vrot.slane %v9427_v62, 3  ;;  %v3552_v27 = vshrl.u32 %v9558_v0, 16  ;;  %v3555_v43 = vshll.u32 %v9558_v0, 16 }
 0x336   : > { %v4528_v26 = vrot.slane %v4281_v4, 4  ;;  %v2530_v3 = vsel %vm2442_vm3, %v2525_v8, %v2529_v5 }
 0x337   : > { %v2978_v57 = vpop.f32.mrf.mxu3  ;;  %v3557_v8 = vrot.slane %v3555_v43, 4 }
 0x338   : > { %v4529_v20 = vsel %vm1277_vm0, %v4526_v55, %v4528_v26  ;;  %v2979_v24 = vadd.f32 %v2978_v57, %v9229_v6 }
 0x339   : > { %v4621_v41 = vmax.f32 %v4470_v34, %v4529_v20  ;;  %v9545_v18 = vpop.f32.mrf.mxu1  ;;  %v3548_v20 = vrot.slane %v3546_v21, 4 }
 0x33a   : > { %v9538_v54 = vpop.f32.mrf.mxu2  ;;  %v3107_v55 = vadd.f32 %v2979_v24, %v8396_v42  ;;  %v9553_v6 = vpop.f32.mrf.mxu0  ;;  %v4156_v24 = vadd.f32 %v9474_v2, %v9457_v49 }
 0x33b   : > { %v4687_v34 = vrot.slane %v4621_v41, 1  ;;  %v4791_v38 = vrot.slane %v4621_v41, 2 }
 0x33c   : > { %v9560_v15 = vadd.f32 %v4154_v37, %v3107_v55  ;;  %v7783_v55 = vld [vmem:[%s7919_s14 + $0x184] sm:$0xf0] }
 0x33d   : > { %v4688_v42 = vsel %vm4678_vm7, %v4686_v11, %v4687_v34  ;;  %v4792_v53 = vsel %vm4782_vm8, %v4790_v46, %v4791_v38  ;;  %4040 = vmatmul.bf16.gmra.mxu0 %v3532_v44 }
 0x33e   : > { %v4761_v61 = vmax.f32 %v4620_v39, %v4688_v42  ;;  %v4530_v45 = vrot.slane %v9560_v15, 4 }
 0x33f   : > { %7413 = vmatmul.msk.bf16.gmra.mxu2 %vm1183_vm2, %v3541_v17  ;;  %v2980_v4 = vpop.f32.mrf.mxu3 }
 0x340   : > { %v4865_v12 = vmax.f32 %v4761_v61, %v4792_v53  ;;  %v4531_v9 = vsel %vm1277_vm0, %v4528_v26, %v4530_v45  ;;  %v2981_v57 = vadd.f32 %v2980_v4, %v9265_v50  ;;  %v2516_v50 = vsel %vm2442_vm3, %v2511_v22, %v2515_v58  ;;  %v7778_v53 = vld [vmem:[%s7919_s14 + $0x164] sm:$0xf] }
 0x341   : > { %v4622_v39 = vmax.f32 %v4471_v48, %v4531_v9  ;;  %v9584_v63 = vpop.f32.mrf.mxu1  ;;  %v3545_v26 = vrot.slane %v3543_v19, 3  ;;  %v3554_v48 = vrot.slane %v3552_v27, 3  ;;  %v7175_v19 = vld [vmem:[%s7919_s14 + $0x168] sm:$0xf0] }
 0x342   : > { %v9574_v60 = vpop.f32.mrf.mxu2  ;;  %4913 = vst.msk [vmem:[#allocation2 + $0x16] sm:$0xfc] %vm4912_vm10, %v4865_v12  ;;  %v3108_v16 = vadd.f32 %v2981_v57, %v8412_v32  ;;  %v9595_v35 = vpop.f32.mrf.mxu0  ;;  %v7189_v32 = vld [vmem:[%s7919_s14 + $0x180] sm:$0xf]  ;;  %v4159_v12 = vadd.f32 %v9508_v14, %v9485_v25  ;;  %v9634_v1 = vor.u32 %v7778_v53, %v7175_v19  ;;  %v2519_v25 = vrot.slane %v9480_v30, 3 }
 0x343   : > { %v4689_v36 = vrot.slane %v4622_v39, 1  ;;  %v4793_v44 = vrot.slane %v4622_v39, 2  ;;  %v9602_v2 = vor.u32 %v3548_v20, %v3545_v26  ;;  %v9607_v46 = vor.u32 %v3557_v8, %v3554_v48  ;;  %v7785_v19 = vld [vmem:[%s7919_s14 + $0x194] sm:$0xf0] }
 0x344   : > { %v9597_v22 = vadd.f32 %v4156_v24, %v3108_v16  ;;  %2880 = vmatmul.bf16.gmra.mxu1 %v2530_v3  ;;  %7308 = vmatmul.msk.bf16.gmra.mxu3 %vm1183_vm2, %v2516_v50  ;;  %v3561_v26 = vshrl.u32 %v9468_v29, 16  ;;  %v3570_v24 = vshrl.u32 %v9634_v1, 16  ;;  %v3573_v16 = vshll.u32 %v9634_v1, 16 }
 0x345   : > { %v4690_v37 = vsel %vm4678_vm7, %v4687_v34, %v4689_v36  ;;  %v4794_v49 = vsel %vm4782_vm8, %v4791_v38, %v4793_v44  ;;  %v9615_v38 = vor.u32 %v7783_v55, %v7189_v32  ;;  %v3550_v4 = vsel %vm3183_vm4, %v9528_v47, %v9602_v2  ;;  %v11606_v55 = vld [vmem:[#allocation4_spill] sm:$0xff] }
 0x346   : > { %v4762_v17 = vmax.f32 %v4621_v41, %v4690_v37  ;;  %v4532_v11 = vrot.slane %v9597_v22, 4  ;;  %v3559_v59 = vsel %vm3183_vm4, %v9532_v13, %v9607_v46  ;;  %v3564_v13 = vshll.u32 %v9468_v29, 16 }
 0x347   : > { %v2983_v42 = vpop.f32.mrf.mxu3  ;;  %v2533_v47 = vrot.slane %v9615_v38, 3  ;;  %v4161_v32 = vadd.f32 %v9538_v54, %v9525_v28 }
 0x348   : > { %v4866_v21 = vmax.f32 %v4762_v17, %v4794_v49  ;;  %v4533_v61 = vsel %vm1277_vm0, %v4530_v45, %v4532_v11  ;;  %v2984_v27 = vadd.f32 %v2983_v42, %v9306_v31  ;;  %v11605_v31 = vld [vmem:[#allocation3_spill] sm:$0xff]  ;;  %v3563_v49 = vrot.slane %v3561_v26, 3 }
 0x349   : > { %v4623_v41 = vmax.f32 %v4472_v23, %v4533_v61  ;;  %v9620_v43 = vpop.f32.mrf.mxu1  ;;  %v2534_v29 = vsel %vm2442_vm3, %v2529_v5, %v2533_v47  ;;  %v3572_v5 = vrot.slane %v3570_v24, 3  ;;  %v3575_v42 = vrot.slane %v3573_v16, 4 }
 0x34a   : > { %v9613_v34 = vpop.f32.mrf.mxu2  ;;  %4914 = vst.msk [vmem:[#allocation2 + $0x1e] sm:$0xff] %vm4886_vm6, %v4866_v21  ;;  %v3109_v45 = vadd.f32 %v2984_v27, %v11605_v31  ;;  %v9629_v9 = vpop.f32.mrf.mxu0  ;;  %v7780_v27 = vld [vmem:[%s7919_s14 + $0x174] sm:$0xf] }
 0x34b   : > { %v4691_v23 = vrot.slane %v4623_v41, 1  ;;  %v4795_v57 = vrot.slane %v4623_v41, 2  ;;  %v9677_v21 = vor.u32 %v3575_v42, %v3572_v5  ;;  %v7183_v41 = vld [vmem:[%s7919_s14 + $0x178] sm:$0xf0]  ;;  %v11608_v5 = vld [vmem:[#allocation6_spill] sm:$0xff] }
 0x34c   : > { %v9636_v3 = vadd.f32 %v4159_v12, %v3109_v45 }
 0x34d   : > { %v4692_v14 = vsel %vm4678_vm7, %v4689_v36, %v4691_v23  ;;  %v4796_v50 = vsel %vm4782_vm8, %v4793_v44, %v4795_v57  ;;  %4045 = vmatmul.bf16.gmra.mxu0 %v3550_v4 }
 0x34e   : > { %v4763_v20 = vmax.f32 %v4622_v39, %v4692_v14  ;;  %v2520_v39 = vsel %vm2442_vm3, %v2515_v58, %v2519_v25  ;;  %v7197_v58 = vld [vmem:[%s7919_s14 + $0x190] sm:$0xf]  ;;  %v4383_v28 = vrot.slane %v9636_v3, 6  ;;  %v4164_v14 = vadd.f32 %v9574_v60, %v9553_v6 }
 0x34f   : > { %7414 = vmatmul.msk.bf16.gmra.mxu2 %vm1183_vm2, %v3559_v59  ;;  %v2985_v48 = vpop.f32.mrf.mxu3  ;;  %v9687_v45 = vor.u32 %v7785_v19, %v7197_v58  ;;  %v3579_v6 = vshrl.u32 %v9540_v51, 16 }
 0x350   : > { %v4867_v8 = vmax.f32 %v4763_v20, %v4796_v50  ;;  %v2986_v37 = vadd.f32 %v2985_v48, %v9337_v10  ;;  %v3566_v10 = vrot.slane %v3564_v13, 4  ;;  %v11607_v50 = vld [vmem:[#allocation5_spill] sm:$0xff]  ;;  %v9704_v20 = vor.u32 %v7780_v27, %v7183_v41  ;;  %v7191_v41 = vld [vmem:[%s7919_s14 + $0x188] sm:$0xf0] }
 0x351   : > { %v9650_v44 = vpop.f32.mrf.mxu1  ;;  %v2537_v16 = vrot.slane %v9687_v45, 3  ;;  %v3582_v48 = vshll.u32 %v9540_v51, 16  ;;  %v4166_v51 = vadd.f32 %v9613_v34, %v9595_v35 }
 0x352   : > { %v9648_v36 = vpop.f32.mrf.mxu2  ;;  %4916 = vst.msk [vmem:[#allocation2 + $0x26] sm:$0x7f] %vm4915_vm11, %v4867_v8  ;;  %v3110_v17 = vadd.f32 %v2986_v37, %v11606_v55  ;;  %v9666_v11 = vpop.f32.mrf.mxu0  ;;  %v9671_v62 = vor.u32 %v3566_v10, %v3563_v49  ;;  %v3588_v8 = vshrl.u32 %v9704_v20, 16 }
 0x353   : > { %v2538_v10 = vsel %vm2442_vm3, %v2533_v47, %v2537_v16  ;;  %v3584_v58 = vrot.slane %v3582_v48, 4 }
 0x354   : > { %v9668_v53 = vadd.f32 %v4161_v32, %v3110_v17  ;;  %2885 = vmatmul.bf16.gmra.mxu1 %v2534_v29  ;;  %7309 = vmatmul.msk.bf16.gmra.mxu3 %vm1183_vm2, %v2520_v39  ;;  %v3568_v57 = vsel %vm3183_vm4, %v9602_v2, %v9671_v62  ;;  %v2523_v2 = vrot.slane %v9558_v0, 3  ;;  %v3581_v17 = vrot.slane %v3579_v6, 3  ;;  %v11610_v0 = vld [vmem:[#allocation8_spill] sm:$0xff] }
 0x355   : > { %v3590_v35 = vrot.slane %v3588_v8, 3  ;;  %v4169_v8 = vadd.f32 %v9648_v36, %v9629_v9  ;;  %v3597_v9 = vshrl.u32 %v9615_v38, 16  ;;  %v3600_v36 = vshll.u32 %v9615_v38, 16 }
 0x356   : > { %v4384_v54 = vrot.slane %v9668_v53, 6  ;;  %v9742_v30 = vor.u32 %v3584_v58, %v3581_v17 }
 0x357   : > { %v2988_v61 = vpop.f32.mrf.mxu3 }
 0x358   : > { %v9682_v4 = vsel %vm4364_vm5, %v4383_v28, %v4384_v54  ;;  %v2989_v12 = vadd.f32 %v2988_v61, %v9370_v33  ;;  %v3577_v33 = vsel %vm3183_vm4, %v9607_v46, %v9677_v21  ;;  %v3591_v46 = vshll.u32 %v9704_v20, 16  ;;  %v7205_v28 = vld [vmem:[%s7919_s14 + $0x1a0] sm:$0xf] }
 0x359   : > { %v4473_v59 = vmax.f32 %v9560_v15, %v9682_v4  ;;  %v9691_v23 = vpop.f32.mrf.mxu1  ;;  %v7213_v4 = vld [vmem:[%s7919_s14 + $0x1b0] sm:$0xf] }
 0x35a   : > { %v9685_v31 = vpop.f32.mrf.mxu2  ;;  %v3111_v26 = vadd.f32 %v2989_v12, %v11607_v50  ;;  %v9699_v13 = vpop.f32.mrf.mxu0  ;;  %v3593_v34 = vrot.slane %v3591_v46, 4  ;;  %v11609_v46 = vld [vmem:[#allocation7_spill] sm:$0xff] }
 0x35c   : > { %v9706_v24 = vadd.f32 %v4164_v14, %v3111_v26  ;;  %v9744_v27 = vor.u32 %v3593_v34, %v3590_v35 }
 0x35d   : > { %4050 = vmatmul.bf16.gmra.mxu0 %v3568_v57 }
 0x35e   : > { %v4386_v60 = vrot.slane %v9706_v24, 6 }
 0x35f   : > { %7415 = vmatmul.msk.bf16.gmra.mxu2 %vm1183_vm2, %v3577_v33  ;;  %v2990_v37 = vpop.f32.mrf.mxu3 }
 0x360   : > { %v9717_v29 = vsel %vm4364_vm5, %v4384_v54, %v4386_v60  ;;  %v2991_v39 = vadd.f32 %v2990_v37, %v9414_v52  ;;  %v2524_v52 = vsel %vm2442_vm3, %v2519_v25, %v2523_v2  ;;  %v7787_v54 = vld [vmem:[%s7919_s14 + $0x1a4] sm:$0xf0]  ;;  %v7782_v25 = vld [vmem:[%s7919_s14 + $0x184] sm:$0xf] }
 0x361   : > { %v4474_v32 = vmax.f32 %v9597_v22, %v9717_v29  ;;  %v9729_v55 = vpop.f32.mrf.mxu1  ;;  %v9748_v57 = vor.u32 %v7787_v54, %v7205_v28  ;;  %v9760_v48 = vor.u32 %v7782_v25, %v7191_v41  ;;  %v3602_v41 = vrot.slane %v3600_v36, 4 }
 0x362   : > { %v9720_v49 = vpop.f32.mrf.mxu2  ;;  %v3112_v42 = vadd.f32 %v2991_v39, %v11608_v5  ;;  %v9737_v47 = vpop.f32.mrf.mxu0 }
 0x363   : > { %v3606_v17 = vshrl.u32 %v9760_v48, 16  ;;  %v3609_v58 = vshll.u32 %v9760_v48, 16 }
 0x364   : > { %v4287_v19 = vadd.f32 %v4166_v51, %v3112_v42  ;;  %2890 = vmatmul.bf16.gmra.mxu1 %v2538_v10  ;;  %7310 = vmatmul.msk.bf16.gmra.mxu3 %vm1183_vm2, %v2524_v52  ;;  %v2541_v10 = vrot.slane %v9748_v57, 3  ;;  %v2527_v52 = vrot.slane %v9634_v1, 3 }
 0x366   : > { %v4388_v61 = vrot.slane %v4287_v19, 6  ;;  %v4534_v5 = vrot.slane %v4287_v19, 4  ;;  %v2542_v35 = vsel %vm2442_vm3, %v2537_v16, %v2541_v10  ;;  %v2528_v19 = vsel %vm2442_vm3, %v2523_v2, %v2527_v52 }
 0x367   : > { %v2993_v12 = vpop.f32.mrf.mxu3 }
 0x368   : > { %v9751_v14 = vsel %vm4364_vm5, %v4386_v60, %v4388_v61  ;;  %v2994_v50 = vadd.f32 %v2993_v12, %v9449_v7  ;;  %v3586_v7 = vsel %vm3183_vm4, %v9671_v62, %v9742_v30  ;;  %v3595_v60 = vsel %vm3183_vm4, %v9677_v21, %v9744_v27 }
 0x369   : > { %v4475_v33 = vmax.f32 %v9636_v3, %v9751_v14  ;;  %v9758_v6 = vpop.f32.mrf.mxu1  ;;  %v4171_v12 = vadd.f32 %v9685_v31, %v9666_v11  ;;  %v7784_v31 = vld [vmem:[%s7919_s14 + $0x194] sm:$0xf] }
 0x36a   : > { %v9754_v26 = vpop.f32.mrf.mxu2  ;;  %v3113_v37 = vadd.f32 %v2994_v50, %v11609_v46  ;;  %v9765_v39 = vpop.f32.mrf.mxu0  ;;  %v3611_v46 = vrot.slane %v3609_v58, 4 }
 0x36c   : > { %v4288_v51 = vadd.f32 %v4169_v8, %v3113_v37  ;;  %v3608_v8 = vrot.slane %v3606_v17, 3 }
 0x36d   : > { %4055 = vmatmul.bf16.gmra.mxu0 %v3586_v7 }
 0x36e   : > { %v4390_v62 = vrot.slane %v4288_v51, 6  ;;  %v4535_v42 = vrot.slane %v4288_v51, 4  ;;  %v9812_v51 = vor.u32 %v3611_v46, %v3608_v8  ;;  %v3618_v46 = vshll.u32 %v9687_v45, 16 }
 0x36f   : > { %7416 = vmatmul.msk.bf16.gmra.mxu2 %vm1183_vm2, %v3595_v60  ;;  %v2995_v21 = vpop.f32.mrf.mxu3 }
 0x370   : > { %v9784_v34 = vsel %vm4364_vm5, %v4388_v61, %v4390_v62  ;;  %v4536_v28 = vsel %vm1277_vm0, %v4534_v5, %v4535_v42  ;;  %v2996_v54 = vadd.f32 %v2995_v21, %v9478_v56  ;;  %v3599_v56 = vrot.slane %v3597_v9, 3  ;;  %v7199_v9 = vld [vmem:[%s7919_s14 + $0x198] sm:$0xf0] }
 0x371   : > { %v4476_v16 = vmax.f32 %v9668_v53, %v9784_v34  ;;  %v4624_v61 = vmax.f32 %v4473_v59, %v4536_v28  ;;  %v9800_v25 = vpop.f32.mrf.mxu1  ;;  %v7789_v59 = vld [vmem:[%s7919_s14 + $0x1b4] sm:$0xf0] }
 0x372   : > { %v9788_v38 = vpop.f32.mrf.mxu2  ;;  %v3114_v50 = vadd.f32 %v2996_v54, %v11610_v0  ;;  %v9805_v2 = vpop.f32.mrf.mxu0  ;;  %v9808_v15 = vor.u32 %v3602_v41, %v3599_v56  ;;  %v9823_v21 = vor.u32 %v7789_v59, %v7213_v4  ;;  %v3613_v41 = vsel %vm3183_vm4, %v9744_v27, %v9812_v51 }
 0x373   : > { %v4693_v22 = vrot.slane %v4624_v61, 1  ;;  %v4797_v29 = vrot.slane %v4624_v61, 2  ;;  %v3615_v27 = vshrl.u32 %v9687_v45, 16 }
 0x374   : > { %v4289_v37 = vadd.f32 %v4171_v12, %v3114_v50  ;;  %2895 = vmatmul.bf16.gmra.mxu1 %v2542_v35  ;;  %7311 = vmatmul.msk.bf16.gmra.mxu3 %vm1183_vm2, %v2528_v19  ;;  %v9843_v12 = vor.u32 %v7784_v31, %v7199_v9 }
 0x376   : > { %v4392_v7 = vrot.slane %v4289_v37, 6  ;;  %v4537_v60 = vrot.slane %v4289_v37, 4  ;;  %v3624_v59 = vshrl.u32 %v9843_v12, 16 }
 0x377   : > { %v2998_v11 = vpop.f32.mrf.mxu3 }
 0x378   : > { %v9817_v36 = vsel %vm4364_vm5, %v4390_v62, %v4392_v7  ;;  %v4538_v17 = vsel %vm1277_vm0, %v4535_v42, %v4537_v60  ;;  %v2999_v5 = vadd.f32 %v2998_v11, %v9520_v40  ;;  %v3604_v62 = vsel %vm3183_vm4, %v9742_v30, %v9808_v15  ;;  %v11611_v42 = vld [vmem:[#allocation9_spill] sm:$0xff] }
 0x379   : > { %v4477_v35 = vmax.f32 %v9706_v24, %v9817_v36  ;;  %v4625_v28 = vmax.f32 %v4474_v32, %v4538_v17  ;;  %v9830_v54 = vpop.f32.mrf.mxu1  ;;  %v4174_v40 = vadd.f32 %v9720_v49, %v9699_v13  ;;  %v2545_v30 = vrot.slane %v9823_v21, 3 }
 0x37a   : > { %v9821_v58 = vpop.f32.mrf.mxu2  ;;  %v3115_v19 = vadd.f32 %v2999_v5, %v11611_v42  ;;  %v9838_v56 = vpop.f32.mrf.mxu0  ;;  %v2531_v13 = vrot.slane %v9704_v20, 3  ;;  %v3627_v7 = vshll.u32 %v9843_v12, 16  ;;  %v4176_v42 = vadd.f32 %v9754_v26, %v9737_v47 }
 0x37b   : > { %v4694_v32 = vrot.slane %v4625_v28, 1  ;;  %v4798_v0 = vrot.slane %v4625_v28, 2  ;;  %v2546_v45 = vsel %vm2442_vm3, %v2541_v10, %v2545_v30  ;;  %v11612_v10 = vld [vmem:[#allocation10_spill] sm:$0xff] }
 0x37c   : > { %v9845_v50 = vadd.f32 %v4174_v40, %v3115_v19  ;;  %v3620_v40 = vrot.slane %v3618_v46, 4  ;;  %v3629_v19 = vrot.slane %v3627_v7, 4  ;;  %v7207_v7 = vld [vmem:[%s7919_s14 + $0x1a8] sm:$0xf0] }
 0x37d   : > { %v4695_v49 = vsel %vm4678_vm7, %v4693_v22, %v4694_v32  ;;  %v4799_v8 = vsel %vm4782_vm8, %v4797_v29, %v4798_v0  ;;  %4060 = vmatmul.bf16.gmra.mxu0 %v3604_v62  ;;  %v7221_v29 = vld [vmem:[%s7919_s14 + $0x1c0] sm:$0xf] }
 0x37e   : > { %v4764_v37 = vmax.f32 %v4624_v61, %v4695_v49  ;;  %v4539_v4 = vrot.slane %v9845_v50, 4  ;;  %v7791_v49 = vld [vmem:[%s7919_s14 + $0x1c4] sm:$0xf0] }
 0x37f   : > { %7417 = vmatmul.msk.bf16.gmra.mxu2 %vm1183_vm2, %v3613_v41  ;;  %v3000_v11 = vpop.f32.mrf.mxu3 }
 0x380   : > { %v4868_v31 = vmax.f32 %v4764_v37, %v4799_v8  ;;  %v4540_v9 = vsel %vm1277_vm0, %v4537_v60, %v4539_v4  ;;  %v3001_v17 = vadd.f32 %v3000_v11, %v9545_v18  ;;  %v2532_v18 = vsel %vm2442_vm3, %v2527_v52, %v2531_v13 }
 0x381   : > { %v4626_v61 = vmax.f32 %v4475_v33, %v4540_v9  ;;  %v9869_v62 = vpop.f32.mrf.mxu1  ;;  %v3617_v60 = vrot.slane %v3615_v27, 3  ;;  %v3626_v33 = vrot.slane %v3624_v59, 3  ;;  %v7786_v59 = vld [vmem:[%s7919_s14 + $0x1a4] sm:$0xf] }
 0x382   : > { %v9859_v5 = vpop.f32.mrf.mxu2  ;;  %4918 = vst.msk [vmem:[#allocation2 + $0x2c] sm:$0xf0] %vm4917_vm12, %v4868_v31  ;;  %v3116_v3 = vadd.f32 %v3001_v17, %v11612_v10  ;;  %v9880_v14 = vpop.f32.mrf.mxu0  ;;  %v9919_v34 = vor.u32 %v7786_v59, %v7207_v7  ;;  %v4181_v7 = vadd.f32 %v9821_v58, %v9805_v2 }
 0x383   : > { %v4696_v1 = vrot.slane %v4626_v61, 1  ;;  %v4800_v41 = vrot.slane %v4626_v61, 2  ;;  %v9887_v26 = vor.u32 %v3620_v40, %v3617_v60  ;;  %v9892_v46 = vor.u32 %v3629_v19, %v3626_v33 }
 0x384   : > { %v9882_v52 = vadd.f32 %v4176_v42, %v3116_v3  ;;  %2900 = vmatmul.bf16.gmra.mxu1 %v2546_v45  ;;  %7312 = vmatmul.msk.bf16.gmra.mxu3 %vm1183_vm2, %v2532_v18  ;;  %v4179_v18 = vadd.f32 %v9788_v38, %v9765_v39  ;;  %v2535_v39 = vrot.slane %v9760_v48, 3  ;;  %v3633_v3 = vshrl.u32 %v9748_v57, 16 }
 0x385   : > { %v4697_v22 = vsel %vm4678_vm7, %v4694_v32, %v4696_v1  ;;  %v4801_v47 = vsel %vm4782_vm8, %v4798_v0, %v4800_v41  ;;  %v9900_v0 = vor.u32 %v7791_v49, %v7221_v29  ;;  %v3622_v45 = vsel %vm3183_vm4, %v9808_v15, %v9887_v26 }
 0x386   : > { %v4765_v8 = vmax.f32 %v4625_v28, %v4697_v22  ;;  %v4541_v27 = vrot.slane %v9882_v52, 4  ;;  %v3631_v53 = vsel %vm3183_vm4, %v9812_v51, %v9892_v46  ;;  %v3636_v51 = vshll.u32 %v9748_v57, 16 }
 0x387   : > { %v3003_v37 = vpop.f32.mrf.mxu3  ;;  %v2549_v15 = vrot.slane %v9900_v0, 3  ;;  %v3642_v22 = vshrl.u32 %v9919_v34, 16 }
 0x388   : > { %v4869_v11 = vmax.f32 %v4765_v8, %v4801_v47  ;;  %v4542_v31 = vsel %vm1277_vm0, %v4539_v4, %v4541_v27  ;;  %v3004_v9 = vadd.f32 %v3003_v37, %v9584_v63  ;;  %v11613_v63 = vld [vmem:[#allocation11_spill] sm:$0xff]  ;;  %v3645_v47 = vshll.u32 %v9919_v34, 16 }
 0x389   : > { %v4627_v28 = vmax.f32 %v4476_v16, %v4542_v31  ;;  %v9905_v17 = vpop.f32.mrf.mxu1  ;;  %v2550_v57 = vsel %vm2442_vm3, %v2545_v30, %v2549_v15  ;;  %v3638_v59 = vrot.slane %v3636_v51, 4  ;;  %v11614_v30 = vld [vmem:[#allocation12_spill] sm:$0xff]  ;;  %v7215_v51 = vld [vmem:[%s7919_s14 + $0x1b8] sm:$0xf0] }
 0x38a   : > { %v9898_v32 = vpop.f32.mrf.mxu2  ;;  %4919 = vst.msk [vmem:[#allocation2 + $0x34] sm:$0xff] %vm4886_vm6, %v4869_v11  ;;  %v3117_v4 = vadd.f32 %v3004_v9, %v11613_v63  ;;  %v9914_v60 = vpop.f32.mrf.mxu0  ;;  %v3647_v11 = vrot.slane %v3645_v47, 4 }
 0x38b   : > { %v4698_v16 = vrot.slane %v4627_v28, 1  ;;  %v4802_v40 = vrot.slane %v4627_v28, 2 }
 0x38c   : > { %v9921_v42 = vadd.f32 %v4179_v18, %v3117_v4  ;;  %v7793_v18 = vld [vmem:[%s7919_s14 + $0x1d4] sm:$0xf0] }
 0x38d   : > { %v4699_v38 = vsel %vm4678_vm7, %v4696_v1, %v4698_v16  ;;  %v4803_v10 = vsel %vm4782_vm8, %v4800_v41, %v4802_v40  ;;  %4065 = vmatmul.bf16.gmra.mxu0 %v3622_v45  ;;  %v7229_v45 = vld [vmem:[%s7919_s14 + $0x1d0] sm:$0xf] }
 0x38e   : > { %v4766_v33 = vmax.f32 %v4626_v61, %v4699_v38  ;;  %v4543_v19 = vrot.slane %v9921_v42, 4  ;;  %v4394_v63 = vrot.slane %v9921_v42, 6 }
 0x38f   : > { %7418 = vmatmul.msk.bf16.gmra.mxu2 %vm1183_vm2, %v3631_v53  ;;  %v3005_v29 = vpop.f32.mrf.mxu3 }
 0x390   : > { %v4870_v49 = vmax.f32 %v4766_v33, %v4803_v10  ;;  %v4544_v1 = vsel %vm1277_vm0, %v4541_v27, %v4543_v19  ;;  %v3006_v41 = vadd.f32 %v3005_v29, %v9620_v43  ;;  %v2536_v43 = vsel %vm2442_vm3, %v2531_v13, %v2535_v39 }
 0x391   : > { %v4628_v61 = vmax.f32 %v4477_v35, %v4544_v1  ;;  %v9945_v37 = vpop.f32.mrf.mxu1  ;;  %v3635_v27 = vrot.slane %v3633_v3, 3  ;;  %v3644_v35 = vrot.slane %v3642_v22, 3  ;;  %v7788_v3 = vld [vmem:[%s7919_s14 + $0x1b4] sm:$0xf]  ;;  %v9979_v22 = vor.u32 %v7793_v18, %v7229_v45  ;;  %v11615_v1 = vld [vmem:[#allocation13_spill] sm:$0xff]  ;;  %v11616_v45 = vld [vmem:[#allocation14_spill] sm:$0xff] }
 0x392   : > { %v9935_v8 = vpop.f32.mrf.mxu2  ;;  %4920 = vst.msk [vmem:[#allocation2 + $0x3c] sm:$0xff] %vm4886_vm6, %v4870_v49  ;;  %v3118_v24 = vadd.f32 %v3006_v41, %v11614_v30  ;;  %v9956_v36 = vpop.f32.mrf.mxu0  ;;  %v4184_v49 = vadd.f32 %v9859_v5, %v9838_v56  ;;  %v2539_v56 = vrot.slane %v9843_v12, 3  ;;  %v3651_v5 = vshrl.u32 %v9823_v21, 16 }
 0x393   : > { %v4700_v31 = vrot.slane %v4628_v61, 1  ;;  %v4804_v20 = vrot.slane %v4628_v61, 2  ;;  %v9963_v58 = vor.u32 %v3638_v59, %v3635_v27  ;;  %v9969_v38 = vor.u32 %v3647_v11, %v3644_v35 }
 0x394   : > { %v9958_v13 = vadd.f32 %v4181_v7, %v3118_v24  ;;  %2905 = vmatmul.bf16.gmra.mxu1 %v2550_v57  ;;  %7313 = vmatmul.msk.bf16.gmra.mxu3 %vm1183_vm2, %v2536_v43  ;;  %v9997_v61 = vor.u32 %v7788_v3, %v7215_v51  ;;  %v2553_v27 = vrot.slane %v9979_v22, 3  ;;  %v3654_v59 = vshll.u32 %v9823_v21, 16 }
 0x395   : > { %v4701_v9 = vsel %vm4678_vm7, %v4698_v16, %v4700_v31  ;;  %v4805_v2 = vsel %vm4782_vm8, %v4802_v40, %v4804_v20  ;;  %v3640_v29 = vsel %vm3183_vm4, %v9887_v26, %v9963_v58  ;;  %v3649_v57 = vsel %vm3183_vm4, %v9892_v46, %v9969_v38 }
 0x396   : > { %v4767_v4 = vmax.f32 %v4627_v28, %v4701_v9  ;;  %v4395_v53 = vrot.slane %v9958_v13, 6  ;;  %v3660_v7 = vshrl.u32 %v9997_v61, 16  ;;  %v3663_v46 = vshll.u32 %v9997_v61, 16 }
 0x397   : > { %v3008_v10 = vpop.f32.mrf.mxu3  ;;  %v2554_v31 = vsel %vm2442_vm3, %v2549_v15, %v2553_v27  ;;  %v4186_v21 = vadd.f32 %v9898_v32, %v9880_v14 }
 0x398   : > { %v4871_v33 = vmax.f32 %v4767_v4, %v4805_v2  ;;  %v9974_v16 = vsel %vm4364_vm5, %v4394_v63, %v4395_v53  ;;  %v3009_v40 = vadd.f32 %v3008_v10, %v9650_v44  ;;  %v3653_v2 = vrot.slane %v3651_v5, 3  ;;  %v7795_v10 = vld [vmem:[%s7919_s14 + $0x1e4] sm:$0xf0] }
 0x399   : > { %v4478_v28 = vmax.f32 %v9845_v50, %v9974_v16  ;;  %v9983_v47 = vpop.f32.mrf.mxu1  ;;  %v3656_v63 = vrot.slane %v3654_v59, 4  ;;  %v3662_v14 = vrot.slane %v3660_v7, 3  ;;  %v3665_v32 = vrot.slane %v3663_v46, 4  ;;  %v11617_v46 = vld [vmem:[#allocation15_spill] sm:$0xff] }
 0x39a   : > { %v9977_v19 = vpop.f32.mrf.mxu2  ;;  %4922 = vst.msk [vmem:[#allocation2 + $0x44] sm:$0x1] %vm4921_vm13, %v4871_v33  ;;  %v3119_v44 = vadd.f32 %v3009_v40, %v11615_v1  ;;  %v9992_v41 = vpop.f32.mrf.mxu0  ;;  %v7223_v33 = vld [vmem:[%s7919_s14 + $0x1c8] sm:$0xf0]  ;;  %v4189_v7 = vadd.f32 %v9935_v8, %v9914_v60  ;;  %v3669_v60 = vshrl.u32 %v9900_v0, 16  ;;  %v3672_v8 = vshll.u32 %v9900_v0, 16 }
 0x39b   : > { %v10035_v48 = vor.u32 %v3656_v63, %v3653_v2  ;;  %v10037_v51 = vor.u32 %v3665_v32, %v3662_v14  ;;  %v4191_v12 = vadd.f32 %v9977_v19, %v9956_v36 }
 0x39c   : > { %v9999_v43 = vadd.f32 %v4184_v49, %v3119_v44 }
 0x39d   : > { %4070 = vmatmul.bf16.gmra.mxu0 %v3640_v29 }
 0x39e   : > { %v4397_v26 = vrot.slane %v9999_v43, 6 }
 0x39f   : > { %7419 = vmatmul.msk.bf16.gmra.mxu2 %vm1183_vm2, %v3649_v57  ;;  %v3010_v30 = vpop.f32.mrf.mxu3 }
 0x3a0   : > { %v10010_v24 = vsel %vm4364_vm5, %v4395_v53, %v4397_v26  ;;  %v3011_v35 = vadd.f32 %v3010_v30, %v9691_v23  ;;  %v2540_v23 = vsel %vm2442_vm3, %v2535_v39, %v2539_v56  ;;  %v7237_v53 = vld [vmem:[%s7919_s14 + $0x1e0] sm:$0xf]  ;;  %v7790_v39 = vld [vmem:[%s7919_s14 + $0x1c4] sm:$0xf] }
 0x3a1   : > { %v4479_v20 = vmax.f32 %v9882_v52, %v10010_v24  ;;  %v10022_v9 = vpop.f32.mrf.mxu1  ;;  %v10041_v29 = vor.u32 %v7795_v10, %v7237_v53  ;;  %v10053_v59 = vor.u32 %v7790_v39, %v7223_v33  ;;  %v3671_v33 = vrot.slane %v3669_v60, 3 }
 0x3a2   : > { %v10013_v11 = vpop.f32.mrf.mxu2  ;;  %v3120_v18 = vadd.f32 %v3011_v35, %v11616_v45  ;;  %v10030_v15 = vpop.f32.mrf.mxu0 }
 0x3a3   : > { %v3678_v2 = vshrl.u32 %v10053_v59, 16 }
 0x3a4   : > { %v4295_v4 = vadd.f32 %v4186_v21, %v3120_v18  ;;  %2910 = vmatmul.bf16.gmra.mxu1 %v2554_v31  ;;  %7314 = vmatmul.msk.bf16.gmra.mxu3 %vm1183_vm2, %v2540_v23  ;;  %v2557_v31 = vrot.slane %v10041_v29, 3  ;;  %v2543_v23 = vrot.slane %v9919_v34, 3 }
 0x3a6   : > { %v4399_v3 = vrot.slane %v4295_v4, 6  ;;  %v4545_v45 = vrot.slane %v4295_v4, 4  ;;  %v2558_v14 = vsel %vm2442_vm3, %v2553_v27, %v2557_v31  ;;  %v2544_v4 = vsel %vm2442_vm3, %v2539_v56, %v2543_v23  ;;  %v11618_v56 = vld [vmem:[#allocation16_spill] sm:$0xff] }
 0x3a7   : > { %v3013_v40 = vpop.f32.mrf.mxu3 }
 0x3a8   : > { %v10044_v49 = vsel %vm4364_vm5, %v4397_v26, %v4399_v3  ;;  %v3014_v1 = vadd.f32 %v3013_v40, %v9729_v55  ;;  %v3658_v55 = vsel %vm3183_vm4, %v9963_v58, %v10035_v48  ;;  %v3667_v26 = vsel %vm3183_vm4, %v9969_v38, %v10037_v51 }
 0x3a9   : > { %v10049_v57 = vpop.f32.mrf.mxu1  ;;  %v4480_v5 = vmax.f32 %v9921_v42, %v10044_v49  ;;  %v3681_v38 = vshll.u32 %v10053_v59, 16  ;;  %v3674_v40 = vrot.slane %v3672_v8, 4  ;;  %v7792_v8 = vld [vmem:[%s7919_s14 + $0x1d4] sm:$0xf] }
 0x3aa   : > { %v10047_v44 = vpop.f32.mrf.mxu2  ;;  %v3121_v30 = vadd.f32 %v3014_v1, %v11617_v46  ;;  %v10058_v35 = vpop.f32.mrf.mxu0  ;;  %v10099_v1 = vld [vmem:[%s7919_s14 + $0x1f8] sm:$0x11] }
 0x3ab   : > { %v3683_v50 = vrot.slane %v3681_v38, 4 }
 0x3ac   : > { %v4296_v21 = vadd.f32 %v4189_v7, %v3121_v30  ;;  %v3680_v30 = vrot.slane %v3678_v2, 3 }
 0x3ad   : > { %4075 = vmatmul.bf16.gmra.mxu0 %v3658_v55  ;;  %v2378_v55 = vunpack.c.l.b16 %v10099_v1 }
 0x3ae   : > { %v4401_v58 = vrot.slane %v4296_v21, 6  ;;  %v4546_v18 = vrot.slane %v4296_v21, 4  ;;  %v10111_v36 = vor.u32 %v3683_v50, %v3680_v30 }
 0x3af   : > { %7420 = vmatmul.msk.bf16.gmra.mxu2 %vm1183_vm2, %v3667_v26  ;;  %v3015_v63 = vpop.f32.mrf.mxu3  ;;  %v10109_v26 = vor.u32 %v3674_v40, %v3671_v33 }
 0x3b0   : > { %v10077_v32 = vsel %vm4364_vm5, %v4399_v3, %v4401_v58  ;;  %v4547_v53 = vsel %vm1277_vm0, %v4545_v45, %v4546_v18  ;;  %v3016_v0 = vadd.f32 %v3015_v63, %v9758_v6  ;;  %v10096_v6 = vld [vmem:[%s7919_s14 + $0x1f0] sm:$0xff]  ;;  %v7231_v45 = vld [vmem:[%s7919_s14 + $0x1d8] sm:$0xf0] }
 0x3b1   : > { %v4481_v39 = vmax.f32 %v9958_v13, %v10077_v32  ;;  %v4629_v27 = vmax.f32 %v4478_v28, %v4547_v53  ;;  %v10093_v3 = vpop.f32.mrf.mxu1  ;;  %v2376_v28 = vunpack.c.l.b16 %v10096_v6 }
 0x3b2   : > { %v10081_v10 = vpop.f32.mrf.mxu2  ;;  %v3122_v7 = vadd.f32 %v3016_v0, %v11618_v56  ;;  %v10104_v46 = vpop.f32.mrf.mxu0  ;;  %v3685_v56 = vsel %vm3183_vm4, %v10037_v51, %v10111_v36  ;;  %v3687_v51 = vshrl.u32 %v9979_v22, 16 }
 0x3b3   : > { %v10124_v53 = vpack.c.b16 %v2378_v55, %v2376_v28  ;;  %v4702_v52 = vrot.slane %v4629_v27, 1  ;;  %v4806_v24 = vrot.slane %v4629_v27, 2  ;;  %v3690_v55 = vshll.u32 %v9979_v22, 16 }
 0x3b4   : > { %v4297_v16 = vadd.f32 %v4191_v12, %v3122_v7  ;;  %2915 = vmatmul.bf16.gmra.mxu1 %v2558_v14  ;;  %7315 = vmatmul.msk.bf16.gmra.mxu3 %vm1183_vm2, %v2544_v4  ;;  %v10144_v7 = vor.u32 %v7792_v8, %v7231_v45 }
 0x3b6   : > { %v4403_v21 = vrot.slane %v4297_v16, 6  ;;  %v4548_v60 = vrot.slane %v4297_v16, 4  ;;  %v2547_v16 = vrot.slane %v9997_v61, 3  ;;  %v3696_v8 = vshrl.u32 %v10144_v7, 16 }
 0x3b7   : > { %v3018_v19 = vpop.f32.mrf.mxu3  ;;  %v3699_v45 = vshll.u32 %v10144_v7, 16 }
 0x3b8   : > { %v10116_v2 = vsel %vm4364_vm5, %v4401_v58, %v4403_v21  ;;  %v4549_v38 = vsel %vm1277_vm0, %v4546_v18, %v4548_v60  ;;  %v3019_v63 = vadd.f32 %v3018_v19, %v9800_v25  ;;  %v3676_v58 = vsel %vm3183_vm4, %v10035_v48, %v10109_v26  ;;  %v11619_v18 = vld [vmem:[#allocation17_spill] sm:$0xff] }
 0x3b9   : > { %v4482_v0 = vmax.f32 %v9999_v43, %v10116_v2  ;;  %v4630_v4 = vmax.f32 %v4479_v20, %v4549_v38  ;;  %v10131_v33 = vpop.f32.mrf.mxu1  ;;  %v4194_v25 = vadd.f32 %v10013_v11, %v9992_v41  ;;  %v2561_v48 = vrot.slane %v10124_v53, 3 }
 0x3ba   : > { %v10120_v14 = vpop.f32.mrf.mxu2  ;;  %v3123_v40 = vadd.f32 %v3019_v63, %v11619_v18  ;;  %v10139_v12 = vpop.f32.mrf.mxu0  ;;  %v3698_v42 = vrot.slane %v3696_v8, 3  ;;  %v3701_v49 = vrot.slane %v3699_v45, 4  ;;  %v7794_v8 = vld [vmem:[%s7919_s14 + $0x1e4] sm:$0xf]  ;;  %v7239_v45 = vld [vmem:[%s7919_s14 + $0x1e8] sm:$0xf0] }
 0x3bb   : > { %v4703_v20 = vrot.slane %v4630_v4, 1  ;;  %v4807_v30 = vrot.slane %v4630_v4, 2  ;;  %v2562_v22 = vsel %vm2442_vm3, %v2557_v31, %v2561_v48  ;;  %v10212_v32 = vor.u32 %v7794_v8, %v7239_v45 }
 0x3bc   : > { %v4298_v50 = vadd.f32 %v4194_v25, %v3123_v40 }
 0x3bd   : > { %v4704_v41 = vsel %vm4678_vm7, %v4702_v52, %v4703_v20  ;;  %v4808_v11 = vsel %vm4782_vm8, %v4806_v24, %v4807_v30  ;;  %4080 = vmatmul.bf16.gmra.mxu0 %v3676_v58  ;;  %v4196_v52 = vadd.f32 %v10047_v44, %v10030_v15  ;;  %v11620_v24 = vld [vmem:[#allocation18_spill] sm:$0xff] }
 0x3be   : > { %v4768_v21 = vmax.f32 %v4629_v27, %v4704_v41  ;;  %v4550_v19 = vrot.slane %v4298_v50, 4 }
 0x3bf   : > { %7421 = vmatmul.msk.bf16.gmra.mxu2 %vm1183_vm2, %v3685_v56  ;;  %v3020_v38 = vpop.f32.mrf.mxu3  ;;  %v3692_v56 = vrot.slane %v3690_v55, 4  ;;  %v10187_v55 = vor.u32 %v3701_v49, %v3698_v42  ;;  %v3714_v42 = vshrl.u32 %v10212_v32, 16  ;;  %v3717_v49 = vshll.u32 %v10212_v32, 16 }
 0x3c0   : > { %v4872_v63 = vmax.f32 %v4768_v21, %v4808_v11  ;;  %v4551_v25 = vsel %vm1277_vm0, %v4548_v60, %v4550_v19  ;;  %v3021_v18 = vadd.f32 %v3020_v38, %v9830_v54  ;;  %v2548_v54 = vsel %vm2442_vm3, %v2543_v23, %v2547_v16 }
 0x3c1   : > { %v4631_v27 = vmax.f32 %v4480_v5, %v4551_v25  ;;  %v10167_v40 = vpop.f32.mrf.mxu1  ;;  %v3689_v60 = vrot.slane %v3687_v51, 3  ;;  %v3703_v13 = vsel %vm3183_vm4, %v10111_v36, %v10187_v55  ;;  %v3716_v43 = vrot.slane %v3714_v42, 3 }
 0x3c2   : > { %v10157_v58 = vpop.f32.mrf.mxu2  ;;  %4924 = vst.msk [vmem:[#allocation2 + $0x42] sm:$0xc0] %vm4923_vm14, %v4872_v63  ;;  %v3124_v31 = vadd.f32 %v3021_v18, %v11620_v24  ;;  %v10177_v50 = vpop.f32.mrf.mxu0  ;;  %v3708_v24 = vshll.u32 %v10041_v29, 16  ;;  %v3719_v2 = vrot.slane %v3717_v49, 4 }
 0x3c3   : > { %v4705_v5 = vrot.slane %v4631_v27, 1  ;;  %v4809_v41 = vrot.slane %v4631_v27, 2  ;;  %v10184_v44 = vor.u32 %v3692_v56, %v3689_v60 }
 0x3c4   : > { %v10179_v11 = vadd.f32 %v4196_v52, %v3124_v31  ;;  %2920 = vmatmul.bf16.gmra.mxu1 %v2562_v22  ;;  %7316 = vmatmul.msk.bf16.gmra.mxu3 %vm1183_vm2, %v2548_v54  ;;  %v4199_v22 = vadd.f32 %v10081_v10, %v10058_v35  ;;  %v3705_v52 = vshrl.u32 %v10041_v29, 16  ;;  %v3710_v45 = vrot.slane %v3708_v24, 4 }
 0x3c5   : > { %v4706_v34 = vsel %vm4678_vm7, %v4703_v20, %v4705_v5  ;;  %v4810_v15 = vsel %vm4782_vm8, %v4807_v30, %v4809_v41 }
 0x3c6   : > { %v4769_v23 = vmax.f32 %v4630_v4, %v4706_v34  ;;  %v4552_v51 = vrot.slane %v10179_v11, 4  ;;  %v3694_v4 = vsel %vm3183_vm4, %v10109_v26, %v10184_v44  ;;  %v2551_v26 = vrot.slane %v10053_v59, 3 }
 0x3c7   : > { %v3023_v21 = vpop.f32.mrf.mxu3  ;;  %v3707_v8 = vrot.slane %v3705_v52, 3 }
 0x3c8   : > { %v4873_v38 = vmax.f32 %v4769_v23, %v4810_v15  ;;  %v4553_v63 = vsel %vm1277_vm0, %v4550_v19, %v4552_v51  ;;  %v3024_v25 = vadd.f32 %v3023_v21, %v9869_v62  ;;  %v11621_v19 = vld [vmem:[#allocation19_spill] sm:$0xff]  ;;  %v2552_v21 = vsel %vm2442_vm3, %v2547_v16, %v2551_v26 }
 0x3c9   : > { %v4632_v20 = vmax.f32 %v4481_v39, %v4553_v63  ;;  %v10198_v30 = vpop.f32.mrf.mxu1 }
 0x3ca   : > { %v10193_v18 = vpop.f32.mrf.mxu2  ;;  %4925 = vst.msk [vmem:[#allocation2 + $0x4a] sm:$0xff] %vm4886_vm6, %v4873_v38  ;;  %v3125_v54 = vadd.f32 %v3024_v25, %v11621_v19  ;;  %v10207_v62 = vpop.f32.mrf.mxu0  ;;  %v2377_v19 = vunpack.c.h.b16 %v10096_v6 }
 0x3cb   : > { %v4707_v39 = vrot.slane %v4632_v20, 1  ;;  %v4811_v60 = vrot.slane %v4632_v20, 2 }
 0x3cc   : > { %v10214_v56 = vadd.f32 %v4199_v22, %v3125_v54 }
 0x3cd   : > { %v4708_v35 = vsel %vm4678_vm7, %v4705_v5, %v4707_v39  ;;  %v4812_v10 = vsel %vm4782_vm8, %v4809_v41, %v4811_v60  ;;  %4085 = vmatmul.bf16.gmra.mxu0 %v3694_v4 }
 0x3ce   : > { %v4770_v36 = vmax.f32 %v4631_v27, %v4708_v35  ;;  %v4554_v31 = vrot.slane %v10214_v56, 4 }
 0x3cf   : > { %7422 = vmatmul.msk.bf16.gmra.mxu2 %vm1183_vm2, %v3703_v13  ;;  %v3025_v34 = vpop.f32.mrf.mxu3  ;;  %v10256_v13 = vor.u32 %v3719_v2, %v3716_v43  ;;  %v4206_v43 = vadd.f32 %v10193_v18, %v10177_v50  ;;  %v10314_v18 = vld [vmem:[#allocation2 + $0x10] sm:$0xff] }
 0x3d0   : > { %v4874_v15 = vmax.f32 %v4770_v36, %v4812_v10  ;;  %v4555_v5 = vsel %vm1277_vm0, %v4552_v51, %v4554_v31  ;;  %v3026_v41 = vadd.f32 %v3025_v34, %v9905_v17  ;;  %v4201_v51 = vadd.f32 %v10120_v14, %v10104_v46  ;;  %v11622_v17 = vld [vmem:[#allocation20_spill] sm:$0xff]  ;;  %v11623_v36 = vld [vmem:[#allocation21_spill] sm:$0xff]  ;;  %v10283_v34 = vld [vmem:[#allocation2 + $0x8] sm:$0xff] }
 0x3d1   : > { %v4633_v29 = vmax.f32 %v4482_v0, %v4555_v5  ;;  %v10232_v27 = vpop.f32.mrf.mxu1  ;;  %v3151_v0 = vld [vmem:[%s7919_s14 + $0x1f8] sm:$0x33]  ;;  %v10253_v14 = vor.u32 %v3710_v45, %v3707_v8  ;;  %v4975_v45 = vrot.slane %v10283_v34, 3 }
 0x3d2   : > { %v10227_v23 = vpop.f32.mrf.mxu2  ;;  %4926 = vst.msk [vmem:[#allocation2 + $0x52] sm:$0xff] %vm4886_vm6, %v4874_v15  ;;  %v3126_v38 = vadd.f32 %v3026_v41, %v11622_v17  ;;  %v10243_v63 = vpop.f32.mrf.mxu0  ;;  %v3179_v16 = vunpack.c.l.b16 %v3151_v0  ;;  %v3180_v35 = vunpack.c.h.b16 %v3151_v0 }
 0x3d3   : > { %v4709_v25 = vrot.slane %v4633_v29, 1  ;;  %v4813_v4 = vrot.slane %v4633_v29, 2 }
 0x3d4   : > { %v10246_v22 = vadd.f32 %v4201_v51, %v3126_v38  ;;  %2925 = vmatmul.bf16.gmra.mxu1 %v2561_v48  ;;  %7317 = vmatmul.msk.bf16.gmra.mxu3 %vm1183_vm2, %v2552_v21  ;;  %v3182_v49 = vpack.c.b16 %v3180_v35, %v2377_v19 }
 0x3d5   : > { %v4710_v61 = vsel %vm4678_vm7, %v4707_v39, %v4709_v25  ;;  %v4814_v46 = vsel %vm4782_vm8, %v4811_v60, %v4813_v4  ;;  %v3712_v39 = vsel %vm3183_vm4, %v10184_v44, %v10253_v14  ;;  %v3181_v60 = vpack.c.b16 %v3179_v16, %v2376_v28  ;;  %v7461_v44 = vld [vmem:[%s11547_s2 + $0x48] sm:$0xff] }
 0x3d6   : > { %v4771_v54 = vmax.f32 %v4632_v20, %v4710_v61  ;;  %v4204_v20 = vadd.f32 %v10157_v58, %v10139_v12  ;;  %5282 = vmatpush.msrb.mxu1 %v7461_v44  ;;  %v2555_v12 = vrot.slane %v10144_v7, 3  ;;  %v10287_v58 = vld [vmem:[#allocation2] sm:$0xff]  ;;  %v4405_v5 = vrot.slane %v10246_v22, 6  ;;  %v11625_v44 = vld [vmem:[#allocation23_spill] sm:$0xff] }
 0x3d7   : > { %v3028_v10 = vpop.f32.mrf.mxu3  ;;  %v3726_v15 = vshll.u32 %v3181_v60, 16  ;;  %v3732_v29 = vshrl.u32 %v3182_v49, 16  ;;  %v3735_v21 = vshll.u32 %v3182_v49, 16  ;;  %v4974_v7 = vrot.slane %v10287_v58, 3  ;;  %v11624_v61 = vld [vmem:[#allocation22_spill] sm:$0xff] }
 0x3d8   : > { %v4875_v52 = vmax.f32 %v4771_v54, %v4814_v46  ;;  %v3029_v53 = vadd.f32 %v3028_v10, %v9945_v37  ;;  %v3721_v37 = vsel %vm3183_vm4, %v10187_v55, %v10256_v13  ;;  %v3723_v55 = vshrl.u32 %v3181_v60, 16 }
 0x3d9   : > { %v10261_v24 = vpop.f32.mrf.mxu1  ;;  %v2556_v25 = vsel %vm2442_vm3, %v2551_v26, %v2555_v12  ;;  %v3728_v16 = vrot.slane %v3726_v15, 4  ;;  %v3734_v54 = vrot.slane %v3732_v29, 3  ;;  %v3737_v35 = vrot.slane %v3735_v21, 4  ;;  %v10344_v21 = vld [vmem:[#allocation2 + $0x18] sm:$0xff] }
 0x3da   : > { %v10259_v48 = vpop.f32.mrf.mxu2  ;;  %4928 = vst.msk [vmem:[#allocation2 + $0x5a] sm:$0x7] %vm4927_vm15, %v4875_v52  ;;  %v3127_v31 = vadd.f32 %v3029_v53, %v11623_v36  ;;  %v10271_v42 = vpop.f32.mrf.mxu0  ;;  %v3725_v4 = vrot.slane %v3723_v55, 3  ;;  %v4976_v10 = vsel %vm2442_vm3, %v4974_v7, %v4975_v45  ;;  %v4209_v49 = vadd.f32 %v10227_v23, %v10207_v62 }
 0x3db   : > { %v10318_v26 = vor.u32 %v3737_v35, %v3734_v54  ;;  %v2559_v62 = vrot.slane %v10212_v32, 3  ;;  %v7443_v32 = vld [vmem:[%s11547_s2 + $0x28] sm:$0xff]  ;;  %v7442_v54 = vld [vmem:[%s11547_s2 + $0x20] sm:$0xff] }
 0x3dc   : > { %v10281_v28 = vadd.f32 %v4204_v20, %v3127_v31  ;;  %v10316_v52 = vor.u32 %v3728_v16, %v3725_v4  ;;  %v4211_v4 = vadd.f32 %v10259_v48, %v10243_v63  ;;  %5135 = vmatpush.msrb.mxu0 %v7443_v32  ;;  %v2379_v63 = vunpack.c.h.b16 %v10099_v1 }
 0x3dd   : > { %4090 = vmatmul.bf16.gmra.mxu0 %v3712_v39  ;;  %v4977_v39 = vrot.slane %v10314_v18, 3 }
 0x3de   : > { %v4406_v41 = vrot.slane %v10281_v28, 6  ;;  %5136 = vmatpush.msrb.mxu0 %v7442_v54 }
 0x3df   : > { %7423 = vmatmul.msk.bf16.gmra.mxu2 %vm1183_vm2, %v3721_v37  ;;  %v3030_v8 = vpop.f32.mrf.mxu3 }
 0x3e0   : > { %v10293_v51 = vsel %vm4364_vm5, %v4405_v5, %v4406_v41  ;;  %v3031_v17 = vadd.f32 %v3030_v8, %v9983_v47  ;;  %v3730_v5 = vsel %vm3183_vm4, %v10253_v14, %v10316_v52  ;;  %v4979_v14 = vrot.slane %v10344_v21, 3 }
 0x3e1   : > { %v4483_v2 = vmax.f32 %v10179_v11, %v10293_v51  ;;  %v10303_v0 = vpop.f32.mrf.mxu1  ;;  %v10407_v51 = vld [vmem:[#allocation2 + $0x28] sm:$0xff] }
 0x3e2   : > { %v10296_v38 = vpop.f32.mrf.mxu2  ;;  %v3128_v46 = vadd.f32 %v3031_v17, %v11624_v61  ;;  %v10309_v47 = vpop.f32.mrf.mxu0  ;;  %v11626_v61 = vld [vmem:[#allocation24_spill] sm:$0xff] }
 0x3e4   : > { %v4303_v50 = vadd.f32 %v4206_v43, %v3128_v46  ;;  %7318 = vmatmul.msk.bf16.gmra.mxu3 %vm1183_vm2, %v2556_v25  ;;  %7428 = vmatmul.msk.f32.vlgmr.msra.gmra.mxu1 %vm4886_vm6, %v4976_v10  ;;  %v2560_v25 = vsel %vm2442_vm3, %v2555_v12, %v2559_v62  ;;  %v10374_v12 = vld [vmem:[#allocation2 + $0x20] sm:$0xff] }
 0x3e6   : > { %v4408_v59 = vrot.slane %v4303_v50, 6 }
 0x3e7   : > { %v3033_v53 = vpop.f32.mrf.mxu3 }
 0x3e8   : > { %v10322_v60 = vsel %vm4364_vm5, %v4406_v41, %v4408_v59  ;;  %v3034_v20 = vadd.f32 %v3033_v53, %v10022_v9  ;;  %v3739_v9 = vsel %vm3183_vm4, %v10256_v13, %v10318_v26  ;;  %v4978_v41 = vsel %vm2442_vm3, %v4975_v45, %v4977_v39 }
 0x3e9   : > { %v4484_v31 = vmax.f32 %v10214_v56, %v10322_v60  ;;  %v10329_v37 = vpop.f32.mrf.mxu1  ;;  %v4981_v53 = vrot.slane %v10374_v12, 3 }
 0x3ea   : > { %v10325_v36 = vpop.f32.mrf.mxu2  ;;  %v3129_v55 = vadd.f32 %v3034_v20, %v11625_v44  ;;  %v10334_v15 = vpop.f32.mrf.mxu0 }
 0x3eb   : > { %v10405_v11 = vsel %vm2442_vm3, %v4979_v14, %v4981_v53 }
 0x3ec   : > { %v4304_v29 = vadd.f32 %v4209_v49, %v3129_v55  ;;  %7429 = vmatmul.msk.f32.gmra.mxu1 %vm4886_vm6, %v4978_v41  ;;  %v4214_v41 = vadd.f32 %v10296_v38, %v10271_v42  ;;  %v4983_v38 = vrot.slane %v10407_v51, 3 }
 0x3ed   : > { %4095 = vmatmul.bf16.gmra.mxu0 %v3730_v5 }
 0x3ee   : > { %v4410_v23 = vrot.slane %v4304_v29, 6  ;;  %v4556_v48 = vrot.slane %v4304_v29, 4  ;;  %v11627_v29 = vld [vmem:[#allocation25_spill] sm:$0xff] }
 0x3ef   : > { %7424 = vmatmul.msk.bf16.gmra.mxu2 %vm1183_vm2, %v3739_v9  ;;  %v3035_v8 = vpop.f32.mrf.mxu3  ;;  %v10394_v9 = vpack.c.b16 %v2379_v63, %v2377_v19 }
 0x3f0   : > { %v10350_v17 = vsel %vm4364_vm5, %v4408_v59, %v4410_v23  ;;  %v3036_v13 = vadd.f32 %v3035_v8, %v10049_v57  ;;  %v4980_v57 = vsel %vm2442_vm3, %v4977_v39, %v4979_v14  ;;  %v7460_v8 = vld [vmem:[%s11547_s2 + $0x40] sm:$0xff] }
 0x3f1   : > { %v4485_v7 = vmax.f32 %v10246_v22, %v10350_v17  ;;  %v10357_v43 = vpop.f32.mrf.mxu1  ;;  %5283 = vmatpush.msrb.mxu1 %v7460_v8  ;;  %v2563_v19 = vrot.slane %v10394_v9, 3  ;;  %v7470_v8 = vld [vmem:[%s11547_s2 + $0x58] sm:$0xff]  ;;  %v5166_v22 = vrot.slane %v10283_v34, 1  ;;  %v5240_v9 = vrot.slane %v10314_v18, 4 }
 0x3f2   : > { %v10353_v45 = vpop.f32.mrf.mxu2  ;;  %v3130_v46 = vadd.f32 %v3036_v13, %v11626_v61  ;;  %v10366_v16 = vpop.f32.mrf.mxu0  ;;  %v11628_v61 = vld [vmem:[#allocation26_spill] sm:$0xff]  ;;  %5333 = vmatpush.msra.mxu3 %v7470_v8  ;;  %v5092_v8 = vrot.slane %v10287_v58, 6 }
 0x3f4   : > { %v4305_v35 = vadd.f32 %v4211_v4, %v3130_v46  ;;  %7319 = vmatmul.msk.bf16.gmra.mxu3 %vm1183_vm2, %v2560_v25  ;;  %7430 = vmatmul.msk.f32.gmra.mxu1 %vm4886_vm6, %v4980_v57  ;;  %v4216_v4 = vadd.f32 %v10325_v36, %v10309_v47 }
 0x3f6   : > { %v4412_v10 = vrot.slane %v4305_v35, 6  ;;  %v4557_v50 = vrot.slane %v4305_v35, 4 }
 0x3f7   : > { %v3038_v59 = vpop.f32.mrf.mxu3 }
 0x3f8   : > { %v10379_v39 = vsel %vm4364_vm5, %v4410_v23, %v4412_v10  ;;  %v4558_v20 = vsel %vm1277_vm0, %v4556_v48, %v4557_v50  ;;  %v3039_v49 = vadd.f32 %v3038_v59, %v10093_v3 }
 0x3f9   : > { %v4486_v55 = vmax.f32 %v10281_v28, %v10379_v39  ;;  %v4634_v1 = vmax.f32 %v4483_v2, %v4558_v20  ;;  %v10390_v5 = vpop.f32.mrf.mxu1 }
 0x3fa   : > { %v10383_v44 = vpop.f32.mrf.mxu2  ;;  %v3131_v3 = vadd.f32 %v3039_v49, %v11627_v29  ;;  %v10399_v23 = vpop.f32.mrf.mxu0 }
 0x3fb   : > { %v4711_v54 = vrot.slane %v4634_v1, 1  ;;  %v4815_v35 = vrot.slane %v4634_v1, 2 }
 0x3fc   : > { %v4306_v6 = vadd.f32 %v4214_v41, %v3131_v3  ;;  %7431 = vmatmul.msk.f32.gmra.mxu1 %vm4886_vm6, %v10405_v11  ;;  %v5167_v41 = vrot.slane %v10314_v18, 1 }
 0x3fd   : > { %4100 = vmatmul.bf16.gmra.mxu0 %v10316_v52 }
 0x3fe   : > { %v4559_v42 = vrot.slane %v4306_v6, 4  ;;  %v11629_v6 = vld [vmem:[#allocation27_spill] sm:$0xff] }
 0x3ff   : > { %7425 = vmatmul.msk.bf16.gmra.mxu2 %vm1183_vm2, %v10318_v26  ;;  %v3040_v2 = vpop.f32.mrf.mxu3  ;;  %v2564_v26 = vsel %vm2442_vm3, %v2559_v62, %v2563_v19  ;;  %v10441_v62 = vld [vmem:[#allocation2 + $0x30] sm:$0xff] }
 0x400   : > { %v4560_v14 = vsel %vm1277_vm0, %v4557_v50, %v4559_v42  ;;  %v3041_v13 = vadd.f32 %v3040_v2, %v10131_v33  ;;  %v10434_v33 = vsel %vm2442_vm3, %v4981_v53, %v4983_v38  ;;  %v4985_v50 = vrot.slane %v10441_v62, 3 }
 0x401   : > { %v4635_v32 = vmax.f32 %v4484_v31, %v4560_v14  ;;  %v10423_v52 = vpop.f32.mrf.mxu1 }
 0x402   : > { %v10418_v25 = vpop.f32.mrf.mxu2  ;;  %v3132_v46 = vadd.f32 %v3041_v13, %v11628_v61  ;;  %v10431_v57 = vpop.f32.mrf.mxu0  ;;  %v10471_v14 = vsel %vm2442_vm3, %v4983_v38, %v4985_v50  ;;  %v7479_v13 = vld [vmem:[%s11547_s2 + $0x68] sm:$0xff] }
 0x403   : > { %v4712_v56 = vrot.slane %v4635_v32, 1  ;;  %v4816_v60 = vrot.slane %v4635_v32, 2 }
 0x404   : > { %v10436_v31 = vadd.f32 %v4216_v4, %v3132_v46  ;;  %7320 = vmatmul.msk.bf16.gmra.mxu3 %vm1183_vm2, %v2564_v26  ;;  %7432 = vmatmul.msk.f32.gmra.mxu1 %vm4886_vm6, %v10434_v33  ;;  %v10481_v26 = vld [vmem:[#allocation2 + $0x38] sm:$0xff] }
 0x405   : > { %v4713_v47 = vsel %vm4678_vm7, %v4711_v54, %v4712_v56  ;;  %v4817_v36 = vsel %vm4782_vm8, %v4815_v35, %v4816_v60  ;;  %v4987_v35 = vrot.slane %v10481_v26, 3 }
 0x406   : > { %v4772_v63 = vmax.f32 %v4634_v1, %v4713_v47  ;;  %v4561_v48 = vrot.slane %v10436_v31, 4  ;;  %v7488_v1 = vld [vmem:[%s11547_s2 + $0x78] sm:$0xff]  ;;  %v5093_v47 = vrot.slane %v10283_v34, 6 }
 0x407   : > { %v3043_v10 = vpop.f32.mrf.mxu3  ;;  %5446 = vmatpush.msrb.mxu2 %v7488_v1 }
 0x408   : > { %v4876_v59 = vmax.f32 %v4772_v63, %v4817_v36  ;;  %v4562_v53 = vsel %vm1277_vm0, %v4559_v42, %v4561_v48  ;;  %v3044_v20 = vadd.f32 %v3043_v10, %v10167_v40  ;;  %v4219_v40 = vadd.f32 %v10353_v45, %v10334_v15 }
 0x409   : > { %v4636_v29 = vmax.f32 %v4485_v7, %v4562_v53  ;;  %v10455_v3 = vpop.f32.mrf.mxu1  ;;  %v5168_v45 = vsel %vm4678_vm7, %v5166_v22, %v5167_v41  ;;  %v5169_v10 = vrot.slane %v10344_v21, 1  ;;  %v7497_v53 = vld [vmem:[%s11547_s2 + $0x88] sm:$0xff] }
 0x40a   : > { %v10449_v49 = vpop.f32.mrf.mxu2  ;;  %4929 = vst.msk [vmem:[#allocation2 + $0x60] sm:$0xff] %vm4886_vm6, %v4876_v59  ;;  %v3133_v42 = vadd.f32 %v3044_v20, %v11629_v6  ;;  %v10467_v2 = vpop.f32.mrf.mxu0  ;;  %v4221_v20 = vadd.f32 %v10383_v44, %v10366_v16  ;;  %5503 = vmatpush.msra.mxu1 %v7497_v53  ;;  %v5094_v16 = vsel %vm4364_vm5, %v5092_v8, %v5093_v47 }
 0x40b   : > { %v4714_v17 = vrot.slane %v4636_v29, 1  ;;  %v4818_v7 = vrot.slane %v4636_v29, 2  ;;  %v4226_v8 = vadd.f32 %v10449_v49, %v10431_v57 }
 0x40c   : > { %v10476_v15 = vadd.f32 %v4219_v40, %v3133_v42  ;;  %7433 = vmatmul.msk.f32.gmra.mxu1 %vm4886_vm6, %v10471_v14 }
 0x40d   : > { %v4715_v4 = vsel %vm4678_vm7, %v4712_v56, %v4714_v17  ;;  %v4819_v61 = vsel %vm4782_vm8, %v4816_v60, %v4818_v7  ;;  %7435 = vmatmul.msk.f32.vlgmr.msra.gmra.mxu0 %vm4886_vm6, %v10287_v58  ;;  %v5170_v58 = vsel %vm4678_vm7, %v5167_v41, %v5169_v10  ;;  %v5171_v41 = vrot.slane %v10374_v12, 1 }
 0x40e   : > { %v4773_v38 = vmax.f32 %v4635_v32, %v4715_v4  ;;  %v4563_v46 = vrot.slane %v10476_v15, 4  ;;  %5390 = vmatpush.msra.mxu0 %v7479_v13  ;;  %v4224_v4 = vadd.f32 %v10418_v25, %v10399_v23 }
 0x40f   : > { %7453 = vmatmul.msk.f32.vlgmr.msra.gmra.mxu2 %vm4886_vm6, %v5168_v45  ;;  %v3045_v54 = vpop.f32.mrf.mxu3  ;;  %v5095_v45 = vrot.slane %v10314_v18, 6 }
 0x410   : > { %v4877_v36 = vmax.f32 %v4773_v38, %v4819_v61  ;;  %v4564_v63 = vsel %vm1277_vm0, %v4561_v48, %v4563_v46  ;;  %v3046_v56 = vadd.f32 %v3045_v54, %v10198_v30  ;;  %v11630_v30 = vld [vmem:[#allocation28_spill] sm:$0xff] }
 0x411   : > { %v4637_v32 = vmax.f32 %v4486_v55, %v4564_v63  ;;  %v10499_v59 = vpop.f32.mrf.mxu1  ;;  %v10514_v55 = vsel %vm2442_vm3, %v4985_v50, %v4987_v35  ;;  %v5096_v54 = vsel %vm4364_vm5, %v5093_v47, %v5095_v45  ;;  %v5097_v47 = vrot.slane %v10344_v21, 6 }
 0x412   : > { %v10493_v60 = vpop.f32.mrf.mxu2  ;;  %4930 = vst.msk [vmem:[#allocation2 + $0x68] sm:$0xff] %vm4886_vm6, %v4877_v36  ;;  %v3134_v48 = vadd.f32 %v3046_v56, %v11630_v30  ;;  %v10508_v1 = vpop.f32.mrf.mxu0  ;;  %v5172_v36 = vsel %vm4678_vm7, %v5169_v10, %v5171_v41  ;;  %v5242_v56 = vrot.slane %v10344_v21, 4  ;;  %v5173_v10 = vrot.slane %v10407_v51, 1 }
 0x413   : > { %v4716_v28 = vrot.slane %v4637_v32, 1  ;;  %v4820_v39 = vrot.slane %v4637_v32, 2 }
 0x414   : > { %v10516_v40 = vadd.f32 %v4221_v20, %v3134_v48  ;;  %7321 = vmatmul.msk.bf16.gmra.mxu3 %vm1183_vm2, %v2563_v19  ;;  %7434 = vmatmul.msk.f32.gmra.mxu1 %vm4886_vm6, %v10514_v55 }
 0x415   : > { %v4717_v44 = vsel %vm4678_vm7, %v4714_v17, %v4716_v28  ;;  %v4821_v6 = vsel %vm4782_vm8, %v4818_v7, %v4820_v39  ;;  %7444 = vmatmul.msk.f32.vlgmr.msrb.gmra.mxu0 %vm4886_vm6, %v5094_v16  ;;  %v5239_v7 = vrot.slane %v10283_v34, 4  ;;  %v11632_v28 = vld [vmem:[#allocation30_spill] sm:$0xff] }
 0x416   : > { %v4774_v50 = vmax.f32 %v4636_v29, %v4717_v44  ;;  %v11631_v29 = vld [vmem:[#allocation29_spill] sm:$0xff]  ;;  %v4414_v23 = vrot.slane %v10516_v40, 6  ;;  %v5098_v44 = vsel %vm4364_vm5, %v5095_v45, %v5097_v47 }
 0x417   : > { %7454 = vmatmul.msk.f32.gmra.mxu2 %vm4886_vm6, %v5170_v58  ;;  %v3048_v42 = vpop.f32.mrf.mxu3 }
 0x418   : > { %v4878_v19 = vmax.f32 %v4774_v50, %v4821_v6  ;;  %v3049_v22 = vadd.f32 %v3048_v42, %v10232_v27  ;;  %v5241_v27 = vsel %vm1277_vm0, %v5239_v7, %v5240_v9  ;;  %v10578_v6 = vsel %vm4678_vm7, %v5171_v41, %v5173_v10  ;;  %v7487_v7 = vld [vmem:[%s11547_s2 + $0x70] sm:$0xff] }
 0x419   : > { %v10535_v17 = vpop.f32.mrf.mxu1  ;;  %v5244_v50 = vrot.slane %v10374_v12, 4  ;;  %5447 = vmatpush.msrb.mxu2 %v7487_v7 }
 0x41a   : > { %v10531_v13 = vpop.f32.mrf.mxu2  ;;  %4931 = vst.msk [vmem:[#allocation2 + $0x70] sm:$0x1f] %vm4910_vm9, %v4878_v19  ;;  %v3135_v61 = vadd.f32 %v3049_v22, %v11631_v29  ;;  %v10542_v38 = vpop.f32.mrf.mxu0  ;;  %v5099_v19 = vrot.slane %v10374_v12, 6  ;;  %v5175_v22 = vrot.slane %v10441_v62, 1  ;;  %v11633_v29 = vld [vmem:[#allocation31_spill] sm:$0xff] }
 0x41c   : > { %v10545_v46 = vadd.f32 %v4224_v4, %v3135_v61  ;;  %7462 = vmatmul.msk.f32.vlgmr.msrb.gmra.mxu1 %vm4886_vm6, %v5241_v27  ;;  %v4229_v4 = vadd.f32 %v10493_v60, %v10467_v2  ;;  %v7469_v27 = vld [vmem:[%s11547_s2 + $0x50] sm:$0xff]  ;;  %v10612_v2 = vsel %vm4364_vm5, %v5097_v47, %v5099_v19  ;;  %v10615_v60 = vsel %vm4678_vm7, %v5173_v10, %v5175_v22 }
 0x41d   : > { %7445 = vmatmul.msk.f32.gmra.mxu0 %vm4886_vm6, %v5096_v54  ;;  %v5245_v54 = vsel %vm1277_vm0, %v5242_v56, %v5244_v50  ;;  %5334 = vmatpush.msra.mxu3 %v7469_v27  ;;  %v5101_v47 = vrot.slane %v10407_v51, 6  ;;  %v5177_v10 = vrot.slane %v10481_v26, 1  ;;  %v5248_v27 = vrot.slane %v10441_v62, 4 }
 0x41e   : > { %v4415_v25 = vrot.slane %v10545_v46, 6 }
 0x41f   : > { %7455 = vmatmul.msk.f32.gmra.mxu2 %vm4886_vm6, %v5172_v36  ;;  %v3050_v63 = vpop.f32.mrf.mxu3 }
 0x420   : > { %v10556_v32 = vsel %vm4364_vm5, %v4414_v23, %v4415_v25  ;;  %v3051_v53 = vadd.f32 %v3050_v63, %v10261_v24  ;;  %v5243_v24 = vsel %vm1277_vm0, %v5240_v9, %v5242_v56  ;;  %v5246_v63 = vrot.slane %v10407_v51, 4 }
 0x421   : > { %v4487_v30 = vmax.f32 %v10436_v31, %v10556_v32  ;;  %v10565_v48 = vpop.f32.mrf.mxu1 }
 0x422   : > { %v10559_v20 = vpop.f32.mrf.mxu2  ;;  %v3136_v39 = vadd.f32 %v3051_v53, %v11632_v28  ;;  %v10570_v16 = vpop.f32.mrf.mxu0 }
 0x424   : > { %v4311_v58 = vadd.f32 %v4226_v8, %v3136_v39  ;;  %7436 = vmatmul.msk.f32.vlgmr.msrb.gmra.mxu3 %vm4886_vm6, %v10283_v34  ;;  %7463 = vmatmul.msk.f32.gmra.mxu1 %vm4886_vm6, %v5243_v24  ;;  %v4231_v39 = vadd.f32 %v10531_v13, %v10508_v1  ;;  %v11634_v24 = vld [vmem:[#allocation32_spill] sm:$0xff]  ;;  %v10653_v1 = vsel %vm4364_vm5, %v5099_v19, %v5101_v47  ;;  %v5103_v19 = vrot.slane %v10441_v62, 6 }
 0x425   : > { %7446 = vmatmul.msk.f32.gmra.mxu0 %vm4886_vm6, %v5098_v44  ;;  %v10656_v13 = vsel %vm4678_vm7, %v5175_v22, %v5177_v10 }
 0x426   : > { %v4417_v57 = vrot.slane %v4311_v58, 6  ;;  %v10697_v31 = vsel %vm4364_vm5, %v5101_v47, %v5103_v19 }
 0x427   : > { %7456 = vmatmul.msk.f32.gmra.mxu2 %vm4886_vm6, %v10578_v6  ;;  %v3053_v49 = vpop.f32.mrf.mxu3 }
 0x428   : > { %v10585_v42 = vsel %vm4364_vm5, %v4415_v25, %v4417_v57  ;;  %v3054_v34 = vadd.f32 %v3053_v49, %v10303_v0  ;;  %v10646_v49 = vsel %vm1277_vm0, %v5244_v50, %v5246_v63  ;;  %v10662_v50 = vld [vmem:[#allocation2 + $0x40] sm:$0xff] }
 0x429   : > { %v4488_v45 = vmax.f32 %v10476_v15, %v10585_v42  ;;  %v10594_v41 = vpop.f32.mrf.mxu1 }
 0x42a   : > { %v10588_v9 = vpop.f32.mrf.mxu2  ;;  %v3137_v0 = vadd.f32 %v3054_v34, %v11633_v29  ;;  %v10602_v61 = vpop.f32.mrf.mxu0 }
 0x42c   : > { %v4312_v36 = vadd.f32 %v4229_v4, %v3137_v0  ;;  %7437 = vmatmul.msk.f32.gmra.mxu3 %vm4886_vm6, %v10314_v18  ;;  %7464 = vmatmul.msk.f32.gmra.mxu1 %vm4886_vm6, %v5245_v54 }
 0x42d   : > { %7447 = vmatmul.msk.f32.gmra.mxu0 %vm4886_vm6, %v10612_v2 }
 0x42e   : > { %v4419_v23 = vrot.slane %v4312_v36, 6  ;;  %v4565_v7 = vrot.slane %v4312_v36, 4 }
 0x42f   : > { %7457 = vmatmul.msk.f32.gmra.mxu2 %vm4886_vm6, %v10615_v60  ;;  %v3055_v25 = vpop.f32.mrf.mxu3 }
 0x430   : > { %v10623_v18 = vsel %vm4364_vm5, %v4417_v57, %v4419_v23  ;;  %v3056_v56 = vadd.f32 %v3055_v25, %v10329_v37  ;;  %v7478_v37 = vld [vmem:[%s11547_s2 + $0x60] sm:$0xff] }
 0x431   : > { %v4489_v8 = vmax.f32 %v10516_v40, %v10623_v18  ;;  %v10632_v28 = vpop.f32.mrf.mxu1  ;;  %v7496_v57 = vld [vmem:[%s11547_s2 + $0x80] sm:$0xff]  ;;  %5391 = vmatpush.msra.mxu0 %v7478_v37  ;;  %v11635_v37 = vld [vmem:[#allocation33_spill] sm:$0xff] }
 0x432   : > { %v10626_v53 = vpop.f32.mrf.mxu2  ;;  %v3138_v58 = vadd.f32 %v3056_v56, %v11634_v24  ;;  %v10637_v44 = vpop.f32.mrf.mxu0  ;;  %5504 = vmatpush.msra.mxu1 %v7496_v57 }
 0x434   : > { %v4313_v34 = vadd.f32 %v4231_v39, %v3138_v58  ;;  %7438 = vmatmul.msk.f32.gmra.mxu3 %vm4886_vm6, %v10344_v21  ;;  %7465 = vmatmul.msk.f32.gmra.mxu1 %vm4886_vm6, %v10646_v49  ;;  %v11555_v39 = vrot.slane %v10662_v50, 1 }
 0x435   : > { %7448 = vmatmul.msk.f32.gmra.mxu0 %vm4886_vm6, %v10653_v1 }
 0x436   : > { %v4421_v4 = vrot.slane %v4313_v34, 6  ;;  %v4566_v29 = vrot.slane %v4313_v34, 4 }
 0x437   : > { %7458 = vmatmul.msk.f32.gmra.mxu2 %vm4886_vm6, %v10656_v13  ;;  %v3058_v0 = vpop.f32.mrf.mxu3 }
 0x438   : > { %v10667_v54 = vsel %vm4364_vm5, %v4419_v23, %v4421_v4  ;;  %v4567_v22 = vsel %vm1277_vm0, %v4565_v7, %v4566_v29  ;;  %v3059_v25 = vadd.f32 %v3058_v0, %v10357_v43  ;;  %v4234_v23 = vadd.f32 %v10559_v20, %v10542_v38  ;;  %v7506_v43 = vld [vmem:[%s11547_s2 + $0x98] sm:$0xff] }
 0x439   : > { %v4490_v36 = vmax.f32 %v10545_v46, %v10667_v54  ;;  %v4638_v24 = vmax.f32 %v4487_v30, %v4567_v22  ;;  %v10679_v58 = vpop.f32.mrf.mxu1  ;;  %v10690_v7 = vsel %vm1277_vm0, %v5246_v63, %v5248_v27  ;;  %5559 = vmatpush.msrb.mxu3 %v7506_v43  ;;  %v10702_v38 = vsel %vm4678_vm7, %v5177_v10, %v11555_v39 }
 0x43a   : > { %v10671_v56 = vpop.f32.mrf.mxu2  ;;  %v3139_v57 = vadd.f32 %v3059_v25, %v11635_v37  ;;  %v10684_v34 = vpop.f32.mrf.mxu0  ;;  %v5250_v20 = vrot.slane %v10481_v26, 4  ;;  %v5105_v22 = vrot.slane %v10481_v26, 6  ;;  %v11636_v37 = vld [vmem:[#allocation34_spill] sm:$0xff] }
 0x43b   : > { %v4718_v42 = vrot.slane %v4638_v24, 1 }
 0x43c   : > { %v4314_v4 = vadd.f32 %v4234_v23, %v3139_v57  ;;  %7439 = vmatmul.msk.f32.gmra.mxu3 %vm4886_vm6, %v10374_v12  ;;  %7466 = vmatmul.msk.f32.gmra.mxu1 %vm4886_vm6, %v10690_v7  ;;  %v7524_v23 = vld [vmem:[%s11547_s2 + $0xb8] sm:$0xff]  ;;  %v10731_v15 = vsel %vm1277_vm0, %v5248_v27, %v5250_v20 }
 0x43d   : > { %7449 = vmatmul.msk.f32.gmra.mxu0 %vm4886_vm6, %v10697_v31  ;;  %5667 = vmatpush.msra.mxu2 %v7524_v23 }
 0x43e   : > { %v4568_v32 = vrot.slane %v4314_v4, 4 }
 0x43f   : > { %7459 = vmatmul.msk.f32.gmra.mxu2 %vm4886_vm6, %v10702_v38  ;;  %v3060_v30 = vpop.f32.mrf.mxu3 }
 0x440   : > { %v4569_v63 = vsel %vm1277_vm0, %v4566_v29, %v4568_v32  ;;  %v3061_v47 = vadd.f32 %v3060_v30, %v10390_v5  ;;  %v7515_v29 = vld [vmem:[%s11547_s2 + $0xa8] sm:$0xff]  ;;  %v4236_v5 = vadd.f32 %v10588_v9, %v10570_v16  ;;  %v10742_v16 = vsel %vm4364_vm5, %v5103_v19, %v5105_v22 }
 0x441   : > { %v4639_v10 = vmax.f32 %v4488_v45, %v4569_v63  ;;  %v10717_v25 = vpop.f32.mrf.mxu1  ;;  %5610 = vmatpush.msrb.mxu0 %v7515_v29  ;;  %v4822_v45 = vrot.slane %v4638_v24, 2 }
 0x442   : > { %v10711_v0 = vpop.f32.mrf.mxu2  ;;  %v3140_v57 = vadd.f32 %v3061_v47, %v11636_v37  ;;  %v10728_v43 = vpop.f32.mrf.mxu0 }
 0x443   : > { %v4719_v4 = vrot.slane %v4639_v10, 1  ;;  %v4823_v30 = vrot.slane %v4639_v10, 2 }
 0x444   : > { %v10733_v63 = vadd.f32 %v4236_v5, %v3140_v57  ;;  %7440 = vmatmul.msk.f32.gmra.mxu3 %vm4886_vm6, %v10407_v51  ;;  %7467 = vmatmul.msk.f32.gmra.mxu1 %vm4886_vm6, %v10731_v15  ;;  %v5252_v5 = vrot.slane %v10662_v50, 4 }
 0x445   : > { %v4720_v9 = vsel %vm4678_vm7, %v4718_v42, %v4719_v4  ;;  %v4824_v27 = vsel %vm4782_vm8, %v4822_v45, %v4823_v30  ;;  %7450 = vmatmul.msk.f32.gmra.mxu0 %vm4886_vm6, %v10742_v16 }
 0x446   : > { %v4775_v47 = vmax.f32 %v4638_v24, %v4720_v9  ;;  %v4570_v23 = vrot.slane %v10733_v63, 4  ;;  %v4239_v24 = vadd.f32 %v10626_v53, %v10602_v61  ;;  %v10773_v40 = vsel %vm1277_vm0, %v5250_v20, %v5252_v5 }
 0x447   : > { %7489 = vmatmul.msk.f32.vlgmr.msrb.gmra.mxu2 %vm4886_vm6, %v10612_v2  ;;  %v3063_v29 = vpop.f32.mrf.mxu3  ;;  %v7533_v2 = vld [vmem:[%s11547_s2 + $0xc8] sm:$0xff] }
 0x448   : > { %v4879_v37 = vmax.f32 %v4775_v47, %v4824_v27  ;;  %v4571_v19 = vsel %vm1277_vm0, %v4568_v32, %v4570_v23  ;;  %v3064_v57 = vadd.f32 %v3063_v29, %v10423_v52  ;;  %v11637_v32 = vld [vmem:[#allocation35_spill] sm:$0xff]  ;;  %5723 = vmatpush.msrb.mxu1 %v7533_v2 }
 0x449   : > { %v4640_v45 = vmax.f32 %v4489_v8, %v4571_v19  ;;  %v10759_v39 = vpop.f32.mrf.mxu1 }
 0x44a   : > { %v10754_v42 = vpop.f32.mrf.mxu2  ;;  %4932 = vst.msk [vmem:[#allocation2 + $0x76] sm:$0xfc] %vm4912_vm10, %v4879_v37  ;;  %v3141_v9 = vadd.f32 %v3064_v57, %v11637_v32  ;;  %v10768_v52 = vpop.f32.mrf.mxu0 }
 0x44b   : > { %v4721_v27 = vrot.slane %v4640_v45, 1  ;;  %v4825_v47 = vrot.slane %v4640_v45, 2 }
 0x44c   : > { %v10775_v18 = vadd.f32 %v4239_v24, %v3141_v9  ;;  %7441 = vmatmul.msk.f32.gmra.mxu3 %vm4886_vm6, %v10441_v62  ;;  %7468 = vmatmul.msk.f32.gmra.mxu1 %vm4886_vm6, %v10773_v40 }
 0x44d   : > { %v4722_v61 = vsel %vm4678_vm7, %v4719_v4, %v4721_v27  ;;  %v4826_v53 = vsel %vm4782_vm8, %v4823_v30, %v4825_v47  ;;  %7480 = vmatmul.msk.f32.vlgmr.msra.gmra.mxu0 %vm4886_vm6, %v10405_v11  ;;  %v4241_v11 = vadd.f32 %v10671_v56, %v10637_v44 }
 0x44e   : > { %v4776_v8 = vmax.f32 %v4639_v10, %v4722_v61  ;;  %v4572_v20 = vrot.slane %v10775_v18, 4 }
 0x44f   : > { %7490 = vmatmul.msk.f32.gmra.mxu2 %vm4886_vm6, %v10653_v1  ;;  %v3065_v29 = vpop.f32.mrf.mxu3  ;;  %v11638_v1 = vld [vmem:[#allocation36_spill] sm:$0xff] }
 0x450   : > { %v4880_v37 = vmax.f32 %v4776_v8, %v4826_v53  ;;  %v4573_v19 = vsel %vm1277_vm0, %v4570_v23, %v4572_v20  ;;  %v3066_v57 = vadd.f32 %v3065_v29, %v10455_v3 }
 0x451   : > { %v4641_v4 = vmax.f32 %v4490_v36, %v4573_v19  ;;  %v2926_v30 = vpop.f32.mrf.mxu1  ;;  %v11640_v19 = vld [vmem:[#allocation38_spill] sm:$0xff] }
 0x452   : > { %v10790_v2 = vpop.f32.mrf.mxu2  ;;  %4933 = vst.msk [vmem:[#allocation2 + $0x7e] sm:$0xff] %vm4886_vm6, %v4880_v37  ;;  %v3142_v10 = vadd.f32 %v3066_v57, %v11638_v1  ;;  %v10799_v24 = vpop.f32.mrf.mxu0  ;;  %v4246_v37 = vadd.f32 %v10754_v42, %v10728_v43  ;;  %v10871_v43 = vld [vmem:[#allocation2 + $0x48] sm:$0xff] }
 0x453   : > { %v4723_v32 = vrot.slane %v4641_v4, 1  ;;  %v4827_v23 = vrot.slane %v4641_v4, 2 }
 0x454   : > { %v10801_v9 = vadd.f32 %v4241_v11, %v3142_v10  ;;  %7471 = vmatmul.msk.f32.vlgmr.msra.gmra.mxu3 %vm4886_vm6, %v10344_v21  ;;  %7498 = vmatmul.msk.f32.vlgmr.msra.gmra.mxu1 %vm4886_vm6, %v10578_v6  ;;  %v4244_v6 = vadd.f32 %v10711_v0, %v10684_v34  ;;  %v5422_v10 = vrot.slane %v10871_v43, 6 }
 0x455   : > { %v4724_v3 = vsel %vm4678_vm7, %v4721_v27, %v4723_v32  ;;  %v4828_v46 = vsel %vm4782_vm8, %v4825_v47, %v4827_v23  ;;  %7481 = vmatmul.msk.f32.gmra.mxu0 %vm4886_vm6, %v10434_v33  ;;  %v11639_v27 = vld [vmem:[#allocation37_spill] sm:$0xff]  ;;  %v7505_v33 = vld [vmem:[%s11547_s2 + $0x90] sm:$0xff] }
 0x456   : > { %v4777_v44 = vmax.f32 %v4640_v45, %v4724_v3  ;;  %v4423_v34 = vrot.slane %v10801_v9, 6  ;;  %5560 = vmatpush.msrb.mxu3 %v7505_v33  ;;  %v4249_v3 = vadd.f32 %v10790_v2, %v10768_v52 }
 0x457   : > { %7491 = vmatmul.msk.f32.gmra.mxu2 %vm4886_vm6, %v10697_v31  ;;  %v3068_v54 = vpop.f32.mrf.mxu3 }
 0x458   : > { %v4881_v56 = vmax.f32 %v4777_v44, %v4828_v46  ;;  %v3069_v36 = vadd.f32 %v3068_v54, %v10499_v59  ;;  %v7523_v59 = vld [vmem:[%s11547_s2 + $0xb0] sm:$0xff]  ;;  %v11641_v46 = vld [vmem:[#allocation39_spill] sm:$0xff] }
 0x459   : > { %v2927_v21 = vpop.f32.mrf.mxu1  ;;  %5668 = vmatpush.msra.mxu2 %v7523_v59 }
 0x45a   : > { %v10814_v61 = vpop.f32.mrf.mxu2  ;;  %4934 = vst.msk [vmem:[#allocation2 + $0x86] sm:$0x7f] %vm4915_vm11, %v4881_v56  ;;  %v3143_v47 = vadd.f32 %v3069_v36, %v11639_v27  ;;  %v10820_v53 = vpop.f32.mrf.mxu0  ;;  %v7532_v56 = vld [vmem:[%s11547_s2 + $0xc0] sm:$0xff]  ;;  %v10913_v21 = vld [vmem:[#allocation2 + $0x50] sm:$0xff] }
 0x45b   : > { %5724 = vmatpush.msrb.mxu1 %v7532_v56 }
 0x45c   : > { %v10828_v31 = vadd.f32 %v4244_v6, %v3143_v47  ;;  %7472 = vmatmul.msk.f32.gmra.mxu3 %vm4886_vm6, %v10374_v12  ;;  %7499 = vmatmul.msk.f32.gmra.mxu1 %vm4886_vm6, %v10615_v60  ;;  %v5420_v60 = vrot.slane %v10662_v50, 6  ;;  %v5477_v47 = vrot.slane %v10871_v43, 1 }
 0x45d   : > { %7482 = vmatmul.msk.f32.gmra.mxu0 %vm4886_vm6, %v10471_v14 }
 0x45e   : > { %v4424_v0 = vrot.slane %v10828_v31, 6  ;;  %v10907_v2 = vsel %vm4364_vm5, %v5420_v60, %v5422_v10 }
 0x45f   : > { %7492 = vmatmul.msk.f32.gmra.mxu2 %vm4886_vm6, %v10742_v16  ;;  %v3070_v45 = vpop.f32.mrf.mxu3 }
 0x460   : > { %v10841_v8 = vsel %vm4364_vm5, %v4423_v34, %v4424_v0  ;;  %v3071_v12 = vadd.f32 %v3070_v45, %v10535_v17  ;;  %v10865_v17 = vsel %vm4364_vm5, %v5105_v22, %v5420_v60  ;;  %v5364_v22 = vrot.slane %v10662_v50, 3 }
 0x461   : > { %v4491_v14 = vmax.f32 %v10733_v63, %v10841_v8  ;;  %v10849_v29 = vpop.f32.mrf.mxu1  ;;  %v5366_v34 = vrot.slane %v10871_v43, 3  ;;  %v4251_v60 = vadd.f32 %v10814_v61, %v10799_v24 }
 0x462   : > { %v10844_v20 = vpop.f32.mrf.mxu2  ;;  %v3144_v57 = vadd.f32 %v3071_v12, %v11640_v19  ;;  %v10854_v4 = vpop.f32.mrf.mxu0  ;;  %v10904_v52 = vsel %vm2442_vm3, %v4987_v35, %v5364_v22 }
 0x464   : > { %v10856_v30 = vadd.f32 %v4246_v37, %v3144_v57  ;;  %7473 = vmatmul.msk.f32.gmra.mxu3 %vm4886_vm6, %v10407_v51  ;;  %7500 = vmatmul.msk.f32.gmra.mxu1 %vm4886_vm6, %v10656_v13  ;;  %v11642_v37 = vld [vmem:[#allocation40_spill] sm:$0xff] }
 0x465   : > { %7483 = vmatmul.msk.f32.gmra.mxu0 %vm4886_vm6, %v10514_v55 }
 0x466   : > { %v4426_v42 = vrot.slane %v10856_v30, 6 }
 0x467   : > { %7493 = vmatmul.msk.f32.gmra.mxu2 %vm4886_vm6, %v10865_v17  ;;  %v3073_v11 = vpop.f32.mrf.mxu3 }
 0x468   : > { %v10875_v51 = vsel %vm4364_vm5, %v4424_v0, %v4426_v42  ;;  %v3074_v13 = vadd.f32 %v3073_v11, %v10565_v48  ;;  %v7514_v48 = vld [vmem:[%s11547_s2 + $0xa0] sm:$0xff]  ;;  %v5424_v0 = vrot.slane %v10913_v21, 6 }
 0x469   : > { %v4492_v32 = vmax.f32 %v10775_v18, %v10875_v51  ;;  %v10884_v23 = vpop.f32.mrf.mxu1  ;;  %5611 = vmatpush.msrb.mxu0 %v7514_v48  ;;  %v5479_v48 = vrot.slane %v10913_v21, 1  ;;  %v7551_v18 = vld [vmem:[%s11547_s2 + $0xe8] sm:$0xff] }
 0x46a   : > { %v10878_v1 = vpop.f32.mrf.mxu2  ;;  %v3145_v44 = vadd.f32 %v3074_v13, %v11641_v46  ;;  %v10889_v54 = vpop.f32.mrf.mxu0  ;;  %v10941_v13 = vsel %vm2442_vm3, %v5364_v22, %v5366_v34  ;;  %v10946_v24 = vsel %vm4364_vm5, %v5422_v10, %v5424_v0 }
 0x46b   : > { %5836 = vmatpush.msra.mxu0 %v7551_v18 }
 0x46c   : > { %v4320_v36 = vadd.f32 %v4249_v3, %v3145_v44  ;;  %7474 = vmatmul.msk.f32.gmra.mxu3 %vm4886_vm6, %v10441_v62  ;;  %7501 = vmatmul.msk.f32.gmra.mxu1 %vm4886_vm6, %v10702_v38 }
 0x46d   : > { %7484 = vmatmul.msk.f32.gmra.mxu0 %vm4886_vm6, %v10904_v52 }
 0x46e   : > { %v4428_v6 = vrot.slane %v4320_v36, 6  ;;  %v4574_v61 = vrot.slane %v4320_v36, 4 }
 0x46f   : > { %7494 = vmatmul.msk.f32.gmra.mxu2 %vm4886_vm6, %v10907_v2  ;;  %v3075_v27 = vpop.f32.mrf.mxu3 }
 0x470   : > { %v10917_v33 = vsel %vm4364_vm5, %v4426_v42, %v4428_v6  ;;  %v3076_v35 = vadd.f32 %v3075_v27, %v10594_v41  ;;  %v11643_v42 = vrot.slane %v10662_v50, 1 }
 0x471   : > { %v4493_v45 = vmax.f32 %v10801_v9, %v10917_v33  ;;  %v5026_v12 = vpop.f32.mrf.mxu1  ;;  %v7559_v9 = vld [vmem:[%s11547_s2 + $0xf0] sm:$0xff] }
 0x472   : > { %v10920_v59 = vpop.f32.mrf.mxu2  ;;  %v3146_v19 = vadd.f32 %v3076_v35, %v11642_v37  ;;  %v10929_v57 = vpop.f32.mrf.mxu0  ;;  %v10934_v41 = vsel %vm4678_vm7, %v11643_v42, %v5477_v47  ;;  %v5368_v35 = vrot.slane %v10913_v21, 3  ;;  %v11644_v37 = vld [vmem:[#allocation41_spill] sm:$0xff] }
 0x474   : > { %v4321_v11 = vadd.f32 %v4251_v60, %v3146_v19  ;;  %7475 = vmatmul.msk.f32.gmra.mxu3 %vm4886_vm6, %v10481_v26  ;;  %7502 = vmatmul.msk.f32.gmra.mxu1 %vm4886_vm6, %v10934_v41 }
 0x475   : > { %7485 = vmatmul.msk.f32.gmra.mxu0 %vm4886_vm6, %v10941_v13 }
 0x476   : > { %v4430_v3 = vrot.slane %v4321_v11, 6  ;;  %v4575_v46 = vrot.slane %v4321_v11, 4  ;;  %v10975_v11 = vsel %vm4678_vm7, %v5477_v47, %v5479_v48 }
 0x477   : > { %7495 = vmatmul.msk.f32.gmra.mxu2 %vm4886_vm6, %v10946_v24  ;;  %v3078_v44 = vpop.f32.mrf.mxu3 }
 0x478   : > { %v10954_v22 = vsel %vm4364_vm5, %v4428_v6, %v4430_v3  ;;  %v4576_v56 = vsel %vm1277_vm0, %v4574_v61, %v4575_v46  ;;  %v3079_v10 = vadd.f32 %v3078_v44, %v10632_v28  ;;  %v4254_v6 = vadd.f32 %v10844_v20, %v10820_v53  ;;  %v7542_v28 = vld [vmem:[%s11547_s2 + $0xd8] sm:$0xff] }
 0x479   : > { %v4494_v12 = vmax.f32 %v10828_v31, %v10954_v22  ;;  %v4642_v36 = vmax.f32 %v4491_v14, %v4576_v56  ;;  %v10966_v60 = vpop.f32.mrf.mxu1  ;;  %v10977_v61 = vld [vmem:[#allocation2 + $0x58] sm:$0xff]  ;;  %5780 = vmatpush.msra.mxu3 %v7542_v28  ;;  %v10986_v53 = vsel %vm2442_vm3, %v5366_v34, %v5368_v35  ;;  %v7568_v31 = vld [vmem:[%s11547_s2 + $0x100] sm:$0xff] }
 0x47a   : > { %v10958_v27 = vpop.f32.mrf.mxu2  ;;  %v3147_v19 = vadd.f32 %v3079_v10, %v11644_v37  ;;  %v4101_v42 = vpop.f32.mrf.mxu0  ;;  %v5481_v14 = vrot.slane %v10977_v61, 1 }
 0x47b   : > { %v11645_v42 = vld [vmem:[#allocation42_spill] sm:$0xff]  ;;  %v4725_v51 = vrot.slane %v4642_v36, 1 }
 0x47c   : > { %v4322_v63 = vadd.f32 %v4254_v6, %v3147_v19  ;;  %7476 = vmatmul.msk.f32.gmra.mxu3 %vm4886_vm6, %v10662_v50  ;;  %7503 = vmatmul.msk.f32.gmra.mxu1 %vm4886_vm6, %v10975_v11  ;;  %v4256_v19 = vadd.f32 %v10878_v1, %v10854_v4  ;;  %v7569_v1 = vld [vmem:[%s11547_s2 + $0x108] sm:$0xff] }
 0x47d   : > { %7486 = vmatmul.msk.f32.gmra.mxu0 %vm4886_vm6, %v10986_v53  ;;  %5944 = vmatpush.msra.mxu1 %v7569_v1 }
 0x47e   : > { %v4432_v8 = vrot.slane %v4322_v63, 6  ;;  %v4577_v20 = vrot.slane %v4322_v63, 4 }
 0x47f   : > { %7525 = vmatmul.msk.f32.vlgmr.msra.gmra.mxu2 %vm4886_vm6, %v10514_v55  ;;  %v3080_v47 = vpop.f32.mrf.mxu3  ;;  %5945 = vmatpush.msra.mxu1 %v7568_v31 }
 0x480   : > { %v10994_v44 = vsel %vm4364_vm5, %v4430_v3, %v4432_v8  ;;  %v4578_v56 = vsel %vm1277_vm0, %v4575_v46, %v4577_v20  ;;  %v3081_v10 = vadd.f32 %v3080_v47, %v10679_v58  ;;  %v11011_v58 = vsel %vm4678_vm7, %v5479_v48, %v5481_v14  ;;  %v7560_v46 = vld [vmem:[%s11547_s2 + $0xf8] sm:$0xff] }
 0x481   : > { %v4495_v6 = vmax.f32 %v10856_v30, %v10994_v44  ;;  %v4643_v55 = vmax.f32 %v4492_v32, %v4578_v56  ;;  %v11003_v37 = vpop.f32.mrf.mxu1  ;;  %v4829_v32 = vrot.slane %v4642_v36, 2  ;;  %5887 = vmatpush.msrb.mxu2 %v7560_v46 }
 0x482   : > { %v4263_v34 = vpop.f32.mrf.mxu2  ;;  %v3148_v3 = vadd.f32 %v3081_v10, %v11645_v42  ;;  %v4102_v28 = vpop.f32.mrf.mxu0 }
 0x483   : > { %v4726_v63 = vrot.slane %v4643_v55, 1  ;;  %v4830_v4 = vrot.slane %v4643_v55, 2  ;;  %5888 = vmatpush.msrb.mxu2 %v7559_v9 }
 0x484   : > { %v4323_v48 = vadd.f32 %v4256_v19, %v3148_v3  ;;  %7477 = vmatmul.msk.f32.gmra.mxu3 %vm4886_vm6, %v10871_v43  ;;  %7504 = vmatmul.msk.f32.gmra.mxu1 %vm4886_vm6, %v11011_v58 }
 0x485   : > { %v4727_v8 = vsel %vm4678_vm7, %v4725_v51, %v4726_v63  ;;  %v4831_v47 = vsel %vm4782_vm8, %v4829_v32, %v4830_v4  ;;  %7516 = vmatmul.msk.f32.vlgmr.msrb.gmra.mxu0 %vm4886_vm6, %v10441_v62  ;;  %v4259_v62 = vadd.f32 %v10920_v59, %v10889_v54 }
 0x486   : > { %v4778_v56 = vmax.f32 %v4642_v36, %v4727_v8  ;;  %v4579_v10 = vrot.slane %v4323_v48, 4 }
 0x487   : > { %7526 = vmatmul.msk.f32.gmra.mxu2 %vm4886_vm6, %v10904_v52  ;;  %v3083_v34 = vpop.f32.mrf.mxu3  ;;  %v11646_v52 = vld [vmem:[#allocation43_spill] sm:$0xff] }
 0x488   : > { %v4882_v19 = vmax.f32 %v4778_v56, %v4831_v47  ;;  %v4580_v42 = vsel %vm1277_vm0, %v4577_v20, %v4579_v10  ;;  %v3084_v3 = vadd.f32 %v3083_v34, %v10717_v25  ;;  %v7541_v20 = vld [vmem:[%s11547_s2 + $0xd0] sm:$0xff] }
 0x489   : > { %v4644_v46 = vmax.f32 %v4493_v45, %v4580_v42  ;;  %v5034_v18 = vpop.f32.mrf.mxu1  ;;  %5781 = vmatpush.msra.mxu3 %v7541_v20 }
 0x48a   : > { %v4264_v28 = vpop.f32.mrf.mxu2  ;;  %4935 = vst.msk [vmem:[#allocation2 + $0x8c] sm:$0xf0] %vm4917_vm12, %v4882_v19  ;;  %v3149_v36 = vadd.f32 %v3084_v3, %v11646_v52  ;;  %v5070_v51 = vpop.f32.mrf.mxu0 }
 0x48b   : > { %v4728_v32 = vrot.slane %v4644_v46, 1  ;;  %v4832_v25 = vrot.slane %v4644_v46, 2 }
 0x48c   : > { %v4324_v1 = vadd.f32 %v4259_v62, %v3149_v36  ;;  %7507 = vmatmul.msk.f32.vlgmr.msrb.gmra.mxu3 %vm4886_vm6, %v10646_v49  ;;  %7534 = vmatmul.msk.f32.vlgmr.msrb.gmra.mxu1 %vm4886_vm6, %v10742_v16  ;;  %v5641_v62 = vrot.slane %v10977_v61, 3 }
 0x48d   : > { %v4729_v54 = vsel %vm4678_vm7, %v4726_v63, %v4728_v32  ;;  %v4833_v33 = vsel %vm4782_vm8, %v4830_v4, %v4832_v25  ;;  %7517 = vmatmul.msk.f32.gmra.mxu0 %vm4886_vm6, %v10481_v26  ;;  %v7550_v63 = vld [vmem:[%s11547_s2 + $0xe0] sm:$0xff]  ;;  %v4261_v4 = vadd.f32 %v10958_v27, %v10929_v57 }
 0x48e   : > { %v4779_v59 = vmax.f32 %v4643_v55, %v4729_v54  ;;  %v4581_v45 = vrot.slane %v4324_v1, 4  ;;  %5837 = vmatpush.msra.mxu0 %v7550_v63 }
 0x48f   : > { %7527 = vmatmul.msk.f32.gmra.mxu2 %vm4886_vm6, %v10941_v13  ;;  %v3085_v49 = vpop.f32.mrf.mxu3  ;;  %v5071_v13 = vadd.f32 %v5070_v51, %v10849_v29 }
 0x490   : > { %v4883_v48 = vmax.f32 %v4779_v59, %v4833_v33  ;;  %v4582_v16 = vsel %vm1277_vm0, %v4579_v10, %v4581_v45  ;;  %v3086_v8 = vadd.f32 %v3085_v49, %v10759_v39  ;;  %v11647_v39 = vld [vmem:[#allocation44_spill] sm:$0xff]  ;;  %v7578_v59 = vld [vmem:[%s11547_s2 + $0x118] sm:$0xff] }
 0x491   : > { %v4645_v26 = vmax.f32 %v4494_v12, %v4582_v16  ;;  %v11066_v55 = vpop.f32.mrf.mxu1  ;;  %6000 = vmatpush.msrb.mxu3 %v7578_v59  ;;  %v5697_v16 = vrot.slane %v10977_v61, 6 }
 0x492   : > { %v5212_v47 = vpop.f32.mrf.mxu2  ;;  %4936 = vst.msk [vmem:[#allocation2 + $0x94] sm:$0xff] %vm4886_vm6, %v4883_v48  ;;  %v3150_v56 = vadd.f32 %v3086_v8, %v11647_v39  ;;  %v5138_v10 = vpop.f32.mrf.mxu0  ;;  %v5533_v48 = vrot.slane %v10871_v43, 4 }
 0x493   : > { %v4730_v34 = vrot.slane %v4645_v26, 1  ;;  %v4834_v19 = vrot.slane %v4645_v26, 2  ;;  %v5157_v42 = vadd.f32 %v5138_v10, %v5071_v13  ;;  %v11143_v10 = vsel %vm4364_vm5, %v5424_v0, %v5697_v16 }
 0x494   : > { %v4325_v3 = vadd.f32 %v4261_v4, %v3150_v56  ;;  %7508 = vmatmul.msk.f32.gmra.mxu3 %vm4886_vm6, %v10690_v7  ;;  %7535 = vmatmul.msk.f32.gmra.mxu1 %vm4886_vm6, %v10865_v17  ;;  %v5534_v56 = vsel %vm1277_vm0, %v5252_v5, %v5533_v48 }
 0x495   : > { %v4731_v29 = vsel %vm4678_vm7, %v4728_v32, %v4730_v34  ;;  %v4835_v57 = vsel %vm4782_vm8, %v4832_v25, %v4834_v19  ;;  %7518 = vmatmul.msk.f32.gmra.mxu0 %vm4886_vm6, %v10662_v50  ;;  %v11085_v22 = vadd.f32 %v5212_v47, %v5157_v42  ;;  %v11102_v32 = vsel %vm2442_vm3, %v5368_v35, %v5641_v62  ;;  %v7587_v50 = vld [vmem:[%s11547_s2 + $0x128] sm:$0xff] }
 0x496   : > { %v4780_v7 = vmax.f32 %v4644_v46, %v4731_v29  ;;  %v4583_v27 = vrot.slane %v4325_v3, 4  ;;  %6057 = vmatpush.msrb.mxu0 %v7587_v50 }
 0x497   : > { %7528 = vmatmul.msk.f32.gmra.mxu2 %vm4886_vm6, %v10986_v53  ;;  %v3088_v17 = vpop.f32.mrf.mxu3 }
 0x498   : > { %v4884_v12 = vmax.f32 %v4780_v7, %v4835_v57  ;;  %v4584_v28 = vsel %vm1277_vm0, %v4581_v45, %v4583_v27  ;;  %v11128_v45 = vld [vmem:[#allocation2 + $0x68] sm:$0xff] }
 0x499   : > { %v4646_v52 = vmax.f32 %v4495_v6, %v4584_v28  ;;  %v11092_v36 = vpop.f32.mrf.mxu1  ;;  %v11110_v6 = vld [vmem:[#allocation2 + $0x60] sm:$0xff]  ;;  %v5645_v63 = vrot.slane %v11128_v45, 3  ;;  %v7605_v57 = vld [vmem:[%s11547_s2 + $0x148] sm:$0xff]  ;;  %v5701_v28 = vrot.slane %v11128_v45, 6 }
 0x49a   : > { %v5215_v18 = vpop.f32.mrf.mxu2  ;;  %4937 = vst.msk [vmem:[#allocation2 + $0x9c] sm:$0xff] %vm4886_vm6, %v4884_v12  ;;  %v5141_v51 = vpop.f32.mrf.mxu0  ;;  %v5643_v9 = vrot.slane %v11110_v6, 3  ;;  %v5699_v42 = vrot.slane %v11110_v6, 6  ;;  %6164 = vmatpush.msrb.mxu1 %v7605_v57  ;;  %v5537_v12 = vrot.slane %v10977_v61, 4 }
 0x49b   : > { %v4732_v20 = vrot.slane %v4646_v52, 1  ;;  %v4836_v46 = vrot.slane %v4646_v52, 2 }
 0x49c   : > { %7509 = vmatmul.msk.f32.gmra.mxu3 %vm4886_vm6, %v10731_v15  ;;  %7536 = vmatmul.msk.f32.gmra.mxu1 %vm4886_vm6, %v10907_v2  ;;  %v11119_v33 = vsel %vm2442_vm3, %v5641_v62, %v5643_v9  ;;  %v11169_v27 = vsel %vm4364_vm5, %v5697_v16, %v5699_v42 }
 0x49d   : > { %v4733_v30 = vsel %vm4678_vm7, %v4730_v34, %v4732_v20  ;;  %v4837_v44 = vsel %vm4782_vm8, %v4834_v19, %v4836_v46  ;;  %7519 = vmatmul.msk.f32.gmra.mxu0 %vm4886_vm6, %v10871_v43  ;;  %v5535_v19 = vrot.slane %v10913_v21, 4 }
 0x49e   : > { %v4781_v15 = vmax.f32 %v4645_v26, %v4733_v30  ;;  %v7596_v26 = vld [vmem:[%s11547_s2 + $0x138] sm:$0xff] }
 0x49f   : > { %7529 = vmatmul.msk.f32.gmra.mxu2 %vm4886_vm6, %v11102_v32  ;;  %v3089_v25 = vpop.f32.mrf.mxu3  ;;  %v5536_v7 = vsel %vm1277_vm0, %v5533_v48, %v5535_v19  ;;  %v11184_v46 = vsel %vm1277_vm0, %v5535_v19, %v5537_v12  ;;  %v7604_v48 = vld [vmem:[%s11547_s2 + $0x140] sm:$0xff]  ;;  %v7614_v19 = vld [vmem:[%s11547_s2 + $0x158] sm:$0xff] }
 0x4a0   : > { %v4885_v2 = vmax.f32 %v4781_v15, %v4837_v44  ;;  %6113 = vmatpush.msra.mxu2 %v7596_v26  ;;  %6165 = vmatpush.msrb.mxu1 %v7604_v48 }
 0x4a1   : > { %v5288_v35 = vpop.f32.mrf.mxu1 }
 0x4a2   : > { %v5218_v1 = vpop.f32.mrf.mxu2  ;;  %4938 = vst.msk [vmem:[#allocation2 + $0xa4] sm:$0x1] %vm4921_vm13, %v4885_v2  ;;  %v5144_v54 = vpop.f32.mrf.mxu0 }
 0x4a4   : > { %7510 = vmatmul.msk.f32.gmra.mxu3 %vm4886_vm6, %v10773_v40  ;;  %7537 = vmatmul.msk.f32.gmra.mxu1 %vm4886_vm6, %v10946_v24 }
 0x4a5   : > { %7520 = vmatmul.msk.f32.gmra.mxu0 %vm4886_vm6, %v10913_v21 }
 0x4a7   : > { %7530 = vmatmul.msk.f32.gmra.mxu2 %vm4886_vm6, %v11119_v33  ;;  %v5073_v49 = vpop.f32.mrf.mxu3 }
 0x4a8   : > { %v5074_v8 = vadd.f32 %v5073_v49, %v10884_v23  ;;  %v11151_v23 = vsel %vm2442_vm3, %v5643_v9, %v5645_v63 }
 0x4a9   : > { %v5291_v13 = vpop.f32.mrf.mxu1 }
 0x4aa   : > { %v5220_v47 = vpop.f32.mrf.mxu2  ;;  %v5158_v4 = vadd.f32 %v5141_v51, %v5074_v8  ;;  %v5146_v39 = vpop.f32.mrf.mxu0 }
 0x4ac   : > { %7511 = vmatmul.msk.f32.gmra.mxu3 %vm4886_vm6, %v5534_v56  ;;  %7538 = vmatmul.msk.f32.gmra.mxu1 %vm4886_vm6, %v11143_v10  ;;  %v5232_v5 = vadd.f32 %v5215_v18, %v5158_v4 }
 0x4ad   : > { %7521 = vmatmul.msk.f32.gmra.mxu0 %vm4886_vm6, %v10977_v61 }
 0x4ae   : > { %v11160_v0 = vadd.f32 %v5288_v35, %v5232_v5  ;;  %v7577_v35 = vld [vmem:[%s11547_s2 + $0x110] sm:$0xff] }
 0x4af   : > { %7531 = vmatmul.msk.f32.gmra.mxu2 %vm4886_vm6, %v11151_v23  ;;  %v5076_v34 = vpop.f32.mrf.mxu3  ;;  %6001 = vmatpush.msrb.mxu3 %v7577_v35 }
 0x4b1   : > { %v5293_v31 = vpop.f32.mrf.mxu1 }
 0x4b2   : > { %v5223_v3 = vpop.f32.mrf.mxu2  ;;  %v5149_v29 = vpop.f32.mrf.mxu0 }
 0x4b4   : > { %7512 = vmatmul.msk.f32.gmra.mxu3 %vm4886_vm6, %v5536_v7  ;;  %7539 = vmatmul.msk.f32.gmra.mxu1 %vm4886_vm6, %v11169_v27 }
 0x4b5   : > { %7522 = vmatmul.msk.f32.gmra.mxu0 %vm4886_vm6, %v11110_v6 }
 0x4b7   : > { %7561 = vmatmul.msk.f32.vlgmr.msrb.gmra.mxu2 %vm4886_vm6, %v10871_v43  ;;  %v5078_v17 = vpop.f32.mrf.mxu3  ;;  %v11189_v43 = vsel %vm4364_vm5, %v5699_v42, %v5701_v28 }
 0x4b8   : > { %v5079_v18 = vadd.f32 %v5078_v17, %v10966_v60 }
 0x4b9   : > { %v5296_v52 = vpop.f32.mrf.mxu1 }
 0x4ba   : > { %v5226_v62 = vpop.f32.mrf.mxu2  ;;  %v5159_v51 = vadd.f32 %v5146_v39, %v5079_v18  ;;  %v5152_v20 = vpop.f32.mrf.mxu0  ;;  %v7632_v18 = vld [vmem:[%s11547_s2 + $0x178] sm:$0xff] }
 0x4bc   : > { %7513 = vmatmul.msk.f32.gmra.mxu3 %vm4886_vm6, %v11184_v46  ;;  %7540 = vmatmul.msk.f32.gmra.mxu1 %vm4886_vm6, %v11189_v43  ;;  %v5233_v60 = vadd.f32 %v5220_v47, %v5159_v51 }
 0x4bd   : > { %7552 = vmatmul.msk.f32.vlgmr.msra.gmra.mxu0 %vm4886_vm6, %v10773_v40  ;;  %v7595_v40 = vld [vmem:[%s11547_s2 + $0x130] sm:$0xff] }
 0x4be   : > { %v11199_v30 = vadd.f32 %v5293_v31, %v5233_v60  ;;  %6114 = vmatpush.msra.mxu2 %v7595_v40 }
 0x4bf   : > { %7562 = vmatmul.msk.f32.gmra.mxu2 %vm4886_vm6, %v10913_v21  ;;  %v5081_v44 = vpop.f32.mrf.mxu3 }
 0x4c0   : > { %v5082_v15 = vadd.f32 %v5081_v44, %v11003_v37  ;;  %6334 = vmatpush.msrb.mxu2 %v7632_v18  ;;  %v11280_v44 = vld [vmem:[#allocation2 + $0x78] sm:$0xff] }
 0x4c1   : > { %v5299_v2 = vpop.f32.mrf.mxu1 }
 0x4c2   : > { %v5228_v25 = vpop.f32.mrf.mxu2  ;;  %v5160_v1 = vadd.f32 %v5149_v29, %v5082_v15  ;;  %v5154_v9 = vpop.f32.mrf.mxu0  ;;  %v5754_v29 = vrot.slane %v11110_v6, 1  ;;  %v5920_v2 = vrot.slane %v11280_v44, 3 }
 0x4c4   : > { %7543 = vmatmul.msk.f32.vlgmr.msra.gmra.mxu3 %vm4886_vm6, %v10702_v38  ;;  %7570 = vmatmul.msk.f32.vlgmr.msra.gmra.mxu1 %vm4886_vm6, %v10986_v53  ;;  %v5234_v21 = vadd.f32 %v5223_v3, %v5160_v1  ;;  %v7586_v38 = vld [vmem:[%s11547_s2 + $0x120] sm:$0xff]  ;;  %v5755_v20 = vsel %vm4678_vm7, %v5481_v14, %v5754_v29 }
 0x4c5   : > { %7553 = vmatmul.msk.f32.gmra.mxu0 %vm4886_vm6, %v5534_v56  ;;  %6221 = vmatpush.msra.mxu3 %v7614_v19 }
 0x4c6   : > { %v11215_v37 = vadd.f32 %v5296_v52, %v5234_v21  ;;  %6058 = vmatpush.msrb.mxu0 %v7586_v38  ;;  %v7641_v21 = vld [vmem:[%s11547_s2 + $0x188] sm:$0xff] }
 0x4c7   : > { %7563 = vmatmul.msk.f32.gmra.mxu2 %vm4886_vm6, %v10977_v61  ;;  %v5084_v54 = vpop.f32.mrf.mxu3  ;;  %v7623_v61 = vld [vmem:[%s11547_s2 + $0x168] sm:$0xff]  ;;  %6390 = vmatpush.msra.mxu1 %v7641_v21 }
 0x4c8   : > { %6277 = vmatpush.msra.mxu0 %v7623_v61  ;;  %v6031_v61 = vrot.slane %v11280_v44, 1 }
 0x4c9   : > { %v5301_v53 = vpop.f32.mrf.mxu1 }
 0x4ca   : > { %v5449_v59 = vpop.f32.mrf.mxu2  ;;  %v5393_v49 = vpop.f32.mrf.mxu0 }
 0x4cc   : > { %7544 = vmatmul.msk.f32.gmra.mxu3 %vm4886_vm6, %v10934_v41  ;;  %7571 = vmatmul.msk.f32.gmra.mxu1 %vm4886_vm6, %v11102_v32 }
 0x4cd   : > { %7554 = vmatmul.msk.f32.gmra.mxu0 %vm4886_vm6, %v5536_v7 }
 0x4cf   : > { %7564 = vmatmul.msk.f32.gmra.mxu2 %vm4886_vm6, %v11110_v6  ;;  %v5086_v16 = vpop.f32.mrf.mxu3 }
 0x4d0   : > { %v5087_v8 = vadd.f32 %v5086_v16, %v11066_v55  ;;  %v5304_v55 = vadd.f32 %v11092_v36, %v11085_v22  ;;  %v11251_v36 = vld [vmem:[#allocation2 + $0x70] sm:$0xff] }
 0x4d1   : > { %v5506_v26 = vpop.f32.mrf.mxu1  ;;  %v5918_v57 = vrot.slane %v11251_v36, 3  ;;  %v5758_v48 = vrot.slane %v11251_v36, 1 }
 0x4d2   : > { %v5452_v47 = vpop.f32.mrf.mxu2  ;;  %v5161_v13 = vadd.f32 %v5154_v9, %v5087_v8  ;;  %v5396_v41 = vpop.f32.mrf.mxu0  ;;  %v5814_v9 = vrot.slane %v11251_v36, 4 }
 0x4d3   : > { %v11274_v60 = vsel %vm2442_vm3, %v5645_v63, %v5918_v57 }
 0x4d4   : > { %7545 = vmatmul.msk.f32.gmra.mxu3 %vm4886_vm6, %v10975_v11  ;;  %7572 = vmatmul.msk.f32.gmra.mxu1 %vm4886_vm6, %v11119_v33  ;;  %v5235_v32 = vadd.f32 %v5228_v25, %v5161_v13  ;;  %v5810_v11 = vrot.slane %v11110_v6, 4  ;;  %v5756_v25 = vrot.slane %v11128_v45, 1 }
 0x4d5   : > { %7555 = vmatmul.msk.f32.gmra.mxu0 %vm4886_vm6, %v11184_v46 }
 0x4d6   : > { %v11241_v4 = vadd.f32 %v5301_v53, %v5235_v32  ;;  %v5811_v22 = vsel %vm1277_vm0, %v5537_v12, %v5810_v11  ;;  %v5812_v12 = vrot.slane %v11128_v45, 4  ;;  %v5757_v54 = vsel %vm4678_vm7, %v5754_v29, %v5756_v25  ;;  %v11308_v53 = vld [vmem:[#allocation2 + $0x80] sm:$0xff] }
 0x4d7   : > { %7565 = vmatmul.msk.f32.gmra.mxu2 %vm4886_vm6, %v11128_v45  ;;  %v5336_v39 = vpop.f32.mrf.mxu3  ;;  %v5922_v16 = vrot.slane %v11308_v53, 3  ;;  %v11320_v32 = vsel %vm4678_vm7, %v5756_v25, %v5758_v48  ;;  %v7640_v29 = vld [vmem:[%s11547_s2 + $0x180] sm:$0xff] }
 0x4d8   : > { %v5355_v56 = vadd.f32 %v5336_v39, %v5304_v55  ;;  %v11306_v38 = vsel %vm1277_vm0, %v5812_v12, %v5814_v9  ;;  %6391 = vmatpush.msra.mxu1 %v7640_v29 }
 0x4d9   : > { %v5509_v5 = vpop.f32.mrf.mxu1 }
 0x4da   : > { %v5455_v50 = vpop.f32.mrf.mxu2  ;;  %v5412_v34 = vadd.f32 %v5393_v49, %v5355_v56  ;;  %v5399_v33 = vpop.f32.mrf.mxu0 }
 0x4db   : > { %v7613_v33 = vld [vmem:[%s11547_s2 + $0x150] sm:$0xff] }
 0x4dc   : > { %7546 = vmatmul.msk.f32.gmra.mxu3 %vm4886_vm6, %v11011_v58  ;;  %7573 = vmatmul.msk.f32.gmra.mxu1 %vm4886_vm6, %v11151_v23  ;;  %v5468_v42 = vadd.f32 %v5449_v59, %v5412_v34  ;;  %v11298_v59 = vsel %vm2442_vm3, %v5918_v57, %v5920_v2 }
 0x4dd   : > { %7556 = vmatmul.msk.f32.gmra.mxu0 %vm4886_vm6, %v5811_v22  ;;  %6222 = vmatpush.msra.mxu3 %v7613_v33 }
 0x4de   : > { %v11259_v3 = vadd.f32 %v5506_v26, %v5468_v42 }
 0x4df   : > { %7566 = vmatmul.msk.f32.gmra.mxu2 %vm4886_vm6, %v11251_v36  ;;  %v5339_v31 = vpop.f32.mrf.mxu3 }
 0x4e0   : > { %v5356_v7 = vadd.f32 %v5339_v31, %v11160_v0  ;;  %v5813_v0 = vsel %vm1277_vm0, %v5810_v11, %v5812_v12  ;;  %v6087_v12 = vrot.slane %v11280_v44, 4 }
 0x4e1   : > { %v5512_v62 = vpop.f32.mrf.mxu1 }
 0x4e2   : > { %v5457_v17 = vpop.f32.mrf.mxu2  ;;  %v5413_v52 = vadd.f32 %v5396_v41, %v5356_v7  ;;  %v5401_v51 = vpop.f32.mrf.mxu0 }
 0x4e4   : > { %7547 = vmatmul.msk.f32.gmra.mxu3 %vm4886_vm6, %v5755_v20  ;;  %7574 = vmatmul.msk.f32.gmra.mxu1 %vm4886_vm6, %v11274_v60  ;;  %v5469_v15 = vadd.f32 %v5452_v47, %v5413_v52  ;;  %v11373_v52 = vsel %vm1277_vm0, %v5814_v9, %v6087_v12 }
 0x4e5   : > { %7557 = vmatmul.msk.f32.gmra.mxu0 %vm4886_vm6, %v5813_v0 }
 0x4e6   : > { %v11288_v14 = vadd.f32 %v5509_v5, %v5469_v15  ;;  %v6089_v15 = vrot.slane %v11308_v53, 4 }
 0x4e7   : > { %7567 = vmatmul.msk.f32.gmra.mxu2 %vm4886_vm6, %v11280_v44  ;;  %v5342_v63 = vpop.f32.mrf.mxu3 }
 0x4e9   : > { %v5514_v35 = vpop.f32.mrf.mxu1 }
 0x4ea   : > { %v5460_v1 = vpop.f32.mrf.mxu2  ;;  %v5404_v40 = vpop.f32.mrf.mxu0 }
 0x4ec   : > { %7548 = vmatmul.msk.f32.gmra.mxu3 %vm4886_vm6, %v5757_v54  ;;  %7575 = vmatmul.msk.f32.gmra.mxu1 %vm4886_vm6, %v11298_v59 }
 0x4ed   : > { %7558 = vmatmul.msk.f32.gmra.mxu0 %vm4886_vm6, %v11306_v38 }
 0x4ef   : > { %7597 = vmatmul.msk.f32.vlgmr.msra.gmra.mxu2 %vm4886_vm6, %v11184_v46  ;;  %v5344_v49 = vpop.f32.mrf.mxu3  ;;  %v11325_v46 = vsel %vm2442_vm3, %v5920_v2, %v5922_v16 }
 0x4f0   : > { %v5357_v8 = vadd.f32 %v5344_v49, %v11199_v30 }
 0x4f1   : > { %v5517_v26 = vpop.f32.mrf.mxu1 }
 0x4f2   : > { %v5463_v47 = vpop.f32.mrf.mxu2  ;;  %v5414_v13 = vadd.f32 %v5401_v51, %v5357_v8  ;;  %v5407_v41 = vpop.f32.mrf.mxu0 }
 0x4f4   : > { %7549 = vmatmul.msk.f32.gmra.mxu3 %vm4886_vm6, %v11320_v32  ;;  %7576 = vmatmul.msk.f32.gmra.mxu1 %vm4886_vm6, %v11325_v46  ;;  %v5470_v30 = vadd.f32 %v5457_v17, %v5414_v13 }
 0x4f5   : > { %7588 = vmatmul.msk.f32.vlgmr.msrb.gmra.mxu0 %vm4886_vm6, %v11011_v58  ;;  %v7631_v58 = vld [vmem:[%s11547_s2 + $0x170] sm:$0xff] }
 0x4f6   : > { %v11334_v55 = vadd.f32 %v5514_v35, %v5470_v30  ;;  %6335 = vmatpush.msrb.mxu2 %v7631_v58  ;;  %v11397_v35 = vld [vmem:[#allocation2 + $0x88] sm:$0xff] }
 0x4f7   : > { %7598 = vmatmul.msk.f32.gmra.mxu2 %vm4886_vm6, %v5811_v22  ;;  %v5347_v39 = vpop.f32.mrf.mxu3  ;;  %v6091_v47 = vrot.slane %v11397_v35, 4 }
 0x4f8   : > { %v5358_v56 = vadd.f32 %v5347_v39, %v11215_v37 }
 0x4f9   : > { %v5520_v11 = vpop.f32.mrf.mxu1 }
 0x4fa   : > { %v5465_v50 = vpop.f32.mrf.mxu2  ;;  %v5415_v5 = vadd.f32 %v5404_v40, %v5358_v56  ;;  %v5409_v34 = vpop.f32.mrf.mxu0  ;;  %v5976_v56 = vrot.slane %v11280_v44, 6  ;;  %v6035_v11 = vrot.slane %v11397_v35, 1 }
 0x4fc   : > { %7579 = vmatmul.msk.f32.vlgmr.msrb.gmra.mxu3 %vm4886_vm6, %v10946_v24  ;;  %7606 = vmatmul.msk.f32.vlgmr.msrb.gmra.mxu1 %vm4886_vm6, %v11110_v6  ;;  %v5471_v37 = vadd.f32 %v5460_v1, %v5415_v5  ;;  %v7622_v24 = vld [vmem:[%s11547_s2 + $0x160] sm:$0xff]  ;;  %v6032_v1 = vsel %vm4678_vm7, %v5758_v48, %v6031_v61  ;;  %v6033_v48 = vrot.slane %v11308_v53, 1 }
 0x4fd   : > { %7589 = vmatmul.msk.f32.gmra.mxu0 %vm4886_vm6, %v5755_v20 }
 0x4fe   : > { %v11349_v22 = vadd.f32 %v5517_v26, %v5471_v37  ;;  %6278 = vmatpush.msra.mxu0 %v7622_v24  ;;  %v6036_v58 = vsel %vm4678_vm7, %v6033_v48, %v6035_v11  ;;  %v5978_v37 = vrot.slane %v11308_v53, 6 }
 0x4ff   : > { %7599 = vmatmul.msk.f32.gmra.mxu2 %vm4886_vm6, %v5813_v0  ;;  %v5350_v19 = vpop.f32.mrf.mxu3 }
 0x500   : > { %v5979_v29 = vsel %vm4364_vm5, %v5976_v56, %v5978_v37 }
 0x501   : > { %v5522_v31 = vpop.f32.mrf.mxu1 }
 0x502   : > { %v5670_v42 = vpop.f32.mrf.mxu2  ;;  %v5613_v6 = vpop.f32.mrf.mxu0 }
 0x504   : > { %7580 = vmatmul.msk.f32.gmra.mxu3 %vm4886_vm6, %v11143_v10  ;;  %7607 = vmatmul.msk.f32.gmra.mxu1 %vm4886_vm6, %v11128_v45 }
 0x505   : > { %7590 = vmatmul.msk.f32.gmra.mxu0 %vm4886_vm6, %v5757_v54  ;;  %v5974_v54 = vrot.slane %v11251_v36, 6 }
 0x507   : > { %7600 = vmatmul.msk.f32.gmra.mxu2 %vm4886_vm6, %v11306_v38  ;;  %v5352_v57 = vpop.f32.mrf.mxu3  ;;  %v5975_v30 = vsel %vm4364_vm5, %v5701_v28, %v5974_v54  ;;  %v5977_v33 = vsel %vm4364_vm5, %v5974_v54, %v5976_v56 }
 0x508   : > { %v5359_v7 = vadd.f32 %v5352_v57, %v11241_v4  ;;  %v11435_v57 = vld [vmem:[#allocation2 + $0x90] sm:$0xff] }
 0x509   : > { %v5726_v10 = vpop.f32.mrf.mxu1  ;;  %v6253_v56 = vrot.slane %v11435_v57, 6 }
 0x50a   : > { %v5673_v17 = vpop.f32.mrf.mxu2  ;;  %v5416_v18 = vadd.f32 %v5409_v34, %v5359_v7  ;;  %v5616_v62 = vpop.f32.mrf.mxu0 }
 0x50c   : > { %7581 = vmatmul.msk.f32.gmra.mxu3 %vm4886_vm6, %v11169_v27  ;;  %7608 = vmatmul.msk.f32.gmra.mxu1 %vm4886_vm6, %v11251_v36  ;;  %v5472_v51 = vadd.f32 %v5465_v50, %v5416_v18  ;;  %v6034_v36 = vsel %vm4678_vm7, %v6031_v61, %v6033_v48 }
 0x50d   : > { %7591 = vmatmul.msk.f32.gmra.mxu0 %vm4886_vm6, %v11320_v32 }
 0x50e   : > { %v11379_v4 = vadd.f32 %v5522_v31, %v5472_v51 }
 0x50f   : > { %7601 = vmatmul.msk.f32.gmra.mxu2 %vm4886_vm6, %v11373_v52  ;;  %v5562_v20 = vpop.f32.mrf.mxu3 }
 0x510   : > { %v5581_v27 = vadd.f32 %v5562_v20, %v11259_v3  ;;  %v11392_v3 = vsel %vm1277_vm0, %v6087_v12, %v6089_v15 }
 0x511   : > { %v5729_v63 = vpop.f32.mrf.mxu1 }
 0x512   : > { %v5676_v0 = vpop.f32.mrf.mxu2  ;;  %v5632_v25 = vadd.f32 %v5613_v6, %v5581_v27  ;;  %v5619_v2 = vpop.f32.mrf.mxu0 }
 0x514   : > { %7582 = vmatmul.msk.f32.gmra.mxu3 %vm4886_vm6, %v11189_v43  ;;  %7609 = vmatmul.msk.f32.gmra.mxu1 %vm4886_vm6, %v11280_v44  ;;  %v5689_v9 = vadd.f32 %v5670_v42, %v5632_v25 }
 0x515   : > { %7592 = vmatmul.msk.f32.gmra.mxu0 %vm4886_vm6, %v6032_v1 }
 0x516   : > { %v11399_v40 = vadd.f32 %v5726_v10, %v5689_v9 }
 0x517   : > { %7602 = vmatmul.msk.f32.gmra.mxu2 %vm4886_vm6, %v11392_v3  ;;  %v5565_v21 = vpop.f32.mrf.mxu3 }
 0x518   : > { %v5582_v49 = vadd.f32 %v5565_v21, %v11288_v14  ;;  %v11415_v14 = vsel %vm1277_vm0, %v6089_v15, %v6091_v47  ;;  %v6308_v15 = vrot.slane %v11435_v57, 1 }
 0x519   : > { %v5732_v26 = vpop.f32.mrf.mxu1 }
 0x51a   : > { %v5678_v8 = vpop.f32.mrf.mxu2  ;;  %v5633_v13 = vadd.f32 %v5616_v62, %v5582_v49  ;;  %v5621_v41 = vpop.f32.mrf.mxu0 }
 0x51c   : > { %7583 = vmatmul.msk.f32.gmra.mxu3 %vm4886_vm6, %v5975_v30  ;;  %7610 = vmatmul.msk.f32.gmra.mxu1 %vm4886_vm6, %v11308_v53  ;;  %v5690_v39 = vadd.f32 %v5673_v17, %v5633_v13 }
 0x51d   : > { %7593 = vmatmul.msk.f32.gmra.mxu0 %vm4886_vm6, %v6034_v36 }
 0x51e   : > { %v11420_v45 = vadd.f32 %v5729_v63, %v5690_v39  ;;  %v6195_v39 = vrot.slane %v11397_v35, 3 }
 0x51f   : > { %7603 = vmatmul.msk.f32.gmra.mxu2 %vm4886_vm6, %v11415_v14  ;;  %v5568_v28 = vpop.f32.mrf.mxu3 }
 0x521   : > { %v5734_v5 = vpop.f32.mrf.mxu1 }
 0x522   : > { %v5681_v50 = vpop.f32.mrf.mxu2  ;;  %v5624_v34 = vpop.f32.mrf.mxu0 }
 0x524   : > { %7584 = vmatmul.msk.f32.gmra.mxu3 %vm4886_vm6, %v5977_v33  ;;  %7611 = vmatmul.msk.f32.gmra.mxu1 %vm4886_vm6, %v11397_v35 }
 0x525   : > { %7594 = vmatmul.msk.f32.gmra.mxu0 %vm4886_vm6, %v6036_v58 }
 0x527   : > { %7633 = vmatmul.msk.f32.vlgmr.msrb.gmra.mxu2 %vm4886_vm6, %v11320_v32  ;;  %v5570_v44 = vpop.f32.mrf.mxu3 }
 0x528   : > { %v5583_v19 = vadd.f32 %v5570_v44, %v11334_v55 }
 0x529   : > { %v5737_v24 = vpop.f32.mrf.mxu1 }
 0x52a   : > { %v5684_v42 = vpop.f32.mrf.mxu2  ;;  %v5634_v31 = vadd.f32 %v5621_v41, %v5583_v19  ;;  %v5627_v6 = vpop.f32.mrf.mxu0 }
 0x52c   : > { %7585 = vmatmul.msk.f32.gmra.mxu3 %vm4886_vm6, %v5979_v29  ;;  %7612 = vmatmul.msk.f32.gmra.mxu1 %vm4886_vm6, %v11435_v57  ;;  %v5691_v7 = vadd.f32 %v5678_v8, %v5634_v31 }
 0x52d   : > { %7624 = vmatmul.msk.f32.vlgmr.msra.gmra.mxu0 %vm4886_vm6, %v11189_v43 }
 0x52e   : > { %v11443_v32 = vadd.f32 %v5734_v5, %v5691_v7 }
 0x52f   : > { %7634 = vmatmul.msk.f32.gmra.mxu2 %vm4886_vm6, %v6032_v1  ;;  %v5573_v55 = vpop.f32.mrf.mxu3 }
 0x530   : > { %v5584_v17 = vadd.f32 %v5573_v55, %v11349_v22 }
 0x531   : > { %v5740_v10 = vpop.f32.mrf.mxu1 }
 0x532   : > { %v5686_v12 = vpop.f32.mrf.mxu2  ;;  %v5635_v18 = vadd.f32 %v5624_v34, %v5584_v17  ;;  %v5629_v62 = vpop.f32.mrf.mxu0 }
 0x534   : > { %7615 = vmatmul.msk.f32.vlgmr.msra.gmra.mxu3 %vm4886_vm6, %v11151_v23  ;;  %7642 = vmatmul.msk.f32.vlgmr.msra.gmra.mxu1 %vm4886_vm6, %v11306_v38  ;;  %v5692_v51 = vadd.f32 %v5681_v50, %v5635_v18 }
 0x535   : > { %7625 = vmatmul.msk.f32.gmra.mxu0 %vm4886_vm6, %v5975_v30 }
 0x536   : > { %v11452_v43 = vadd.f32 %v5737_v24, %v5692_v51 }
 0x537   : > { %7635 = vmatmul.msk.f32.gmra.mxu2 %vm4886_vm6, %v6034_v36  ;;  %v5576_v20 = vpop.f32.mrf.mxu3 }
 0x539   : > { %v5742_v22 = vpop.f32.mrf.mxu1 }
 0x53a   : > { %v5890_v27 = vpop.f32.mrf.mxu2  ;;  %v5839_v0 = vpop.f32.mrf.mxu0 }
 0x53c   : > { %7616 = vmatmul.msk.f32.gmra.mxu3 %vm4886_vm6, %v11274_v60  ;;  %7643 = vmatmul.msk.f32.gmra.mxu1 %vm4886_vm6, %v11373_v52  ;;  %v6309_v60 = vsel %vm4678_vm7, %v6035_v11, %v6308_v15 }
 0x53d   : > { %7626 = vmatmul.msk.f32.gmra.mxu0 %vm4886_vm6, %v5977_v33  ;;  %v6196_v33 = vsel %vm2442_vm3, %v5922_v16, %v6195_v39  ;;  %v6197_v16 = vrot.slane %v11435_v57, 3 }
 0x53f   : > { %7636 = vmatmul.msk.f32.gmra.mxu2 %vm4886_vm6, %v6036_v58  ;;  %v5578_v23 = vpop.f32.mrf.mxu3  ;;  %v6198_v6 = vsel %vm2442_vm3, %v6195_v39, %v6197_v16 }
 0x540   : > { %v5585_v38 = vadd.f32 %v5578_v23, %v11379_v4  ;;  %v11469_v4 = vld [vmem:[#allocation2 + $0x98] sm:$0xff] }
 0x541   : > { %v5947_v63 = vpop.f32.mrf.mxu1  ;;  %v6310_v49 = vrot.slane %v11469_v4, 1  ;;  %v6255_v42 = vrot.slane %v11469_v4, 6  ;;  %v6199_v55 = vrot.slane %v11469_v4, 3 }
 0x542   : > { %v5893_v61 = vpop.f32.mrf.mxu2  ;;  %v5636_v25 = vadd.f32 %v5629_v62, %v5585_v38  ;;  %v5842_v2 = vpop.f32.mrf.mxu0 }
 0x543   : > { %v6311_v13 = vsel %vm4678_vm7, %v6308_v15, %v6310_v49  ;;  %v6256_v7 = vsel %vm4364_vm5, %v6253_v56, %v6255_v42  ;;  %v6200_v20 = vsel %vm2442_vm3, %v6197_v16, %v6199_v55 }
 0x544   : > { %7617 = vmatmul.msk.f32.gmra.mxu3 %vm4886_vm6, %v11298_v59  ;;  %7644 = vmatmul.msk.f32.gmra.mxu1 %vm4886_vm6, %v11392_v3  ;;  %v5693_v52 = vadd.f32 %v5686_v12, %v5636_v25  ;;  %v6251_v59 = vrot.slane %v11397_v35, 6  ;;  %v6366_v35 = vrot.slane %v11469_v4, 4 }
 0x545   : > { %7627 = vmatmul.msk.f32.gmra.mxu0 %vm4886_vm6, %v5979_v29 }
 0x546   : > { %v11471_v1 = vadd.f32 %v5742_v22, %v5693_v52  ;;  %v6252_v26 = vsel %vm4364_vm5, %v5978_v37, %v6251_v59 }
 0x547   : > { %7637 = vmatmul.msk.f32.gmra.mxu2 %vm4886_vm6, %v6309_v60  ;;  %v5783_v9 = vpop.f32.mrf.mxu3 }
 0x548   : > { %v5802_v21 = vadd.f32 %v5783_v9, %v11399_v40  ;;  %v4959_v40 = vld [vmem:[#allocation2 + $0xa0] sm:$0xff] }
 0x549   : > { %v5950_v3 = vpop.f32.mrf.mxu1  ;;  %v6312_v50 = vrot.slane %v4959_v40, 1  ;;  %v6368_v17 = vrot.slane %v4959_v40, 4 }
 0x54a   : > { %v5896_v54 = vpop.f32.mrf.mxu2  ;;  %v5858_v8 = vadd.f32 %v5839_v0, %v5802_v21  ;;  %v5845_v48 = vpop.f32.mrf.mxu0 }
 0x54b   : > { %v6313_v44 = vsel %vm4678_vm7, %v6310_v49, %v6312_v50 }
 0x54c   : > { %7618 = vmatmul.msk.f32.gmra.mxu3 %vm4886_vm6, %v11325_v46  ;;  %7645 = vmatmul.msk.f32.gmra.mxu1 %vm4886_vm6, %v11415_v14  ;;  %v5909_v41 = vadd.f32 %v5890_v27, %v5858_v8  ;;  %v6364_v46 = vrot.slane %v11435_v57, 4  ;;  %v6369_v27 = vsel %vm1277_vm0, %v6366_v35, %v6368_v17 }
 0x54d   : > { %7628 = vmatmul.msk.f32.gmra.mxu0 %vm4886_vm6, %v6252_v26 }
 0x54e   : > { %v11484_v30 = vadd.f32 %v5947_v63, %v5909_v41  ;;  %v6365_v58 = vsel %vm1277_vm0, %v6091_v47, %v6364_v46  ;;  %v6367_v29 = vsel %vm1277_vm0, %v6364_v46, %v6366_v35  ;;  %vm6453_vm0 = vcmask 254976  }
 0x54f   : > { %7638 = vmatmul.msk.f32.gmra.mxu2 %vm4886_vm6, %v6311_v13  ;;  %v5786_v36 = vpop.f32.mrf.mxu3  ;;  %v11648_v13 = vmov 0.0  }
 0x550   : > { %v5803_v28 = vadd.f32 %v5786_v36, %v11420_v45  ;;  %v6254_v45 = vsel %vm4364_vm5, %v6251_v59, %v6253_v56  ;;  %6492 = vst [vmem:[%s11523_s28] sm:$0xff] %v11648_v13 }
 0x551   : > { %v5953_v11 = vpop.f32.mrf.mxu1 }
 0x552   : > { %v5898_v14 = vpop.f32.mrf.mxu2  ;;  %v5859_v5 = vadd.f32 %v5842_v2, %v5803_v28  ;;  %v5847_v34 = vpop.f32.mrf.mxu0 }
 0x554   : > { %7619 = vmatmul.msk.f32.gmra.mxu3 %vm4886_vm6, %v6196_v33  ;;  %7646 = vmatmul.msk.f32.gmra.mxu1 %vm4886_vm6, %v6365_v58  ;;  %v5910_v37 = vadd.f32 %v5893_v61, %v5859_v5 }
 0x555   : > { %7629 = vmatmul.msk.f32.gmra.mxu0 %vm4886_vm6, %v6254_v45 }
 0x556   : > { %v5967_v53 = vadd.f32 %v5950_v3, %v5910_v37 }
 0x557   : > { %7639 = vmatmul.msk.f32.gmra.mxu2 %vm4886_vm6, %v6313_v44  ;;  %v5789_v19 = vpop.f32.mrf.mxu3 }
 0x559   : > { %v5955_v24 = vpop.f32.mrf.mxu1 }
 0x55a   : > { %v5901_v47 = vpop.f32.mrf.mxu2  ;;  %v5850_v31 = vpop.f32.mrf.mxu0 }
 0x55c   : > { %7620 = vmatmul.msk.f32.gmra.mxu3 %vm4886_vm6, %v6198_v6  ;;  %7647 = vmatmul.msk.f32.gmra.mxu1 %vm4886_vm6, %v6367_v29 }
 0x55d   : > { %7630 = vmatmul.msk.f32.gmra.mxu0 %vm4886_vm6, %v6256_v7 }
 0x55f   : > { %v5791_v57 = vpop.f32.mrf.mxu3 }
 0x560   : > { %v5804_v12 = vadd.f32 %v5791_v57, %v11443_v32 }
 0x561   : > { %v5958_v18 = vpop.f32.mrf.mxu1 }
 0x562   : > { %v5904_v10 = vpop.f32.mrf.mxu2  ;;  %v5860_v62 = vadd.f32 %v5847_v34, %v5804_v12  ;;  %v5853_v51 = vpop.f32.mrf.mxu0 }
 0x564   : > { %7621 = vmatmul.msk.f32.gmra.mxu3 %vm4886_vm6, %v6200_v20  ;;  %7648 = vmatmul.msk.f32.gmra.mxu1 %vm4886_vm6, %v6369_v27  ;;  %v5911_v22 = vadd.f32 %v5898_v14, %v5860_v62 }
 0x566   : > { %v5968_v0 = vadd.f32 %v5955_v24, %v5911_v22 }
 0x567   : > { %v5794_v23 = vpop.f32.mrf.mxu3 }
 0x568   : > { %v5805_v38 = vadd.f32 %v5794_v23, %v11452_v43 }
 0x569   : > { %v5961_v15 = vpop.f32.mrf.mxu1 }
 0x56a   : > { %v5906_v61 = vpop.f32.mrf.mxu2  ;;  %v5861_v32 = vadd.f32 %v5850_v31, %v5805_v38  ;;  %v5855_v63 = vpop.f32.mrf.mxu0 }
 0x56c   : > { %v5912_v25 = vadd.f32 %v5901_v47, %v5861_v32 }
 0x56e   : > { %v5969_v2 = vadd.f32 %v5958_v18, %v5912_v25 }
 0x56f   : > { %v5797_v60 = vpop.f32.mrf.mxu3 }
 0x571   : > { %v5963_v4 = vpop.f32.mrf.mxu1 }
 0x572   : > { %v6116_v52 = vpop.f32.mrf.mxu2  ;;  %v6060_v9 = vpop.f32.mrf.mxu0 }
 0x577   : > { %v5799_v21 = vpop.f32.mrf.mxu3 }
 0x578   : > { %v5806_v54 = vadd.f32 %v5799_v21, %v11471_v1 }
 0x579   : > { %v6167_v49 = vpop.f32.mrf.mxu1 }
 0x57a   : > { %v6119_v59 = vpop.f32.mrf.mxu2  ;;  %v5862_v3 = vadd.f32 %v5855_v63, %v5806_v54  ;;  %v6063_v8 = vpop.f32.mrf.mxu0 }
 0x57c   : > { %v5913_v48 = vadd.f32 %v5906_v61, %v5862_v3 }
 0x57e   : > { %v5970_v43 = vadd.f32 %v5963_v4, %v5913_v48 }
 0x57f   : > { %v6003_v26 = vpop.f32.mrf.mxu3 }
 0x580   : > { %v6022_v41 = vadd.f32 %v6003_v26, %v11484_v30 }
 0x581   : > { %v6170_v1 = vpop.f32.mrf.mxu1 }
 0x582   : > { %v6122_v40 = vpop.f32.mrf.mxu2  ;;  %v6079_v36 = vadd.f32 %v6060_v9, %v6022_v41  ;;  %v6066_v39 = vpop.f32.mrf.mxu0 }
 0x584   : > { %v6135_v46 = vadd.f32 %v6116_v52, %v6079_v36 }
 0x586   : > { %v6186_v28 = vadd.f32 %v6167_v49, %v6135_v46 }
 0x587   : > { %v6006_v14 = vpop.f32.mrf.mxu3 }
 0x588   : > { %v6023_v56 = vadd.f32 %v6006_v14, %v5967_v53 }
 0x589   : > { %v6173_v11 = vpop.f32.mrf.mxu1 }
 0x58a   : > { %v6124_v50 = vpop.f32.mrf.mxu2  ;;  %v6080_v5 = vadd.f32 %v6063_v8, %v6023_v56  ;;  %v6068_v34 = vpop.f32.mrf.mxu0 }
 0x58c   : > { %v6136_v33 = vadd.f32 %v6119_v59, %v6080_v5 }
 0x58e   : > { %v6187_v58 = vadd.f32 %v6170_v1, %v6136_v33 }
 0x58f   : > { %v6009_v45 = vpop.f32.mrf.mxu3 }
 0x591   : > { %v6175_v37 = vpop.f32.mrf.mxu1 }
 0x592   : > { %v6127_v44 = vpop.f32.mrf.mxu2  ;;  %v6071_v19 = vpop.f32.mrf.mxu0 }
 0x597   : > { %v6011_v16 = vpop.f32.mrf.mxu3 }
 0x598   : > { %v6024_v30 = vadd.f32 %v6011_v16, %v5968_v0 }
 0x599   : > { %v6178_v47 = vpop.f32.mrf.mxu1 }
 0x59a   : > { %v6130_v35 = vpop.f32.mrf.mxu2  ;;  %v6081_v42 = vadd.f32 %v6068_v34, %v6024_v30  ;;  %v6074_v24 = vpop.f32.mrf.mxu0 }
 0x59c   : > { %v6137_v31 = vadd.f32 %v6124_v50, %v6081_v42 }
 0x59e   : > { %v6188_v6 = vadd.f32 %v6175_v37, %v6137_v31 }
 0x59f   : > { %v6014_v29 = vpop.f32.mrf.mxu3 }
 0x5a0   : > { %v6025_v53 = vadd.f32 %v6014_v29, %v5969_v2 }
 0x5a1   : > { %v6181_v57 = vpop.f32.mrf.mxu1 }
 0x5a2   : > { %v6132_v7 = vpop.f32.mrf.mxu2  ;;  %v6082_v55 = vadd.f32 %v6071_v19, %v6025_v53  ;;  %v6076_v17 = vpop.f32.mrf.mxu0 }
 0x5a4   : > { %v6138_v12 = vadd.f32 %v6127_v44, %v6082_v55 }
 0x5a6   : > { %v6189_v10 = vadd.f32 %v6178_v47, %v6138_v12 }
 0x5a7   : > { %v6017_v18 = vpop.f32.mrf.mxu3 }
 0x5a9   : > { %v6183_v51 = vpop.f32.mrf.mxu1 }
 0x5aa   : > { %v6337_v62 = vpop.f32.mrf.mxu2  ;;  %v6280_v20 = vpop.f32.mrf.mxu0 }
 0x5af   : > { %v6019_v27 = vpop.f32.mrf.mxu3 }
 0x5b0   : > { %v6026_v22 = vadd.f32 %v6019_v27, %v5970_v43 }
 0x5b1   : > { %v6393_v23 = vpop.f32.mrf.mxu1 }
 0x5b2   : > { %v6340_v0 = vpop.f32.mrf.mxu2  ;;  %v6083_v38 = vadd.f32 %v6076_v17, %v6026_v22  ;;  %v6283_v61 = vpop.f32.mrf.mxu0 }
 0x5b4   : > { %v6139_v15 = vadd.f32 %v6132_v7, %v6083_v38 }
 0x5b6   : > { %v6190_v12 = vadd.f32 %v6183_v51, %v6139_v15 }
 0x5b7   : > { %v6224_v32 = vpop.f32.mrf.mxu3 }
 0x5b8   : > { %v6243_v63 = vadd.f32 %v6224_v32, %v6186_v28 }
 0x5b9   : > { %v6396_v2 = vpop.f32.mrf.mxu1 }
 0x5ba   : > { %v6343_v25 = vpop.f32.mrf.mxu2  ;;  %v6299_v60 = vadd.f32 %v6280_v20, %v6243_v63  ;;  %v6286_v52 = vpop.f32.mrf.mxu0 }
 0x5bc   : > { %v6356_v4 = vadd.f32 %v6337_v62, %v6299_v60  ;;  %v6450_v60 = vld [vmem:[%s11548_s3] sm:$0x3] }
 0x5be   : > { %v6412_v8 = vadd.f32 %v6393_v23, %v6356_v4  ;;  %v6457_v4 = vld [vmem:[%s11549_s4] sm:$0x3] }
 0x5bf   : > { %v6227_v9 = vpop.f32.mrf.mxu3 }
 0x5c0   : > { %v6244_v21 = vadd.f32 %v6227_v9, %v6187_v58  ;;  %v6422_v13 = vrot.slane %v6412_v8, 3  ;;  %v6435_v41 = vrot.slane %v6412_v8, 6 }
 0x5c1   : > { %v6399_v59 = vpop.f32.mrf.mxu1 }
 0x5c2   : > { %v6345_v54 = vpop.f32.mrf.mxu2  ;;  %v6300_v49 = vadd.f32 %v6283_v61, %v6244_v21  ;;  %v6288_v3 = vpop.f32.mrf.mxu0 }
 0x5c4   : > { %v6357_v48 = vadd.f32 %v6340_v0, %v6300_v49 }
 0x5c6   : > { %v6413_v43 = vadd.f32 %v6396_v2, %v6357_v48 }
 0x5c7   : > { %v6230_v26 = vpop.f32.mrf.mxu3 }
 0x5c8   : > { %v6423_v40 = vrot.slane %v6413_v43, 3  ;;  %v6436_v1 = vrot.slane %v6413_v43, 6 }
 0x5c9   : > { %v6401_v39 = vpop.f32.mrf.mxu1 }
 0x5ca   : > { %v6348_v36 = vpop.f32.mrf.mxu2  ;;  %v6291_v46 = vpop.f32.mrf.mxu0  ;;  %v6424_v28 = vsel %vm2442_vm3, %v6422_v13, %v6423_v40  ;;  %v6437_v14 = vsel %vm4364_vm5, %v6435_v41, %v6436_v1 }
 0x5cb   : > { %v6432_v56 = vmax.f32 %v6412_v8, %v6424_v28 }
 0x5cd   : > { %v6445_v50 = vmax.f32 %v6432_v56, %v6437_v14 }
 0x5cf   : > { %v6232_v11 = vpop.f32.mrf.mxu3 }
 0x5d0   : > { %v6245_v5 = vadd.f32 %v6232_v11, %v6188_v6 }
 0x5d1   : > { %v6404_v33 = vpop.f32.mrf.mxu1 }
 0x5d2   : > { %v6351_v34 = vpop.f32.mrf.mxu2  ;;  %v6294_v58 = vpop.f32.mrf.mxu0  ;;  %v6301_v45 = vadd.f32 %v6288_v3, %v6245_v5 }
 0x5d4   : > { %v6358_v37 = vadd.f32 %v6345_v54, %v6301_v45 }
 0x5d6   : > { %v6414_v35 = vadd.f32 %v6401_v39, %v6358_v37 }
 0x5d7   : > { %v6235_v44 = vpop.f32.mrf.mxu3 }
 0x5d8   : > { %v6246_v19 = vadd.f32 %v6235_v44, %v6189_v10  ;;  %v6425_v31 = vrot.slane %v6414_v35, 3  ;;  %v6438_v29 = vrot.slane %v6414_v35, 6 }
 0x5d9   : > { %v6407_v16 = vpop.f32.mrf.mxu1 }
 0x5da   : > { %v6302_v30 = vadd.f32 %v6291_v46, %v6246_v19  ;;  %v6296_v20 = vpop.f32.mrf.mxu0  ;;  %v6353_v22 = vpop.f32.mrf.mxu2 }
 0x5dc   : > { %v6359_v47 = vadd.f32 %v6348_v36, %v6302_v30 }
 0x5de   : > { %v6415_v42 = vadd.f32 %v6404_v33, %v6359_v47 }
 0x5df   : > { %v6238_v24 = vpop.f32.mrf.mxu3 }
 0x5e0   : > { %v6426_v53 = vrot.slane %v6415_v42, 3  ;;  %v6439_v7 = vrot.slane %v6415_v42, 6 }
 0x5e1   : > { %v6409_v23 = vpop.f32.mrf.mxu1 }
 0x5e2   : > { %v6427_v57 = vsel %vm2442_vm3, %v6425_v31, %v6426_v53  ;;  %v6440_v6 = vsel %vm4364_vm5, %v6438_v29, %v6439_v7 }
 0x5e3   : > { %v6433_v55 = vmax.f32 %v6414_v35, %v6427_v57 }
 0x5e5   : > { %v6446_v17 = vmax.f32 %v6433_v55, %v6440_v6 }
 0x5e7   : > { %v6240_v18 = vpop.f32.mrf.mxu3  ;;  %v6448_v62 = vmax.f32 %v6445_v50, %v6446_v17 }
 0x5e8   : > { %v6247_v10 = vadd.f32 %v6240_v18, %v6190_v12 }
 0x5ea   : > { %v6303_v27 = vadd.f32 %v6296_v20, %v6247_v10 }
 0x5ec   : > { %v6360_v0 = vadd.f32 %v6353_v22, %v6303_v27 }
 0x5ee   : > { %v6416_v38 = vadd.f32 %v6409_v23, %v6360_v0 }
 0x5f0   : > { %v6428_v61 = vrot.slane %v6416_v38, 3  ;;  %v6441_v63 = vrot.slane %v6416_v38, 6 }
 0x5f2   : > { %v6434_v32 = vmax.f32 %v6416_v38, %v6428_v61 }
 0x5f4   : > { %v6447_v25 = vmax.f32 %v6434_v32, %v6441_v63 }
 0x5f6   : > { %v6449_v2 = vmax.f32 %v6448_v62, %v6447_v25 }
 0x5f8   : > { %v6451_v52 = vperm.slane %v6449_v2, 0 }
 0x5fa   : > { %v6452_v51 = vmul.f32 %v6451_v52, %v6450_v60 }
 0x5fc   : > { %v6454_v15 = vsel %vm6453_vm0, %v6452_v51, 0.0 }
 0x5fd   : > { %6455 = vadd.xlane.f32.xlu0 %v6454_v15 }
 0x670   : > { %v6456_v9 = vpop.xlane.xlu0 %6455 }
 0x671   : > { %v6458_v21 = vadd.f32 %v6457_v4, %v6456_v9 }
 0x673   : > { %v6460_v54 = vsel %vm6459_vm1, %v6458_v21, -inf }
 0x674   : > { %v6461_v59 = vrot.slane %v6460_v54, 4 }
 0x676   : > { %v6462_v49 = vmax.f32 %v6460_v54, %v6461_v59 }
 0x678   : > { %v6463_v3 = vrot.slane %v6462_v49, 2 }
 0x67a   : > { %v6464_v8 = vmax.f32 %v6462_v49, %v6463_v3 }
 0x67c   : > { %v6465_v48 = vrot.slane %v6464_v8, 1 }
 0x67e   : > { %v6466_v43 = vmax.f32 %v6464_v8, %v6465_v48 }
 0x680   : > { %v6467_v26 = vsub.f32 %v6458_v21, %v6466_v43 }
 0x682   : > { %v6468_v13 = vmul.f32 1.442695, %v6467_v26 }
 0x684   : > { %7836 = vpow2.f32 %v6468_v13 }
 0x68a   : > { %v7837_v41 = vpop.eup %7836 }
 0x68b   : > { %v6470_v40 = vsel %vm6459_vm1, %v7837_v41, 0.0 }
 0x68c   : > { %v6471_v1 = vrot.slane %v6470_v40, 4 }
 0x68e   : > { %v6472_v36 = vadd.f32 %v6471_v1, %v6470_v40 }
 0x690   : > { %v6473_v39 = vrot.slane %v6472_v36, 2 }
 0x692   : > { %v6474_v46 = vadd.f32 %v6473_v39, %v6472_v36 }
 0x694   : > { %v6475_v28 = vrot.slane %v6474_v46, 1 }
 0x696   : > { %v6476_v14 = vadd.f32 %v6475_v28, %v6474_v46 }
 0x698   : > { %7838 = vrcp.f32 %v6476_v14  ;;  %v6488_v5 = vand.u32 2147483648, %v6476_v14  ;;  %v6486_v33 = vand.u32 2147483647, %v6476_v14  ;;  %vm6482_vm3 = vweird.f32 %v6476_v14 }
 0x69a   : > { %v6489_v45 = vor.u32 1.1754944e-38, %v6488_v5  ;;  %vm6487_vm5 = vcmp.eq.f32.partialorder %v6486_v33, 8.507059e+37 }
 0x69e   : > { %v7839_v56 = vpop.eup %7838 }
 0x69f   : > { %v6478_v50 = vmul.f32 %v7839_v56, %v6476_v14  ;;  %vm6483_vm2 = vweird.f32 %v7839_v56 }
 0x6a0   : > { %vm6484_vm4 = vmor %vm6482_vm3, %vm6483_vm2 }
 0x6a1   : > { %v6479_v11 = vsub.f32 1.0, %v6478_v50 }
 0x6a3   : > { %v6480_v34 = vmul.f32 %v7839_v56, %v6479_v11 }
 0x6a5   : > { %v6481_v58 = vadd.f32 %v7839_v56, %v6480_v34 }
 0x6a7   : > { %v6485_v44 = vsel %vm6484_vm4, %v7839_v56, %v6481_v58 }
 0x6a8   : > { %v6490_v37 = vsel %vm6487_vm5, %v6489_v45, %v6485_v44 }
 0x6a9   : > { %v6491_v19 = vmul.f32 %v7837_v41, %v6490_v37 }
 0x6ab   : > { %6493 = vst.msk [vmem:[%s11523_s28] sm:$0x3] %vm6459_vm1, %v6491_v19 }
 0x6ac PF: > { %s15_s18 = sadd.s32 1, %s7847_s18  }
 0x6ad   : > { %p12_p4 = scmp.ge.s32.totalorder %s15_s18, 4  }
 0x6af   :  { %14 = sbr.rel (!%p12_p4) target bundleno = 1 (0x1), region = 97 }

</bundles_post_ra>
